<compile_context>
chip_gen: v5e
topology: v5e:2x2
jax: 0.10.0
libtpu: 0.0.40
codegen_flags: <defaults>
</compile_context>

<pallas_src>
import functools

import jax
import jax.numpy as jnp
import numpy as np
from jax.experimental import pallas as pl
from jax.experimental.pallas import tpu as pltpu


def _round_up(x, m):
    return ((x + m - 1) // m) * m


# ----------------------------------------------------------------------------
# Pallas kernels: out = act(x @ w [+ b]) with f32 accumulation on the MXU.
# ----------------------------------------------------------------------------
def _apply_act(acc, act):
    if act == "leaky":
        return jnp.where(acc > 0, acc, 0.2 * acc)
    if act == "sigmoid":
        # EUP reciprocal instead of a VALU divide.
        return pl.reciprocal(1.0 + jnp.exp(-acc), approx=True)
    return acc


def _mm_act_kernel(x_ref, w_ref, o_ref, *, act):
    acc = jnp.dot(x_ref[...], w_ref[...], preferred_element_type=jnp.float32)
    acc = _apply_act(acc, act)
    o_ref[...] = acc.astype(o_ref.dtype)


def _mm_bias_act_kernel(x_ref, w_ref, b_ref, o_ref, *, act):
    acc = jnp.dot(x_ref[...], w_ref[...], preferred_element_type=jnp.float32)
    acc = acc + b_ref[...]                      # (TM, N) + (1, N)
    acc = _apply_act(acc, act)
    o_ref[...] = acc.astype(o_ref.dtype)


def matmul_act(x, w, b, act, out_dtype):
    """act(x @ w + b). x: (M, K) bf16, w: (K, N) bf16 with K%128==0, N%128==0.

    b is either None or a (1, N) f32 array. Returns (M, N) in out_dtype.
    Tiled over M only; K and N stay resident in VMEM (tiny for this net).
    """
    M, K = x.shape
    Kw, N = w.shape
    assert Kw == K and K % 128 == 0 and N % 128 == 0, (x.shape, w.shape)

    x = x.astype(jnp.bfloat16)
    w = w.astype(jnp.bfloat16)

    # Adaptive M tile: big tiles amortize per-step overhead, but keep >=2
    # parallel grid steps on the large layers for megacore sharding.
    mp_min = _round_up(M, 16)
    if mp_min >= 1024:
        TM = 512
    elif mp_min >= 512:
        TM = 256
    else:
        TM = mp_min
    Mp = _round_up(M, TM)
    if Mp != M:
        x = jnp.pad(x, ((0, Mp - M), (0, 0)))

    in_specs = [
        pl.BlockSpec((TM, K), lambda i: (i, 0)),
        pl.BlockSpec((K, N), lambda i: (0, 0)),
    ]
    args = [x, w]
    if b is not None:
        in_specs.append(pl.BlockSpec((1, N), lambda i: (0, 0)))
        args.append(b.astype(jnp.float32))
        kernel = functools.partial(_mm_bias_act_kernel, act=act)
    else:
        kernel = functools.partial(_mm_act_kernel, act=act)

    out = pl.pallas_call(
        kernel,
        out_shape=jax.ShapeDtypeStruct((Mp, N), out_dtype),
        grid=(Mp // TM,),
        in_specs=in_specs,
        out_specs=pl.BlockSpec((TM, N), lambda i: (i, 0)),
        compiler_params=pltpu.CompilerParams(
            dimension_semantics=("parallel",)
        ),
    )(*args)
    return out if Mp == M else out[:M]


# ----------------------------------------------------------------------------
# NHWC im2col glue (plain JAX: spatial pad + strided slices + lane concat).
# Column order is (kh, kw)-major, channel-minor, matching the packed weights.
# ----------------------------------------------------------------------------
def im2col_nhwc(x, k, stride, pad):
    """x: (B, H, W, C) -> (B*OH*OW, k*k*C), plus OH, OW."""
    B, H, W, C = x.shape
    if pad:
        x = jnp.pad(x, ((0, 0), (pad, pad), (pad, pad), (0, 0)))
    OH = (H + 2 * pad - k) // stride + 1
    OW = (W + 2 * pad - k) // stride + 1
    cols = []
    for kh in range(k):
        for kw in range(k):
            cols.append(
                x[:, kh:kh + stride * OH:stride, kw:kw + stride * OW:stride, :]
            )
    patches = jnp.concatenate(cols, axis=-1)        # (B, OH, OW, k*k*C)
    return patches.reshape(B * OH * OW, k * k * C), OH, OW


def conv_block(x_nhwc, w_packed, b_packed, stride, pad, act, out_dtype):
    """Conv2d(4x4, stride, pad) + activation; channels stay padded to 128."""
    B = x_nhwc.shape[0]
    patches, OH, OW = im2col_nhwc(x_nhwc, 4, stride, pad)
    out = matmul_act(patches, w_packed, b_packed, act, out_dtype)  # (M, 128)
    return out.reshape(B, OH, OW, out.shape[-1])


# ----------------------------------------------------------------------------
# Parameters: torch-layout init + one-time packing to matmul-ready matrices.
# ----------------------------------------------------------------------------
def init_discriminator_params(key, channels_img, features_d):
    dims = [
        (features_d, channels_img),
        (features_d * 2, features_d),
        (features_d * 4, features_d * 2),
        (features_d * 8, features_d * 4),
    ]
    params = {}
    keys = jax.random.split(key, 6)
    for i, (oc, ic) in enumerate(dims):
        params[f"w{i}"] = 0.02 * jax.random.normal(
            keys[i], (oc, ic, 4, 4), jnp.float32
        )
    # final conv: Conv2d(features_d*8, 1, k=4, s=2, p=0) with bias
    params["w4"] = 0.02 * jax.random.normal(
        keys[4], (1, features_d * 8, 4, 4), jnp.float32
    )
    params["b4"] = 0.02 * jax.random.normal(keys[5], (1,), jnp.float32)
    return params


def pack_discriminator_params(params):
    """One-time packing: (OC, IC, 4, 4) -> padded (16*ICp, 128) bf16 matrices.

    Layer 0 consumes the real image padded to ICp=round_up(C,8) channels
    (so K is 128-aligned); layers 1-4 consume the previous layer's output,
    which stays padded to 128 channels.
    """
    packed = {}
    for i in range(5):
        w = params[f"w{i}"]                         # (OC, IC, 4, 4)
        oc, ic, k, _ = w.shape
        icp = _round_up(ic, 8) if i == 0 else 128
        ocp = 128
        wt = jnp.transpose(w, (2, 3, 1, 0))         # (kh, kw, IC, OC)
        wt = jnp.pad(wt, ((0, 0), (0, 0), (0, icp - ic), (0, ocp - oc)))
        packed[f"w{i}"] = wt.reshape(k * k * icp, ocp).astype(jnp.bfloat16)
    b = params["b4"]
    packed["b4"] = jnp.pad(b, (0, 128 - b.shape[0])).reshape(1, 128).astype(
        jnp.float32
    )
    return packed


# ----------------------------------------------------------------------------
# Forward pass (NHWC bf16 internally, NCHW at the boundaries).
# ----------------------------------------------------------------------------
def discriminator_forward(packed, x):
    """x: (B, channels_img, 64, 64) f32 -> (B, 1, 1, 1) f32."""
    h = jnp.transpose(x, (0, 2, 3, 1))              # NCHW -> NHWC (once)
    c = h.shape[-1]
    cp0 = _round_up(c, 8)
    if cp0 > c:
        h = jnp.pad(h, ((0, 0), (0, 0), (0, 0), (0, cp0 - c)))
    h = h.astype(jnp.bfloat16)

    # four Conv(4,2,1, no-bias) + LeakyReLU(0.2) blocks; bf16 between layers
    for i in range(4):
        h = conv_block(h, packed[f"w{i}"], None, stride=2, pad=1,
                       act="leaky", out_dtype=jnp.bfloat16)

    # final Conv(4,2,0) with bias + Sigmoid, f32 output
    h = conv_block(h, packed["w4"], packed["b4"], stride=2, pad=0,
                   act="sigmoid", out_dtype=jnp.float32)

    h = h[..., :1]                                  # real OC = 1
    return jnp.transpose(h, (0, 3, 1, 2))           # (B, 1, 1, 1)


# ----------------------------------------------------------------------------
# Pure-JAX f32 reference (for correctness check)
# ----------------------------------------------------------------------------
def _ref_conv(x, w, b, stride, pad):
    out = jax.lax.conv_general_dilated(
        x, w, window_strides=(stride, stride),
        padding=[(pad, pad), (pad, pad)],
        dimension_numbers=("NCHW", "OIHW", "NCHW"),
    )
    return out + b.reshape(1, -1, 1, 1)


def reference_forward(params, x):
    h = x
    for i in range(4):
        oc = params[f"w{i}"].shape[0]
        h = _ref_conv(h, params[f"w{i}"], jnp.zeros((oc,), jnp.float32), 2, 1)
        h = jnp.where(h > 0, h, 0.2 * h)
    h = _ref_conv(h, params["w4"], params["b4"], 2, 0)
    return jax.nn.sigmoid(h)


if __name__ == "__main__":
    key = jax.random.PRNGKey(0)
    k_param, k_x = jax.random.split(key)

    batch, channels_img, features_d = 2, 3, 8
    # Spatial size must be 64 so the final 4x4 stride-2 conv produces 1x1.
    x = jax.random.normal(k_x, (batch, channels_img, 64, 64), jnp.float32)

    params = init_discriminator_params(k_param, channels_img, features_d)
    packed = pack_discriminator_params(params)      # one-time weight packing

    fwd = jax.jit(discriminator_forward)
    out = jax.block_until_ready(fwd(packed, x))
    assert out.shape == (batch, 1, 1, 1), out.shape

    ref = jax.block_until_ready(reference_forward(params, x))
    np.testing.assert_allclose(np.asarray(out), np.asarray(ref),
                               rtol=1e-2, atol=1e-2)

    print("KERNEL_OK")
</pallas_src>

<mosaic_0001>
module attributes {stable_mosaic.version = 11 : i64} {
  func.func @_mm_act_kernel(%arg0: i32, %arg1: memref<512x128xbf16, #tpu.memory_space<vmem>>, %arg2: memref<128x128xbf16, #tpu.memory_space<vmem>>, %arg3: memref<512x128xbf16, #tpu.memory_space<vmem>>) attributes {dimension_semantics = [#tpu.dimension_semantics<parallel>], iteration_bounds = array<i64: 4>, scalar_prefetch = 0 : i64, scratch_operands = 0 : i64, tpu.core_type = #tpu.core_type<tc>, window_params = [{transform_indices = @transform_0, window_bounds = array<i64: 512, 128>}, {pipeline_mode = #tpu.pipeline_mode<synchronous>, transform_indices = @transform_1, window_bounds = array<i64: 128, 128>}, {transform_indices = @transform_2, window_bounds = array<i64: 512, 128>}]} {
    %c0 = arith.constant 0 : index
    %c0_0 = arith.constant 0 : index
    %0 = vector.load %arg1[%c0, %c0_0] : memref<512x128xbf16, #tpu.memory_space<vmem>>, vector<512x128xbf16>
    %c0_1 = arith.constant 0 : index
    %c0_2 = arith.constant 0 : index
    %1 = vector.load %arg2[%c0_1, %c0_2] : memref<128x128xbf16, #tpu.memory_space<vmem>>, vector<128x128xbf16>
    %cst = arith.constant dense<0.000000e+00> : vector<512x128xf32>
    %2 = tpu.matmul %0, %1, %cst {dimension_numbers = #tpu.dot_dimension_numbers<[1], [0], [0], [1], [0, 0, 1, 1], [], []>} : vector<512x128xbf16>, vector<128x128xbf16>, vector<512x128xf32> -> vector<512x128xf32>
    %cst_3 = arith.constant 0.000000e+00 : f32
    %3 = vector.broadcast %cst_3 : f32 to vector<512x128xf32>
    %4 = arith.cmpf ogt, %2, %3 : vector<512x128xf32>
    %cst_4 = arith.constant 2.000000e-01 : f32
    %5 = vector.broadcast %cst_4 : f32 to vector<512x128xf32>
    %6 = arith.mulf %5, %2 : vector<512x128xf32>
    %7 = arith.select %4, %2, %6 : vector<512x128xi1>, vector<512x128xf32>
    %8 = arith.truncf %7 : vector<512x128xf32> to vector<512x128xbf16>
    %c0_5 = arith.constant 0 : index
    %c0_6 = arith.constant 0 : index
    %9 = vector.load %arg3[%c0_5, %c0_6] : memref<512x128xbf16, #tpu.memory_space<vmem>>, vector<512x128xbf16>
    tpu.vector_store %arg3[%c0_5, %c0_6], %8 {strides = array<i32>} : memref<512x128xbf16, #tpu.memory_space<vmem>>, vector<512x128xbf16>,
    return
  }
  func.func @transform_0(%arg0: i32) -> (i32, i32) {
    %c0_i32 = arith.constant 0 : i32
    %c0_i32_0 = arith.constant 0 : i32
    return %arg0, %c0_i32 : i32, i32
  }
  func.func @transform_1(%arg0: i32) -> (i32, i32) {
    %c0_i32 = arith.constant 0 : i32
    %c0_i32_0 = arith.constant 0 : i32
    %c0_i32_1 = arith.constant 0 : i32
    return %c0_i32, %c0_i32_0 : i32, i32
  }
  func.func @transform_2(%arg0: i32) -> (i32, i32) {
    %c0_i32 = arith.constant 0 : i32
    %c0_i32_0 = arith.constant 0 : i32
    return %arg0, %c0_i32 : i32, i32
  }
}

module attributes {stable_mosaic.version = 11 : i64} {
  func.func @_mm_act_kernel(%arg0: i32, %arg1: memref<256x2048xbf16, #tpu.memory_space<vmem>>, %arg2: memref<2048x128xbf16, #tpu.memory_space<vmem>>, %arg3: memref<256x128xbf16, #tpu.memory_space<vmem>>) attributes {dimension_semantics = [#tpu.dimension_semantics<parallel>], iteration_bounds = array<i64: 2>, scalar_prefetch = 0 : i64, scratch_operands = 0 : i64, tpu.core_type = #tpu.core_type<tc>, window_params = [{transform_indices = @transform_0, window_bounds = array<i64: 256, 2048>}, {pipeline_mode = #tpu.pipeline_mode<synchronous>, transform_indices = @transform_1, window_bounds = array<i64: 2048, 128>}, {transform_indices = @transform_2, window_bounds = array<i64: 256, 128>}]} {
    %c0 = arith.constant 0 : index
    %c0_0 = arith.constant 0 : index
    %0 = vector.load %arg1[%c0, %c0_0] : memref<256x2048xbf16, #tpu.memory_space<vmem>>, vector<256x2048xbf16>
    %c0_1 = arith.constant 0 : index
    %c0_2 = arith.constant 0 : index
    %1 = vector.load %arg2[%c0_1, %c0_2] : memref<2048x128xbf16, #tpu.memory_space<vmem>>, vector<2048x128xbf16>
    %cst = arith.constant dense<0.000000e+00> : vector<256x128xf32>
    %2 = tpu.matmul %0, %1, %cst {dimension_numbers = #tpu.dot_dimension_numbers<[1], [0], [0], [1], [0, 0, 1, 1], [], []>} : vector<256x2048xbf16>, vector<2048x128xbf16>, vector<256x128xf32> -> vector<256x128xf32>
    %cst_3 = arith.constant 0.000000e+00 : f32
    %3 = vector.broadcast %cst_3 : f32 to vector<256x128xf32>
    %4 = arith.cmpf ogt, %2, %3 : vector<256x128xf32>
    %cst_4 = arith.constant 2.000000e-01 : f32
    %5 = vector.broadcast %cst_4 : f32 to vector<256x128xf32>
    %6 = arith.mulf %5, %2 : vector<256x128xf32>
    %7 = arith.select %4, %2, %6 : vector<256x128xi1>, vector<256x128xf32>
    %8 = arith.truncf %7 : vector<256x128xf32> to vector<256x128xbf16>
    %c0_5 = arith.constant 0 : index
    %c0_6 = arith.constant 0 : index
    %9 = vector.load %arg3[%c0_5, %c0_6] : memref<256x128xbf16, #tpu.memory_space<vmem>>, vector<256x128xbf16>
    tpu.vector_store %arg3[%c0_5, %c0_6], %8 {strides = array<i32>} : memref<256x128xbf16, #tpu.memory_space<vmem>>, vector<256x128xbf16>,
    return
  }
  func.func @transform_0(%arg0: i32) -> (i32, i32) {
    %c0_i32 = arith.constant 0 : i32
    %c0_i32_0 = arith.constant 0 : i32
    return %arg0, %c0_i32 : i32, i32
  }
  func.func @transform_1(%arg0: i32) -> (i32, i32) {
    %c0_i32 = arith.constant 0 : i32
    %c0_i32_0 = arith.constant 0 : i32
    %c0_i32_1 = arith.constant 0 : i32
    return %c0_i32, %c0_i32_0 : i32, i32
  }
  func.func @transform_2(%arg0: i32) -> (i32, i32) {
    %c0_i32 = arith.constant 0 : i32
    %c0_i32_0 = arith.constant 0 : i32
    return %arg0, %c0_i32 : i32, i32
  }
}

module attributes {stable_mosaic.version = 11 : i64} {
  func.func @_mm_act_kernel(%arg0: i32, %arg1: memref<128x2048xbf16, #tpu.memory_space<vmem>>, %arg2: memref<2048x128xbf16, #tpu.memory_space<vmem>>, %arg3: memref<128x128xbf16, #tpu.memory_space<vmem>>) attributes {dimension_semantics = [#tpu.dimension_semantics<parallel>], iteration_bounds = array<i64: 1>, scalar_prefetch = 0 : i64, scratch_operands = 0 : i64, tpu.core_type = #tpu.core_type<tc>, window_params = [{transform_indices = @transform_0, window_bounds = array<i64: 128, 2048>}, {pipeline_mode = #tpu.pipeline_mode<synchronous>, transform_indices = @transform_1, window_bounds = array<i64: 2048, 128>}, {transform_indices = @transform_2, window_bounds = array<i64: 128, 128>}]} {
    %c0 = arith.constant 0 : index
    %c0_0 = arith.constant 0 : index
    %0 = vector.load %arg1[%c0, %c0_0] : memref<128x2048xbf16, #tpu.memory_space<vmem>>, vector<128x2048xbf16>
    %c0_1 = arith.constant 0 : index
    %c0_2 = arith.constant 0 : index
    %1 = vector.load %arg2[%c0_1, %c0_2] : memref<2048x128xbf16, #tpu.memory_space<vmem>>, vector<2048x128xbf16>
    %cst = arith.constant dense<0.000000e+00> : vector<128x128xf32>
    %2 = tpu.matmul %0, %1, %cst {dimension_numbers = #tpu.dot_dimension_numbers<[1], [0], [0], [1], [0, 0, 1, 1], [], []>} : vector<128x2048xbf16>, vector<2048x128xbf16>, vector<128x128xf32> -> vector<128x128xf32>
    %cst_3 = arith.constant 0.000000e+00 : f32
    %3 = vector.broadcast %cst_3 : f32 to vector<128x128xf32>
    %4 = arith.cmpf ogt, %2, %3 : vector<128x128xf32>
    %cst_4 = arith.constant 2.000000e-01 : f32
    %5 = vector.broadcast %cst_4 : f32 to vector<128x128xf32>
    %6 = arith.mulf %5, %2 : vector<128x128xf32>
    %7 = arith.select %4, %2, %6 : vector<128x128xi1>, vector<128x128xf32>
    %8 = arith.truncf %7 : vector<128x128xf32> to vector<128x128xbf16>
    %c0_5 = arith.constant 0 : index
    %c0_6 = arith.constant 0 : index
    %9 = vector.load %arg3[%c0_5, %c0_6] : memref<128x128xbf16, #tpu.memory_space<vmem>>, vector<128x128xbf16>
    tpu.vector_store %arg3[%c0_5, %c0_6], %8 {strides = array<i32>} : memref<128x128xbf16, #tpu.memory_space<vmem>>, vector<128x128xbf16>,
    return
  }
  func.func @transform_0(%arg0: i32) -> (i32, i32) {
    %c0_i32 = arith.constant 0 : i32
    %c0_i32_0 = arith.constant 0 : i32
    return %arg0, %c0_i32 : i32, i32
  }
  func.func @transform_1(%arg0: i32) -> (i32, i32) {
    %c0_i32 = arith.constant 0 : i32
    %c0_i32_0 = arith.constant 0 : i32
    %c0_i32_1 = arith.constant 0 : i32
    return %c0_i32, %c0_i32_0 : i32, i32
  }
  func.func @transform_2(%arg0: i32) -> (i32, i32) {
    %c0_i32 = arith.constant 0 : i32
    %c0_i32_0 = arith.constant 0 : i32
    return %arg0, %c0_i32 : i32, i32
  }
}

module attributes {stable_mosaic.version = 11 : i64} {
  func.func @_mm_act_kernel(%arg0: i32, %arg1: memref<32x2048xbf16, #tpu.memory_space<vmem>>, %arg2: memref<2048x128xbf16, #tpu.memory_space<vmem>>, %arg3: memref<32x128xbf16, #tpu.memory_space<vmem>>) attributes {dimension_semantics = [#tpu.dimension_semantics<parallel>], iteration_bounds = array<i64: 1>, scalar_prefetch = 0 : i64, scratch_operands = 0 : i64, tpu.core_type = #tpu.core_type<tc>, window_params = [{transform_indices = @transform_0, window_bounds = array<i64: 32, 2048>}, {pipeline_mode = #tpu.pipeline_mode<synchronous>, transform_indices = @transform_1, window_bounds = array<i64: 2048, 128>}, {transform_indices = @transform_2, window_bounds = array<i64: 32, 128>}]} {
    %c0 = arith.constant 0 : index
    %c0_0 = arith.constant 0 : index
    %0 = vector.load %arg1[%c0, %c0_0] : memref<32x2048xbf16, #tpu.memory_space<vmem>>, vector<32x2048xbf16>
    %c0_1 = arith.constant 0 : index
    %c0_2 = arith.constant 0 : index
    %1 = vector.load %arg2[%c0_1, %c0_2] : memref<2048x128xbf16, #tpu.memory_space<vmem>>, vector<2048x128xbf16>
    %cst = arith.constant dense<0.000000e+00> : vector<32x128xf32>
    %2 = tpu.matmul %0, %1, %cst {dimension_numbers = #tpu.dot_dimension_numbers<[1], [0], [0], [1], [0, 0, 1, 1], [], []>} : vector<32x2048xbf16>, vector<2048x128xbf16>, vector<32x128xf32> -> vector<32x128xf32>
    %cst_3 = arith.constant 0.000000e+00 : f32
    %3 = vector.broadcast %cst_3 : f32 to vector<32x128xf32>
    %4 = arith.cmpf ogt, %2, %3 : vector<32x128xf32>
    %cst_4 = arith.constant 2.000000e-01 : f32
    %5 = vector.broadcast %cst_4 : f32 to vector<32x128xf32>
    %6 = arith.mulf %5, %2 : vector<32x128xf32>
    %7 = arith.select %4, %2, %6 : vector<32x128xi1>, vector<32x128xf32>
    %8 = arith.truncf %7 : vector<32x128xf32> to vector<32x128xbf16>
    %c0_5 = arith.constant 0 : index
    %c0_6 = arith.constant 0 : index
    %9 = vector.load %arg3[%c0_5, %c0_6] : memref<32x128xbf16, #tpu.memory_space<vmem>>, vector<32x128xbf16>
    tpu.vector_store %arg3[%c0_5, %c0_6], %8 {strides = array<i32>} : memref<32x128xbf16, #tpu.memory_space<vmem>>, vector<32x128xbf16>,
    return
  }
  func.func @transform_0(%arg0: i32) -> (i32, i32) {
    %c0_i32 = arith.constant 0 : i32
    %c0_i32_0 = arith.constant 0 : i32
    return %arg0, %c0_i32 : i32, i32
  }
  func.func @transform_1(%arg0: i32) -> (i32, i32) {
    %c0_i32 = arith.constant 0 : i32
    %c0_i32_0 = arith.constant 0 : i32
    %c0_i32_1 = arith.constant 0 : i32
    return %c0_i32, %c0_i32_0 : i32, i32
  }
  func.func @transform_2(%arg0: i32) -> (i32, i32) {
    %c0_i32 = arith.constant 0 : i32
    %c0_i32_0 = arith.constant 0 : i32
    return %arg0, %c0_i32 : i32, i32
  }
}

module attributes {stable_mosaic.version = 11 : i64} {
  func.func @_mm_bias_act_kernel(%arg0: i32, %arg1: memref<16x2048xbf16, #tpu.memory_space<vmem>>, %arg2: memref<2048x128xbf16, #tpu.memory_space<vmem>>, %arg3: memref<1x128xf32, #tpu.memory_space<vmem>>, %arg4: memref<16x128xf32, #tpu.memory_space<vmem>>) attributes {dimension_semantics = [#tpu.dimension_semantics<parallel>], iteration_bounds = array<i64: 1>, scalar_prefetch = 0 : i64, scratch_operands = 0 : i64, tpu.core_type = #tpu.core_type<tc>, window_params = [{transform_indices = @transform_0, window_bounds = array<i64: 16, 2048>}, {pipeline_mode = #tpu.pipeline_mode<synchronous>, transform_indices = @transform_1, window_bounds = array<i64: 2048, 128>}, {pipeline_mode = #tpu.pipeline_mode<synchronous>, transform_indices = @transform_2, window_bounds = array<i64: 1, 128>}, {transform_indices = @transform_3, window_bounds = array<i64: 16, 128>}]} {
    %c0 = arith.constant 0 : index
    %c0_0 = arith.constant 0 : index
    %0 = vector.load %arg1[%c0, %c0_0] : memref<16x2048xbf16, #tpu.memory_space<vmem>>, vector<16x2048xbf16>
    %c0_1 = arith.constant 0 : index
    %c0_2 = arith.constant 0 : index
    %1 = vector.load %arg2[%c0_1, %c0_2] : memref<2048x128xbf16, #tpu.memory_space<vmem>>, vector<2048x128xbf16>
    %cst = arith.constant dense<0.000000e+00> : vector<16x128xf32>
    %2 = tpu.matmul %0, %1, %cst {dimension_numbers = #tpu.dot_dimension_numbers<[1], [0], [0], [1], [0, 0, 1, 1], [], []>} : vector<16x2048xbf16>, vector<2048x128xbf16>, vector<16x128xf32> -> vector<16x128xf32>
    %c0_3 = arith.constant 0 : index
    %c0_4 = arith.constant 0 : index
    %3 = vector.load %arg3[%c0_3, %c0_4] : memref<1x128xf32, #tpu.memory_space<vmem>>, vector<1x128xf32>
    %4 = vector.broadcast %3 : vector<1x128xf32> to vector<16x128xf32>
    %5 = arith.addf %2, %4 : vector<16x128xf32>
    %cst_5 = arith.constant 0.000000e+00 : f32
    %6 = vector.broadcast %cst_5 : f32 to vector<16x128xf32>
    %7 = arith.subf %6, %5 : vector<16x128xf32>
    %8 = math.exp %7 : vector<16x128xf32>
    %cst_6 = arith.constant 1.000000e+00 : f32
    %9 = vector.broadcast %cst_6 : f32 to vector<16x128xf32>
    %10 = arith.addf %9, %8 : vector<16x128xf32>
    %11 = tpu.reciprocal %10 {approx = true} : vector<16x128xf32> -> vector<16x128xf32>
    %c0_7 = arith.constant 0 : index
    %c0_8 = arith.constant 0 : index
    %12 = vector.load %arg4[%c0_7, %c0_8] : memref<16x128xf32, #tpu.memory_space<vmem>>, vector<16x128xf32>
    tpu.vector_store %arg4[%c0_7, %c0_8], %11 {strides = array<i32>} : memref<16x128xf32, #tpu.memory_space<vmem>>, vector<16x128xf32>,
    return
  }
  func.func @transform_0(%arg0: i32) -> (i32, i32) {
    %c0_i32 = arith.constant 0 : i32
    %c0_i32_0 = arith.constant 0 : i32
    return %arg0, %c0_i32 : i32, i32
  }
  func.func @transform_1(%arg0: i32) -> (i32, i32) {
    %c0_i32 = arith.constant 0 : i32
    %c0_i32_0 = arith.constant 0 : i32
    %c0_i32_1 = arith.constant 0 : i32
    return %c0_i32, %c0_i32_0 : i32, i32
  }
  func.func @transform_2(%arg0: i32) -> (i32, i32) {
    %c0_i32 = arith.constant 0 : i32
    %c0_i32_0 = arith.constant 0 : i32
    %c0_i32_1 = arith.constant 0 : i32
    return %c0_i32, %c0_i32_0 : i32, i32
  }
  func.func @transform_3(%arg0: i32) -> (i32, i32) {
    %c0_i32 = arith.constant 0 : i32
    %c0_i32_0 = arith.constant 0 : i32
    return %arg0, %c0_i32 : i32, i32
  }
}

</mosaic_0001>

<bundles_post_ra>
// kernel: discriminator_forward.5
= control target key start
LH: loop header
LB: loop body
LE: loop exit
PB: predicated region body
PF: predicated region fallthrough
CT: control target
= control target key end

     0   :  { %s1469_s9 = smov 0   ;;  %s1585_s0 = inlined_call_operand.vmem [shape: bf16[2048,128], index: 0, kind: input, shape index: {}]   ;;  %s1586_s1 = inlined_call_operand.vmem [shape: bf16[128,128], index: 1, kind: input, shape index: {}]   ;;  %s1587_s2 = inlined_call_operand.vmem [shape: bf16[2048,128], index: 2, kind: output, shape index: {}]  }
   0x1 LB: > { %s1012_s10 = sadd.s32 4294967295, %s1452_s9   ;;  %p1016_p0 = scmp.ge.s32.totalorder %s1452_s9, 1  ;;  %s1452_s9 = sphi %s1469_s9, %s12_s9  }
   0x2   : > { %p113_p1 = scmp.lt.s32.totalorder %s1452_s9, 5 }
   0x4   : > { %p114_p2 = pnand %p1016_p0, %p113_p1 }
   0x5   : > { %s1017_s19 = sshll.u32 (!%p114_p2), %s1012_s10, 6 }
   0x6   : > { %117 = sbr.rel (%p114_p2) target bundleno = 303 (0x12f), region = 28  ;;  %p136_p3 = scmp.lt.s32.totalorder (!%p114_p2), %s1017_s19, 255 }
   0xb   : > { %v1222_v0 = vld [vmem:[%s1586_s1 + $0x38] sm:$0xff]  ;;  %v1221_v1 = vld [vmem:[%s1586_s1 + $0x30] sm:$0xff]  ;;  %v1220_v2 = vld [vmem:[%s1586_s1 + $0x28] sm:$0xff]  ;;  %s1589_s19 = smov (!%p136_p3, %s1017_s19), 255 }
   0xc   : > { %467 = vmatpush.bf16.msra.mxu0 %v1222_v0  ;;  %1414 = vmatpush.bf16.msra.mxu1 %v1222_v0  ;;  %v1219_v3 = vld [vmem:[%s1586_s1 + $0x20] sm:$0xff]  ;;  %v1218_v4 = vld [vmem:[%s1586_s1 + $0x18] sm:$0xff]  ;;  %v1217_v5 = vld [vmem:[%s1586_s1 + $0x10] sm:$0xff]  ;;  %s1018_s26 = sshll.u32 %s1589_s19, 2 }
   0xd   : > { %1415 = vmatpush.bf16.msra.mxu2 %v1222_v0  ;;  %1416 = vmatpush.bf16.msra.mxu3 %v1222_v0  ;;  %v1216_v6 = vld [vmem:[%s1586_s1 + $0x8] sm:$0xff]  ;;  %v1215_v7 = vld [vmem:[%s1586_s1] sm:$0xff]  ;;  %s1509_s3 = scalar_lea.vmem %s1585_s0, %s1018_s26  ;;  %s1548_s6 = scalar_lea.vmem %s1587_s2, %s1018_s26 }
   0xe   : > { %v1183_v8 = vld [vmem:[%s1509_s3] sm:$0xff]  ;;  %v1184_v12 = vld [vmem:[%s1509_s3 + $0x8] sm:$0xff]  ;;  %v1185_v16 = vld [vmem:[%s1509_s3 + $0x10] sm:$0xff] }
   0xf   : > { %v1191_v9 = vld [vmem:[%s1509_s3 + $0x40] sm:$0xff]  ;;  %v1192_v13 = vld [vmem:[%s1509_s3 + $0x48] sm:$0xff]  ;;  %v1193_v17 = vld [vmem:[%s1509_s3 + $0x50] sm:$0xff] }
  0x10   : > { %468 = vmatpush.bf16.msra.mxu0 %v1221_v1  ;;  %1417 = vmatpush.bf16.msra.mxu1 %v1221_v1  ;;  %v1199_v10 = vld [vmem:[%s1509_s3 + $0x80] sm:$0xff]  ;;  %v1200_v14 = vld [vmem:[%s1509_s3 + $0x88] sm:$0xff]  ;;  %v1201_v18 = vld [vmem:[%s1509_s3 + $0x90] sm:$0xff] }
  0x11   : > { %1418 = vmatpush.bf16.msra.mxu2 %v1221_v1  ;;  %1419 = vmatpush.bf16.msra.mxu3 %v1221_v1  ;;  %v1207_v11 = vld [vmem:[%s1509_s3 + $0xc0] sm:$0xff]  ;;  %v1208_v15 = vld [vmem:[%s1509_s3 + $0xc8] sm:$0xff]  ;;  %v1209_v19 = vld [vmem:[%s1509_s3 + $0xd0] sm:$0xff] }
  0x12   : > { %v1186_v20 = vld [vmem:[%s1509_s3 + $0x18] sm:$0xff]  ;;  %v1187_v24 = vld [vmem:[%s1509_s3 + $0x20] sm:$0xff]  ;;  %v1188_v28 = vld [vmem:[%s1509_s3 + $0x28] sm:$0xff] }
  0x13   : > { %v1194_v21 = vld [vmem:[%s1509_s3 + $0x58] sm:$0xff]  ;;  %v1195_v25 = vld [vmem:[%s1509_s3 + $0x60] sm:$0xff]  ;;  %v1196_v29 = vld [vmem:[%s1509_s3 + $0x68] sm:$0xff] }
  0x14   : > { %469 = vmatpush.bf16.msra.mxu0 %v1220_v2  ;;  %1420 = vmatpush.bf16.msra.mxu1 %v1220_v2  ;;  %v1202_v22 = vld [vmem:[%s1509_s3 + $0x98] sm:$0xff]  ;;  %v1203_v26 = vld [vmem:[%s1509_s3 + $0xa0] sm:$0xff]  ;;  %v1204_v30 = vld [vmem:[%s1509_s3 + $0xa8] sm:$0xff] }
  0x15   : > { %1421 = vmatpush.bf16.msra.mxu2 %v1220_v2  ;;  %1422 = vmatpush.bf16.msra.mxu3 %v1220_v2  ;;  %v1210_v23 = vld [vmem:[%s1509_s3 + $0xd8] sm:$0xff]  ;;  %v1211_v27 = vld [vmem:[%s1509_s3 + $0xe0] sm:$0xff]  ;;  %v1212_v31 = vld [vmem:[%s1509_s3 + $0xe8] sm:$0xff] }
  0x16   : > { %v1189_v32 = vld [vmem:[%s1509_s3 + $0x30] sm:$0xff]  ;;  %v1190_v36 = vld [vmem:[%s1509_s3 + $0x38] sm:$0xff] }
  0x17   : > { %v1197_v33 = vld [vmem:[%s1509_s3 + $0x70] sm:$0xff]  ;;  %v1198_v37 = vld [vmem:[%s1509_s3 + $0x78] sm:$0xff] }
  0x18   : > { %470 = vmatpush.bf16.msra.mxu0 %v1219_v3  ;;  %1423 = vmatpush.bf16.msra.mxu1 %v1219_v3  ;;  %v1205_v34 = vld [vmem:[%s1509_s3 + $0xb0] sm:$0xff]  ;;  %v1206_v38 = vld [vmem:[%s1509_s3 + $0xb8] sm:$0xff] }
  0x19   : > { %1424 = vmatpush.bf16.msra.mxu2 %v1219_v3  ;;  %1425 = vmatpush.bf16.msra.mxu3 %v1219_v3  ;;  %v1213_v35 = vld [vmem:[%s1509_s3 + $0xf0] sm:$0xff]  ;;  %v1214_v39 = vld [vmem:[%s1509_s3 + $0xf8] sm:$0xff] }
  0x1c   : > { %471 = vmatpush.bf16.msra.mxu0 %v1218_v4  ;;  %1426 = vmatpush.bf16.msra.mxu1 %v1218_v4 }
  0x1d   : > { %1427 = vmatpush.bf16.msra.mxu2 %v1218_v4  ;;  %1428 = vmatpush.bf16.msra.mxu3 %v1218_v4 }
  0x20   : > { %472 = vmatpush.bf16.msra.mxu0 %v1217_v5  ;;  %1429 = vmatpush.bf16.msra.mxu1 %v1217_v5 }
  0x21   : > { %1430 = vmatpush.bf16.msra.mxu2 %v1217_v5  ;;  %1431 = vmatpush.bf16.msra.mxu3 %v1217_v5 }
  0x24   : > { %473 = vmatpush.bf16.msra.mxu0 %v1216_v6  ;;  %1432 = vmatpush.bf16.msra.mxu1 %v1216_v6 }
  0x25   : > { %1433 = vmatpush.bf16.msra.mxu2 %v1216_v6  ;;  %1434 = vmatpush.bf16.msra.mxu3 %v1216_v6 }
  0x28   : > { %474 = vmatpush.bf16.msra.mxu0 %v1215_v7  ;;  %1435 = vmatpush.bf16.msra.mxu1 %v1215_v7 }
  0x29   : > { %1436 = vmatpush.bf16.msra.mxu2 %v1215_v7  ;;  %1437 = vmatpush.bf16.msra.mxu3 %v1215_v7 }
  0x2b   : > { %475 = vmatmul.bf16.vlgmr.msra.gmra.mxu0 %v1183_v8  ;;  %515 = vmatmul.bf16.vlgmr.msra.gmra.mxu1 %v1191_v9 }
  0x2c   : > { %555 = vmatmul.bf16.vlgmr.msra.gmra.mxu2 %v1199_v10  ;;  %595 = vmatmul.bf16.vlgmr.msra.gmra.mxu3 %v1207_v11 }
  0x3b   : > { %480 = vmatmul.bf16.gmra.mxu0 %v1184_v12  ;;  %520 = vmatmul.bf16.gmra.mxu1 %v1192_v13 }
  0x3c   : > { %560 = vmatmul.bf16.gmra.mxu2 %v1200_v14  ;;  %600 = vmatmul.bf16.gmra.mxu3 %v1208_v15 }
  0x4b   : > { %485 = vmatmul.bf16.gmra.mxu0 %v1185_v16  ;;  %525 = vmatmul.bf16.gmra.mxu1 %v1193_v17 }
  0x4c   : > { %565 = vmatmul.bf16.gmra.mxu2 %v1201_v18  ;;  %605 = vmatmul.bf16.gmra.mxu3 %v1209_v19 }
  0x5b   : > { %490 = vmatmul.bf16.gmra.mxu0 %v1186_v20  ;;  %530 = vmatmul.bf16.gmra.mxu1 %v1194_v21 }
  0x5c   : > { %570 = vmatmul.bf16.gmra.mxu2 %v1202_v22  ;;  %610 = vmatmul.bf16.gmra.mxu3 %v1210_v23 }
  0x6b   : > { %495 = vmatmul.bf16.gmra.mxu0 %v1187_v24  ;;  %535 = vmatmul.bf16.gmra.mxu1 %v1195_v25 }
  0x6c   : > { %575 = vmatmul.bf16.gmra.mxu2 %v1203_v26  ;;  %615 = vmatmul.bf16.gmra.mxu3 %v1211_v27 }
  0x7b   : > { %500 = vmatmul.bf16.gmra.mxu0 %v1188_v28  ;;  %540 = vmatmul.bf16.gmra.mxu1 %v1196_v29 }
  0x7c   : > { %580 = vmatmul.bf16.gmra.mxu2 %v1204_v30  ;;  %620 = vmatmul.bf16.gmra.mxu3 %v1212_v31 }
  0x8b   : > { %505 = vmatmul.bf16.gmra.mxu0 %v1189_v32  ;;  %545 = vmatmul.bf16.gmra.mxu1 %v1197_v33 }
  0x8c   : > { %585 = vmatmul.bf16.gmra.mxu2 %v1205_v34  ;;  %625 = vmatmul.bf16.gmra.mxu3 %v1213_v35 }
  0x9b   : > { %510 = vmatmul.bf16.gmra.mxu0 %v1190_v36  ;;  %550 = vmatmul.bf16.gmra.mxu1 %v1198_v37 }
  0x9c   : > { %590 = vmatmul.bf16.gmra.mxu2 %v1206_v38  ;;  %630 = vmatmul.bf16.gmra.mxu3 %v1214_v39 }
  0xa8   : > { %v476_v40 = vpop.f32.mrf.mxu0  ;;  %v516_v41 = vpop.f32.mrf.mxu1 }
  0xa9   : > { %v700_v42 = vmul.f32 0.2, %v476_v40  ;;  %v716_v43 = vmul.f32 0.2, %v516_v41  ;;  %vm636_vm0 = vcmp.gt.f32.partialorder %v476_v40, 0.0  ;;  %vm652_vm1 = vcmp.gt.f32.partialorder %v516_v41, 0.0 }
  0xab   : > { %v764_v50 = vsel %vm636_vm0, %v476_v40, %v700_v42  ;;  %v780_v51 = vsel %vm652_vm1, %v516_v41, %v716_v43 }
  0xaf   : > { %v556_v44 = vpop.f32.mrf.mxu2  ;;  %v596_v45 = vpop.f32.mrf.mxu3 }
  0xb0   : > { %v478_v46 = vpop.f32.mrf.mxu0  ;;  %v518_v47 = vpop.f32.mrf.mxu1  ;;  %v732_v56 = vmul.f32 0.2, %v556_v44  ;;  %v748_v57 = vmul.f32 0.2, %v596_v45  ;;  %vm668_vm4 = vcmp.gt.f32.partialorder %v556_v44, 0.0  ;;  %vm684_vm5 = vcmp.gt.f32.partialorder %v596_v45, 0.0 }
  0xb1   : > { %vm637_vm2 = vcmp.gt.f32.partialorder %v478_v46, 0.0  ;;  %v701_v48 = vmul.f32 0.2, %v478_v46  ;;  %vm653_vm3 = vcmp.gt.f32.partialorder %v518_v47, 0.0  ;;  %v717_v49 = vmul.f32 0.2, %v518_v47 }
  0xb2   : > { %v796_v0 = vsel %vm668_vm4, %v556_v44, %v732_v56  ;;  %v812_v1 = vsel %vm684_vm5, %v596_v45, %v748_v57 }
  0xb3   : > { %v765_v52 = vsel %vm637_vm2, %v478_v46, %v701_v48  ;;  %v781_v53 = vsel %vm653_vm3, %v518_v47, %v717_v49 }
  0xb4   : > { %v1226_v54 = vpack.c.bf16 %v765_v52, %v764_v50  ;;  %v1266_v55 = vpack.c.bf16 %v781_v53, %v780_v51 }
  0xb6   : > { %1227 = vst [vmem:[%s1548_s6] sm:$0xff] %v1226_v54  }
  0xb7   : > { %1390 = vst [vmem:[%s1548_s6 + $0x40] sm:$0xff] %v1266_v55   ;;  %v558_v58 = vpop.f32.mrf.mxu2  ;;  %v598_v59 = vpop.f32.mrf.mxu3 }
  0xb8   : > { %vm669_vm6 = vcmp.gt.f32.partialorder %v558_v58, 0.0  ;;  %v733_v60 = vmul.f32 0.2, %v558_v58  ;;  %vm685_vm7 = vcmp.gt.f32.partialorder %v598_v59, 0.0  ;;  %v749_v61 = vmul.f32 0.2, %v598_v59  ;;  %v481_v62 = vpop.f32.mrf.mxu0  ;;  %v521_v63 = vpop.f32.mrf.mxu1 }
  0xb9   : > { %v702_v6 = vmul.f32 0.2, %v481_v62  ;;  %v718_v7 = vmul.f32 0.2, %v521_v63  ;;  %vm638_vm8 = vcmp.gt.f32.partialorder %v481_v62, 0.0  ;;  %vm654_vm9 = vcmp.gt.f32.partialorder %v521_v63, 0.0 }
  0xba   : > { %v797_v2 = vsel %vm669_vm6, %v558_v58, %v733_v60  ;;  %v813_v3 = vsel %vm685_vm7, %v598_v59, %v749_v61 }
  0xbb   : > { %v1306_v4 = vpack.c.bf16 %v797_v2, %v796_v0  ;;  %v1346_v5 = vpack.c.bf16 %v813_v3, %v812_v1  ;;  %v766_v14 = vsel %vm638_vm8, %v481_v62, %v702_v6  ;;  %v782_v15 = vsel %vm654_vm9, %v521_v63, %v718_v7 }
  0xbd   : > { %1398 = vst [vmem:[%s1548_s6 + $0x80] sm:$0xff] %v1306_v4  }
  0xbe   : > { %1406 = vst [vmem:[%s1548_s6 + $0xc0] sm:$0xff] %v1346_v5  }
  0xbf   : > { %v561_v8 = vpop.f32.mrf.mxu2  ;;  %v601_v9 = vpop.f32.mrf.mxu3 }
  0xc0   : > { %v483_v10 = vpop.f32.mrf.mxu0  ;;  %v523_v11 = vpop.f32.mrf.mxu1  ;;  %v734_v20 = vmul.f32 0.2, %v561_v8  ;;  %v750_v21 = vmul.f32 0.2, %v601_v9  ;;  %vm670_vm12 = vcmp.gt.f32.partialorder %v561_v8, 0.0  ;;  %vm686_vm13 = vcmp.gt.f32.partialorder %v601_v9, 0.0 }
  0xc1   : > { %vm639_vm10 = vcmp.gt.f32.partialorder %v483_v10, 0.0  ;;  %v703_v12 = vmul.f32 0.2, %v483_v10  ;;  %vm655_vm11 = vcmp.gt.f32.partialorder %v523_v11, 0.0  ;;  %v719_v13 = vmul.f32 0.2, %v523_v11 }
  0xc2   : > { %v798_v28 = vsel %vm670_vm12, %v561_v8, %v734_v20  ;;  %v814_v29 = vsel %vm686_vm13, %v601_v9, %v750_v21 }
  0xc3   : > { %v767_v16 = vsel %vm639_vm10, %v483_v10, %v703_v12  ;;  %v783_v17 = vsel %vm655_vm11, %v523_v11, %v719_v13 }
  0xc4   : > { %v1231_v18 = vpack.c.bf16 %v767_v16, %v766_v14  ;;  %v1271_v19 = vpack.c.bf16 %v783_v17, %v782_v15 }
  0xc6   : > { %1383 = vst [vmem:[%s1548_s6 + $0x8] sm:$0xff] %v1231_v18  }
  0xc7   : > { %1391 = vst [vmem:[%s1548_s6 + $0x48] sm:$0xff] %v1271_v19   ;;  %v563_v22 = vpop.f32.mrf.mxu2  ;;  %v603_v23 = vpop.f32.mrf.mxu3 }
  0xc8   : > { %vm671_vm14 = vcmp.gt.f32.partialorder %v563_v22, 0.0  ;;  %v735_v24 = vmul.f32 0.2, %v563_v22  ;;  %vm687_vm15 = vcmp.gt.f32.partialorder %v603_v23, 0.0  ;;  %v751_v25 = vmul.f32 0.2, %v603_v23  ;;  %v486_v26 = vpop.f32.mrf.mxu0  ;;  %v526_v27 = vpop.f32.mrf.mxu1 }
  0xc9   : > { %v704_v34 = vmul.f32 0.2, %v486_v26  ;;  %v720_v35 = vmul.f32 0.2, %v526_v27  ;;  %vm640_vm0 = vcmp.gt.f32.partialorder %v486_v26, 0.0  ;;  %vm656_vm1 = vcmp.gt.f32.partialorder %v526_v27, 0.0 }
  0xca   : > { %v799_v30 = vsel %vm671_vm14, %v563_v22, %v735_v24  ;;  %v815_v31 = vsel %vm687_vm15, %v603_v23, %v751_v25 }
  0xcb   : > { %v1311_v32 = vpack.c.bf16 %v799_v30, %v798_v28  ;;  %v1351_v33 = vpack.c.bf16 %v815_v31, %v814_v29  ;;  %v768_v42 = vsel %vm640_vm0, %v486_v26, %v704_v34  ;;  %v784_v43 = vsel %vm656_vm1, %v526_v27, %v720_v35 }
  0xcd   : > { %1399 = vst [vmem:[%s1548_s6 + $0x88] sm:$0xff] %v1311_v32  }
  0xce   : > { %1407 = vst [vmem:[%s1548_s6 + $0xc8] sm:$0xff] %v1351_v33  }
  0xcf   : > { %v566_v36 = vpop.f32.mrf.mxu2  ;;  %v606_v37 = vpop.f32.mrf.mxu3 }
  0xd0   : > { %v488_v38 = vpop.f32.mrf.mxu0  ;;  %v528_v39 = vpop.f32.mrf.mxu1  ;;  %v736_v48 = vmul.f32 0.2, %v566_v36  ;;  %v752_v49 = vmul.f32 0.2, %v606_v37  ;;  %vm672_vm4 = vcmp.gt.f32.partialorder %v566_v36, 0.0  ;;  %vm688_vm5 = vcmp.gt.f32.partialorder %v606_v37, 0.0 }
  0xd1   : > { %vm641_vm2 = vcmp.gt.f32.partialorder %v488_v38, 0.0  ;;  %v705_v40 = vmul.f32 0.2, %v488_v38  ;;  %vm657_vm3 = vcmp.gt.f32.partialorder %v528_v39, 0.0  ;;  %v721_v41 = vmul.f32 0.2, %v528_v39 }
  0xd2   : > { %v800_v56 = vsel %vm672_vm4, %v566_v36, %v736_v48  ;;  %v816_v57 = vsel %vm688_vm5, %v606_v37, %v752_v49 }
  0xd3   : > { %v769_v44 = vsel %vm641_vm2, %v488_v38, %v705_v40  ;;  %v785_v45 = vsel %vm657_vm3, %v528_v39, %v721_v41 }
  0xd4   : > { %v1236_v46 = vpack.c.bf16 %v769_v44, %v768_v42  ;;  %v1276_v47 = vpack.c.bf16 %v785_v45, %v784_v43 }
  0xd6   : > { %1384 = vst [vmem:[%s1548_s6 + $0x10] sm:$0xff] %v1236_v46  }
  0xd7   : > { %1392 = vst [vmem:[%s1548_s6 + $0x50] sm:$0xff] %v1276_v47   ;;  %v568_v50 = vpop.f32.mrf.mxu2  ;;  %v608_v51 = vpop.f32.mrf.mxu3 }
  0xd8   : > { %vm673_vm6 = vcmp.gt.f32.partialorder %v568_v50, 0.0  ;;  %v737_v52 = vmul.f32 0.2, %v568_v50  ;;  %vm689_vm7 = vcmp.gt.f32.partialorder %v608_v51, 0.0  ;;  %v753_v53 = vmul.f32 0.2, %v608_v51  ;;  %v491_v54 = vpop.f32.mrf.mxu0  ;;  %v531_v55 = vpop.f32.mrf.mxu1 }
  0xd9   : > { %v706_v62 = vmul.f32 0.2, %v491_v54  ;;  %v722_v63 = vmul.f32 0.2, %v531_v55  ;;  %vm642_vm8 = vcmp.gt.f32.partialorder %v491_v54, 0.0  ;;  %vm658_vm9 = vcmp.gt.f32.partialorder %v531_v55, 0.0 }
  0xda   : > { %v801_v58 = vsel %vm673_vm6, %v568_v50, %v737_v52  ;;  %v817_v59 = vsel %vm689_vm7, %v608_v51, %v753_v53 }
  0xdb   : > { %v1316_v60 = vpack.c.bf16 %v801_v58, %v800_v56  ;;  %v1356_v61 = vpack.c.bf16 %v817_v59, %v816_v57  ;;  %v770_v6 = vsel %vm642_vm8, %v491_v54, %v706_v62  ;;  %v786_v7 = vsel %vm658_vm9, %v531_v55, %v722_v63 }
  0xdd   : > { %1400 = vst [vmem:[%s1548_s6 + $0x90] sm:$0xff] %v1316_v60  }
  0xde   : > { %1408 = vst [vmem:[%s1548_s6 + $0xd0] sm:$0xff] %v1356_v61  }
  0xdf   : > { %v571_v0 = vpop.f32.mrf.mxu2  ;;  %v611_v1 = vpop.f32.mrf.mxu3 }
  0xe0   : > { %v493_v2 = vpop.f32.mrf.mxu0  ;;  %v533_v3 = vpop.f32.mrf.mxu1  ;;  %v738_v12 = vmul.f32 0.2, %v571_v0  ;;  %v754_v13 = vmul.f32 0.2, %v611_v1  ;;  %vm674_vm12 = vcmp.gt.f32.partialorder %v571_v0, 0.0  ;;  %vm690_vm13 = vcmp.gt.f32.partialorder %v611_v1, 0.0 }
  0xe1   : > { %vm643_vm10 = vcmp.gt.f32.partialorder %v493_v2, 0.0  ;;  %v707_v4 = vmul.f32 0.2, %v493_v2  ;;  %vm659_vm11 = vcmp.gt.f32.partialorder %v533_v3, 0.0  ;;  %v723_v5 = vmul.f32 0.2, %v533_v3 }
  0xe2   : > { %v802_v20 = vsel %vm674_vm12, %v571_v0, %v738_v12  ;;  %v818_v21 = vsel %vm690_vm13, %v611_v1, %v754_v13 }
  0xe3   : > { %v771_v8 = vsel %vm643_vm10, %v493_v2, %v707_v4  ;;  %v787_v9 = vsel %vm659_vm11, %v533_v3, %v723_v5 }
  0xe4   : > { %v1241_v10 = vpack.c.bf16 %v771_v8, %v770_v6  ;;  %v1281_v11 = vpack.c.bf16 %v787_v9, %v786_v7 }
  0xe6   : > { %1385 = vst [vmem:[%s1548_s6 + $0x18] sm:$0xff] %v1241_v10  }
  0xe7   : > { %1393 = vst [vmem:[%s1548_s6 + $0x58] sm:$0xff] %v1281_v11   ;;  %v573_v14 = vpop.f32.mrf.mxu2  ;;  %v613_v15 = vpop.f32.mrf.mxu3 }
  0xe8   : > { %vm675_vm14 = vcmp.gt.f32.partialorder %v573_v14, 0.0  ;;  %v739_v16 = vmul.f32 0.2, %v573_v14  ;;  %vm691_vm15 = vcmp.gt.f32.partialorder %v613_v15, 0.0  ;;  %v755_v17 = vmul.f32 0.2, %v613_v15  ;;  %v496_v18 = vpop.f32.mrf.mxu0  ;;  %v536_v19 = vpop.f32.mrf.mxu1 }
  0xe9   : > { %v708_v26 = vmul.f32 0.2, %v496_v18  ;;  %v724_v27 = vmul.f32 0.2, %v536_v19  ;;  %vm644_vm0 = vcmp.gt.f32.partialorder %v496_v18, 0.0  ;;  %vm660_vm1 = vcmp.gt.f32.partialorder %v536_v19, 0.0 }
  0xea   : > { %v803_v22 = vsel %vm675_vm14, %v573_v14, %v739_v16  ;;  %v819_v23 = vsel %vm691_vm15, %v613_v15, %v755_v17 }
  0xeb   : > { %v1321_v24 = vpack.c.bf16 %v803_v22, %v802_v20  ;;  %v1361_v25 = vpack.c.bf16 %v819_v23, %v818_v21  ;;  %v772_v34 = vsel %vm644_vm0, %v496_v18, %v708_v26  ;;  %v788_v35 = vsel %vm660_vm1, %v536_v19, %v724_v27 }
  0xed   : > { %1401 = vst [vmem:[%s1548_s6 + $0x98] sm:$0xff] %v1321_v24  }
  0xee   : > { %1409 = vst [vmem:[%s1548_s6 + $0xd8] sm:$0xff] %v1361_v25  }
  0xef   : > { %v576_v28 = vpop.f32.mrf.mxu2  ;;  %v616_v29 = vpop.f32.mrf.mxu3 }
  0xf0   : > { %v498_v30 = vpop.f32.mrf.mxu0  ;;  %v538_v31 = vpop.f32.mrf.mxu1  ;;  %v740_v40 = vmul.f32 0.2, %v576_v28  ;;  %v756_v41 = vmul.f32 0.2, %v616_v29  ;;  %vm676_vm4 = vcmp.gt.f32.partialorder %v576_v28, 0.0  ;;  %vm692_vm5 = vcmp.gt.f32.partialorder %v616_v29, 0.0 }
  0xf1   : > { %vm645_vm2 = vcmp.gt.f32.partialorder %v498_v30, 0.0  ;;  %v709_v32 = vmul.f32 0.2, %v498_v30  ;;  %vm661_vm3 = vcmp.gt.f32.partialorder %v538_v31, 0.0  ;;  %v725_v33 = vmul.f32 0.2, %v538_v31 }
  0xf2   : > { %v804_v48 = vsel %vm676_vm4, %v576_v28, %v740_v40  ;;  %v820_v49 = vsel %vm692_vm5, %v616_v29, %v756_v41 }
  0xf3   : > { %v773_v36 = vsel %vm645_vm2, %v498_v30, %v709_v32  ;;  %v789_v37 = vsel %vm661_vm3, %v538_v31, %v725_v33 }
  0xf4   : > { %v1246_v38 = vpack.c.bf16 %v773_v36, %v772_v34  ;;  %v1286_v39 = vpack.c.bf16 %v789_v37, %v788_v35 }
  0xf6   : > { %1386 = vst [vmem:[%s1548_s6 + $0x20] sm:$0xff] %v1246_v38  }
  0xf7   : > { %1394 = vst [vmem:[%s1548_s6 + $0x60] sm:$0xff] %v1286_v39   ;;  %v578_v42 = vpop.f32.mrf.mxu2  ;;  %v618_v43 = vpop.f32.mrf.mxu3 }
  0xf8   : > { %vm677_vm6 = vcmp.gt.f32.partialorder %v578_v42, 0.0  ;;  %v741_v44 = vmul.f32 0.2, %v578_v42  ;;  %vm693_vm7 = vcmp.gt.f32.partialorder %v618_v43, 0.0  ;;  %v757_v45 = vmul.f32 0.2, %v618_v43  ;;  %v501_v46 = vpop.f32.mrf.mxu0  ;;  %v541_v47 = vpop.f32.mrf.mxu1 }
  0xf9   : > { %v710_v54 = vmul.f32 0.2, %v501_v46  ;;  %v726_v55 = vmul.f32 0.2, %v541_v47  ;;  %vm646_vm8 = vcmp.gt.f32.partialorder %v501_v46, 0.0  ;;  %vm662_vm9 = vcmp.gt.f32.partialorder %v541_v47, 0.0 }
  0xfa   : > { %v805_v50 = vsel %vm677_vm6, %v578_v42, %v741_v44  ;;  %v821_v51 = vsel %vm693_vm7, %v618_v43, %v757_v45 }
  0xfb   : > { %v1326_v52 = vpack.c.bf16 %v805_v50, %v804_v48  ;;  %v1366_v53 = vpack.c.bf16 %v821_v51, %v820_v49  ;;  %v774_v62 = vsel %vm646_vm8, %v501_v46, %v710_v54  ;;  %v790_v63 = vsel %vm662_vm9, %v541_v47, %v726_v55 }
  0xfd   : > { %1402 = vst [vmem:[%s1548_s6 + $0xa0] sm:$0xff] %v1326_v52  }
  0xfe   : > { %1410 = vst [vmem:[%s1548_s6 + $0xe0] sm:$0xff] %v1366_v53  }
  0xff   : > { %v581_v56 = vpop.f32.mrf.mxu2  ;;  %v621_v57 = vpop.f32.mrf.mxu3 }
 0x100   : > { %v503_v58 = vpop.f32.mrf.mxu0  ;;  %v543_v59 = vpop.f32.mrf.mxu1  ;;  %v742_v4 = vmul.f32 0.2, %v581_v56  ;;  %v758_v5 = vmul.f32 0.2, %v621_v57  ;;  %vm678_vm12 = vcmp.gt.f32.partialorder %v581_v56, 0.0  ;;  %vm694_vm13 = vcmp.gt.f32.partialorder %v621_v57, 0.0 }
 0x101   : > { %vm647_vm10 = vcmp.gt.f32.partialorder %v503_v58, 0.0  ;;  %v711_v60 = vmul.f32 0.2, %v503_v58  ;;  %vm663_vm11 = vcmp.gt.f32.partialorder %v543_v59, 0.0  ;;  %v727_v61 = vmul.f32 0.2, %v543_v59 }
 0x102   : > { %v806_v12 = vsel %vm678_vm12, %v581_v56, %v742_v4  ;;  %v822_v13 = vsel %vm694_vm13, %v621_v57, %v758_v5 }
 0x103   : > { %v775_v0 = vsel %vm647_vm10, %v503_v58, %v711_v60  ;;  %v791_v1 = vsel %vm663_vm11, %v543_v59, %v727_v61 }
 0x104   : > { %v1251_v2 = vpack.c.bf16 %v775_v0, %v774_v62  ;;  %v1291_v3 = vpack.c.bf16 %v791_v1, %v790_v63 }
 0x106   : > { %1387 = vst [vmem:[%s1548_s6 + $0x28] sm:$0xff] %v1251_v2  }
 0x107   : > { %1395 = vst [vmem:[%s1548_s6 + $0x68] sm:$0xff] %v1291_v3   ;;  %v583_v6 = vpop.f32.mrf.mxu2  ;;  %v623_v7 = vpop.f32.mrf.mxu3 }
 0x108   : > { %vm679_vm14 = vcmp.gt.f32.partialorder %v583_v6, 0.0  ;;  %v743_v8 = vmul.f32 0.2, %v583_v6  ;;  %vm695_vm15 = vcmp.gt.f32.partialorder %v623_v7, 0.0  ;;  %v759_v9 = vmul.f32 0.2, %v623_v7  ;;  %v506_v10 = vpop.f32.mrf.mxu0  ;;  %v546_v11 = vpop.f32.mrf.mxu1 }
 0x109   : > { %v712_v18 = vmul.f32 0.2, %v506_v10  ;;  %v728_v19 = vmul.f32 0.2, %v546_v11  ;;  %vm648_vm0 = vcmp.gt.f32.partialorder %v506_v10, 0.0  ;;  %vm664_vm1 = vcmp.gt.f32.partialorder %v546_v11, 0.0 }
 0x10a   : > { %v807_v14 = vsel %vm679_vm14, %v583_v6, %v743_v8  ;;  %v823_v15 = vsel %vm695_vm15, %v623_v7, %v759_v9 }
 0x10b   : > { %v1331_v16 = vpack.c.bf16 %v807_v14, %v806_v12  ;;  %v1371_v17 = vpack.c.bf16 %v823_v15, %v822_v13  ;;  %v776_v26 = vsel %vm648_vm0, %v506_v10, %v712_v18  ;;  %v792_v27 = vsel %vm664_vm1, %v546_v11, %v728_v19 }
 0x10d   : > { %1403 = vst [vmem:[%s1548_s6 + $0xa8] sm:$0xff] %v1331_v16  }
 0x10e   : > { %1411 = vst [vmem:[%s1548_s6 + $0xe8] sm:$0xff] %v1371_v17  }
 0x10f   : > { %v586_v20 = vpop.f32.mrf.mxu2  ;;  %v626_v21 = vpop.f32.mrf.mxu3 }
 0x110   : > { %v508_v22 = vpop.f32.mrf.mxu0  ;;  %v548_v23 = vpop.f32.mrf.mxu1  ;;  %v744_v32 = vmul.f32 0.2, %v586_v20  ;;  %v760_v33 = vmul.f32 0.2, %v626_v21  ;;  %vm680_vm4 = vcmp.gt.f32.partialorder %v586_v20, 0.0  ;;  %vm696_vm5 = vcmp.gt.f32.partialorder %v626_v21, 0.0 }
 0x111   : > { %vm649_vm2 = vcmp.gt.f32.partialorder %v508_v22, 0.0  ;;  %v713_v24 = vmul.f32 0.2, %v508_v22  ;;  %vm665_vm3 = vcmp.gt.f32.partialorder %v548_v23, 0.0  ;;  %v729_v25 = vmul.f32 0.2, %v548_v23 }
 0x112   : > { %v808_v40 = vsel %vm680_vm4, %v586_v20, %v744_v32  ;;  %v824_v41 = vsel %vm696_vm5, %v626_v21, %v760_v33 }
 0x113   : > { %v777_v28 = vsel %vm649_vm2, %v508_v22, %v713_v24  ;;  %v793_v29 = vsel %vm665_vm3, %v548_v23, %v729_v25 }
 0x114   : > { %v1256_v30 = vpack.c.bf16 %v777_v28, %v776_v26  ;;  %v1296_v31 = vpack.c.bf16 %v793_v29, %v792_v27 }
 0x116   : > { %1388 = vst [vmem:[%s1548_s6 + $0x30] sm:$0xff] %v1256_v30  }
 0x117   : > { %1396 = vst [vmem:[%s1548_s6 + $0x70] sm:$0xff] %v1296_v31   ;;  %v588_v34 = vpop.f32.mrf.mxu2  ;;  %v628_v35 = vpop.f32.mrf.mxu3 }
 0x118   : > { %vm681_vm6 = vcmp.gt.f32.partialorder %v588_v34, 0.0  ;;  %v745_v36 = vmul.f32 0.2, %v588_v34  ;;  %vm697_vm7 = vcmp.gt.f32.partialorder %v628_v35, 0.0  ;;  %v761_v37 = vmul.f32 0.2, %v628_v35  ;;  %v511_v38 = vpop.f32.mrf.mxu0  ;;  %v551_v39 = vpop.f32.mrf.mxu1 }
 0x119   : > { %v714_v46 = vmul.f32 0.2, %v511_v38  ;;  %v730_v47 = vmul.f32 0.2, %v551_v39  ;;  %vm650_vm8 = vcmp.gt.f32.partialorder %v511_v38, 0.0  ;;  %vm666_vm9 = vcmp.gt.f32.partialorder %v551_v39, 0.0 }
 0x11a   : > { %v809_v42 = vsel %vm681_vm6, %v588_v34, %v745_v36  ;;  %v825_v43 = vsel %vm697_vm7, %v628_v35, %v761_v37 }
 0x11b   : > { %v1336_v44 = vpack.c.bf16 %v809_v42, %v808_v40  ;;  %v1376_v45 = vpack.c.bf16 %v825_v43, %v824_v41  ;;  %v778_v54 = vsel %vm650_vm8, %v511_v38, %v714_v46  ;;  %v794_v55 = vsel %vm666_vm9, %v551_v39, %v730_v47 }
 0x11d   : > { %1404 = vst [vmem:[%s1548_s6 + $0xb0] sm:$0xff] %v1336_v44  }
 0x11e   : > { %1412 = vst [vmem:[%s1548_s6 + $0xf0] sm:$0xff] %v1376_v45  }
 0x11f   : > { %v591_v48 = vpop.f32.mrf.mxu2  ;;  %v631_v49 = vpop.f32.mrf.mxu3 }
 0x120   : > { %v513_v50 = vpop.f32.mrf.mxu0  ;;  %v553_v51 = vpop.f32.mrf.mxu1  ;;  %v746_v60 = vmul.f32 0.2, %v591_v48  ;;  %v762_v61 = vmul.f32 0.2, %v631_v49  ;;  %vm682_vm12 = vcmp.gt.f32.partialorder %v591_v48, 0.0  ;;  %vm698_vm13 = vcmp.gt.f32.partialorder %v631_v49, 0.0 }
 0x121   : > { %vm651_vm10 = vcmp.gt.f32.partialorder %v513_v50, 0.0  ;;  %v715_v52 = vmul.f32 0.2, %v513_v50  ;;  %vm667_vm11 = vcmp.gt.f32.partialorder %v553_v51, 0.0  ;;  %v731_v53 = vmul.f32 0.2, %v553_v51 }
 0x122   : > { %v810_v2 = vsel %vm682_vm12, %v591_v48, %v746_v60  ;;  %v826_v3 = vsel %vm698_vm13, %v631_v49, %v762_v61 }
 0x123   : > { %v779_v56 = vsel %vm651_vm10, %v513_v50, %v715_v52  ;;  %v795_v57 = vsel %vm667_vm11, %v553_v51, %v731_v53 }
 0x124   : > { %v1261_v58 = vpack.c.bf16 %v779_v56, %v778_v54  ;;  %v1301_v59 = vpack.c.bf16 %v795_v57, %v794_v55 }
 0x126   : > { %1389 = vst [vmem:[%s1548_s6 + $0x38] sm:$0xff] %v1261_v58  }
 0x127   : > { %1397 = vst [vmem:[%s1548_s6 + $0x78] sm:$0xff] %v1301_v59   ;;  %v593_v62 = vpop.f32.mrf.mxu2  ;;  %v633_v63 = vpop.f32.mrf.mxu3 }
 0x128   : > { %vm683_vm14 = vcmp.gt.f32.partialorder %v593_v62, 0.0  ;;  %v747_v0 = vmul.f32 0.2, %v593_v62  ;;  %vm699_vm15 = vcmp.gt.f32.partialorder %v633_v63, 0.0  ;;  %v763_v1 = vmul.f32 0.2, %v633_v63 }
 0x12a   : > { %v811_v4 = vsel %vm683_vm14, %v593_v62, %v747_v0  ;;  %v827_v5 = vsel %vm699_vm15, %v633_v63, %v763_v1 }
 0x12b   : > { %v1341_v6 = vpack.c.bf16 %v811_v4, %v810_v2  ;;  %v1381_v7 = vpack.c.bf16 %v827_v5, %v826_v3 }
 0x12d   : > { %1405 = vst [vmem:[%s1548_s6 + $0xb8] sm:$0xff] %v1341_v6  }
 0x12e   : > { %1413 = vst [vmem:[%s1548_s6 + $0xf8] sm:$0xff] %v1381_v7  }
 0x12f PF: > { %s12_s9 = sadd.s32 1, %s1452_s9  }
 0x130   : > { %p9_p4 = scmp.ge.s32.totalorder %s12_s9, 6  }
 0x132   :  { %11 = sbr.rel (!%p9_p4) target bundleno = 1 (0x1), region = 58 }

// kernel: discriminator_forward.6
= control target key start
LH: loop header
LB: loop body
LE: loop exit
PB: predicated region body
PF: predicated region fallthrough
CT: control target
= control target key end

     0   :  { %s6409_s9 = smov 0   ;;  %s7634_s0 = inlined_call_operand.vmem [shape: bf16[512,2048], index: 0, kind: input, shape index: {}]   ;;  %s7635_s1 = inlined_call_operand.vmem [shape: bf16[2048,128], index: 1, kind: input, shape index: {}]   ;;  %s7636_s2 = inlined_call_operand.vmem [shape: bf16[512,128], index: 2, kind: output, shape index: {}]  }
   0x1 LB: > { %s4350_s10 = sadd.s32 4294967295, %s6392_s9   ;;  %p4354_p0 = scmp.ge.s32.totalorder %s6392_s9, 1  ;;  %s6392_s9 = sphi %s6409_s9, %s12_s9  }
   0x2   : > { %p114_p1 = scmp.lt.s32.totalorder %s6392_s9, 3 }
   0x4   : > { %p115_p2 = pnand %p4354_p0, %p114_p1 }
   0x5   : > { %s4355_s7 = sshll.u32 (!%p115_p2), %s4350_s10, 5 }
   0x6   : > { %118 = sbr.rel (%p115_p2) target bundleno = 1203 (0x4b3), region = 28  ;;  %p138_p3 = scmp.lt.s32.totalorder (!%p115_p2), %s4355_s7, 63 }
   0xb   : > { %v6162_v0 = vld [vmem:[%s7635_s1 + $0x38] sm:$0xff]  ;;  %v6161_v4 = vld [vmem:[%s7635_s1 + $0x30] sm:$0xff]  ;;  %v6160_v8 = vld [vmem:[%s7635_s1 + $0x28] sm:$0xff]  ;;  %s7638_s7 = smov (!%p138_p3, %s4355_s7), 63 }
   0xc   : > { %v6170_v1 = vld [vmem:[%s7635_s1 + $0x78] sm:$0xff]  ;;  %2710 = vmatpush.bf16.msra.mxu0 %v6162_v0  ;;  %v6169_v5 = vld [vmem:[%s7635_s1 + $0x70] sm:$0xff]  ;;  %v6168_v9 = vld [vmem:[%s7635_s1 + $0x68] sm:$0xff]  ;;  %s5898_s5 = sshll.u32 %s7638_s7, 6  ;;  %s4359_s19 = sshll.u32 %s7638_s7, 2 }
   0xd   : > { %v6178_v2 = vld [vmem:[%s7635_s1 + $0xb8] sm:$0xff]  ;;  %2799 = vmatpush.bf16.msra.mxu1 %v6170_v1  ;;  %v6177_v6 = vld [vmem:[%s7635_s1 + $0xb0] sm:$0xff]  ;;  %v6176_v10 = vld [vmem:[%s7635_s1 + $0xa8] sm:$0xff]  ;;  %s6501_s15 = scalar_lea.vmem %s7634_s0, %s5898_s5  ;;  %s7536_s22 = scalar_lea.vmem %s7636_s2, %s4359_s19 }
   0xe   : > { %v6186_v3 = vld [vmem:[%s7635_s1 + $0xf8] sm:$0xff]  ;;  %2888 = vmatpush.bf16.msra.mxu2 %v6178_v2  ;;  %v6185_v7 = vld [vmem:[%s7635_s1 + $0xf0] sm:$0xff]  ;;  %v6184_v11 = vld [vmem:[%s7635_s1 + $0xe8] sm:$0xff] }
   0xf   : > { %2977 = vmatpush.bf16.msra.mxu3 %v6186_v3  ;;  %v6159_v12 = vld [vmem:[%s7635_s1 + $0x20] sm:$0xff]  ;;  %v6158_v16 = vld [vmem:[%s7635_s1 + $0x18] sm:$0xff]  ;;  %v6157_v20 = vld [vmem:[%s7635_s1 + $0x10] sm:$0xff] }
  0x10   : > { %2711 = vmatpush.bf16.msra.mxu0 %v6161_v4  ;;  %v6167_v13 = vld [vmem:[%s7635_s1 + $0x60] sm:$0xff]  ;;  %v6166_v17 = vld [vmem:[%s7635_s1 + $0x58] sm:$0xff]  ;;  %v6165_v21 = vld [vmem:[%s7635_s1 + $0x50] sm:$0xff] }
  0x11   : > { %2800 = vmatpush.bf16.msra.mxu1 %v6169_v5  ;;  %v6175_v14 = vld [vmem:[%s7635_s1 + $0xa0] sm:$0xff]  ;;  %v6174_v18 = vld [vmem:[%s7635_s1 + $0x98] sm:$0xff]  ;;  %v6173_v22 = vld [vmem:[%s7635_s1 + $0x90] sm:$0xff] }
  0x12   : > { %2889 = vmatpush.bf16.msra.mxu2 %v6177_v6  ;;  %v6183_v15 = vld [vmem:[%s7635_s1 + $0xe0] sm:$0xff]  ;;  %v6182_v19 = vld [vmem:[%s7635_s1 + $0xd8] sm:$0xff]  ;;  %v6181_v23 = vld [vmem:[%s7635_s1 + $0xd0] sm:$0xff] }
  0x13   : > { %2978 = vmatpush.bf16.msra.mxu3 %v6185_v7  ;;  %v6156_v24 = vld [vmem:[%s7635_s1 + $0x8] sm:$0xff]  ;;  %v6155_v28 = vld [vmem:[%s7635_s1] sm:$0xff]  ;;  %v6210_v40 = vld [vmem:[%s7635_s1 + $0x1b8] sm:$0xff] }
  0x14   : > { %2712 = vmatpush.bf16.msra.mxu0 %v6160_v8  ;;  %v6164_v25 = vld [vmem:[%s7635_s1 + $0x48] sm:$0xff]  ;;  %v6163_v29 = vld [vmem:[%s7635_s1 + $0x40] sm:$0xff]  ;;  %v6194_v41 = vld [vmem:[%s7635_s1 + $0x138] sm:$0xff] }
  0x15   : > { %2801 = vmatpush.bf16.msra.mxu1 %v6168_v9  ;;  %v6172_v26 = vld [vmem:[%s7635_s1 + $0x88] sm:$0xff]  ;;  %v6171_v30 = vld [vmem:[%s7635_s1 + $0x80] sm:$0xff]  ;;  %v6218_v46 = vld [vmem:[%s7635_s1 + $0x1f8] sm:$0xff] }
  0x16   : > { %2890 = vmatpush.bf16.msra.mxu2 %v6176_v10  ;;  %v6180_v27 = vld [vmem:[%s7635_s1 + $0xc8] sm:$0xff]  ;;  %v6179_v31 = vld [vmem:[%s7635_s1 + $0xc0] sm:$0xff]  ;;  %v6202_v47 = vld [vmem:[%s7635_s1 + $0x178] sm:$0xff] }
  0x17   : > { %2979 = vmatpush.bf16.msra.mxu3 %v6184_v11  ;;  %v4362_v32 = vld [vmem:[%s6501_s15] sm:$0xf]  ;;  %v5899_v34 = vld [vmem:[%s6501_s15 + $0x4] sm:$0xf]  ;;  %v4370_v36 = vld [vmem:[%s6501_s15 + $0x8] sm:$0xf] }
  0x18   : > { %2713 = vmatpush.bf16.msra.mxu0 %v6159_v12  ;;  %v5907_v33 = vld [vmem:[%s6501_s15 + $0x3c] sm:$0xf0]  ;;  %v4364_v35 = vld [vmem:[%s6501_s15 + $0x40] sm:$0xf0]  ;;  %v5908_v37 = vld [vmem:[%s6501_s15 + $0x44] sm:$0xf0] }
  0x19   : > { %2802 = vmatpush.bf16.msra.mxu1 %v6167_v13  ;;  %v5900_v38 = vld [vmem:[%s6501_s15 + $0xc] sm:$0xf]  ;;  %v4363_v42 = vor.u32 %v5907_v33, %v4362_v32  ;;  %v4367_v43 = vor.u32 %v5899_v34, %v4364_v35  ;;  %v4371_v44 = vor.u32 %v5908_v37, %v4370_v36  ;;  %v6209_v48 = vld [vmem:[%s7635_s1 + $0x1b0] sm:$0xff]  ;;  %v4426_v52 = vld [vmem:[%s6501_s15 + $0x80] sm:$0xf] }
  0x1a   : > { %2891 = vmatpush.bf16.msra.mxu2 %v6175_v14  ;;  %v4372_v39 = vld [vmem:[%s6501_s15 + $0x48] sm:$0xf0]  ;;  %v6193_v49 = vld [vmem:[%s7635_s1 + $0x130] sm:$0xff]  ;;  %v5923_v53 = vld [vmem:[%s6501_s15 + $0xbc] sm:$0xf0] }
  0x1b   : > { %2980 = vmatpush.bf16.msra.mxu3 %v6183_v15  ;;  %v4375_v45 = vor.u32 %v5900_v38, %v4372_v39  ;;  %v6217_v50 = vld [vmem:[%s7635_s1 + $0x1f0] sm:$0xff]  ;;  %v5915_v54 = vld [vmem:[%s6501_s15 + $0x84] sm:$0xf]  ;;  %v4434_v56 = vld [vmem:[%s6501_s15 + $0x88] sm:$0xf]  ;;  %v4427_v60 = vor.u32 %v5923_v53, %v4426_v52 }
  0x1c   : > { %2714 = vmatpush.bf16.msra.mxu0 %v6158_v16  ;;  %v6201_v51 = vld [vmem:[%s7635_s1 + $0x170] sm:$0xff]  ;;  %v4428_v55 = vld [vmem:[%s6501_s15 + $0xc0] sm:$0xf0]  ;;  %v5924_v57 = vld [vmem:[%s6501_s15 + $0xc4] sm:$0xf0] }
  0x1d   : > { %2803 = vmatpush.bf16.msra.mxu1 %v6166_v17  ;;  %v5916_v58 = vld [vmem:[%s6501_s15 + $0x8c] sm:$0xf]  ;;  %v4431_v61 = vor.u32 %v5915_v54, %v4428_v55  ;;  %v4435_v62 = vor.u32 %v5924_v57, %v4434_v56  ;;  %v4490_v0 = vld [vmem:[%s6501_s15 + $0x100] sm:$0xf]  ;;  %v5931_v2 = vld [vmem:[%s6501_s15 + $0x104] sm:$0xf] }
  0x1e   : > { %2892 = vmatpush.bf16.msra.mxu2 %v6174_v18  ;;  %v4436_v59 = vld [vmem:[%s6501_s15 + $0xc8] sm:$0xf0]  ;;  %v5939_v1 = vld [vmem:[%s6501_s15 + $0x13c] sm:$0xf0]  ;;  %v4492_v3 = vld [vmem:[%s6501_s15 + $0x140] sm:$0xf0] }
  0x1f   : > { %2981 = vmatpush.bf16.msra.mxu3 %v6182_v19  ;;  %v4439_v63 = vor.u32 %v5916_v58, %v4436_v59  ;;  %v4498_v4 = vld [vmem:[%s6501_s15 + $0x108] sm:$0xf]  ;;  %v5932_v6 = vld [vmem:[%s6501_s15 + $0x10c] sm:$0xf]  ;;  %v4491_v8 = vor.u32 %v5939_v1, %v4490_v0  ;;  %v4495_v9 = vor.u32 %v5931_v2, %v4492_v3  ;;  %v4554_v16 = vld [vmem:[%s6501_s15 + $0x180] sm:$0xf] }
  0x20   : > { %2715 = vmatpush.bf16.msra.mxu0 %v6157_v20  ;;  %v5940_v5 = vld [vmem:[%s6501_s15 + $0x144] sm:$0xf0]  ;;  %v4500_v7 = vld [vmem:[%s6501_s15 + $0x148] sm:$0xf0]  ;;  %v5955_v17 = vld [vmem:[%s6501_s15 + $0x1bc] sm:$0xf0] }
  0x21   : > { %2804 = vmatpush.bf16.msra.mxu1 %v6165_v21  ;;  %v4499_v10 = vor.u32 %v5940_v5, %v4498_v4  ;;  %v4503_v11 = vor.u32 %v5932_v6, %v4500_v7  ;;  %v6208_v12 = vld [vmem:[%s7635_s1 + $0x1a8] sm:$0xff]  ;;  %v5947_v18 = vld [vmem:[%s6501_s15 + $0x184] sm:$0xf]  ;;  %v4746_v56 = vld [vmem:[%s6501_s15 + $0x300] sm:$0xf] }
  0x22   : > { %2893 = vmatpush.bf16.msra.mxu2 %v6173_v22  ;;  %v6192_v13 = vld [vmem:[%s7635_s1 + $0x128] sm:$0xff]  ;;  %v4556_v19 = vld [vmem:[%s6501_s15 + $0x1c0] sm:$0xf0]  ;;  %v6003_v57 = vld [vmem:[%s6501_s15 + $0x33c] sm:$0xf0] }
  0x23   : > { %2982 = vmatpush.bf16.msra.mxu3 %v6181_v23  ;;  %v6216_v14 = vld [vmem:[%s7635_s1 + $0x1e8] sm:$0xff]  ;;  %v5995_v58 = vld [vmem:[%s6501_s15 + $0x304] sm:$0xf]  ;;  %v4747_v0 = vor.u32 %v6003_v57, %v4746_v56  ;;  %v6206_v4 = vld [vmem:[%s7635_s1 + $0x198] sm:$0xff] }
  0x24   : > { %2716 = vmatpush.bf16.msra.mxu0 %v6156_v24  ;;  %v6200_v15 = vld [vmem:[%s7635_s1 + $0x168] sm:$0xff]  ;;  %v4555_v24 = vor.u32 %v5955_v17, %v4554_v16  ;;  %v4748_v59 = vld [vmem:[%s6501_s15 + $0x340] sm:$0xf0]  ;;  %v6190_v5 = vld [vmem:[%s7635_s1 + $0x118] sm:$0xff] }
  0x25   : > { %2805 = vmatpush.bf16.msra.mxu1 %v6164_v25  ;;  %v4562_v20 = vld [vmem:[%s6501_s15 + $0x188] sm:$0xf]  ;;  %v5948_v22 = vld [vmem:[%s6501_s15 + $0x18c] sm:$0xf]  ;;  %v4559_v25 = vor.u32 %v5947_v18, %v4556_v19  ;;  %v4751_v1 = vor.u32 %v5995_v58, %v4748_v59  ;;  %v6214_v6 = vld [vmem:[%s7635_s1 + $0x1d8] sm:$0xff] }
  0x26   : > { %2894 = vmatpush.bf16.msra.mxu2 %v6172_v26  ;;  %v5956_v21 = vld [vmem:[%s6501_s15 + $0x1c4] sm:$0xf0]  ;;  %v4564_v23 = vld [vmem:[%s6501_s15 + $0x1c8] sm:$0xf0]  ;;  %v6198_v7 = vld [vmem:[%s7635_s1 + $0x158] sm:$0xff] }
  0x27   : > { %2983 = vmatpush.bf16.msra.mxu3 %v6180_v27  ;;  %v4563_v26 = vor.u32 %v5956_v21, %v4562_v20  ;;  %v4567_v27 = vor.u32 %v5948_v22, %v4564_v23  ;;  %v4626_v32 = vld [vmem:[%s6501_s15 + $0x208] sm:$0xf]  ;;  %v5964_v34 = vld [vmem:[%s6501_s15 + $0x20c] sm:$0xf]  ;;  %v4874_v20 = vld [vmem:[%s6501_s15 + $0x400] sm:$0xf] }
  0x28   : > { %2717 = vmatpush.bf16.msra.mxu0 %v6155_v28  ;;  %v4618_v28 = vld [vmem:[%s6501_s15 + $0x200] sm:$0xf]  ;;  %v5972_v33 = vld [vmem:[%s6501_s15 + $0x244] sm:$0xf0]  ;;  %v4628_v35 = vld [vmem:[%s6501_s15 + $0x248] sm:$0xf0] }
  0x29   : > { %2806 = vmatpush.bf16.msra.mxu1 %v6163_v29  ;;  %v5971_v29 = vld [vmem:[%s6501_s15 + $0x23c] sm:$0xf0]  ;;  %v4627_v38 = vor.u32 %v5972_v33, %v4626_v32  ;;  %v4631_v39 = vor.u32 %v5964_v34, %v4628_v35  ;;  %v6027_v22 = vld [vmem:[%s6501_s15 + $0x404] sm:$0xf]  ;;  %v6205_v35 = vld [vmem:[%s7635_s1 + $0x190] sm:$0xff] }
  0x2a   : > { %2895 = vmatpush.bf16.msra.mxu2 %v6171_v30  ;;  %v5963_v30 = vld [vmem:[%s6501_s15 + $0x204] sm:$0xf]  ;;  %v4619_v36 = vor.u32 %v5971_v29, %v4618_v28  ;;  %v6035_v21 = vld [vmem:[%s6501_s15 + $0x43c] sm:$0xf0] }
  0x2b   : > { %2984 = vmatpush.bf16.msra.mxu3 %v6179_v31  ;;  %2718 = vmatmul.bf16.vlgmr.msra.gmra.mxu0 %v4363_v42  ;;  %v4620_v31 = vld [vmem:[%s6501_s15 + $0x240] sm:$0xf0]  ;;  %v4875_v28 = vor.u32 %v6035_v21, %v4874_v20 }
  0x2c   : > { %3066 = vmatpush.bf16.msrb.mxu0 %v6194_v41  ;;  %2807 = vmatmul.bf16.vlgmr.msra.gmra.mxu1 %v4367_v43  ;;  %v4623_v37 = vor.u32 %v5963_v30, %v4620_v31  ;;  %v6191_v41 = vld [vmem:[%s7635_s1 + $0x120] sm:$0xff] }
  0x2d   : > { %2896 = vmatmul.bf16.vlgmr.msra.gmra.mxu2 %v4371_v44  ;;  %3155 = vmatpush.bf16.msrb.mxu1 %v6202_v47  ;;  %v6215_v42 = vld [vmem:[%s7635_s1 + $0x1e0] sm:$0xff] }
  0x2e   : > { %3244 = vmatpush.bf16.msrb.mxu2 %v6210_v40  ;;  %2985 = vmatmul.bf16.vlgmr.msra.gmra.mxu3 %v4375_v45  ;;  %v6207_v40 = vld [vmem:[%s7635_s1 + $0x1a0] sm:$0xff] }
  0x2f   : > { %3333 = vmatpush.bf16.msrb.mxu3 %v6218_v46  ;;  %v6199_v43 = vld [vmem:[%s7635_s1 + $0x160] sm:$0xff] }
  0x30   : > { %3067 = vmatpush.bf16.msrb.mxu0 %v6193_v49  ;;  %v4682_v44 = vld [vmem:[%s6501_s15 + $0x280] sm:$0xf]  ;;  %v5979_v46 = vld [vmem:[%s6501_s15 + $0x284] sm:$0xf]  ;;  %v5988_v49 = vld [vmem:[%s6501_s15 + $0x2c4] sm:$0xf0] }
  0x31   : > { %3156 = vmatpush.bf16.msrb.mxu1 %v6201_v51  ;;  %v5987_v45 = vld [vmem:[%s6501_s15 + $0x2bc] sm:$0xf0]  ;;  %v4684_v47 = vld [vmem:[%s6501_s15 + $0x2c0] sm:$0xf0]  ;;  %v4692_v51 = vld [vmem:[%s6501_s15 + $0x2c8] sm:$0xf0] }
  0x32   : > { %3245 = vmatpush.bf16.msrb.mxu2 %v6209_v48  ;;  %v4690_v48 = vld [vmem:[%s6501_s15 + $0x288] sm:$0xf]  ;;  %v4683_v52 = vor.u32 %v5987_v45, %v4682_v44  ;;  %v4687_v53 = vor.u32 %v5979_v46, %v4684_v47  ;;  %v4876_v23 = vld [vmem:[%s6501_s15 + $0x440] sm:$0xf0]  ;;  %v6197_v45 = vld [vmem:[%s7635_s1 + $0x150] sm:$0xff] }
  0x33   : > { %3334 = vmatpush.bf16.msrb.mxu3 %v6217_v50  ;;  %v5980_v50 = vld [vmem:[%s6501_s15 + $0x28c] sm:$0xf]  ;;  %v4691_v54 = vor.u32 %v5988_v49, %v4690_v48  ;;  %v4879_v29 = vor.u32 %v6027_v22, %v4876_v23  ;;  %v4938_v46 = vld [vmem:[%s6501_s15 + $0x480] sm:$0xf]  ;;  %v6043_v48 = vld [vmem:[%s6501_s15 + $0x484] sm:$0xf] }
  0x34   : > { %3068 = vmatpush.bf16.msrb.mxu0 %v6192_v13  ;;  %v4695_v55 = vor.u32 %v5980_v50, %v4692_v51  ;;  %v6020_v13 = vld [vmem:[%s6501_s15 + $0x3c4] sm:$0xf0]  ;;  %v6051_v47 = vld [vmem:[%s6501_s15 + $0x4bc] sm:$0xf0]  ;;  %v4940_v49 = vld [vmem:[%s6501_s15 + $0x4c0] sm:$0xf0] }
  0x35   : > { %3157 = vmatpush.bf16.msrb.mxu1 %v6200_v15  ;;  %v4820_v15 = vld [vmem:[%s6501_s15 + $0x3c8] sm:$0xf0]  ;;  %v4946_v50 = vld [vmem:[%s6501_s15 + $0x488] sm:$0xf]  ;;  %v4939_v56 = vor.u32 %v6051_v47, %v4938_v46  ;;  %v4943_v57 = vor.u32 %v6043_v48, %v4940_v49 }
  0x36   : > { %3246 = vmatpush.bf16.msrb.mxu2 %v6208_v12  ;;  %v4818_v12 = vld [vmem:[%s6501_s15 + $0x388] sm:$0xf]  ;;  %v5076_v46 = vld [vmem:[%s6501_s15 + $0x5c8] sm:$0xf0] }
  0x37   : > { %3335 = vmatpush.bf16.msrb.mxu3 %v6216_v14  ;;  %v6012_v14 = vld [vmem:[%s6501_s15 + $0x38c] sm:$0xf]  ;;  %v4819_v18 = vor.u32 %v6020_v13, %v4818_v12  ;;  %v6052_v51 = vld [vmem:[%s6501_s15 + $0x4c4] sm:$0xf0] }
  0x38   : > { %3069 = vmatpush.bf16.msrb.mxu0 %v6191_v41  ;;  %v4823_v19 = vor.u32 %v6012_v14, %v4820_v15  ;;  %v5010_v12 = vld [vmem:[%s6501_s15 + $0x508] sm:$0xf]  ;;  %v6060_v14 = vld [vmem:[%s6501_s15 + $0x50c] sm:$0xf] }
  0x39   : > { %3158 = vmatpush.bf16.msrb.mxu1 %v6199_v43  ;;  %v6068_v13 = vld [vmem:[%s6501_s15 + $0x544] sm:$0xf0]  ;;  %v5012_v15 = vld [vmem:[%s6501_s15 + $0x548] sm:$0xf0] }
  0x3a   : > { %3247 = vmatpush.bf16.msrb.mxu2 %v6207_v40  ;;  %v5011_v23 = vor.u32 %v6068_v13, %v5010_v12 }
  0x3b   : > { %2723 = vmatmul.bf16.gmra.mxu0 %v4427_v60  ;;  %3336 = vmatpush.bf16.msrb.mxu3 %v6215_v42  ;;  %v4754_v60 = vld [vmem:[%s6501_s15 + $0x308] sm:$0xf] }
  0x3c   : > { %2812 = vmatmul.bf16.gmra.mxu1 %v4431_v61  ;;  %v6004_v61 = vld [vmem:[%s6501_s15 + $0x344] sm:$0xf0]  ;;  %3070 = vmatpush.bf16.msrb.mxu0 %v6190_v5 }
  0x3d   : > { %2901 = vmatmul.bf16.gmra.mxu2 %v4435_v62  ;;  %v5996_v62 = vld [vmem:[%s6501_s15 + $0x30c] sm:$0xf]  ;;  %v4755_v2 = vor.u32 %v6004_v61, %v4754_v60  ;;  %3159 = vmatpush.bf16.msrb.mxu1 %v6198_v7  ;;  %v4947_v61 = vor.u32 %v6052_v51, %v4946_v50 }
  0x3e   : > { %2990 = vmatmul.bf16.gmra.mxu3 %v4439_v63  ;;  %v4756_v63 = vld [vmem:[%s6501_s15 + $0x348] sm:$0xf0]  ;;  %3248 = vmatpush.bf16.msrb.mxu2 %v6206_v4 }
  0x3f   : > { %v4759_v3 = vor.u32 %v5996_v62, %v4756_v63  ;;  %3337 = vmatpush.bf16.msrb.mxu3 %v6214_v6 }
  0x41   : > { %3160 = vmatpush.bf16.msrb.mxu1 %v6197_v45  ;;  %v6076_v45 = vld [vmem:[%s6501_s15 + $0x58c] sm:$0xf] }
  0x42   : > { %3249 = vmatpush.bf16.msrb.mxu2 %v6205_v35 }
  0x4b   : > { %2728 = vmatmul.bf16.gmra.mxu0 %v4491_v8  ;;  %v4810_v8 = vld [vmem:[%s6501_s15 + $0x380] sm:$0xf] }
  0x4c   : > { %2817 = vmatmul.bf16.gmra.mxu1 %v4495_v9  ;;  %v6019_v9 = vld [vmem:[%s6501_s15 + $0x3bc] sm:$0xf0] }
  0x4d   : > { %2906 = vmatmul.bf16.gmra.mxu2 %v4499_v10  ;;  %v6011_v10 = vld [vmem:[%s6501_s15 + $0x384] sm:$0xf]  ;;  %v4811_v16 = vor.u32 %v6019_v9, %v4810_v8  ;;  %v5002_v8 = vld [vmem:[%s6501_s15 + $0x500] sm:$0xf] }
  0x4e   : > { %2995 = vmatmul.bf16.gmra.mxu3 %v4503_v11  ;;  %v4812_v11 = vld [vmem:[%s6501_s15 + $0x3c0] sm:$0xf0]  ;;  %v6067_v9 = vld [vmem:[%s6501_s15 + $0x53c] sm:$0xf0] }
  0x4f   : > { %v4815_v17 = vor.u32 %v6011_v10, %v4812_v11  ;;  %v6059_v10 = vld [vmem:[%s6501_s15 + $0x504] sm:$0xf] }
  0x50   : > { %v5004_v11 = vld [vmem:[%s6501_s15 + $0x540] sm:$0xf0] }
  0x5b   : > { %2733 = vmatmul.bf16.gmra.mxu0 %v4555_v24  ;;  %v4882_v24 = vld [vmem:[%s6501_s15 + $0x408] sm:$0xf] }
  0x5c   : > { %2822 = vmatmul.bf16.gmra.mxu1 %v4559_v25  ;;  %v6036_v25 = vld [vmem:[%s6501_s15 + $0x444] sm:$0xf0] }
  0x5d   : > { %2911 = vmatmul.bf16.gmra.mxu2 %v4563_v26  ;;  %v6028_v26 = vld [vmem:[%s6501_s15 + $0x40c] sm:$0xf]  ;;  %v4883_v32 = vor.u32 %v6036_v25, %v4882_v24  ;;  %v5015_v24 = vor.u32 %v6060_v14, %v5012_v15 }
  0x5e   : > { %3000 = vmatmul.bf16.gmra.mxu3 %v4567_v27  ;;  %v4884_v27 = vld [vmem:[%s6501_s15 + $0x448] sm:$0xf0] }
  0x5f   : > { %v4887_v33 = vor.u32 %v6028_v26, %v4884_v27  ;;  %v6204_v27 = vld [vmem:[%s7635_s1 + $0x188] sm:$0xff] }
  0x60   : > { %3250 = vmatpush.bf16.msrb.mxu2 %v6204_v27 }
  0x6b   : > { %2738 = vmatmul.bf16.gmra.mxu0 %v4619_v36  ;;  %v6189_v36 = vld [vmem:[%s7635_s1 + $0x110] sm:$0xff] }
  0x6c   : > { %2827 = vmatmul.bf16.gmra.mxu1 %v4623_v37  ;;  %v6213_v37 = vld [vmem:[%s7635_s1 + $0x1d0] sm:$0xff]  ;;  %3071 = vmatpush.bf16.msrb.mxu0 %v6189_v36 }
  0x6d   : > { %2916 = vmatmul.bf16.gmra.mxu2 %v4627_v38  ;;  %3338 = vmatpush.bf16.msrb.mxu3 %v6213_v37  ;;  %v6196_v37 = vld [vmem:[%s7635_s1 + $0x148] sm:$0xff] }
  0x6e   : > { %3005 = vmatmul.bf16.gmra.mxu3 %v4631_v39  ;;  %3161 = vmatpush.bf16.msrb.mxu1 %v6196_v37  ;;  %v6107_v37 = vld [vmem:[%s6501_s15 + $0x684] sm:$0xf] }
  0x7b   : > { %2743 = vmatmul.bf16.gmra.mxu0 %v4683_v52  ;;  %v6044_v52 = vld [vmem:[%s6501_s15 + $0x48c] sm:$0xf] }
  0x7c   : > { %2832 = vmatmul.bf16.gmra.mxu1 %v4687_v53  ;;  %v4948_v53 = vld [vmem:[%s6501_s15 + $0x4c8] sm:$0xf0] }
  0x7d   : > { %2921 = vmatmul.bf16.gmra.mxu2 %v4691_v54  ;;  %v4951_v62 = vor.u32 %v6044_v52, %v4948_v53 }
  0x7e   : > { %3010 = vmatmul.bf16.gmra.mxu3 %v4695_v55 }
  0x8b   : > { %2748 = vmatmul.bf16.gmra.mxu0 %v4747_v0 }
  0x8c   : > { %2837 = vmatmul.bf16.gmra.mxu1 %v4751_v1 }
  0x8d   : > { %2926 = vmatmul.bf16.gmra.mxu2 %v4755_v2 }
  0x8e   : > { %3015 = vmatmul.bf16.gmra.mxu3 %v4759_v3 }
  0x9b   : > { %2753 = vmatmul.bf16.gmra.mxu0 %v4811_v16 }
  0x9c   : > { %2842 = vmatmul.bf16.gmra.mxu1 %v4815_v17 }
  0x9d   : > { %2931 = vmatmul.bf16.gmra.mxu2 %v4819_v18  ;;  %v5003_v18 = vor.u32 %v6067_v9, %v5002_v8  ;;  %v6100_v8 = vld [vmem:[%s6501_s15 + $0x644] sm:$0xf0]  ;;  %v6092_v9 = vld [vmem:[%s6501_s15 + $0x60c] sm:$0xf] }
  0x9e   : > { %3020 = vmatmul.bf16.gmra.mxu3 %v4823_v19  ;;  %v5007_v19 = vor.u32 %v6059_v10, %v5004_v11  ;;  %v5140_v10 = vld [vmem:[%s6501_s15 + $0x648] sm:$0xf0] }
  0xa8   : > { %v2719_v30 = vpop.f32.mrf.mxu0 }
  0xa9   : > { %v2808_v31 = vpop.f32.mrf.mxu1 }
  0xaa   : > { %v2809_v34 = vadd.f32 %v2808_v31, %v2719_v30 }
  0xab   : > { %2758 = vmatmul.bf16.gmra.mxu0 %v4875_v28  ;;  %v6188_v28 = vld [vmem:[%s7635_s1 + $0x108] sm:$0xff] }
  0xac   : > { %2847 = vmatmul.bf16.gmra.mxu1 %v4879_v29  ;;  %v6212_v29 = vld [vmem:[%s7635_s1 + $0x1c8] sm:$0xff]  ;;  %3072 = vmatpush.bf16.msrb.mxu0 %v6188_v28 }
  0xad   : > { %2936 = vmatmul.bf16.gmra.mxu2 %v4883_v32  ;;  %3339 = vmatpush.bf16.msrb.mxu3 %v6212_v29 }
  0xae   : > { %3025 = vmatmul.bf16.gmra.mxu3 %v4887_v33 }
  0xb0   : > { %v2897_v38 = vpop.f32.mrf.mxu2  ;;  %v2721_v41 = vpop.f32.mrf.mxu0 }
  0xb1   : > { %v2986_v39 = vpop.f32.mrf.mxu3  ;;  %v2898_v40 = vadd.f32 %v2897_v38, %v2809_v34  ;;  %v2810_v42 = vpop.f32.mrf.mxu1  ;;  %v5066_v38 = vld [vmem:[%s6501_s15 + $0x580] sm:$0xf] }
  0xb2   : > { %v2811_v43 = vadd.f32 %v2810_v42, %v2721_v41  ;;  %v5068_v41 = vld [vmem:[%s6501_s15 + $0x5c0] sm:$0xf0]  ;;  %v5074_v42 = vld [vmem:[%s6501_s15 + $0x588] sm:$0xf] }
  0xb3   : > { %v6662_v44 = vadd.f32 %v2986_v39, %v2898_v40  ;;  %v6083_v39 = vld [vmem:[%s6501_s15 + $0x5bc] sm:$0xf0]  ;;  %v6075_v40 = vld [vmem:[%s6501_s15 + $0x584] sm:$0xf] }
  0xb4   : > { %v5067_v49 = vor.u32 %v6083_v39, %v5066_v38  ;;  %v5071_v50 = vor.u32 %v6075_v40, %v5068_v41  ;;  %v5196_v38 = vld [vmem:[%s6501_s15 + $0x6c0] sm:$0xf0]  ;;  %v5202_v39 = vld [vmem:[%s6501_s15 + $0x688] sm:$0xf]  ;;  %v6108_v41 = vld [vmem:[%s6501_s15 + $0x68c] sm:$0xf] }
  0xb5   : > { %v6116_v40 = vld [vmem:[%s6501_s15 + $0x6c4] sm:$0xf0] }
  0xb8   : > { %v2899_v54 = vpop.f32.mrf.mxu2  ;;  %v2724_v59 = vpop.f32.mrf.mxu0 }
  0xb9   : > { %v2988_v55 = vpop.f32.mrf.mxu3  ;;  %v2900_v58 = vadd.f32 %v2899_v54, %v2811_v43  ;;  %v2813_v60 = vpop.f32.mrf.mxu1  ;;  %v6084_v43 = vld [vmem:[%s6501_s15 + $0x5c4] sm:$0xf0] }
  0xba   : > { %v2814_v63 = vadd.f32 %v2813_v60, %v2724_v59  ;;  %v5075_v54 = vor.u32 %v6084_v43, %v5074_v42  ;;  %v5204_v42 = vld [vmem:[%s6501_s15 + $0x6c8] sm:$0xf0] }
  0xbb   : > { %v6675_v0 = vadd.f32 %v2988_v55, %v2900_v58  ;;  %2763 = vmatmul.bf16.gmra.mxu0 %v4939_v56  ;;  %v5079_v55 = vor.u32 %v6076_v45, %v5076_v46 }
  0xbc   : > { %2852 = vmatmul.bf16.gmra.mxu1 %v4943_v57 }
  0xbd   : > { %2941 = vmatmul.bf16.gmra.mxu2 %v4947_v61 }
  0xbe   : > { %3030 = vmatmul.bf16.gmra.mxu3 %v4951_v62 }
  0xc0   : > { %v2902_v1 = vpop.f32.mrf.mxu2  ;;  %v2726_v4 = vpop.f32.mrf.mxu0 }
  0xc1   : > { %v2991_v2 = vpop.f32.mrf.mxu3  ;;  %v2903_v3 = vadd.f32 %v2902_v1, %v2814_v63  ;;  %v2815_v5 = vpop.f32.mrf.mxu1 }
  0xc2   : > { %v2816_v6 = vadd.f32 %v2815_v5, %v2726_v4  ;;  %v6091_v4 = vld [vmem:[%s6501_s15 + $0x604] sm:$0xf] }
  0xc3   : > { %v6677_v7 = vadd.f32 %v2991_v2, %v2903_v3  ;;  %v5130_v2 = vld [vmem:[%s6501_s15 + $0x600] sm:$0xf]  ;;  %v5132_v5 = vld [vmem:[%s6501_s15 + $0x640] sm:$0xf0] }
  0xc4   : > { %v6099_v3 = vld [vmem:[%s6501_s15 + $0x63c] sm:$0xf0]  ;;  %v5135_v14 = vor.u32 %v6091_v4, %v5132_v5  ;;  %v5260_v4 = vld [vmem:[%s6501_s15 + $0x740] sm:$0xf0]  ;;  %v5266_v5 = vld [vmem:[%s6501_s15 + $0x708] sm:$0xf] }
  0xc5   : > { %v5131_v13 = vor.u32 %v6099_v3, %v5130_v2  ;;  %v6131_v2 = vld [vmem:[%s6501_s15 + $0x73c] sm:$0xf0]  ;;  %v6123_v3 = vld [vmem:[%s6501_s15 + $0x704] sm:$0xf] }
  0xc8   : > { %v2904_v16 = vpop.f32.mrf.mxu2  ;;  %v2729_v21 = vpop.f32.mrf.mxu0 }
  0xc9   : > { %v2993_v17 = vpop.f32.mrf.mxu3  ;;  %v2905_v20 = vadd.f32 %v2904_v16, %v2816_v6  ;;  %v2818_v22 = vpop.f32.mrf.mxu1  ;;  %v5138_v6 = vld [vmem:[%s6501_s15 + $0x608] sm:$0xf] }
  0xca   : > { %v2819_v25 = vadd.f32 %v2818_v22, %v2729_v21  ;;  %v6203_v22 = vld [vmem:[%s7635_s1 + $0x180] sm:$0xff] }
  0xcb   : > { %v6687_v26 = vadd.f32 %v2993_v17, %v2905_v20  ;;  %2768 = vmatmul.bf16.gmra.mxu0 %v5003_v18  ;;  %v5139_v18 = vor.u32 %v6100_v8, %v5138_v6  ;;  %3251 = vmatpush.bf16.msrb.mxu2 %v6203_v22  ;;  %v6132_v6 = vld [vmem:[%s6501_s15 + $0x744] sm:$0xf0]  ;;  %v6124_v8 = vld [vmem:[%s6501_s15 + $0x70c] sm:$0xf]  ;;  %v6242_v22 = vld [vmem:[%s7635_s1 + $0x2b8] sm:$0xff] }
  0xcc   : > { %2857 = vmatmul.bf16.gmra.mxu1 %v5007_v19  ;;  %v5143_v19 = vor.u32 %v6092_v9, %v5140_v10  ;;  %v5268_v9 = vld [vmem:[%s6501_s15 + $0x748] sm:$0xf0] }
  0xcd   : > { %2946 = vmatmul.bf16.gmra.mxu2 %v5011_v23  ;;  %v6187_v23 = vld [vmem:[%s7635_s1 + $0x100] sm:$0xff] }
  0xce   : > { %3035 = vmatmul.bf16.gmra.mxu3 %v5015_v24  ;;  %v6211_v24 = vld [vmem:[%s7635_s1 + $0x1c0] sm:$0xff]  ;;  %3073 = vmatpush.bf16.msrb.mxu0 %v6187_v23  ;;  %v6226_v23 = vld [vmem:[%s7635_s1 + $0x238] sm:$0xff] }
  0xcf   : > { %3340 = vmatpush.bf16.msrb.mxu3 %v6211_v24  ;;  %v6250_v24 = vld [vmem:[%s7635_s1 + $0x2f8] sm:$0xff]  ;;  %3600 = vmatpush.bf16.msra.mxu2 %v6242_v22 }
  0xd0   : > { %v2907_v30 = vpop.f32.mrf.mxu2  ;;  %v2731_v33 = vpop.f32.mrf.mxu0 }
  0xd1   : > { %v2996_v31 = vpop.f32.mrf.mxu3  ;;  %v2908_v32 = vadd.f32 %v2907_v30, %v2819_v25  ;;  %v2820_v34 = vpop.f32.mrf.mxu1 }
  0xd2   : > { %v2821_v35 = vadd.f32 %v2820_v34, %v2731_v33  ;;  %v6195_v33 = vld [vmem:[%s7635_s1 + $0x140] sm:$0xff]  ;;  %3422 = vmatpush.bf16.msra.mxu0 %v6226_v23 }
  0xd3   : > { %v6698_v36 = vadd.f32 %v2996_v31, %v2908_v32  ;;  %v5194_v34 = vld [vmem:[%s6501_s15 + $0x680] sm:$0xf]  ;;  %3162 = vmatpush.bf16.msrb.mxu1 %v6195_v33  ;;  %3689 = vmatpush.bf16.msra.mxu3 %v6250_v24 }
  0xd8   : > { %v2909_v47 = vpop.f32.mrf.mxu2  ;;  %v2734_v52 = vpop.f32.mrf.mxu0 }
  0xd9   : > { %v2998_v48 = vpop.f32.mrf.mxu3  ;;  %v2910_v51 = vadd.f32 %v2909_v47, %v2821_v35  ;;  %v2823_v53 = vpop.f32.mrf.mxu1  ;;  %v6115_v35 = vld [vmem:[%s6501_s15 + $0x6bc] sm:$0xf0]  ;;  %v5199_v47 = vor.u32 %v6107_v37, %v5196_v38  ;;  %v6139_v38 = vld [vmem:[%s6501_s15 + $0x784] sm:$0xf] }
  0xda   : > { %v2824_v56 = vadd.f32 %v2823_v53, %v2734_v52  ;;  %v5195_v46 = vor.u32 %v6115_v35, %v5194_v34  ;;  %v5207_v52 = vor.u32 %v6108_v41, %v5204_v42  ;;  %v6234_v34 = vld [vmem:[%s7635_s1 + $0x278] sm:$0xff]  ;;  %v5322_v35 = vld [vmem:[%s6501_s15 + $0x780] sm:$0xf]  ;;  %v6148_v41 = vld [vmem:[%s6501_s15 + $0x7c4] sm:$0xf0] }
  0xdb   : > { %v6711_v57 = vadd.f32 %v2998_v48, %v2910_v51  ;;  %2773 = vmatmul.bf16.gmra.mxu0 %v5067_v49  ;;  %v5203_v51 = vor.u32 %v6116_v40, %v5202_v39  ;;  %v6147_v37 = vld [vmem:[%s6501_s15 + $0x7bc] sm:$0xf0]  ;;  %v5324_v39 = vld [vmem:[%s6501_s15 + $0x7c0] sm:$0xf0]  ;;  %v5330_v40 = vld [vmem:[%s6501_s15 + $0x788] sm:$0xf]  ;;  %3511 = vmatpush.bf16.msra.mxu1 %v6234_v34 }
  0xdc   : > { %2862 = vmatmul.bf16.gmra.mxu1 %v5071_v50  ;;  %v6140_v42 = vld [vmem:[%s6501_s15 + $0x78c] sm:$0xf] }
  0xdd   : > { %2951 = vmatmul.bf16.gmra.mxu2 %v5075_v54 }
  0xde   : > { %3040 = vmatmul.bf16.gmra.mxu3 %v5079_v55 }
  0xe0   : > { %v2912_v58 = vpop.f32.mrf.mxu2  ;;  %v2736_v61 = vpop.f32.mrf.mxu0 }
  0xe1   : > { %v3001_v59 = vpop.f32.mrf.mxu3  ;;  %v2913_v60 = vadd.f32 %v2912_v58, %v2824_v56  ;;  %v2825_v62 = vpop.f32.mrf.mxu1 }
  0xe2   : > { %v2826_v63 = vadd.f32 %v2825_v62, %v2736_v61 }
  0xe3   : > { %v6713_v1 = vadd.f32 %v3001_v59, %v2913_v60 }
  0xe8   : > { %v2914_v11 = vpop.f32.mrf.mxu2  ;;  %v2739_v16 = vpop.f32.mrf.mxu0 }
  0xe9   : > { %v3003_v12 = vpop.f32.mrf.mxu3  ;;  %v2915_v15 = vadd.f32 %v2914_v11, %v2826_v63  ;;  %v2828_v17 = vpop.f32.mrf.mxu1  ;;  %v5258_v63 = vld [vmem:[%s6501_s15 + $0x700] sm:$0xf] }
  0xea   : > { %v2829_v20 = vadd.f32 %v2828_v17, %v2739_v16  ;;  %v5267_v17 = vor.u32 %v6132_v6, %v5266_v5  ;;  %v5909_v5 = vld [vmem:[%s6501_s15 + $0x4c] sm:$0xf0]  ;;  %v5901_v6 = vld [vmem:[%s6501_s15 + $0x14] sm:$0xf] }
  0xeb   : > { %v6723_v21 = vadd.f32 %v3003_v12, %v2915_v15  ;;  %2778 = vmatmul.bf16.gmra.mxu0 %v5131_v13  ;;  %v5259_v12 = vor.u32 %v6131_v2, %v5258_v63  ;;  %v5263_v13 = vor.u32 %v6123_v3, %v5260_v4  ;;  %v4378_v4 = vld [vmem:[%s6501_s15 + $0x10] sm:$0xf] }
  0xec   : > { %2867 = vmatmul.bf16.gmra.mxu1 %v5135_v14 }
  0xed   : > { %2956 = vmatmul.bf16.gmra.mxu2 %v5139_v18  ;;  %v5271_v18 = vor.u32 %v6124_v8, %v5268_v9  ;;  %v4380_v8 = vld [vmem:[%s6501_s15 + $0x50] sm:$0xf0]  ;;  %v4386_v9 = vld [vmem:[%s6501_s15 + $0x18] sm:$0xf] }
  0xee   : > { %3045 = vmatmul.bf16.gmra.mxu3 %v5143_v19 }
  0xf0   : > { %v2917_v25 = vpop.f32.mrf.mxu2  ;;  %v2741_v29 = vpop.f32.mrf.mxu0 }
  0xf1   : > { %v3006_v27 = vpop.f32.mrf.mxu3  ;;  %v2918_v28 = vadd.f32 %v2917_v25, %v2829_v20  ;;  %v2830_v30 = vpop.f32.mrf.mxu1 }
  0xf2   : > { %v2831_v31 = vadd.f32 %v2830_v30, %v2741_v29 }
  0xf3   : > { %v6734_v32 = vadd.f32 %v3006_v27, %v2918_v28 }
  0xf8   : > { %v2919_v43 = vpop.f32.mrf.mxu2  ;;  %v2744_v49 = vpop.f32.mrf.mxu0 }
  0xf9   : > { %v3008_v45 = vpop.f32.mrf.mxu3  ;;  %v2920_v48 = vadd.f32 %v2919_v43, %v2831_v31  ;;  %v2833_v50 = vpop.f32.mrf.mxu1  ;;  %v5332_v43 = vld [vmem:[%s6501_s15 + $0x7c8] sm:$0xf0] }
  0xfa   : > { %v2834_v53 = vadd.f32 %v2833_v50, %v2744_v49 }
  0xfb   : > { %v6747_v54 = vadd.f32 %v3008_v45, %v2920_v48  ;;  %2783 = vmatmul.bf16.gmra.mxu0 %v5195_v46  ;;  %v5327_v48 = vor.u32 %v6139_v38, %v5324_v39 }
  0xfc   : > { %2872 = vmatmul.bf16.gmra.mxu1 %v5199_v47  ;;  %v5323_v47 = vor.u32 %v6147_v37, %v5322_v35 }
  0xfd   : > { %2961 = vmatmul.bf16.gmra.mxu2 %v5203_v51 }
  0xfe   : > { %3050 = vmatmul.bf16.gmra.mxu3 %v5207_v52  ;;  %v5331_v52 = vor.u32 %v6148_v41, %v5330_v40  ;;  %v6233_v40 = vld [vmem:[%s7635_s1 + $0x270] sm:$0xff] }
  0xff   : > { %v4442_v41 = vld [vmem:[%s6501_s15 + $0x90] sm:$0xf]  ;;  %3512 = vmatpush.bf16.msra.mxu1 %v6233_v40  ;;  %v6224_v40 = vld [vmem:[%s7635_s1 + $0x228] sm:$0xff] }
 0x100   : > { %v2922_v55 = vpop.f32.mrf.mxu2  ;;  %v2746_v59 = vpop.f32.mrf.mxu0 }
 0x101   : > { %v3011_v56 = vpop.f32.mrf.mxu3  ;;  %v2923_v58 = vadd.f32 %v2922_v55, %v2834_v53  ;;  %v2835_v60 = vpop.f32.mrf.mxu1  ;;  %v5335_v53 = vor.u32 %v6140_v42, %v5332_v43  ;;  %v5925_v42 = vld [vmem:[%s6501_s15 + $0xcc] sm:$0xf0]  ;;  %v5917_v43 = vld [vmem:[%s6501_s15 + $0x94] sm:$0xf] }
 0x102   : > { %v2836_v61 = vadd.f32 %v2835_v60, %v2746_v59 }
 0x103   : > { %v6749_v62 = vadd.f32 %v3011_v56, %v2923_v58 }
 0x108   : > { %v2924_v10 = vpop.f32.mrf.mxu2  ;;  %v2749_v15 = vpop.f32.mrf.mxu0 }
 0x109   : > { %v3013_v11 = vpop.f32.mrf.mxu3  ;;  %v2925_v14 = vadd.f32 %v2924_v10, %v2836_v61  ;;  %v2838_v16 = vpop.f32.mrf.mxu1  ;;  %v5910_v10 = vld [vmem:[%s6501_s15 + $0x54] sm:$0xf0] }
 0x10a   : > { %v2839_v19 = vadd.f32 %v2838_v16, %v2749_v15  ;;  %v4379_v15 = vor.u32 %v5909_v5, %v4378_v4  ;;  %v4383_v16 = vor.u32 %v5901_v6, %v4380_v8  ;;  %v4387_v22 = vor.u32 %v5910_v10, %v4386_v9 }
 0x10b   : > { %v6759_v20 = vadd.f32 %v3013_v11, %v2925_v14  ;;  %2788 = vmatmul.bf16.gmra.mxu0 %v5259_v12  ;;  %v5902_v11 = vld [vmem:[%s6501_s15 + $0x1c] sm:$0xf] }
 0x10c   : > { %2877 = vmatmul.bf16.gmra.mxu1 %v5263_v13  ;;  %v4388_v12 = vld [vmem:[%s6501_s15 + $0x58] sm:$0xf0] }
 0x10d   : > { %2966 = vmatmul.bf16.gmra.mxu2 %v5267_v17  ;;  %v4391_v23 = vor.u32 %v5902_v11, %v4388_v12  ;;  %v4506_v12 = vld [vmem:[%s6501_s15 + $0x110] sm:$0xf] }
 0x10e   : > { %3055 = vmatmul.bf16.gmra.mxu3 %v5271_v18 }
 0x110   : > { %v2927_v25 = vpop.f32.mrf.mxu2  ;;  %v2751_v29 = vpop.f32.mrf.mxu0 }
 0x111   : > { %v3016_v27 = vpop.f32.mrf.mxu3  ;;  %v2928_v28 = vadd.f32 %v2927_v25, %v2839_v19  ;;  %v2840_v30 = vpop.f32.mrf.mxu1 }
 0x112   : > { %v2841_v31 = vadd.f32 %v2840_v30, %v2751_v29  ;;  %v6249_v29 = vld [vmem:[%s7635_s1 + $0x2f0] sm:$0xff] }
 0x113   : > { %v6770_v33 = vadd.f32 %v3016_v27, %v2928_v28  ;;  %v6241_v27 = vld [vmem:[%s7635_s1 + $0x2b0] sm:$0xff]  ;;  %3690 = vmatpush.bf16.msra.mxu3 %v6249_v29 }
 0x114   : > { %v6225_v28 = vld [vmem:[%s7635_s1 + $0x230] sm:$0xff]  ;;  %3601 = vmatpush.bf16.msra.mxu2 %v6241_v27 }
 0x115   : > { %3423 = vmatpush.bf16.msra.mxu0 %v6225_v28 }
 0x118   : > { %v2929_v45 = vpop.f32.mrf.mxu2  ;;  %v2754_v50 = vpop.f32.mrf.mxu0 }
 0x119   : > { %v3018_v46 = vpop.f32.mrf.mxu3  ;;  %v2930_v49 = vadd.f32 %v2929_v45, %v2841_v31  ;;  %v2843_v51 = vpop.f32.mrf.mxu1  ;;  %v4444_v45 = vld [vmem:[%s6501_s15 + $0xd0] sm:$0xf0]  ;;  %3424 = vmatpush.bf16.msra.mxu0 %v6224_v40 }
 0x11a   : > { %v2844_v55 = vadd.f32 %v2843_v51, %v2754_v50 }
 0x11b   : > { %v6783_v56 = vadd.f32 %v3018_v46, %v2930_v49  ;;  %2793 = vmatmul.bf16.gmra.mxu0 %v5323_v47  ;;  %v4450_v46 = vld [vmem:[%s6501_s15 + $0x98] sm:$0xf]  ;;  %v4452_v49 = vld [vmem:[%s6501_s15 + $0xd8] sm:$0xf0] }
 0x11c   : > { %2882 = vmatmul.bf16.gmra.mxu1 %v5327_v48  ;;  %v5926_v47 = vld [vmem:[%s6501_s15 + $0xd4] sm:$0xf0]  ;;  %v5918_v48 = vld [vmem:[%s6501_s15 + $0x9c] sm:$0xf] }
 0x11d   : > { %2971 = vmatmul.bf16.gmra.mxu2 %v5331_v52  ;;  %v4443_v52 = vor.u32 %v5925_v42, %v4442_v41  ;;  %v6248_v41 = vld [vmem:[%s7635_s1 + $0x2e8] sm:$0xff] }
 0x11e   : > { %3060 = vmatmul.bf16.gmra.mxu3 %v5335_v53  ;;  %v4447_v53 = vor.u32 %v5917_v43, %v4444_v45 }
 0x11f   : > { %3691 = vmatpush.bf16.msra.mxu3 %v6248_v41 }
 0x120   : > { %v2932_v58 = vpop.f32.mrf.mxu2  ;;  %v2756_v61 = vpop.f32.mrf.mxu0 }
 0x121   : > { %v3021_v59 = vpop.f32.mrf.mxu3  ;;  %v2933_v60 = vadd.f32 %v2932_v58, %v2844_v55  ;;  %v2845_v63 = vpop.f32.mrf.mxu1 }
 0x122   : > { %v2846_v2 = vadd.f32 %v2845_v63, %v2756_v61  ;;  %v4455_v61 = vor.u32 %v5918_v48, %v4452_v49 }
 0x123   : > { %v6785_v3 = vadd.f32 %v3021_v59, %v2933_v60  ;;  %v4451_v60 = vor.u32 %v5926_v47, %v4450_v46 }
 0x128   : > { %v2934_v13 = vpop.f32.mrf.mxu2  ;;  %v2759_v18 = vpop.f32.mrf.mxu0 }
 0x129   : > { %v3023_v14 = vpop.f32.mrf.mxu3  ;;  %v2935_v17 = vadd.f32 %v2934_v13, %v2846_v2  ;;  %v2848_v19 = vpop.f32.mrf.mxu1  ;;  %v5941_v13 = vld [vmem:[%s6501_s15 + $0x14c] sm:$0xf0] }
 0x12a   : > { %v2849_v24 = vadd.f32 %v2848_v19, %v2759_v18  ;;  %v5934_v18 = vld [vmem:[%s6501_s15 + $0x11c] sm:$0xf] }
 0x12b   : > { %v6795_v25 = vadd.f32 %v3023_v14, %v2935_v17  ;;  %3074 = vmatmul.bf16.vlgmr.msrb.gmra.mxu0 %v4379_v15  ;;  %v5933_v14 = vld [vmem:[%s6501_s15 + $0x114] sm:$0xf]  ;;  %v5942_v17 = vld [vmem:[%s6501_s15 + $0x154] sm:$0xf0]  ;;  %v4516_v19 = vld [vmem:[%s6501_s15 + $0x158] sm:$0xf0] }
 0x12c   : > { %3163 = vmatmul.bf16.vlgmr.msrb.gmra.mxu1 %v4383_v16  ;;  %v4508_v15 = vld [vmem:[%s6501_s15 + $0x150] sm:$0xf0]  ;;  %v4514_v16 = vld [vmem:[%s6501_s15 + $0x118] sm:$0xf] }
 0x12d   : > { %3252 = vmatmul.bf16.vlgmr.msrb.gmra.mxu2 %v4387_v22  ;;  %v4511_v27 = vor.u32 %v5933_v14, %v4508_v15 }
 0x12e   : > { %3341 = vmatmul.bf16.vlgmr.msrb.gmra.mxu3 %v4391_v23 }
 0x130   : > { %v2937_v30 = vpop.f32.mrf.mxu2  ;;  %v2761_v35 = vpop.f32.mrf.mxu0 }
 0x131   : > { %v3026_v31 = vpop.f32.mrf.mxu3  ;;  %v2938_v34 = vadd.f32 %v2937_v30, %v2849_v24  ;;  %v2850_v37 = vpop.f32.mrf.mxu1  ;;  %v4507_v24 = vor.u32 %v5941_v13, %v4506_v12 }
 0x132   : > { %v2851_v38 = vadd.f32 %v2850_v37, %v2761_v35 }
 0x133   : > { %v6806_v39 = vadd.f32 %v3026_v31, %v2938_v34  ;;  %v4515_v31 = vor.u32 %v5942_v17, %v4514_v16  ;;  %v4519_v34 = vor.u32 %v5934_v18, %v4516_v19 }
 0x138   : > { %v2939_v50 = vpop.f32.mrf.mxu2  ;;  %v2764_v58 = vpop.f32.mrf.mxu0 }
 0x139   : > { %v3028_v51 = vpop.f32.mrf.mxu3  ;;  %v2940_v55 = vadd.f32 %v2939_v50, %v2851_v38  ;;  %v2853_v59 = vpop.f32.mrf.mxu1  ;;  %v6240_v38 = vld [vmem:[%s7635_s1 + $0x2a8] sm:$0xff] }
 0x13a   : > { %v2854_v63 = vadd.f32 %v2853_v59, %v2764_v58  ;;  %3602 = vmatpush.bf16.msra.mxu2 %v6240_v38  ;;  %v6232_v50 = vld [vmem:[%s7635_s1 + $0x268] sm:$0xff]  ;;  %v4578_v58 = vld [vmem:[%s6501_s15 + $0x198] sm:$0xf]  ;;  %v4644_v38 = vld [vmem:[%s6501_s15 + $0x258] sm:$0xf0] }
 0x13b   : > { %v6819_v2 = vadd.f32 %v3028_v51, %v2940_v55  ;;  %3079 = vmatmul.bf16.gmra.mxu0 %v4443_v52  ;;  %v4570_v51 = vld [vmem:[%s6501_s15 + $0x190] sm:$0xf]  ;;  %v4572_v55 = vld [vmem:[%s6501_s15 + $0x1d0] sm:$0xf0]  ;;  %3513 = vmatpush.bf16.msra.mxu1 %v6232_v50  ;;  %v5958_v59 = vld [vmem:[%s6501_s15 + $0x1d4] sm:$0xf0] }
 0x13c   : > { %3168 = vmatmul.bf16.gmra.mxu1 %v4447_v53  ;;  %v5957_v52 = vld [vmem:[%s6501_s15 + $0x1cc] sm:$0xf0]  ;;  %v5949_v53 = vld [vmem:[%s6501_s15 + $0x194] sm:$0xf]  ;;  %v4579_v12 = vor.u32 %v5958_v59, %v4578_v58  ;;  %v6247_v58 = vld [vmem:[%s7635_s1 + $0x2e0] sm:$0xff] }
 0x13d   : > { %3257 = vmatmul.bf16.gmra.mxu2 %v4451_v60  ;;  %v5950_v60 = vld [vmem:[%s6501_s15 + $0x19c] sm:$0xf]  ;;  %3692 = vmatpush.bf16.msra.mxu3 %v6247_v58  ;;  %v6006_v58 = vld [vmem:[%s6501_s15 + $0x354] sm:$0xf0] }
 0x13e   : > { %3346 = vmatmul.bf16.gmra.mxu3 %v4455_v61  ;;  %v4580_v61 = vld [vmem:[%s6501_s15 + $0x1d8] sm:$0xf0] }
 0x13f   : > { %v4583_v13 = vor.u32 %v5950_v60, %v4580_v61 }
 0x140   : > { %v2942_v4 = vpop.f32.mrf.mxu2  ;;  %v2766_v8 = vpop.f32.mrf.mxu0 }
 0x141   : > { %v3031_v5 = vpop.f32.mrf.mxu3  ;;  %v2943_v6 = vadd.f32 %v2942_v4, %v2854_v63  ;;  %v2855_v9 = vpop.f32.mrf.mxu1 }
 0x142   : > { %v2856_v10 = vadd.f32 %v2855_v9, %v2766_v8 }
 0x143   : > { %v6821_v11 = vadd.f32 %v3031_v5, %v2943_v6  ;;  %v4571_v5 = vor.u32 %v5957_v52, %v4570_v51  ;;  %v4575_v6 = vor.u32 %v5949_v53, %v4572_v55  ;;  %v6239_v53 = vld [vmem:[%s7635_s1 + $0x2a0] sm:$0xff] }
 0x144   : > { %v6223_v55 = vld [vmem:[%s7635_s1 + $0x220] sm:$0xff]  ;;  %3603 = vmatpush.bf16.msra.mxu2 %v6239_v53  ;;  %v4764_v53 = vld [vmem:[%s6501_s15 + $0x350] sm:$0xf0] }
 0x145   : > { %3425 = vmatpush.bf16.msra.mxu0 %v6223_v55  ;;  %v4770_v55 = vld [vmem:[%s6501_s15 + $0x318] sm:$0xf] }
 0x148   : > { %v2944_v22 = vpop.f32.mrf.mxu2  ;;  %v2769_v29 = vpop.f32.mrf.mxu0 }
 0x149   : > { %v3033_v23 = vpop.f32.mrf.mxu3  ;;  %v2945_v28 = vadd.f32 %v2944_v22, %v2856_v10  ;;  %v2858_v30 = vpop.f32.mrf.mxu1 }
 0x14a   : > { %v2859_v35 = vadd.f32 %v2858_v30, %v2769_v29  ;;  %v5965_v29 = vld [vmem:[%s6501_s15 + $0x214] sm:$0xf] }
 0x14b   : > { %v6831_v37 = vadd.f32 %v3033_v23, %v2945_v28  ;;  %3084 = vmatmul.bf16.gmra.mxu0 %v4507_v24  ;;  %v5973_v28 = vld [vmem:[%s6501_s15 + $0x24c] sm:$0xf0]  ;;  %v4636_v30 = vld [vmem:[%s6501_s15 + $0x250] sm:$0xf0] }
 0x14c   : > { %3173 = vmatmul.bf16.gmra.mxu1 %v4511_v27  ;;  %v4634_v27 = vld [vmem:[%s6501_s15 + $0x210] sm:$0xf] }
 0x14d   : > { %3262 = vmatmul.bf16.gmra.mxu2 %v4515_v31  ;;  %v4642_v31 = vld [vmem:[%s6501_s15 + $0x218] sm:$0xf] }
 0x14e   : > { %3351 = vmatmul.bf16.gmra.mxu3 %v4519_v34  ;;  %v5974_v34 = vld [vmem:[%s6501_s15 + $0x254] sm:$0xf0] }
 0x150   : > { %v2947_v42 = vpop.f32.mrf.mxu2  ;;  %v2771_v46 = vpop.f32.mrf.mxu0 }
 0x151   : > { %v3036_v43 = vpop.f32.mrf.mxu3  ;;  %v2948_v45 = vadd.f32 %v2947_v42, %v2859_v35  ;;  %v2860_v47 = vpop.f32.mrf.mxu1  ;;  %v5966_v35 = vld [vmem:[%s6501_s15 + $0x21c] sm:$0xf]  ;;  %v4635_v42 = vor.u32 %v5973_v28, %v4634_v27 }
 0x152   : > { %v2861_v48 = vadd.f32 %v2860_v47, %v2771_v46  ;;  %v4647_v50 = vor.u32 %v5966_v35, %v4644_v38 }
 0x153   : > { %v6842_v49 = vadd.f32 %v3036_v43, %v2948_v45  ;;  %v4639_v43 = vor.u32 %v5965_v29, %v4636_v30 }
 0x158   : > { %v2949_v63 = vpop.f32.mrf.mxu2  ;;  %v2774_v9 = vpop.f32.mrf.mxu0 }
 0x159   : > { %v3038_v4 = vpop.f32.mrf.mxu3  ;;  %v2950_v8 = vadd.f32 %v2949_v63, %v2861_v48  ;;  %v2863_v10 = vpop.f32.mrf.mxu1  ;;  %v4643_v48 = vor.u32 %v5974_v34, %v4642_v31 }
 0x15a   : > { %v2864_v14 = vadd.f32 %v2863_v10, %v2774_v9  ;;  %v4698_v9 = vld [vmem:[%s6501_s15 + $0x290] sm:$0xf] }
 0x15b   : > { %v6855_v15 = vadd.f32 %v3038_v4, %v2950_v8  ;;  %3089 = vmatmul.bf16.gmra.mxu0 %v4571_v5  ;;  %v6231_v8 = vld [vmem:[%s7635_s1 + $0x260] sm:$0xff]  ;;  %v5989_v10 = vld [vmem:[%s6501_s15 + $0x2cc] sm:$0xf0] }
 0x15c   : > { %3178 = vmatmul.bf16.gmra.mxu1 %v4575_v6 }
 0x15d   : > { %3267 = vmatmul.bf16.gmra.mxu2 %v4579_v12  ;;  %v5981_v12 = vld [vmem:[%s6501_s15 + $0x294] sm:$0xf]  ;;  %3514 = vmatpush.bf16.msra.mxu1 %v6231_v8 }
 0x15e   : > { %3356 = vmatmul.bf16.gmra.mxu3 %v4583_v13  ;;  %v4700_v13 = vld [vmem:[%s6501_s15 + $0x2d0] sm:$0xf0] }
 0x15f   : > { %v4703_v27 = vor.u32 %v5981_v12, %v4700_v13  ;;  %v4771_v12 = vor.u32 %v6006_v58, %v4770_v55 }
 0x160   : > { %v2952_v16 = vpop.f32.mrf.mxu2  ;;  %v2776_v19 = vpop.f32.mrf.mxu0 }
 0x161   : > { %v3041_v17 = vpop.f32.mrf.mxu3  ;;  %v2953_v18 = vadd.f32 %v2952_v16, %v2864_v14  ;;  %v2865_v22 = vpop.f32.mrf.mxu1  ;;  %v4706_v14 = vld [vmem:[%s6501_s15 + $0x298] sm:$0xf] }
 0x162   : > { %v2866_v23 = vadd.f32 %v2865_v22, %v2776_v19  ;;  %v5990_v16 = vld [vmem:[%s6501_s15 + $0x2d4] sm:$0xf0] }
 0x163   : > { %v6857_v24 = vadd.f32 %v3041_v17, %v2953_v18  ;;  %v5982_v17 = vld [vmem:[%s6501_s15 + $0x29c] sm:$0xf]  ;;  %v4707_v31 = vor.u32 %v5990_v16, %v4706_v14 }
 0x164   : > { %v4708_v18 = vld [vmem:[%s6501_s15 + $0x2d8] sm:$0xf0] }
 0x165   : > { %v4711_v34 = vor.u32 %v5982_v17, %v4708_v18  ;;  %v6238_v17 = vld [vmem:[%s7635_s1 + $0x298] sm:$0xff] }
 0x166   : > { %v6222_v18 = vld [vmem:[%s7635_s1 + $0x218] sm:$0xff]  ;;  %3604 = vmatpush.bf16.msra.mxu2 %v6238_v17 }
 0x167   : > { %3426 = vmatpush.bf16.msra.mxu0 %v6222_v18  ;;  %v4890_v18 = vld [vmem:[%s6501_s15 + $0x410] sm:$0xf] }
 0x168   : > { %v2954_v40 = vpop.f32.mrf.mxu2  ;;  %v2779_v46 = vpop.f32.mrf.mxu0 }
 0x169   : > { %v3043_v41 = vpop.f32.mrf.mxu3  ;;  %v2955_v45 = vadd.f32 %v2954_v40, %v2866_v23  ;;  %v2868_v47 = vpop.f32.mrf.mxu1  ;;  %v4699_v23 = vor.u32 %v5989_v10, %v4698_v9 }
 0x16a   : > { %v2869_v51 = vadd.f32 %v2868_v47, %v2779_v46 }
 0x16b   : > { %v6867_v52 = vadd.f32 %v3043_v41, %v2955_v45  ;;  %3094 = vmatmul.bf16.gmra.mxu0 %v4635_v42 }
 0x16c   : > { %3183 = vmatmul.bf16.gmra.mxu1 %v4639_v43 }
 0x16d   : > { %3272 = vmatmul.bf16.gmra.mxu2 %v4643_v48  ;;  %v4762_v48 = vld [vmem:[%s6501_s15 + $0x310] sm:$0xf] }
 0x16e   : > { %3361 = vmatmul.bf16.gmra.mxu3 %v4647_v50  ;;  %v6005_v50 = vld [vmem:[%s6501_s15 + $0x34c] sm:$0xf0] }
 0x170   : > { %v2957_v59 = vpop.f32.mrf.mxu2  ;;  %v2781_v63 = vpop.f32.mrf.mxu0 }
 0x171   : > { %v3046_v60 = vpop.f32.mrf.mxu3  ;;  %v2958_v61 = vadd.f32 %v2957_v59, %v2869_v51  ;;  %v2870_v4 = vpop.f32.mrf.mxu1  ;;  %v5997_v51 = vld [vmem:[%s6501_s15 + $0x314] sm:$0xf]  ;;  %v5998_v59 = vld [vmem:[%s6501_s15 + $0x31c] sm:$0xf] }
 0x172   : > { %v2871_v5 = vadd.f32 %v2870_v4, %v2781_v63  ;;  %v4763_v4 = vor.u32 %v6005_v50, %v4762_v48  ;;  %v4836_v48 = vld [vmem:[%s6501_s15 + $0x3d8] sm:$0xf0] }
 0x173   : > { %v6878_v6 = vadd.f32 %v3046_v60, %v2958_v61  ;;  %v4772_v60 = vld [vmem:[%s6501_s15 + $0x358] sm:$0xf0] }
 0x174   : > { %v4775_v13 = vor.u32 %v5998_v59, %v4772_v60 }
 0x178   : > { %v2959_v19 = vpop.f32.mrf.mxu2  ;;  %v2784_v29 = vpop.f32.mrf.mxu0 }
 0x179   : > { %v3048_v22 = vpop.f32.mrf.mxu3  ;;  %v2960_v28 = vadd.f32 %v2959_v19, %v2871_v5  ;;  %v2873_v30 = vpop.f32.mrf.mxu1  ;;  %v4767_v5 = vor.u32 %v5997_v51, %v4764_v53  ;;  %v6246_v19 = vld [vmem:[%s7635_s1 + $0x2d8] sm:$0xff] }
 0x17a   : > { %v2874_v35 = vadd.f32 %v2873_v30, %v2784_v29  ;;  %3693 = vmatpush.bf16.msra.mxu3 %v6246_v19  ;;  %v6037_v19 = vld [vmem:[%s6501_s15 + $0x44c] sm:$0xf0] }
 0x17b   : > { %v6891_v38 = vadd.f32 %v3048_v22, %v2960_v28  ;;  %3099 = vmatmul.bf16.gmra.mxu0 %v4699_v23 }
 0x17c   : > { %3188 = vmatmul.bf16.gmra.mxu1 %v4703_v27 }
 0x17d   : > { %3277 = vmatmul.bf16.gmra.mxu2 %v4707_v31 }
 0x17e   : > { %3366 = vmatmul.bf16.gmra.mxu3 %v4711_v34  ;;  %v6230_v34 = vld [vmem:[%s7635_s1 + $0x258] sm:$0xff] }
 0x17f   : > { %3515 = vmatpush.bf16.msra.mxu1 %v6230_v34 }
 0x180   : > { %v2962_v40 = vpop.f32.mrf.mxu2  ;;  %v2786_v43 = vpop.f32.mrf.mxu0 }
 0x181   : > { %v3051_v41 = vpop.f32.mrf.mxu3  ;;  %v2963_v42 = vadd.f32 %v2962_v40, %v2874_v35  ;;  %v2875_v45 = vpop.f32.mrf.mxu1  ;;  %v4826_v35 = vld [vmem:[%s6501_s15 + $0x390] sm:$0xf] }
 0x182   : > { %v2876_v46 = vadd.f32 %v2875_v45, %v2786_v43  ;;  %v6021_v40 = vld [vmem:[%s6501_s15 + $0x3cc] sm:$0xf0]  ;;  %v4834_v43 = vld [vmem:[%s6501_s15 + $0x398] sm:$0xf] }
 0x183   : > { %v6893_v47 = vadd.f32 %v3051_v41, %v2963_v42  ;;  %v6013_v41 = vld [vmem:[%s6501_s15 + $0x394] sm:$0xf]  ;;  %v6022_v45 = vld [vmem:[%s6501_s15 + $0x3d4] sm:$0xf0]  ;;  %v4827_v53 = vor.u32 %v6021_v40, %v4826_v35  ;;  %v4891_v40 = vor.u32 %v6037_v19, %v4890_v18 }
 0x184   : > { %v4828_v42 = vld [vmem:[%s6501_s15 + $0x3d0] sm:$0xf0] }
 0x185   : > { %v4831_v55 = vor.u32 %v6013_v41, %v4828_v42  ;;  %v6045_v18 = vld [vmem:[%s6501_s15 + $0x494] sm:$0xf] }
 0x186   : > { %v4956_v19 = vld [vmem:[%s6501_s15 + $0x4d0] sm:$0xf0] }
 0x188   : > { %v2964_v61 = vpop.f32.mrf.mxu2  ;;  %v2789_v9 = vpop.f32.mrf.mxu0 }
 0x189   : > { %v3053_v63 = vpop.f32.mrf.mxu3  ;;  %v2965_v8 = vadd.f32 %v2964_v61, %v2876_v46  ;;  %v2878_v10 = vpop.f32.mrf.mxu1  ;;  %v6014_v46 = vld [vmem:[%s6501_s15 + $0x39c] sm:$0xf]  ;;  %v4835_v61 = vor.u32 %v6022_v45, %v4834_v43 }
 0x18a   : > { %v2879_v14 = vadd.f32 %v2878_v10, %v2789_v9 }
 0x18b   : > { %v6903_v16 = vadd.f32 %v3053_v63, %v2965_v8  ;;  %3104 = vmatmul.bf16.gmra.mxu0 %v4763_v4  ;;  %v4839_v63 = vor.u32 %v6014_v46, %v4836_v48 }
 0x18c   : > { %3193 = vmatmul.bf16.gmra.mxu1 %v4767_v5 }
 0x18d   : > { %3282 = vmatmul.bf16.gmra.mxu2 %v4771_v12 }
 0x18e   : > { %3371 = vmatmul.bf16.gmra.mxu3 %v4775_v13 }
 0x190   : > { %v2967_v22 = vpop.f32.mrf.mxu2  ;;  %v2791_v28 = vpop.f32.mrf.mxu0 }
 0x191   : > { %v3056_v23 = vpop.f32.mrf.mxu3  ;;  %v2968_v27 = vadd.f32 %v2967_v22, %v2879_v14  ;;  %v2880_v29 = vpop.f32.mrf.mxu1  ;;  %v6029_v22 = vld [vmem:[%s6501_s15 + $0x414] sm:$0xf] }
 0x192   : > { %v2881_v30 = vadd.f32 %v2880_v29, %v2791_v28  ;;  %v6038_v28 = vld [vmem:[%s6501_s15 + $0x454] sm:$0xf0]  ;;  %v6030_v29 = vld [vmem:[%s6501_s15 + $0x41c] sm:$0xf] }
 0x193   : > { %v6914_v31 = vadd.f32 %v3056_v23, %v2968_v27  ;;  %v4892_v23 = vld [vmem:[%s6501_s15 + $0x450] sm:$0xf0]  ;;  %v4898_v27 = vld [vmem:[%s6501_s15 + $0x418] sm:$0xf] }
 0x194   : > { %v4895_v41 = vor.u32 %v6029_v22, %v4892_v23  ;;  %v4899_v46 = vor.u32 %v6038_v28, %v4898_v27  ;;  %v4962_v22 = vld [vmem:[%s6501_s15 + $0x498] sm:$0xf]  ;;  %v6046_v27 = vld [vmem:[%s6501_s15 + $0x49c] sm:$0xf] }
 0x195   : > { %v6054_v23 = vld [vmem:[%s6501_s15 + $0x4d4] sm:$0xf0]  ;;  %v4964_v28 = vld [vmem:[%s6501_s15 + $0x4d8] sm:$0xf0] }
 0x198   : > { %v2969_v50 = vpop.f32.mrf.mxu2  ;;  %v2794_v59 = vpop.f32.mrf.mxu0 }
 0x199   : > { %v3058_v51 = vpop.f32.mrf.mxu3  ;;  %v2970_v58 = vadd.f32 %v2969_v50, %v2881_v30  ;;  %v2883_v60 = vpop.f32.mrf.mxu1  ;;  %v4900_v30 = vld [vmem:[%s6501_s15 + $0x458] sm:$0xf0] }
 0x19a   : > { %v2884_v4 = vadd.f32 %v2883_v60, %v2794_v59  ;;  %v4903_v48 = vor.u32 %v6030_v29, %v4900_v30 }
 0x19b   : > { %v6927_v5 = vadd.f32 %v3058_v51, %v2970_v58  ;;  %3109 = vmatmul.bf16.gmra.mxu0 %v4827_v53  ;;  %v6221_v58 = vld [vmem:[%s7635_s1 + $0x210] sm:$0xff] }
 0x19c   : > { %3198 = vmatmul.bf16.gmra.mxu1 %v4831_v55  ;;  %v6237_v55 = vld [vmem:[%s7635_s1 + $0x290] sm:$0xff]  ;;  %3427 = vmatpush.bf16.msra.mxu0 %v6221_v58 }
 0x19d   : > { %3287 = vmatmul.bf16.gmra.mxu2 %v4835_v61 }
 0x19e   : > { %3376 = vmatmul.bf16.gmra.mxu3 %v4839_v63  ;;  %3605 = vmatpush.bf16.msra.mxu2 %v6237_v55 }
 0x1a0   : > { %v2972_v8 = vpop.f32.mrf.mxu2  ;;  %v2796_v12 = vpop.f32.mrf.mxu0 }
 0x1a1   : > { %v3061_v9 = vpop.f32.mrf.mxu3  ;;  %v2973_v10 = vadd.f32 %v2972_v8, %v2884_v4  ;;  %v2885_v13 = vpop.f32.mrf.mxu1 }
 0x1a2   : > { %v2886_v14 = vadd.f32 %v2885_v13, %v2796_v12  ;;  %v4954_v13 = vld [vmem:[%s6501_s15 + $0x490] sm:$0xf] }
 0x1a3   : > { %v6929_v17 = vadd.f32 %v3061_v9, %v2973_v10  ;;  %v6229_v10 = vld [vmem:[%s7635_s1 + $0x250] sm:$0xff] }
 0x1a4   : > { %3516 = vmatpush.bf16.msra.mxu1 %v6229_v10  ;;  %v5026_v10 = vld [vmem:[%s6501_s15 + $0x518] sm:$0xf] }
 0x1a8   : > { %v2974_v34 = vpop.f32.mrf.mxu2  ;;  %v3075_v43 = vpop.f32.mrf.mxu0 }
 0x1a9   : > { %v3063_v35 = vpop.f32.mrf.mxu3  ;;  %v2975_v42 = vadd.f32 %v2974_v34, %v2886_v14  ;;  %v3164_v45 = vpop.f32.mrf.mxu1  ;;  %v3076_v50 = vadd.f32 %v3075_v43, %v6662_v44  ;;  %v6245_v44 = vld [vmem:[%s7635_s1 + $0x2d0] sm:$0xff]  ;;  %v4967_v43 = vor.u32 %v6046_v27, %v4964_v28 }
 0x1aa   : > { %3694 = vmatpush.bf16.msra.mxu3 %v6245_v44  ;;  %v6053_v14 = vld [vmem:[%s6501_s15 + $0x4cc] sm:$0xf0] }
 0x1ab   : > { %v6940_v51 = vadd.f32 %v3063_v35, %v2975_v42  ;;  %v3165_v53 = vadd.f32 %v3164_v45, %v3076_v50  ;;  %3114 = vmatmul.bf16.gmra.mxu0 %v4891_v40  ;;  %v4955_v34 = vor.u32 %v6053_v14, %v4954_v13  ;;  %v4963_v42 = vor.u32 %v6054_v23, %v4962_v22  ;;  %v6062_v13 = vld [vmem:[%s6501_s15 + $0x51c] sm:$0xf] }
 0x1ac   : > { %3203 = vmatmul.bf16.gmra.mxu1 %v4895_v41  ;;  %v5028_v14 = vld [vmem:[%s6501_s15 + $0x558] sm:$0xf0] }
 0x1ad   : > { %3292 = vmatmul.bf16.gmra.mxu2 %v4899_v46 }
 0x1ae   : > { %3381 = vmatmul.bf16.gmra.mxu3 %v4903_v48 }
 0x1b0   : > { %v3253_v59 = vpop.f32.mrf.mxu2  ;;  %v3077_v63 = vpop.f32.mrf.mxu0 }
 0x1b1   : > { %v3342_v60 = vpop.f32.mrf.mxu3  ;;  %v3254_v61 = vadd.f32 %v3253_v59, %v3165_v53  ;;  %v3166_v4 = vpop.f32.mrf.mxu1  ;;  %v3078_v8 = vadd.f32 %v3077_v63, %v6675_v0  ;;  %v4959_v0 = vor.u32 %v6045_v18, %v4956_v19  ;;  %v6069_v63 = vld [vmem:[%s6501_s15 + $0x54c] sm:$0xf0] }
 0x1b3   : > { %v6952_v9 = vadd.f32 %v3342_v60, %v3254_v61  ;;  %v3167_v12 = vadd.f32 %v3166_v4, %v3078_v8  ;;  %v5018_v61 = vld [vmem:[%s6501_s15 + $0x510] sm:$0xf]  ;;  %v6061_v4 = vld [vmem:[%s6501_s15 + $0x514] sm:$0xf] }
 0x1b4   : > { %v5020_v8 = vld [vmem:[%s6501_s15 + $0x550] sm:$0xf0]  ;;  %v5019_v22 = vor.u32 %v6069_v63, %v5018_v61 }
 0x1b5   : > { %v5023_v23 = vor.u32 %v6061_v4, %v5020_v8  ;;  %v6077_v61 = vld [vmem:[%s6501_s15 + $0x594] sm:$0xf]  ;;  %v5090_v4 = vld [vmem:[%s6501_s15 + $0x598] sm:$0xf] }
 0x1b6   : > { %v5084_v63 = vld [vmem:[%s6501_s15 + $0x5d0] sm:$0xf0]  ;;  %v6086_v8 = vld [vmem:[%s6501_s15 + $0x5d4] sm:$0xf0] }
 0x1b8   : > { %v3255_v29 = vpop.f32.mrf.mxu2  ;;  %v3080_v40 = vpop.f32.mrf.mxu0 }
 0x1b9   : > { %v3344_v30 = vpop.f32.mrf.mxu3  ;;  %v3256_v35 = vadd.f32 %v3255_v29, %v3167_v12  ;;  %v3169_v41 = vpop.f32.mrf.mxu1  ;;  %v3081_v45 = vadd.f32 %v3080_v40, %v6677_v7  ;;  %v6070_v12 = vld [vmem:[%s6501_s15 + $0x554] sm:$0xf0]  ;;  %v6236_v40 = vld [vmem:[%s7635_s1 + $0x288] sm:$0xff] }
 0x1ba   : > { %3606 = vmatpush.bf16.msra.mxu2 %v6236_v40 }
 0x1bb   : > { %v6966_v46 = vadd.f32 %v3344_v30, %v3256_v35  ;;  %v3170_v48 = vadd.f32 %v3169_v41, %v3081_v45  ;;  %3119 = vmatmul.bf16.gmra.mxu0 %v4955_v34  ;;  %v5027_v30 = vor.u32 %v6070_v12, %v5026_v10  ;;  %v6220_v41 = vld [vmem:[%s7635_s1 + $0x208] sm:$0xff]  ;;  %v6078_v10 = vld [vmem:[%s6501_s15 + $0x59c] sm:$0xf] }
 0x1bc   : > { %3208 = vmatmul.bf16.gmra.mxu1 %v4959_v0  ;;  %3428 = vmatpush.bf16.msra.mxu0 %v6220_v41  ;;  %v5092_v12 = vld [vmem:[%s6501_s15 + $0x5d8] sm:$0xf0] }
 0x1bd   : > { %3297 = vmatmul.bf16.gmra.mxu2 %v4963_v42 }
 0x1be   : > { %3386 = vmatmul.bf16.gmra.mxu3 %v4967_v43 }
 0x1c0   : > { %v3258_v50 = vpop.f32.mrf.mxu2  ;;  %v3082_v58 = vpop.f32.mrf.mxu0 }
 0x1c1   : > { %v3347_v53 = vpop.f32.mrf.mxu3  ;;  %v3259_v55 = vadd.f32 %v3258_v50, %v3170_v48  ;;  %v3171_v44 = vpop.f32.mrf.mxu1  ;;  %v3083_v7 = vadd.f32 %v3082_v58, %v6687_v26  ;;  %v5031_v26 = vor.u32 %v6062_v13, %v5028_v14  ;;  %v6228_v58 = vld [vmem:[%s7635_s1 + $0x248] sm:$0xff] }
 0x1c2   : > { %3517 = vmatpush.bf16.msra.mxu1 %v6228_v58  ;;  %v5154_v58 = vld [vmem:[%s6501_s15 + $0x618] sm:$0xf] }
 0x1c3   : > { %v6969_v59 = vadd.f32 %v3347_v53, %v3259_v55  ;;  %v3172_v60 = vadd.f32 %v3171_v44, %v3083_v7  ;;  %v5082_v7 = vld [vmem:[%s6501_s15 + $0x590] sm:$0xf] }
 0x1c8   : > { %v3260_v18 = vpop.f32.mrf.mxu2  ;;  %v3085_v28 = vpop.f32.mrf.mxu0 }
 0x1c9   : > { %v3349_v19 = vpop.f32.mrf.mxu3  ;;  %v3261_v27 = vadd.f32 %v3260_v18, %v3172_v60  ;;  %v3174_v29 = vpop.f32.mrf.mxu1  ;;  %v3086_v34 = vadd.f32 %v3085_v28, %v6698_v36  ;;  %v6244_v36 = vld [vmem:[%s7635_s1 + $0x2c8] sm:$0xff]  ;;  %v6085_v60 = vld [vmem:[%s6501_s15 + $0x5cc] sm:$0xf0]  ;;  %v5095_v28 = vor.u32 %v6078_v10, %v5092_v12 }
 0x1ca   : > { %3695 = vmatpush.bf16.msra.mxu3 %v6244_v36  ;;  %v5083_v18 = vor.u32 %v6085_v60, %v5082_v7  ;;  %v6094_v7 = vld [vmem:[%s6501_s15 + $0x61c] sm:$0xf] }
 0x1cb   : > { %v6980_v0 = vadd.f32 %v3349_v19, %v3261_v27  ;;  %v3175_v35 = vadd.f32 %v3174_v29, %v3086_v34  ;;  %3124 = vmatmul.bf16.gmra.mxu0 %v5019_v22  ;;  %v5091_v27 = vor.u32 %v6086_v8, %v5090_v4  ;;  %v5156_v60 = vld [vmem:[%s6501_s15 + $0x658] sm:$0xf0] }
 0x1cc   : > { %3213 = vmatmul.bf16.gmra.mxu1 %v5023_v23 }
 0x1cd   : > { %3302 = vmatmul.bf16.gmra.mxu2 %v5027_v30 }
 0x1ce   : > { %3391 = vmatmul.bf16.gmra.mxu3 %v5031_v26 }
 0x1d0   : > { %v3263_v42 = vpop.f32.mrf.mxu2  ;;  %v3087_v48 = vpop.f32.mrf.mxu0 }
 0x1d1   : > { %v3352_v43 = vpop.f32.mrf.mxu3  ;;  %v3264_v45 = vadd.f32 %v3263_v42, %v3175_v35  ;;  %v3176_v50 = vpop.f32.mrf.mxu1  ;;  %v3088_v53 = vadd.f32 %v3087_v48, %v6711_v57  ;;  %v5087_v57 = vor.u32 %v6077_v61, %v5084_v63  ;;  %v6101_v48 = vld [vmem:[%s6501_s15 + $0x64c] sm:$0xf0] }
 0x1d3   : > { %v6992_v55 = vadd.f32 %v3352_v43, %v3264_v45  ;;  %v3177_v44 = vadd.f32 %v3176_v50, %v3088_v53  ;;  %v5146_v45 = vld [vmem:[%s6501_s15 + $0x610] sm:$0xf]  ;;  %v6093_v50 = vld [vmem:[%s6501_s15 + $0x614] sm:$0xf] }
 0x1d4   : > { %v5148_v53 = vld [vmem:[%s6501_s15 + $0x650] sm:$0xf0]  ;;  %v5147_v4 = vor.u32 %v6101_v48, %v5146_v45 }
 0x1d5   : > { %v5151_v8 = vor.u32 %v6093_v50, %v5148_v53  ;;  %v6109_v45 = vld [vmem:[%s6501_s15 + $0x694] sm:$0xf]  ;;  %v5218_v50 = vld [vmem:[%s6501_s15 + $0x698] sm:$0xf] }
 0x1d6   : > { %v5212_v48 = vld [vmem:[%s6501_s15 + $0x6d0] sm:$0xf0]  ;;  %v6118_v53 = vld [vmem:[%s6501_s15 + $0x6d4] sm:$0xf0] }
 0x1d8   : > { %v3265_v13 = vpop.f32.mrf.mxu2  ;;  %v3090_v22 = vpop.f32.mrf.mxu0 }
 0x1d9   : > { %v3354_v14 = vpop.f32.mrf.mxu3  ;;  %v3266_v19 = vadd.f32 %v3265_v13, %v3177_v44  ;;  %v3179_v23 = vpop.f32.mrf.mxu1  ;;  %v3091_v29 = vadd.f32 %v3090_v22, %v6713_v1  ;;  %v6102_v44 = vld [vmem:[%s6501_s15 + $0x654] sm:$0xf0]  ;;  %v6235_v22 = vld [vmem:[%s7635_s1 + $0x280] sm:$0xff] }
 0x1da   : > { %3607 = vmatpush.bf16.msra.mxu2 %v6235_v22 }
 0x1db   : > { %v7006_v30 = vadd.f32 %v3354_v14, %v3266_v19  ;;  %v3180_v26 = vadd.f32 %v3179_v23, %v3091_v29  ;;  %3129 = vmatmul.bf16.gmra.mxu0 %v5083_v18  ;;  %v5155_v14 = vor.u32 %v6102_v44, %v5154_v58  ;;  %v6219_v23 = vld [vmem:[%s7635_s1 + $0x200] sm:$0xff]  ;;  %v6110_v58 = vld [vmem:[%s6501_s15 + $0x69c] sm:$0xf] }
 0x1dc   : > { %3218 = vmatmul.bf16.gmra.mxu1 %v5087_v57  ;;  %3429 = vmatpush.bf16.msra.mxu0 %v6219_v23  ;;  %v5220_v44 = vld [vmem:[%s6501_s15 + $0x6d8] sm:$0xf0] }
 0x1dd   : > { %3307 = vmatmul.bf16.gmra.mxu2 %v5091_v27 }
 0x1de   : > { %3396 = vmatmul.bf16.gmra.mxu3 %v5095_v28 }
 0x1e0   : > { %v3268_v34 = vpop.f32.mrf.mxu2  ;;  %v3092_v41 = vpop.f32.mrf.mxu0 }
 0x1e1   : > { %v3357_v35 = vpop.f32.mrf.mxu3  ;;  %v3269_v40 = vadd.f32 %v3268_v34, %v3180_v26  ;;  %v3181_v36 = vpop.f32.mrf.mxu1  ;;  %v3093_v1 = vadd.f32 %v3092_v41, %v6723_v21  ;;  %v5159_v21 = vor.u32 %v6094_v7, %v5156_v60  ;;  %v6227_v41 = vld [vmem:[%s7635_s1 + $0x240] sm:$0xff] }
 0x1e2   : > { %3518 = vmatpush.bf16.msra.mxu1 %v6227_v41  ;;  %v5282_v41 = vld [vmem:[%s6501_s15 + $0x718] sm:$0xf] }
 0x1e3   : > { %v7009_v42 = vadd.f32 %v3357_v35, %v3269_v40  ;;  %v3182_v43 = vadd.f32 %v3181_v36, %v3093_v1  ;;  %v5210_v1 = vld [vmem:[%s6501_s15 + $0x690] sm:$0xf] }
 0x1e8   : > { %v3270_v61 = vpop.f32.mrf.mxu2  ;;  %v3095_v12 = vpop.f32.mrf.mxu0 }
 0x1e9   : > { %v3359_v63 = vpop.f32.mrf.mxu3  ;;  %v3271_v10 = vadd.f32 %v3270_v61, %v3182_v43  ;;  %v3184_v13 = vpop.f32.mrf.mxu1  ;;  %v3096_v18 = vadd.f32 %v3095_v12, %v6734_v32  ;;  %v6243_v32 = vld [vmem:[%s7635_s1 + $0x2c0] sm:$0xff]  ;;  %v6117_v43 = vld [vmem:[%s6501_s15 + $0x6cc] sm:$0xf0]  ;;  %v5223_v12 = vor.u32 %v6110_v58, %v5220_v44 }
 0x1ea   : > { %3696 = vmatpush.bf16.msra.mxu3 %v6243_v32  ;;  %v5211_v61 = vor.u32 %v6117_v43, %v5210_v1  ;;  %v6126_v1 = vld [vmem:[%s6501_s15 + $0x71c] sm:$0xf] }
 0x1eb   : > { %v7020_v57 = vadd.f32 %v3359_v63, %v3271_v10  ;;  %v3185_v19 = vadd.f32 %v3184_v13, %v3096_v18  ;;  %3134 = vmatmul.bf16.gmra.mxu0 %v5147_v4  ;;  %v5219_v10 = vor.u32 %v6118_v53, %v5218_v50  ;;  %v5284_v43 = vld [vmem:[%s6501_s15 + $0x758] sm:$0xf0] }
 0x1ec   : > { %3223 = vmatmul.bf16.gmra.mxu1 %v5151_v8 }
 0x1ed   : > { %3312 = vmatmul.bf16.gmra.mxu2 %v5155_v14 }
 0x1ee   : > { %3401 = vmatmul.bf16.gmra.mxu3 %v5159_v21 }
 0x1f0   : > { %v3273_v27 = vpop.f32.mrf.mxu2  ;;  %v3097_v26 = vpop.f32.mrf.mxu0 }
 0x1f1   : > { %v3362_v28 = vpop.f32.mrf.mxu3  ;;  %v3274_v29 = vadd.f32 %v3273_v27, %v3185_v19  ;;  %v3186_v34 = vpop.f32.mrf.mxu1  ;;  %v3098_v35 = vadd.f32 %v3097_v26, %v6747_v54  ;;  %v5215_v54 = vor.u32 %v6109_v45, %v5212_v48  ;;  %v6133_v26 = vld [vmem:[%s6501_s15 + $0x74c] sm:$0xf0] }
 0x1f3   : > { %v7032_v40 = vadd.f32 %v3362_v28, %v3274_v29  ;;  %v3187_v36 = vadd.f32 %v3186_v34, %v3098_v35  ;;  %v5274_v29 = vld [vmem:[%s6501_s15 + $0x710] sm:$0xf]  ;;  %v6125_v34 = vld [vmem:[%s6501_s15 + $0x714] sm:$0xf] }
 0x1f4   : > { %v5276_v35 = vld [vmem:[%s6501_s15 + $0x750] sm:$0xf0]  ;;  %v5275_v50 = vor.u32 %v6133_v26, %v5274_v29 }
 0x1f5   : > { %v5279_v53 = vor.u32 %v6125_v34, %v5276_v35  ;;  %v6141_v29 = vld [vmem:[%s6501_s15 + $0x794] sm:$0xf]  ;;  %v5346_v34 = vld [vmem:[%s6501_s15 + $0x798] sm:$0xf] }
 0x1f6   : > { %v5340_v26 = vld [vmem:[%s6501_s15 + $0x7d0] sm:$0xf0]  ;;  %v6150_v35 = vld [vmem:[%s6501_s15 + $0x7d4] sm:$0xf0] }
 0x1f8   : > { %v3275_v7 = vpop.f32.mrf.mxu2  ;;  %v3100_v4 = vpop.f32.mrf.mxu0 }
 0x1f9   : > { %v3364_v60 = vpop.f32.mrf.mxu3  ;;  %v3276_v63 = vadd.f32 %v3275_v7, %v3187_v36  ;;  %v3189_v8 = vpop.f32.mrf.mxu1  ;;  %v3101_v13 = vadd.f32 %v3100_v4, %v6749_v62  ;;  %v6134_v36 = vld [vmem:[%s6501_s15 + $0x754] sm:$0xf0] }
 0x1fa   : > { %v6274_v4 = vld [vmem:[%s7635_s1 + $0x3b8] sm:$0xff] }
 0x1fb   : > { %v7046_v14 = vadd.f32 %v3364_v60, %v3276_v63  ;;  %v3190_v21 = vadd.f32 %v3189_v8, %v3101_v13  ;;  %3139 = vmatmul.bf16.gmra.mxu0 %v5211_v61  ;;  %v5283_v60 = vor.u32 %v6134_v36, %v5282_v41  ;;  %v6258_v8 = vld [vmem:[%s7635_s1 + $0x338] sm:$0xff]  ;;  %3956 = vmatpush.bf16.msrb.mxu2 %v6274_v4 }
 0x1fc   : > { %3228 = vmatmul.bf16.gmra.mxu1 %v5215_v54  ;;  %3778 = vmatpush.bf16.msrb.mxu0 %v6258_v8  ;;  %v6142_v41 = vld [vmem:[%s6501_s15 + $0x79c] sm:$0xf] }
 0x1fd   : > { %3317 = vmatmul.bf16.gmra.mxu2 %v5219_v10  ;;  %v5348_v36 = vld [vmem:[%s6501_s15 + $0x7d8] sm:$0xf0] }
 0x1fe   : > { %3406 = vmatmul.bf16.gmra.mxu3 %v5223_v12 }
 0x200   : > { %v3278_v18 = vpop.f32.mrf.mxu2  ;;  %v3102_v23 = vpop.f32.mrf.mxu0 }
 0x201   : > { %v3367_v19 = vpop.f32.mrf.mxu3  ;;  %v3279_v22 = vadd.f32 %v3278_v18, %v3190_v21  ;;  %v3191_v32 = vpop.f32.mrf.mxu1  ;;  %v3103_v62 = vadd.f32 %v3102_v23, %v6759_v20  ;;  %v5287_v20 = vor.u32 %v6126_v1, %v5284_v43  ;;  %v6266_v23 = vld [vmem:[%s7635_s1 + $0x378] sm:$0xff] }
 0x202   : > { %3867 = vmatpush.bf16.msrb.mxu1 %v6266_v23  ;;  %v4402_v23 = vld [vmem:[%s6501_s15 + $0x28] sm:$0xf] }
 0x203   : > { %v7049_v27 = vadd.f32 %v3367_v19, %v3279_v22  ;;  %v3192_v28 = vadd.f32 %v3191_v32, %v3103_v62  ;;  %v5338_v62 = vld [vmem:[%s6501_s15 + $0x790] sm:$0xf] }
 0x208   : > { %v3280_v45 = vpop.f32.mrf.mxu2  ;;  %v3105_v44 = vpop.f32.mrf.mxu0 }
 0x209   : > { %v3369_v48 = vpop.f32.mrf.mxu3  ;;  %v3281_v58 = vadd.f32 %v3280_v45, %v3192_v28  ;;  %v3194_v7 = vpop.f32.mrf.mxu1  ;;  %v3106_v61 = vadd.f32 %v3105_v44, %v6770_v33  ;;  %v6282_v33 = vld [vmem:[%s7635_s1 + $0x3f8] sm:$0xff]  ;;  %v6149_v28 = vld [vmem:[%s6501_s15 + $0x7cc] sm:$0xf0]  ;;  %v5351_v44 = vor.u32 %v6142_v41, %v5348_v36 }
 0x20a   : > { %4045 = vmatpush.bf16.msrb.mxu3 %v6282_v33  ;;  %v5339_v45 = vor.u32 %v6149_v28, %v5338_v62  ;;  %v5904_v62 = vld [vmem:[%s6501_s15 + $0x2c] sm:$0xf] }
 0x20b   : > { %v7060_v54 = vadd.f32 %v3369_v48, %v3281_v58  ;;  %v3195_v63 = vadd.f32 %v3194_v7, %v3106_v61  ;;  %3144 = vmatmul.bf16.gmra.mxu0 %v5275_v50  ;;  %v5347_v58 = vor.u32 %v6150_v35, %v5346_v34  ;;  %v4404_v28 = vld [vmem:[%s6501_s15 + $0x68] sm:$0xf0] }
 0x20c   : > { %3233 = vmatmul.bf16.gmra.mxu1 %v5279_v53 }
 0x20d   : > { %3322 = vmatmul.bf16.gmra.mxu2 %v5283_v60 }
 0x20e   : > { %3411 = vmatmul.bf16.gmra.mxu3 %v5287_v20 }
 0x210   : > { %v3283_v10 = vpop.f32.mrf.mxu2  ;;  %v3107_v21 = vpop.f32.mrf.mxu0 }
 0x211   : > { %v3372_v12 = vpop.f32.mrf.mxu3  ;;  %v3284_v13 = vadd.f32 %v3283_v10, %v3195_v63  ;;  %v3196_v18 = vpop.f32.mrf.mxu1  ;;  %v3108_v19 = vadd.f32 %v3107_v21, %v6783_v56  ;;  %v5343_v56 = vor.u32 %v6141_v29, %v5340_v26  ;;  %v5911_v21 = vld [vmem:[%s6501_s15 + $0x5c] sm:$0xf0] }
 0x213   : > { %v7072_v22 = vadd.f32 %v3372_v12, %v3284_v13  ;;  %v3197_v32 = vadd.f32 %v3196_v18, %v3108_v19  ;;  %v4394_v13 = vld [vmem:[%s6501_s15 + $0x20] sm:$0xf]  ;;  %v5903_v18 = vld [vmem:[%s6501_s15 + $0x24] sm:$0xf] }
 0x214   : > { %v4396_v19 = vld [vmem:[%s6501_s15 + $0x60] sm:$0xf0]  ;;  %v4395_v34 = vor.u32 %v5911_v21, %v4394_v13 }
 0x215   : > { %v4399_v35 = vor.u32 %v5903_v18, %v4396_v19  ;;  %v5919_v13 = vld [vmem:[%s6501_s15 + $0xa4] sm:$0xf]  ;;  %v4466_v18 = vld [vmem:[%s6501_s15 + $0xa8] sm:$0xf] }
 0x216   : > { %v4460_v21 = vld [vmem:[%s6501_s15 + $0xe0] sm:$0xf0]  ;;  %v5928_v19 = vld [vmem:[%s6501_s15 + $0xe4] sm:$0xf0] }
 0x218   : > { %v3285_v1 = vpop.f32.mrf.mxu2  ;;  %v3110_v50 = vpop.f32.mrf.mxu0 }
 0x219   : > { %v3374_v43 = vpop.f32.mrf.mxu3  ;;  %v3286_v48 = vadd.f32 %v3285_v1, %v3197_v32  ;;  %v3199_v53 = vpop.f32.mrf.mxu1  ;;  %v3111_v7 = vadd.f32 %v3110_v50, %v6785_v3  ;;  %v5912_v32 = vld [vmem:[%s6501_s15 + $0x64] sm:$0xf0]  ;;  %v6273_v50 = vld [vmem:[%s7635_s1 + $0x3b0] sm:$0xff] }
 0x21a   : > { %3957 = vmatpush.bf16.msrb.mxu2 %v6273_v50 }
 0x21b   : > { %v7086_v60 = vadd.f32 %v3374_v43, %v3286_v48  ;;  %v3200_v20 = vadd.f32 %v3199_v53, %v3111_v7  ;;  %3149 = vmatmul.bf16.gmra.mxu0 %v5339_v45  ;;  %v4403_v43 = vor.u32 %v5912_v32, %v4402_v23  ;;  %v6257_v53 = vld [vmem:[%s7635_s1 + $0x330] sm:$0xff]  ;;  %v5920_v23 = vld [vmem:[%s6501_s15 + $0xac] sm:$0xf] }
 0x21c   : > { %3238 = vmatmul.bf16.gmra.mxu1 %v5343_v56  ;;  %3779 = vmatpush.bf16.msrb.mxu0 %v6257_v53  ;;  %v4468_v32 = vld [vmem:[%s6501_s15 + $0xe8] sm:$0xf0] }
 0x21d   : > { %3327 = vmatmul.bf16.gmra.mxu2 %v5347_v58 }
 0x21e   : > { %3416 = vmatmul.bf16.gmra.mxu3 %v5351_v44 }
 0x220   : > { %v3288_v61 = vpop.f32.mrf.mxu2  ;;  %v3112_v8 = vpop.f32.mrf.mxu0 }
 0x221   : > { %v3377_v63 = vpop.f32.mrf.mxu3  ;;  %v3289_v4 = vadd.f32 %v3288_v61, %v3200_v20  ;;  %v3201_v33 = vpop.f32.mrf.mxu1  ;;  %v3113_v3 = vadd.f32 %v3112_v8, %v6795_v25  ;;  %v4407_v25 = vor.u32 %v5904_v62, %v4404_v28  ;;  %v6265_v8 = vld [vmem:[%s7635_s1 + $0x370] sm:$0xff] }
 0x222   : > { %3868 = vmatpush.bf16.msrb.mxu1 %v6265_v8  ;;  %v4530_v8 = vld [vmem:[%s6501_s15 + $0x128] sm:$0xf] }
 0x223   : > { %v7089_v10 = vadd.f32 %v3377_v63, %v3289_v4  ;;  %v3202_v12 = vadd.f32 %v3201_v33, %v3113_v3  ;;  %v4458_v3 = vld [vmem:[%s6501_s15 + $0xa0] sm:$0xf] }
 0x228   : > { %v3290_v29 = vpop.f32.mrf.mxu2  ;;  %v3115_v36 = vpop.f32.mrf.mxu0 }
 0x229   : > { %v3379_v26 = vpop.f32.mrf.mxu3  ;;  %v3291_v41 = vadd.f32 %v3290_v29, %v3202_v12  ;;  %v3204_v1 = vpop.f32.mrf.mxu1  ;;  %v3116_v45 = vadd.f32 %v3115_v36, %v6806_v39  ;;  %v6281_v39 = vld [vmem:[%s7635_s1 + $0x3f0] sm:$0xff]  ;;  %v5927_v12 = vld [vmem:[%s6501_s15 + $0xdc] sm:$0xf0]  ;;  %v4471_v36 = vor.u32 %v5920_v23, %v4468_v32 }
 0x22a   : > { %4046 = vmatpush.bf16.msrb.mxu3 %v6281_v39  ;;  %v4459_v29 = vor.u32 %v5927_v12, %v4458_v3  ;;  %v5936_v3 = vld [vmem:[%s6501_s15 + $0x12c] sm:$0xf] }
 0x22b   : > { %v7100_v56 = vadd.f32 %v3379_v26, %v3291_v41  ;;  %v3205_v48 = vadd.f32 %v3204_v1, %v3116_v45  ;;  %3430 = vmatmul.bf16.vlgmr.msra.gmra.mxu0 %v4395_v34  ;;  %v4467_v41 = vor.u32 %v5928_v19, %v4466_v18  ;;  %v4532_v12 = vld [vmem:[%s6501_s15 + $0x168] sm:$0xf0] }
 0x22c   : > { %3519 = vmatmul.bf16.vlgmr.msra.gmra.mxu1 %v4399_v35 }
 0x22d   : > { %3608 = vmatmul.bf16.vlgmr.msra.gmra.mxu2 %v4403_v43 }
 0x22e   : > { %3697 = vmatmul.bf16.vlgmr.msra.gmra.mxu3 %v4407_v25 }
 0x230   : > { %v3293_v58 = vpop.f32.mrf.mxu2  ;;  %v3117_v20 = vpop.f32.mrf.mxu0 }
 0x231   : > { %v3382_v44 = vpop.f32.mrf.mxu3  ;;  %v3294_v7 = vadd.f32 %v3293_v58, %v3205_v48  ;;  %v3206_v61 = vpop.f32.mrf.mxu1  ;;  %v3118_v63 = vadd.f32 %v3117_v20, %v6819_v2  ;;  %v4463_v2 = vor.u32 %v5919_v13, %v4460_v21  ;;  %v5943_v20 = vld [vmem:[%s6501_s15 + $0x15c] sm:$0xf0] }
 0x233   : > { %v7112_v4 = vadd.f32 %v3382_v44, %v3294_v7  ;;  %v3207_v33 = vadd.f32 %v3206_v61, %v3118_v63  ;;  %v4522_v7 = vld [vmem:[%s6501_s15 + $0x120] sm:$0xf]  ;;  %v5935_v61 = vld [vmem:[%s6501_s15 + $0x124] sm:$0xf] }
 0x234   : > { %v4524_v63 = vld [vmem:[%s6501_s15 + $0x160] sm:$0xf0]  ;;  %v4523_v18 = vor.u32 %v5943_v20, %v4522_v7 }
 0x235   : > { %v4527_v19 = vor.u32 %v5935_v61, %v4524_v63  ;;  %v5951_v7 = vld [vmem:[%s6501_s15 + $0x1a4] sm:$0xf]  ;;  %v4594_v61 = vld [vmem:[%s6501_s15 + $0x1a8] sm:$0xf] }
 0x236   : > { %v4588_v20 = vld [vmem:[%s6501_s15 + $0x1e0] sm:$0xf0]  ;;  %v5960_v63 = vld [vmem:[%s6501_s15 + $0x1e4] sm:$0xf0] }
 0x238   : > { %v3295_v62 = vpop.f32.mrf.mxu2  ;;  %v3120_v34 = vpop.f32.mrf.mxu0 }
 0x239   : > { %v3384_v28 = vpop.f32.mrf.mxu3  ;;  %v3296_v26 = vadd.f32 %v3295_v62, %v3207_v33  ;;  %v3209_v35 = vpop.f32.mrf.mxu1  ;;  %v3121_v1 = vadd.f32 %v3120_v34, %v6821_v11  ;;  %v5944_v33 = vld [vmem:[%s6501_s15 + $0x164] sm:$0xf0] }
 0x23a   : > { %v6272_v34 = vld [vmem:[%s7635_s1 + $0x3a8] sm:$0xff] }
 0x23b   : > { %v7126_v43 = vadd.f32 %v3384_v28, %v3296_v26  ;;  %v3210_v25 = vadd.f32 %v3209_v35, %v3121_v1  ;;  %3435 = vmatmul.bf16.gmra.mxu0 %v4459_v29  ;;  %v4531_v28 = vor.u32 %v5944_v33, %v4530_v8  ;;  %v6256_v35 = vld [vmem:[%s7635_s1 + $0x328] sm:$0xff]  ;;  %3958 = vmatpush.bf16.msrb.mxu2 %v6272_v34 }
 0x23c   : > { %3524 = vmatmul.bf16.gmra.mxu1 %v4463_v2  ;;  %3780 = vmatpush.bf16.msrb.mxu0 %v6256_v35  ;;  %v5952_v8 = vld [vmem:[%s6501_s15 + $0x1ac] sm:$0xf] }
 0x23d   : > { %3613 = vmatmul.bf16.gmra.mxu2 %v4467_v41  ;;  %v4596_v33 = vld [vmem:[%s6501_s15 + $0x1e8] sm:$0xf0] }
 0x23e   : > { %3702 = vmatmul.bf16.gmra.mxu3 %v4471_v36 }
 0x240   : > { %v3298_v45 = vpop.f32.mrf.mxu2  ;;  %v3122_v53 = vpop.f32.mrf.mxu0 }
 0x241   : > { %v3387_v48 = vpop.f32.mrf.mxu3  ;;  %v3299_v50 = vadd.f32 %v3298_v45, %v3210_v25  ;;  %v3211_v39 = vpop.f32.mrf.mxu1  ;;  %v3123_v11 = vadd.f32 %v3122_v53, %v6831_v37  ;;  %v4535_v37 = vor.u32 %v5936_v3, %v4532_v12  ;;  %v6264_v53 = vld [vmem:[%s7635_s1 + $0x368] sm:$0xff] }
 0x242   : > { %3869 = vmatpush.bf16.msrb.mxu1 %v6264_v53  ;;  %v4658_v53 = vld [vmem:[%s6501_s15 + $0x228] sm:$0xf] }
 0x243   : > { %v7129_v58 = vadd.f32 %v3387_v48, %v3299_v50  ;;  %v3212_v44 = vadd.f32 %v3211_v39, %v3123_v11  ;;  %v4586_v11 = vld [vmem:[%s6501_s15 + $0x1a0] sm:$0xf] }
 0x248   : > { %v3300_v13 = vpop.f32.mrf.mxu2  ;;  %v3125_v32 = vpop.f32.mrf.mxu0 }
 0x249   : > { %v3389_v21 = vpop.f32.mrf.mxu3  ;;  %v3301_v23 = vadd.f32 %v3300_v13, %v3212_v44  ;;  %v3214_v62 = vpop.f32.mrf.mxu1  ;;  %v3126_v29 = vadd.f32 %v3125_v32, %v6842_v49  ;;  %v6280_v49 = vld [vmem:[%s7635_s1 + $0x3e8] sm:$0xff]  ;;  %v5959_v44 = vld [vmem:[%s6501_s15 + $0x1dc] sm:$0xf0]  ;;  %v4599_v32 = vor.u32 %v5952_v8, %v4596_v33 }
 0x24a   : > { %4047 = vmatpush.bf16.msrb.mxu3 %v6280_v49  ;;  %v4587_v13 = vor.u32 %v5959_v44, %v4586_v11  ;;  %v5968_v11 = vld [vmem:[%s6501_s15 + $0x22c] sm:$0xf] }
 0x24b   : > { %v7140_v2 = vadd.f32 %v3389_v21, %v3301_v23  ;;  %v3215_v26 = vadd.f32 %v3214_v62, %v3126_v29  ;;  %3440 = vmatmul.bf16.gmra.mxu0 %v4523_v18  ;;  %v4595_v23 = vor.u32 %v5960_v63, %v4594_v61  ;;  %v4660_v44 = vld [vmem:[%s6501_s15 + $0x268] sm:$0xf0] }
 0x24c   : > { %3529 = vmatmul.bf16.gmra.mxu1 %v4527_v19 }
 0x24d   : > { %3618 = vmatmul.bf16.gmra.mxu2 %v4531_v28 }
 0x24e   : > { %3707 = vmatmul.bf16.gmra.mxu3 %v4535_v37 }
 0x250   : > { %v3303_v41 = vpop.f32.mrf.mxu2  ;;  %v3127_v25 = vpop.f32.mrf.mxu0 }
 0x251   : > { %v3392_v36 = vpop.f32.mrf.mxu3  ;;  %v3304_v1 = vadd.f32 %v3303_v41, %v3215_v26  ;;  %v3216_v45 = vpop.f32.mrf.mxu1  ;;  %v3128_v48 = vadd.f32 %v3127_v25, %v6855_v15  ;;  %v4591_v15 = vor.u32 %v5951_v7, %v4588_v20  ;;  %v5975_v25 = vld [vmem:[%s6501_s15 + $0x25c] sm:$0xf0] }
 0x253   : > { %v7152_v50 = vadd.f32 %v3392_v36, %v3304_v1  ;;  %v3217_v39 = vadd.f32 %v3216_v45, %v3128_v48  ;;  %v4650_v1 = vld [vmem:[%s6501_s15 + $0x220] sm:$0xf]  ;;  %v5967_v45 = vld [vmem:[%s6501_s15 + $0x224] sm:$0xf] }
 0x254   : > { %v4652_v48 = vld [vmem:[%s6501_s15 + $0x260] sm:$0xf0]  ;;  %v4651_v61 = vor.u32 %v5975_v25, %v4650_v1 }
 0x255   : > { %v4655_v63 = vor.u32 %v5967_v45, %v4652_v48  ;;  %v5983_v1 = vld [vmem:[%s6501_s15 + $0x2a4] sm:$0xf]  ;;  %v4722_v45 = vld [vmem:[%s6501_s15 + $0x2a8] sm:$0xf] }
 0x256   : > { %v4716_v25 = vld [vmem:[%s6501_s15 + $0x2e0] sm:$0xf0]  ;;  %v5992_v48 = vld [vmem:[%s6501_s15 + $0x2e4] sm:$0xf0] }
 0x258   : > { %v3305_v3 = vpop.f32.mrf.mxu2  ;;  %v3130_v18 = vpop.f32.mrf.mxu0 }
 0x259   : > { %v3394_v12 = vpop.f32.mrf.mxu3  ;;  %v3306_v21 = vadd.f32 %v3305_v3, %v3217_v39  ;;  %v3219_v19 = vpop.f32.mrf.mxu1  ;;  %v3131_v62 = vadd.f32 %v3130_v18, %v6857_v24  ;;  %v5976_v39 = vld [vmem:[%s6501_s15 + $0x264] sm:$0xf0]  ;;  %v6271_v18 = vld [vmem:[%s7635_s1 + $0x3a0] sm:$0xff] }
 0x25a   : > { %3959 = vmatpush.bf16.msrb.mxu2 %v6271_v18 }
 0x25b   : > { %v7166_v28 = vadd.f32 %v3394_v12, %v3306_v21  ;;  %v3220_v37 = vadd.f32 %v3219_v19, %v3131_v62  ;;  %3445 = vmatmul.bf16.gmra.mxu0 %v4587_v13  ;;  %v4659_v12 = vor.u32 %v5976_v39, %v4658_v53  ;;  %v6255_v19 = vld [vmem:[%s7635_s1 + $0x320] sm:$0xff]  ;;  %v5984_v53 = vld [vmem:[%s6501_s15 + $0x2ac] sm:$0xf] }
 0x25c   : > { %3534 = vmatmul.bf16.gmra.mxu1 %v4591_v15  ;;  %3781 = vmatpush.bf16.msrb.mxu0 %v6255_v19  ;;  %v4724_v39 = vld [vmem:[%s6501_s15 + $0x2e8] sm:$0xf0] }
 0x25d   : > { %3623 = vmatmul.bf16.gmra.mxu2 %v4595_v23 }
 0x25e   : > { %3712 = vmatmul.bf16.gmra.mxu3 %v4599_v32 }
 0x260   : > { %v3308_v29 = vpop.f32.mrf.mxu2  ;;  %v3132_v35 = vpop.f32.mrf.mxu0 }
 0x261   : > { %v3397_v26 = vpop.f32.mrf.mxu3  ;;  %v3309_v34 = vadd.f32 %v3308_v29, %v3220_v37  ;;  %v3221_v49 = vpop.f32.mrf.mxu1  ;;  %v3133_v24 = vadd.f32 %v3132_v35, %v6867_v52  ;;  %v4663_v52 = vor.u32 %v5968_v11, %v4660_v44  ;;  %v6263_v35 = vld [vmem:[%s7635_s1 + $0x360] sm:$0xff] }
 0x262   : > { %3870 = vmatpush.bf16.msrb.mxu1 %v6263_v35  ;;  %v4786_v35 = vld [vmem:[%s6501_s15 + $0x328] sm:$0xf] }
 0x263   : > { %v7169_v41 = vadd.f32 %v3397_v26, %v3309_v34  ;;  %v3222_v36 = vadd.f32 %v3221_v49, %v3133_v24  ;;  %v4714_v24 = vld [vmem:[%s6501_s15 + $0x2a0] sm:$0xf] }
 0x268   : > { %v3310_v7 = vpop.f32.mrf.mxu2  ;;  %v3135_v33 = vpop.f32.mrf.mxu0 }
 0x269   : > { %v3399_v20 = vpop.f32.mrf.mxu3  ;;  %v3311_v8 = vadd.f32 %v3310_v7, %v3222_v36  ;;  %v3224_v3 = vpop.f32.mrf.mxu1  ;;  %v3136_v13 = vadd.f32 %v3135_v33, %v6878_v6  ;;  %v6279_v6 = vld [vmem:[%s7635_s1 + $0x3e0] sm:$0xff]  ;;  %v4727_v33 = vor.u32 %v5984_v53, %v4724_v39 }
 0x26a   : > { %4048 = vmatpush.bf16.msrb.mxu3 %v6279_v6  ;;  %v5991_v36 = vld [vmem:[%s6501_s15 + $0x2dc] sm:$0xf0] }
 0x26b   : > { %v7180_v15 = vadd.f32 %v3399_v20, %v3311_v8  ;;  %v3225_v21 = vadd.f32 %v3224_v3, %v3136_v13  ;;  %3450 = vmatmul.bf16.gmra.mxu0 %v4651_v61  ;;  %v4715_v7 = vor.u32 %v5991_v36, %v4714_v24  ;;  %v4723_v8 = vor.u32 %v5992_v48, %v4722_v45  ;;  %v6000_v24 = vld [vmem:[%s6501_s15 + $0x32c] sm:$0xf] }
 0x26c   : > { %3539 = vmatmul.bf16.gmra.mxu1 %v4655_v63  ;;  %v4788_v36 = vld [vmem:[%s6501_s15 + $0x368] sm:$0xf0] }
 0x26d   : > { %3628 = vmatmul.bf16.gmra.mxu2 %v4659_v12 }
 0x26e   : > { %3717 = vmatmul.bf16.gmra.mxu3 %v4663_v52 }
 0x270   : > { %v3313_v23 = vpop.f32.mrf.mxu2  ;;  %v3137_v37 = vpop.f32.mrf.mxu0 }
 0x271   : > { %v3402_v32 = vpop.f32.mrf.mxu3  ;;  %v3314_v62 = vadd.f32 %v3313_v23, %v3225_v21  ;;  %v3226_v29 = vpop.f32.mrf.mxu1  ;;  %v3138_v26 = vadd.f32 %v3137_v37, %v6891_v38  ;;  %v4719_v38 = vor.u32 %v5983_v1, %v4716_v25  ;;  %v6007_v37 = vld [vmem:[%s6501_s15 + $0x35c] sm:$0xf0] }
 0x273   : > { %v7192_v34 = vadd.f32 %v3402_v32, %v3314_v62  ;;  %v3227_v49 = vadd.f32 %v3226_v29, %v3138_v26  ;;  %v4778_v62 = vld [vmem:[%s6501_s15 + $0x320] sm:$0xf]  ;;  %v5999_v29 = vld [vmem:[%s6501_s15 + $0x324] sm:$0xf] }
 0x274   : > { %v4780_v26 = vld [vmem:[%s6501_s15 + $0x360] sm:$0xf0]  ;;  %v4779_v45 = vor.u32 %v6007_v37, %v4778_v62 }
 0x275   : > { %v4783_v48 = vor.u32 %v5999_v29, %v4780_v26  ;;  %v6015_v62 = vld [vmem:[%s6501_s15 + $0x3a4] sm:$0xf]  ;;  %v4850_v29 = vld [vmem:[%s6501_s15 + $0x3a8] sm:$0xf] }
 0x276   : > { %v4844_v37 = vld [vmem:[%s6501_s15 + $0x3e0] sm:$0xf0]  ;;  %v6024_v26 = vld [vmem:[%s6501_s15 + $0x3e4] sm:$0xf0] }
 0x278   : > { %v3315_v11 = vpop.f32.mrf.mxu2  ;;  %v3140_v61 = vpop.f32.mrf.mxu0 }
 0x279   : > { %v3404_v44 = vpop.f32.mrf.mxu3  ;;  %v3316_v20 = vadd.f32 %v3315_v11, %v3227_v49  ;;  %v3229_v63 = vpop.f32.mrf.mxu1  ;;  %v3141_v3 = vadd.f32 %v3140_v61, %v6893_v47  ;;  %v6008_v49 = vld [vmem:[%s6501_s15 + $0x364] sm:$0xf0]  ;;  %v6270_v61 = vld [vmem:[%s7635_s1 + $0x398] sm:$0xff] }
 0x27a   : > { %3960 = vmatpush.bf16.msrb.mxu2 %v6270_v61 }
 0x27b   : > { %v7206_v12 = vadd.f32 %v3404_v44, %v3316_v20  ;;  %v3230_v52 = vadd.f32 %v3229_v63, %v3141_v3  ;;  %3455 = vmatmul.bf16.gmra.mxu0 %v4715_v7  ;;  %v4787_v44 = vor.u32 %v6008_v49, %v4786_v35  ;;  %v6254_v63 = vld [vmem:[%s7635_s1 + $0x318] sm:$0xff]  ;;  %v6016_v35 = vld [vmem:[%s6501_s15 + $0x3ac] sm:$0xf] }
 0x27c   : > { %3544 = vmatmul.bf16.gmra.mxu1 %v4719_v38  ;;  %3782 = vmatpush.bf16.msrb.mxu0 %v6254_v63  ;;  %v4852_v49 = vld [vmem:[%s6501_s15 + $0x3e8] sm:$0xf0] }
 0x27d   : > { %3633 = vmatmul.bf16.gmra.mxu2 %v4723_v8 }
 0x27e   : > { %3722 = vmatmul.bf16.gmra.mxu3 %v4727_v33 }
 0x280   : > { %v3318_v13 = vpop.f32.mrf.mxu2  ;;  %v3142_v19 = vpop.f32.mrf.mxu0 }
 0x281   : > { %v3407_v21 = vpop.f32.mrf.mxu3  ;;  %v3319_v18 = vadd.f32 %v3318_v13, %v3230_v52  ;;  %v3231_v6 = vpop.f32.mrf.mxu1  ;;  %v3143_v47 = vadd.f32 %v3142_v19, %v6903_v16  ;;  %v4791_v16 = vor.u32 %v6000_v24, %v4788_v36  ;;  %v6262_v19 = vld [vmem:[%s7635_s1 + $0x358] sm:$0xff] }
 0x282   : > { %3871 = vmatpush.bf16.msrb.mxu1 %v6262_v19  ;;  %v4914_v19 = vld [vmem:[%s6501_s15 + $0x428] sm:$0xf] }
 0x283   : > { %v7209_v23 = vadd.f32 %v3407_v21, %v3319_v18  ;;  %v3232_v32 = vadd.f32 %v3231_v6, %v3143_v47  ;;  %v4842_v47 = vld [vmem:[%s6501_s15 + $0x3a0] sm:$0xf] }
 0x288   : > { %v3320_v1 = vpop.f32.mrf.mxu2  ;;  %v3145_v39 = vpop.f32.mrf.mxu0 }
 0x289   : > { %v3409_v25 = vpop.f32.mrf.mxu3  ;;  %v3321_v53 = vadd.f32 %v3320_v1, %v3232_v32  ;;  %v3234_v11 = vpop.f32.mrf.mxu1  ;;  %v3146_v7 = vadd.f32 %v3145_v39, %v6914_v31  ;;  %v6278_v31 = vld [vmem:[%s7635_s1 + $0x3d8] sm:$0xff]  ;;  %v6023_v32 = vld [vmem:[%s6501_s15 + $0x3dc] sm:$0xf0]  ;;  %v4855_v39 = vor.u32 %v6016_v35, %v4852_v49 }
 0x28a   : > { %4049 = vmatpush.bf16.msrb.mxu3 %v6278_v31  ;;  %v4843_v1 = vor.u32 %v6023_v32, %v4842_v47  ;;  %v6032_v47 = vld [vmem:[%s6501_s15 + $0x42c] sm:$0xf] }
 0x28b   : > { %v7220_v38 = vadd.f32 %v3409_v25, %v3321_v53  ;;  %v3235_v20 = vadd.f32 %v3234_v11, %v3146_v7  ;;  %3460 = vmatmul.bf16.gmra.mxu0 %v4779_v45  ;;  %v4851_v53 = vor.u32 %v6024_v26, %v4850_v29  ;;  %v4916_v32 = vld [vmem:[%s6501_s15 + $0x468] sm:$0xf0] }
 0x28c   : > { %3549 = vmatmul.bf16.gmra.mxu1 %v4783_v48 }
 0x28d   : > { %3638 = vmatmul.bf16.gmra.mxu2 %v4787_v44 }
 0x28e   : > { %3727 = vmatmul.bf16.gmra.mxu3 %v4791_v16 }
 0x290   : > { %v3323_v8 = vpop.f32.mrf.mxu2  ;;  %v3147_v52 = vpop.f32.mrf.mxu0 }
 0x291   : > { %v3412_v33 = vpop.f32.mrf.mxu3  ;;  %v3324_v3 = vadd.f32 %v3323_v8, %v3235_v20  ;;  %v3236_v13 = vpop.f32.mrf.mxu1  ;;  %v3148_v21 = vadd.f32 %v3147_v52, %v6927_v5  ;;  %v4847_v5 = vor.u32 %v6015_v62, %v4844_v37  ;;  %v6039_v52 = vld [vmem:[%s6501_s15 + $0x45c] sm:$0xf0] }
 0x293   : > { %v7232_v18 = vadd.f32 %v3412_v33, %v3324_v3  ;;  %v3237_v6 = vadd.f32 %v3236_v13, %v3148_v21  ;;  %v4906_v3 = vld [vmem:[%s6501_s15 + $0x420] sm:$0xf]  ;;  %v6031_v13 = vld [vmem:[%s6501_s15 + $0x424] sm:$0xf] }
 0x294   : > { %v4908_v21 = vld [vmem:[%s6501_s15 + $0x460] sm:$0xf0]  ;;  %v4907_v29 = vor.u32 %v6039_v52, %v4906_v3 }
 0x295   : > { %v4911_v26 = vor.u32 %v6031_v13, %v4908_v21  ;;  %v6047_v3 = vld [vmem:[%s6501_s15 + $0x4a4] sm:$0xf]  ;;  %v4978_v13 = vld [vmem:[%s6501_s15 + $0x4a8] sm:$0xf] }
 0x296   : > { %v4972_v52 = vld [vmem:[%s6501_s15 + $0x4e0] sm:$0xf0]  ;;  %v6056_v21 = vld [vmem:[%s6501_s15 + $0x4e4] sm:$0xf0] }
 0x298   : > { %v3325_v24 = vpop.f32.mrf.mxu2  ;;  %v3150_v45 = vpop.f32.mrf.mxu0 }
 0x299   : > { %v3414_v36 = vpop.f32.mrf.mxu3  ;;  %v3326_v25 = vadd.f32 %v3325_v24, %v3237_v6  ;;  %v3239_v48 = vpop.f32.mrf.mxu1  ;;  %v3151_v11 = vadd.f32 %v3150_v45, %v6929_v17  ;;  %v6040_v6 = vld [vmem:[%s6501_s15 + $0x464] sm:$0xf0]  ;;  %v6269_v45 = vld [vmem:[%s7635_s1 + $0x390] sm:$0xff] }
 0x29a   : > { %3961 = vmatpush.bf16.msrb.mxu2 %v6269_v45 }
 0x29b   : > { %v7246_v44 = vadd.f32 %v3414_v36, %v3326_v25  ;;  %v3240_v16 = vadd.f32 %v3239_v48, %v3151_v11  ;;  %3465 = vmatmul.bf16.gmra.mxu0 %v4843_v1  ;;  %v4915_v36 = vor.u32 %v6040_v6, %v4914_v19  ;;  %v6253_v48 = vld [vmem:[%s7635_s1 + $0x310] sm:$0xff]  ;;  %v6048_v19 = vld [vmem:[%s6501_s15 + $0x4ac] sm:$0xf] }
 0x29c   : > { %3554 = vmatmul.bf16.gmra.mxu1 %v4847_v5  ;;  %3783 = vmatpush.bf16.msrb.mxu0 %v6253_v48  ;;  %v4980_v6 = vld [vmem:[%s6501_s15 + $0x4e8] sm:$0xf0] }
 0x29d   : > { %3643 = vmatmul.bf16.gmra.mxu2 %v4851_v53 }
 0x29e   : > { %3732 = vmatmul.bf16.gmra.mxu3 %v4855_v39 }
 0x2a0   : > { %v3328_v7 = vpop.f32.mrf.mxu2  ;;  %v3152_v63 = vpop.f32.mrf.mxu0 }
 0x2a1   : > { %v3417_v20 = vpop.f32.mrf.mxu3  ;;  %v3329_v61 = vadd.f32 %v3328_v7, %v3240_v16  ;;  %v3241_v31 = vpop.f32.mrf.mxu1  ;;  %v3153_v17 = vadd.f32 %v3152_v63, %v6940_v51  ;;  %v4919_v51 = vor.u32 %v6032_v47, %v4916_v32  ;;  %v6261_v63 = vld [vmem:[%s7635_s1 + $0x350] sm:$0xff] }
 0x2a2   : > { %3872 = vmatpush.bf16.msrb.mxu1 %v6261_v63  ;;  %v5042_v63 = vld [vmem:[%s6501_s15 + $0x528] sm:$0xf] }
 0x2a3   : > { %v7249_v8 = vadd.f32 %v3417_v20, %v3329_v61  ;;  %v3242_v33 = vadd.f32 %v3241_v31, %v3153_v17  ;;  %v4970_v17 = vld [vmem:[%s6501_s15 + $0x4a0] sm:$0xf] }
 0x2a8   : > { %v3330_v62 = vpop.f32.mrf.mxu2  ;;  %v3431_v49 = vpop.f32.mrf.mxu0 }
 0x2a9   : > { %v3419_v37 = vpop.f32.mrf.mxu3  ;;  %v3331_v35 = vadd.f32 %v3330_v62, %v3242_v33  ;;  %v3520_v24 = vpop.f32.mrf.mxu1  ;;  %v3432_v1 = vadd.f32 %v3431_v49, %v6952_v9  ;;  %v6277_v9 = vld [vmem:[%s7635_s1 + $0x3d0] sm:$0xff]  ;;  %v6055_v33 = vld [vmem:[%s6501_s15 + $0x4dc] sm:$0xf0]  ;;  %v4983_v49 = vor.u32 %v6048_v19, %v4980_v6 }
 0x2aa   : > { %4050 = vmatpush.bf16.msrb.mxu3 %v6277_v9  ;;  %v4971_v62 = vor.u32 %v6055_v33, %v4970_v17  ;;  %v6064_v17 = vld [vmem:[%s6501_s15 + $0x52c] sm:$0xf] }
 0x2ab   : > { %v7260_v5 = vadd.f32 %v3419_v37, %v3331_v35  ;;  %v3521_v25 = vadd.f32 %v3520_v24, %v3432_v1  ;;  %3470 = vmatmul.bf16.gmra.mxu0 %v4907_v29  ;;  %v4979_v35 = vor.u32 %v6056_v21, %v4978_v13  ;;  %v5044_v33 = vld [vmem:[%s6501_s15 + $0x568] sm:$0xf0] }
 0x2ac   : > { %3559 = vmatmul.bf16.gmra.mxu1 %v4911_v26 }
 0x2ad   : > { %3648 = vmatmul.bf16.gmra.mxu2 %v4915_v36 }
 0x2ae   : > { %3737 = vmatmul.bf16.gmra.mxu3 %v4919_v51 }
 0x2b0   : > { %v3609_v53 = vpop.f32.mrf.mxu2  ;;  %v3433_v16 = vpop.f32.mrf.mxu0 }
 0x2b1   : > { %v3698_v39 = vpop.f32.mrf.mxu3  ;;  %v3610_v11 = vadd.f32 %v3609_v53, %v3521_v25  ;;  %v3522_v7 = vpop.f32.mrf.mxu1  ;;  %v3434_v20 = vadd.f32 %v3433_v16, %v6966_v46  ;;  %v4975_v46 = vor.u32 %v6047_v3, %v4972_v52  ;;  %v6071_v16 = vld [vmem:[%s6501_s15 + $0x55c] sm:$0xf0] }
 0x2b3   : > { %v7272_v61 = vadd.f32 %v3698_v39, %v3610_v11  ;;  %v3523_v31 = vadd.f32 %v3522_v7, %v3434_v20  ;;  %v5034_v11 = vld [vmem:[%s6501_s15 + $0x520] sm:$0xf]  ;;  %v6063_v7 = vld [vmem:[%s6501_s15 + $0x524] sm:$0xf] }
 0x2b4   : > { %v5036_v20 = vld [vmem:[%s6501_s15 + $0x560] sm:$0xf0]  ;;  %v5035_v13 = vor.u32 %v6071_v16, %v5034_v11 }
 0x2b5   : > { %v5039_v21 = vor.u32 %v6063_v7, %v5036_v20  ;;  %v6079_v11 = vld [vmem:[%s6501_s15 + $0x5a4] sm:$0xf]  ;;  %v5106_v7 = vld [vmem:[%s6501_s15 + $0x5a8] sm:$0xf] }
 0x2b6   : > { %v5100_v16 = vld [vmem:[%s6501_s15 + $0x5e0] sm:$0xf0]  ;;  %v6088_v20 = vld [vmem:[%s6501_s15 + $0x5e4] sm:$0xf0] }
 0x2b8   : > { %v3611_v47 = vpop.f32.mrf.mxu2  ;;  %v3436_v29 = vpop.f32.mrf.mxu0 }
 0x2b9   : > { %v3700_v32 = vpop.f32.mrf.mxu3  ;;  %v3612_v37 = vadd.f32 %v3611_v47, %v3523_v31  ;;  %v3525_v26 = vpop.f32.mrf.mxu1  ;;  %v3437_v24 = vadd.f32 %v3436_v29, %v6969_v59  ;;  %v6072_v31 = vld [vmem:[%s6501_s15 + $0x564] sm:$0xf0] }
 0x2ba   : > { %v6268_v29 = vld [vmem:[%s7635_s1 + $0x388] sm:$0xff] }
 0x2bb   : > { %v7286_v36 = vadd.f32 %v3700_v32, %v3612_v37  ;;  %v3526_v51 = vadd.f32 %v3525_v26, %v3437_v24  ;;  %3475 = vmatmul.bf16.gmra.mxu0 %v4971_v62  ;;  %v5043_v32 = vor.u32 %v6072_v31, %v5042_v63  ;;  %v6252_v26 = vld [vmem:[%s7635_s1 + $0x308] sm:$0xff]  ;;  %3962 = vmatpush.bf16.msrb.mxu2 %v6268_v29 }
 0x2bc   : > { %3564 = vmatmul.bf16.gmra.mxu1 %v4975_v46  ;;  %3784 = vmatpush.bf16.msrb.mxu0 %v6252_v26  ;;  %v6080_v63 = vld [vmem:[%s6501_s15 + $0x5ac] sm:$0xf] }
 0x2bd   : > { %3653 = vmatmul.bf16.gmra.mxu2 %v4979_v35  ;;  %v5108_v31 = vld [vmem:[%s6501_s15 + $0x5e8] sm:$0xf0] }
 0x2be   : > { %3742 = vmatmul.bf16.gmra.mxu3 %v4983_v49 }
 0x2c0   : > { %v3614_v1 = vpop.f32.mrf.mxu2  ;;  %v3438_v48 = vpop.f32.mrf.mxu0 }
 0x2c1   : > { %v3703_v25 = vpop.f32.mrf.mxu3  ;;  %v3615_v45 = vadd.f32 %v3614_v1, %v3526_v51  ;;  %v3527_v9 = vpop.f32.mrf.mxu1  ;;  %v3439_v59 = vadd.f32 %v3438_v48, %v6980_v0  ;;  %v5047_v0 = vor.u32 %v6064_v17, %v5044_v33  ;;  %v6260_v48 = vld [vmem:[%s7635_s1 + $0x348] sm:$0xff] }
 0x2c2   : > { %3873 = vmatpush.bf16.msrb.mxu1 %v6260_v48  ;;  %v5170_v48 = vld [vmem:[%s6501_s15 + $0x628] sm:$0xf] }
 0x2c3   : > { %v7289_v53 = vadd.f32 %v3703_v25, %v3615_v45  ;;  %v3528_v39 = vadd.f32 %v3527_v9, %v3439_v59  ;;  %v5098_v59 = vld [vmem:[%s6501_s15 + $0x5a0] sm:$0xf] }
 0x2c8   : > { %v3616_v3 = vpop.f32.mrf.mxu2  ;;  %v3441_v6 = vpop.f32.mrf.mxu0 }
 0x2c9   : > { %v3705_v52 = vpop.f32.mrf.mxu3  ;;  %v3617_v19 = vadd.f32 %v3616_v3, %v3528_v39  ;;  %v3530_v47 = vpop.f32.mrf.mxu1  ;;  %v3442_v62 = vadd.f32 %v3441_v6, %v6992_v55  ;;  %v6276_v55 = vld [vmem:[%s7635_s1 + $0x3c8] sm:$0xff]  ;;  %v6087_v39 = vld [vmem:[%s6501_s15 + $0x5dc] sm:$0xf0]  ;;  %v5111_v6 = vor.u32 %v6080_v63, %v5108_v31 }
 0x2ca   : > { %4051 = vmatpush.bf16.msrb.mxu3 %v6276_v55  ;;  %v5099_v3 = vor.u32 %v6087_v39, %v5098_v59  ;;  %v6096_v59 = vld [vmem:[%s6501_s15 + $0x62c] sm:$0xf] }
 0x2cb   : > { %v7300_v46 = vadd.f32 %v3705_v52, %v3617_v19  ;;  %v3531_v37 = vadd.f32 %v3530_v47, %v3442_v62  ;;  %3480 = vmatmul.bf16.gmra.mxu0 %v5035_v13  ;;  %v5107_v19 = vor.u32 %v6088_v20, %v5106_v7  ;;  %v5172_v39 = vld [vmem:[%s6501_s15 + $0x668] sm:$0xf0] }
 0x2cc   : > { %3569 = vmatmul.bf16.gmra.mxu1 %v5039_v21 }
 0x2cd   : > { %3658 = vmatmul.bf16.gmra.mxu2 %v5043_v32 }
 0x2ce   : > { %3747 = vmatmul.bf16.gmra.mxu3 %v5047_v0 }
 0x2d0   : > { %v3619_v35 = vpop.f32.mrf.mxu2  ;;  %v3443_v51 = vpop.f32.mrf.mxu0 }
 0x2d1   : > { %v3708_v49 = vpop.f32.mrf.mxu3  ;;  %v3620_v24 = vadd.f32 %v3619_v35, %v3531_v37  ;;  %v3532_v1 = vpop.f32.mrf.mxu1  ;;  %v3444_v25 = vadd.f32 %v3443_v51, %v7006_v30  ;;  %v5103_v30 = vor.u32 %v6079_v11, %v5100_v16  ;;  %v6103_v51 = vld [vmem:[%s6501_s15 + $0x65c] sm:$0xf0] }
 0x2d3   : > { %v7312_v45 = vadd.f32 %v3708_v49, %v3620_v24  ;;  %v3533_v9 = vadd.f32 %v3532_v1, %v3444_v25  ;;  %v5162_v24 = vld [vmem:[%s6501_s15 + $0x620] sm:$0xf]  ;;  %v6095_v1 = vld [vmem:[%s6501_s15 + $0x624] sm:$0xf] }
 0x2d4   : > { %v5164_v25 = vld [vmem:[%s6501_s15 + $0x660] sm:$0xf0]  ;;  %v5163_v7 = vor.u32 %v6103_v51, %v5162_v24 }
 0x2d5   : > { %v5167_v20 = vor.u32 %v6095_v1, %v5164_v25  ;;  %v6111_v24 = vld [vmem:[%s6501_s15 + $0x6a4] sm:$0xf]  ;;  %v5234_v1 = vld [vmem:[%s6501_s15 + $0x6a8] sm:$0xf] }
 0x2d6   : > { %v5228_v51 = vld [vmem:[%s6501_s15 + $0x6e0] sm:$0xf0]  ;;  %v6120_v25 = vld [vmem:[%s6501_s15 + $0x6e4] sm:$0xf0] }
 0x2d8   : > { %v3621_v17 = vpop.f32.mrf.mxu2  ;;  %v3446_v13 = vpop.f32.mrf.mxu0 }
 0x2d9   : > { %v3710_v33 = vpop.f32.mrf.mxu3  ;;  %v3622_v52 = vadd.f32 %v3621_v17, %v3533_v9  ;;  %v3535_v21 = vpop.f32.mrf.mxu1  ;;  %v3447_v47 = vadd.f32 %v3446_v13, %v7009_v42  ;;  %v6104_v9 = vld [vmem:[%s6501_s15 + $0x664] sm:$0xf0]  ;;  %v6267_v13 = vld [vmem:[%s7635_s1 + $0x380] sm:$0xff] }
 0x2da   : > { %3963 = vmatpush.bf16.msrb.mxu2 %v6267_v13 }
 0x2db   : > { %v7326_v32 = vadd.f32 %v3710_v33, %v3622_v52  ;;  %v3536_v0 = vadd.f32 %v3535_v21, %v3447_v47  ;;  %3485 = vmatmul.bf16.gmra.mxu0 %v5099_v3  ;;  %v5171_v33 = vor.u32 %v6104_v9, %v5170_v48  ;;  %v6251_v21 = vld [vmem:[%s7635_s1 + $0x300] sm:$0xff]  ;;  %v6112_v48 = vld [vmem:[%s6501_s15 + $0x6ac] sm:$0xf] }
 0x2dc   : > { %3574 = vmatmul.bf16.gmra.mxu1 %v5103_v30  ;;  %3785 = vmatpush.bf16.msrb.mxu0 %v6251_v21  ;;  %v5236_v9 = vld [vmem:[%s6501_s15 + $0x6e8] sm:$0xf0] }
 0x2dd   : > { %3663 = vmatmul.bf16.gmra.mxu2 %v5107_v19 }
 0x2de   : > { %3752 = vmatmul.bf16.gmra.mxu3 %v5111_v6 }
 0x2e0   : > { %v3624_v62 = vpop.f32.mrf.mxu2  ;;  %v3448_v26 = vpop.f32.mrf.mxu0 }
 0x2e1   : > { %v3713_v37 = vpop.f32.mrf.mxu3  ;;  %v3625_v29 = vadd.f32 %v3624_v62, %v3536_v0  ;;  %v3537_v55 = vpop.f32.mrf.mxu1  ;;  %v3449_v42 = vadd.f32 %v3448_v26, %v7020_v57  ;;  %v5175_v57 = vor.u32 %v6096_v59, %v5172_v39  ;;  %v6259_v26 = vld [vmem:[%s7635_s1 + $0x340] sm:$0xff] }
 0x2e2   : > { %3874 = vmatpush.bf16.msrb.mxu1 %v6259_v26  ;;  %v5298_v26 = vld [vmem:[%s6501_s15 + $0x728] sm:$0xf] }
 0x2e3   : > { %v7329_v35 = vadd.f32 %v3713_v37, %v3625_v29  ;;  %v3538_v49 = vadd.f32 %v3537_v55, %v3449_v42  ;;  %v5226_v42 = vld [vmem:[%s6501_s15 + $0x6a0] sm:$0xf] }
 0x2e8   : > { %v3626_v11 = vpop.f32.mrf.mxu2  ;;  %v3451_v31 = vpop.f32.mrf.mxu0 }
 0x2e9   : > { %v3715_v16 = vpop.f32.mrf.mxu3  ;;  %v3627_v63 = vadd.f32 %v3626_v11, %v3538_v49  ;;  %v3540_v17 = vpop.f32.mrf.mxu1  ;;  %v3452_v3 = vadd.f32 %v3451_v31, %v7032_v40  ;;  %v6275_v40 = vld [vmem:[%s7635_s1 + $0x3c0] sm:$0xff]  ;;  %v5239_v31 = vor.u32 %v6112_v48, %v5236_v9 }
 0x2ea   : > { %4052 = vmatpush.bf16.msrb.mxu3 %v6275_v40  ;;  %v6119_v49 = vld [vmem:[%s6501_s15 + $0x6dc] sm:$0xf0] }
 0x2eb   : > { %v7340_v30 = vadd.f32 %v3715_v16, %v3627_v63  ;;  %v3541_v52 = vadd.f32 %v3540_v17, %v3452_v3  ;;  %3490 = vmatmul.bf16.gmra.mxu0 %v5163_v7  ;;  %v5227_v11 = vor.u32 %v6119_v49, %v5226_v42  ;;  %v5235_v63 = vor.u32 %v6120_v25, %v5234_v1  ;;  %v6128_v42 = vld [vmem:[%s6501_s15 + $0x72c] sm:$0xf] }
 0x2ec   : > { %3579 = vmatmul.bf16.gmra.mxu1 %v5167_v20  ;;  %v5300_v49 = vld [vmem:[%s6501_s15 + $0x768] sm:$0xf0] }
 0x2ed   : > { %3668 = vmatmul.bf16.gmra.mxu2 %v5171_v33 }
 0x2ee   : > { %3757 = vmatmul.bf16.gmra.mxu3 %v5175_v57 }
 0x2f0   : > { %v3629_v19 = vpop.f32.mrf.mxu2  ;;  %v3453_v0 = vpop.f32.mrf.mxu0 }
 0x2f1   : > { %v3718_v6 = vpop.f32.mrf.mxu3  ;;  %v3630_v47 = vadd.f32 %v3629_v19, %v3541_v52  ;;  %v3542_v62 = vpop.f32.mrf.mxu1  ;;  %v3454_v37 = vadd.f32 %v3453_v0, %v7046_v14  ;;  %v5231_v14 = vor.u32 %v6111_v24, %v5228_v51  ;;  %v6135_v0 = vld [vmem:[%s6501_s15 + $0x75c] sm:$0xf0] }
 0x2f3   : > { %v7352_v29 = vadd.f32 %v3718_v6, %v3630_v47  ;;  %v3543_v55 = vadd.f32 %v3542_v62, %v3454_v37  ;;  %v5290_v47 = vld [vmem:[%s6501_s15 + $0x720] sm:$0xf]  ;;  %v6127_v62 = vld [vmem:[%s6501_s15 + $0x724] sm:$0xf] }
 0x2f4   : > { %v5292_v37 = vld [vmem:[%s6501_s15 + $0x760] sm:$0xf0]  ;;  %v5291_v1 = vor.u32 %v6135_v0, %v5290_v47  ;;  %v6144_v47 = vld [vmem:[%s6501_s15 + $0x7ac] sm:$0xf] }
 0x2f5   : > { %v5295_v25 = vor.u32 %v6127_v62, %v5292_v37  ;;  %v5364_v0 = vld [vmem:[%s6501_s15 + $0x7e8] sm:$0xf0] }
 0x2f8   : > { %v3631_v59 = vpop.f32.mrf.mxu2  ;;  %v3456_v7 = vpop.f32.mrf.mxu0 }
 0x2f9   : > { %v3720_v39 = vpop.f32.mrf.mxu3  ;;  %v3632_v16 = vadd.f32 %v3631_v59, %v3543_v55  ;;  %v3545_v20 = vpop.f32.mrf.mxu1  ;;  %v3457_v17 = vadd.f32 %v3456_v7, %v7049_v27  ;;  %v6136_v55 = vld [vmem:[%s6501_s15 + $0x764] sm:$0xf0] }
 0x2fb   : > { %v7366_v33 = vadd.f32 %v3720_v39, %v3632_v16  ;;  %v3546_v57 = vadd.f32 %v3545_v20, %v3457_v17  ;;  %3495 = vmatmul.bf16.gmra.mxu0 %v5227_v11  ;;  %v5299_v39 = vor.u32 %v6136_v55, %v5298_v26 }
 0x2fc   : > { %3584 = vmatmul.bf16.gmra.mxu1 %v5231_v14 }
 0x2fd   : > { %3673 = vmatmul.bf16.gmra.mxu2 %v5235_v63 }
 0x2fe   : > { %3762 = vmatmul.bf16.gmra.mxu3 %v5239_v31 }
 0x300   : > { %v3634_v3 = vpop.f32.mrf.mxu2  ;;  %v3458_v21 = vpop.f32.mrf.mxu0 }
 0x301   : > { %v3723_v52 = vpop.f32.mrf.mxu3  ;;  %v3635_v13 = vadd.f32 %v3634_v3, %v3546_v57  ;;  %v3547_v40 = vpop.f32.mrf.mxu1  ;;  %v3459_v27 = vadd.f32 %v3458_v21, %v7060_v54  ;;  %v5303_v54 = vor.u32 %v6128_v42, %v5300_v49  ;;  %v6143_v21 = vld [vmem:[%s6501_s15 + $0x7a4] sm:$0xf] }
 0x303   : > { %v7369_v19 = vadd.f32 %v3723_v52, %v3635_v13  ;;  %v3548_v6 = vadd.f32 %v3547_v40, %v3459_v27  ;;  %v5354_v52 = vld [vmem:[%s6501_s15 + $0x7a0] sm:$0xf]  ;;  %v5356_v40 = vld [vmem:[%s6501_s15 + $0x7e0] sm:$0xf0]  ;;  %v5362_v27 = vld [vmem:[%s6501_s15 + $0x7a8] sm:$0xf] }
 0x304   : > { %v6151_v13 = vld [vmem:[%s6501_s15 + $0x7dc] sm:$0xf0]  ;;  %v5359_v55 = vor.u32 %v6143_v21, %v5356_v40 }
 0x305   : > { %v5355_v26 = vor.u32 %v6151_v13, %v5354_v52  ;;  %v5906_v52 = vld [vmem:[%s6501_s15 + $0x3c] sm:$0xf] }
 0x306   : > { %v4420_v13 = vld [vmem:[%s6501_s15 + $0x78] sm:$0xf0] }
 0x308   : > { %v3636_v24 = vpop.f32.mrf.mxu2  ;;  %v3461_v9 = vpop.f32.mrf.mxu0 }
 0x309   : > { %v3725_v51 = vpop.f32.mrf.mxu3  ;;  %v3637_v48 = vadd.f32 %v3636_v24, %v3548_v6  ;;  %v3550_v59 = vpop.f32.mrf.mxu1  ;;  %v3462_v11 = vadd.f32 %v3461_v9, %v7072_v22  ;;  %v6152_v6 = vld [vmem:[%s6501_s15 + $0x7e4] sm:$0xf0] }
 0x30b   : > { %v7380_v14 = vadd.f32 %v3725_v51, %v3637_v48  ;;  %v3551_v16 = vadd.f32 %v3550_v59, %v3462_v11  ;;  %3500 = vmatmul.bf16.gmra.mxu0 %v5291_v1  ;;  %v5363_v51 = vor.u32 %v6152_v6, %v5362_v27 }
 0x30c   : > { %3589 = vmatmul.bf16.gmra.mxu1 %v5295_v25 }
 0x30d   : > { %3678 = vmatmul.bf16.gmra.mxu2 %v5299_v39 }
 0x30e   : > { %3767 = vmatmul.bf16.gmra.mxu3 %v5303_v54 }
 0x310   : > { %v3639_v7 = vpop.f32.mrf.mxu2  ;;  %v3463_v31 = vpop.f32.mrf.mxu0 }
 0x311   : > { %v3728_v20 = vpop.f32.mrf.mxu3  ;;  %v3640_v63 = vadd.f32 %v3639_v7, %v3551_v16  ;;  %v3552_v17 = vpop.f32.mrf.mxu1  ;;  %v3464_v22 = vadd.f32 %v3463_v31, %v7086_v60  ;;  %v5367_v60 = vor.u32 %v6144_v47, %v5364_v0  ;;  %v5905_v31 = vld [vmem:[%s6501_s15 + $0x34] sm:$0xf] }
 0x313   : > { %v7383_v57 = vadd.f32 %v3728_v20, %v3640_v63  ;;  %v3553_v3 = vadd.f32 %v3552_v17, %v3464_v22  ;;  %v4410_v20 = vld [vmem:[%s6501_s15 + $0x30] sm:$0xf]  ;;  %v4412_v17 = vld [vmem:[%s6501_s15 + $0x70] sm:$0xf0]  ;;  %v4418_v22 = vld [vmem:[%s6501_s15 + $0x38] sm:$0xf] }
 0x314   : > { %v5913_v63 = vld [vmem:[%s6501_s15 + $0x6c] sm:$0xf0]  ;;  %v4415_v6 = vor.u32 %v5905_v31, %v4412_v17 }
 0x315   : > { %v4411_v27 = vor.u32 %v5913_v63, %v4410_v20  ;;  %v5922_v20 = vld [vmem:[%s6501_s15 + $0xbc] sm:$0xf] }
 0x316   : > { %v4484_v63 = vld [vmem:[%s6501_s15 + $0xf8] sm:$0xf0] }
 0x318   : > { %v3641_v62 = vpop.f32.mrf.mxu2  ;;  %v3466_v49 = vpop.f32.mrf.mxu0 }
 0x319   : > { %v3730_v37 = vpop.f32.mrf.mxu3  ;;  %v3642_v42 = vadd.f32 %v3641_v62, %v3553_v3  ;;  %v3555_v24 = vpop.f32.mrf.mxu1  ;;  %v3467_v1 = vadd.f32 %v3466_v49, %v7089_v10  ;;  %v5914_v3 = vld [vmem:[%s6501_s15 + $0x74] sm:$0xf0] }
 0x31b   : > { %v7394_v25 = vadd.f32 %v3730_v37, %v3642_v42  ;;  %v3556_v48 = vadd.f32 %v3555_v24, %v3467_v1  ;;  %3505 = vmatmul.bf16.gmra.mxu0 %v5355_v26  ;;  %v4419_v37 = vor.u32 %v5914_v3, %v4418_v22 }
 0x31c   : > { %3594 = vmatmul.bf16.gmra.mxu1 %v5359_v55 }
 0x31d   : > { %3683 = vmatmul.bf16.gmra.mxu2 %v5363_v51 }
 0x31e   : > { %3772 = vmatmul.bf16.gmra.mxu3 %v5367_v60 }
 0x320   : > { %v3644_v9 = vpop.f32.mrf.mxu2  ;;  %v3468_v54 = vpop.f32.mrf.mxu0 }
 0x321   : > { %v3733_v59 = vpop.f32.mrf.mxu3  ;;  %v3645_v39 = vadd.f32 %v3644_v9, %v3556_v48  ;;  %v3557_v11 = vpop.f32.mrf.mxu1  ;;  %v3469_v10 = vadd.f32 %v3468_v54, %v7100_v56  ;;  %v4423_v56 = vor.u32 %v5906_v52, %v4420_v13  ;;  %v5921_v54 = vld [vmem:[%s6501_s15 + $0xb4] sm:$0xf] }
 0x323   : > { %v7397_v16 = vadd.f32 %v3733_v59, %v3645_v39  ;;  %v3558_v7 = vadd.f32 %v3557_v11, %v3469_v10  ;;  %v4474_v59 = vld [vmem:[%s6501_s15 + $0xb0] sm:$0xf]  ;;  %v4476_v11 = vld [vmem:[%s6501_s15 + $0xf0] sm:$0xf0]  ;;  %v4482_v10 = vld [vmem:[%s6501_s15 + $0xb8] sm:$0xf] }
 0x324   : > { %v5929_v39 = vld [vmem:[%s6501_s15 + $0xec] sm:$0xf0]  ;;  %v4479_v3 = vor.u32 %v5921_v54, %v4476_v11 }
 0x325   : > { %v4475_v22 = vor.u32 %v5929_v39, %v4474_v59  ;;  %v5938_v59 = vld [vmem:[%s6501_s15 + $0x13c] sm:$0xf] }
 0x326   : > { %v4548_v39 = vld [vmem:[%s6501_s15 + $0x178] sm:$0xf0] }
 0x328   : > { %v3646_v21 = vpop.f32.mrf.mxu2  ;;  %v3471_v0 = vpop.f32.mrf.mxu0 }
 0x329   : > { %v3735_v40 = vpop.f32.mrf.mxu3  ;;  %v3647_v47 = vadd.f32 %v3646_v21, %v3558_v7  ;;  %v3560_v62 = vpop.f32.mrf.mxu1  ;;  %v3472_v26 = vadd.f32 %v3471_v0, %v7112_v4  ;;  %v5930_v7 = vld [vmem:[%s6501_s15 + $0xf4] sm:$0xf0] }
 0x32b   : > { %v7408_v55 = vadd.f32 %v3735_v40, %v3647_v47  ;;  %v3561_v42 = vadd.f32 %v3560_v62, %v3472_v26  ;;  %3786 = vmatmul.bf16.vlgmr.msrb.gmra.mxu0 %v4411_v27  ;;  %v4483_v40 = vor.u32 %v5930_v7, %v4482_v10 }
 0x32c   : > { %3875 = vmatmul.bf16.vlgmr.msrb.gmra.mxu1 %v4415_v6 }
 0x32d   : > { %3964 = vmatmul.bf16.vlgmr.msrb.gmra.mxu2 %v4419_v37 }
 0x32e   : > { %4053 = vmatmul.bf16.vlgmr.msrb.gmra.mxu3 %v4423_v56 }
 0x330   : > { %v3649_v49 = vpop.f32.mrf.mxu2  ;;  %v3473_v60 = vpop.f32.mrf.mxu0 }
 0x331   : > { %v3738_v24 = vpop.f32.mrf.mxu3  ;;  %v3650_v51 = vadd.f32 %v3649_v49, %v3561_v42  ;;  %v3562_v1 = vpop.f32.mrf.mxu1  ;;  %v3474_v4 = vadd.f32 %v3473_v60, %v7126_v43  ;;  %v4487_v43 = vor.u32 %v5922_v20, %v4484_v63  ;;  %v5937_v60 = vld [vmem:[%s6501_s15 + $0x134] sm:$0xf] }
 0x333   : > { %v7411_v48 = vadd.f32 %v3738_v24, %v3650_v51  ;;  %v3563_v9 = vadd.f32 %v3562_v1, %v3474_v4  ;;  %v4538_v24 = vld [vmem:[%s6501_s15 + $0x130] sm:$0xf]  ;;  %v4540_v1 = vld [vmem:[%s6501_s15 + $0x170] sm:$0xf0]  ;;  %v4546_v4 = vld [vmem:[%s6501_s15 + $0x138] sm:$0xf] }
 0x334   : > { %v5945_v51 = vld [vmem:[%s6501_s15 + $0x16c] sm:$0xf0]  ;;  %v4543_v7 = vor.u32 %v5937_v60, %v4540_v1 }
 0x335   : > { %v4539_v10 = vor.u32 %v5945_v51, %v4538_v24  ;;  %v5954_v24 = vld [vmem:[%s6501_s15 + $0x1bc] sm:$0xf] }
 0x336   : > { %v4612_v51 = vld [vmem:[%s6501_s15 + $0x1f8] sm:$0xf0] }
 0x338   : > { %v3651_v31 = vpop.f32.mrf.mxu2  ;;  %v3476_v13 = vpop.f32.mrf.mxu0 }
 0x339   : > { %v3740_v17 = vpop.f32.mrf.mxu3  ;;  %v3652_v52 = vadd.f32 %v3651_v31, %v3563_v9  ;;  %v3565_v21 = vpop.f32.mrf.mxu1  ;;  %v3477_v27 = vadd.f32 %v3476_v13, %v7129_v58  ;;  %v5946_v9 = vld [vmem:[%s6501_s15 + $0x174] sm:$0xf0] }
 0x33b   : > { %v7422_v6 = vadd.f32 %v3740_v17, %v3652_v52  ;;  %v3566_v47 = vadd.f32 %v3565_v21, %v3477_v27  ;;  %3791 = vmatmul.bf16.gmra.mxu0 %v4475_v22  ;;  %v4547_v17 = vor.u32 %v5946_v9, %v4546_v4 }
 0x33c   : > { %3880 = vmatmul.bf16.gmra.mxu1 %v4479_v3 }
 0x33d   : > { %3969 = vmatmul.bf16.gmra.mxu2 %v4483_v40 }
 0x33e   : > { %4058 = vmatmul.bf16.gmra.mxu3 %v4487_v43 }
 0x340   : > { %v3654_v0 = vpop.f32.mrf.mxu2  ;;  %v3478_v56 = vpop.f32.mrf.mxu0 }
 0x341   : > { %v3743_v62 = vpop.f32.mrf.mxu3  ;;  %v3655_v37 = vadd.f32 %v3654_v0, %v3566_v47  ;;  %v3567_v26 = vpop.f32.mrf.mxu1  ;;  %v3479_v58 = vadd.f32 %v3478_v56, %v7140_v2  ;;  %v4551_v2 = vor.u32 %v5938_v59, %v4548_v39  ;;  %v5953_v56 = vld [vmem:[%s6501_s15 + $0x1b4] sm:$0xf] }
 0x343   : > { %v7425_v42 = vadd.f32 %v3743_v62, %v3655_v37  ;;  %v3568_v49 = vadd.f32 %v3567_v26, %v3479_v58  ;;  %v4602_v62 = vld [vmem:[%s6501_s15 + $0x1b0] sm:$0xf]  ;;  %v4604_v26 = vld [vmem:[%s6501_s15 + $0x1f0] sm:$0xf0]  ;;  %v4610_v58 = vld [vmem:[%s6501_s15 + $0x1b8] sm:$0xf] }
 0x344   : > { %v5961_v37 = vld [vmem:[%s6501_s15 + $0x1ec] sm:$0xf0]  ;;  %v4607_v9 = vor.u32 %v5953_v56, %v4604_v26 }
 0x345   : > { %v4603_v4 = vor.u32 %v5961_v37, %v4602_v62  ;;  %v5970_v62 = vld [vmem:[%s6501_s15 + $0x23c] sm:$0xf] }
 0x346   : > { %v4676_v37 = vld [vmem:[%s6501_s15 + $0x278] sm:$0xf0] }
 0x348   : > { %v3656_v54 = vpop.f32.mrf.mxu2  ;;  %v3481_v63 = vpop.f32.mrf.mxu0 }
 0x349   : > { %v3745_v11 = vpop.f32.mrf.mxu3  ;;  %v3657_v20 = vadd.f32 %v3656_v54, %v3568_v49  ;;  %v3570_v31 = vpop.f32.mrf.mxu1  ;;  %v3482_v22 = vadd.f32 %v3481_v63, %v7152_v50  ;;  %v5962_v49 = vld [vmem:[%s6501_s15 + $0x1f4] sm:$0xf0] }
 0x34b   : > { %v7436_v3 = vadd.f32 %v3745_v11, %v3657_v20  ;;  %v3571_v52 = vadd.f32 %v3570_v31, %v3482_v22  ;;  %3796 = vmatmul.bf16.gmra.mxu0 %v4539_v10  ;;  %v4611_v11 = vor.u32 %v5962_v49, %v4610_v58 }
 0x34c   : > { %3885 = vmatmul.bf16.gmra.mxu1 %v4543_v7 }
 0x34d   : > { %3974 = vmatmul.bf16.gmra.mxu2 %v4547_v17 }
 0x34e   : > { %4063 = vmatmul.bf16.gmra.mxu3 %v4551_v2 }
 0x350   : > { %v3659_v13 = vpop.f32.mrf.mxu2  ;;  %v3483_v43 = vpop.f32.mrf.mxu0 }
 0x351   : > { %v3748_v21 = vpop.f32.mrf.mxu3  ;;  %v3660_v40 = vadd.f32 %v3659_v13, %v3571_v52  ;;  %v3572_v27 = vpop.f32.mrf.mxu1  ;;  %v3484_v50 = vadd.f32 %v3483_v43, %v7166_v28  ;;  %v4615_v28 = vor.u32 %v5954_v24, %v4612_v51  ;;  %v5969_v43 = vld [vmem:[%s6501_s15 + $0x234] sm:$0xf] }
 0x353   : > { %v7439_v47 = vadd.f32 %v3748_v21, %v3660_v40  ;;  %v3573_v0 = vadd.f32 %v3572_v27, %v3484_v50  ;;  %v4666_v21 = vld [vmem:[%s6501_s15 + $0x230] sm:$0xf]  ;;  %v4668_v27 = vld [vmem:[%s6501_s15 + $0x270] sm:$0xf0]  ;;  %v4674_v50 = vld [vmem:[%s6501_s15 + $0x238] sm:$0xf] }
 0x354   : > { %v5977_v40 = vld [vmem:[%s6501_s15 + $0x26c] sm:$0xf0]  ;;  %v4671_v49 = vor.u32 %v5969_v43, %v4668_v27 }
 0x355   : > { %v4667_v58 = vor.u32 %v5977_v40, %v4666_v21  ;;  %v5986_v21 = vld [vmem:[%s6501_s15 + $0x2bc] sm:$0xf] }
 0x356   : > { %v4740_v40 = vld [vmem:[%s6501_s15 + $0x2f8] sm:$0xf0] }
 0x358   : > { %v3661_v60 = vpop.f32.mrf.mxu2  ;;  %v3486_v39 = vpop.f32.mrf.mxu0 }
 0x359   : > { %v3750_v1 = vpop.f32.mrf.mxu3  ;;  %v3662_v59 = vadd.f32 %v3661_v60, %v3573_v0  ;;  %v3575_v54 = vpop.f32.mrf.mxu1  ;;  %v3487_v10 = vadd.f32 %v3486_v39, %v7169_v41  ;;  %v5978_v0 = vld [vmem:[%s6501_s15 + $0x274] sm:$0xf0] }
 0x35b   : > { %v7450_v7 = vadd.f32 %v3750_v1, %v3662_v59  ;;  %v3576_v20 = vadd.f32 %v3575_v54, %v3487_v10  ;;  %3801 = vmatmul.bf16.gmra.mxu0 %v4603_v4  ;;  %v4675_v1 = vor.u32 %v5978_v0, %v4674_v50 }
 0x35c   : > { %3890 = vmatmul.bf16.gmra.mxu1 %v4607_v9 }
 0x35d   : > { %3979 = vmatmul.bf16.gmra.mxu2 %v4611_v11 }
 0x35e   : > { %4068 = vmatmul.bf16.gmra.mxu3 %v4615_v28 }
 0x360   : > { %v3664_v63 = vpop.f32.mrf.mxu2  ;;  %v3488_v2 = vpop.f32.mrf.mxu0 }
 0x361   : > { %v3753_v31 = vpop.f32.mrf.mxu3  ;;  %v3665_v17 = vadd.f32 %v3664_v63, %v3576_v20  ;;  %v3577_v22 = vpop.f32.mrf.mxu1  ;;  %v3489_v41 = vadd.f32 %v3488_v2, %v7180_v15  ;;  %v4679_v15 = vor.u32 %v5970_v62, %v4676_v37  ;;  %v5985_v2 = vld [vmem:[%s6501_s15 + $0x2b4] sm:$0xf] }
 0x363   : > { %v7453_v52 = vadd.f32 %v3753_v31, %v3665_v17  ;;  %v3578_v13 = vadd.f32 %v3577_v22, %v3489_v41  ;;  %v4730_v31 = vld [vmem:[%s6501_s15 + $0x2b0] sm:$0xf]  ;;  %v4732_v22 = vld [vmem:[%s6501_s15 + $0x2f0] sm:$0xf0]  ;;  %v4738_v41 = vld [vmem:[%s6501_s15 + $0x2b8] sm:$0xf] }
 0x364   : > { %v5993_v17 = vld [vmem:[%s6501_s15 + $0x2ec] sm:$0xf0]  ;;  %v4735_v0 = vor.u32 %v5985_v2, %v4732_v22 }
 0x365   : > { %v4731_v50 = vor.u32 %v5993_v17, %v4730_v31  ;;  %v6002_v31 = vld [vmem:[%s6501_s15 + $0x33c] sm:$0xf] }
 0x366   : > { %v4804_v17 = vld [vmem:[%s6501_s15 + $0x378] sm:$0xf0] }
 0x368   : > { %v3666_v56 = vpop.f32.mrf.mxu2  ;;  %v3491_v51 = vpop.f32.mrf.mxu0 }
 0x369   : > { %v3755_v26 = vpop.f32.mrf.mxu3  ;;  %v3667_v24 = vadd.f32 %v3666_v56, %v3578_v13  ;;  %v3580_v60 = vpop.f32.mrf.mxu1  ;;  %v3492_v4 = vadd.f32 %v3491_v51, %v7192_v34  ;;  %v5994_v13 = vld [vmem:[%s6501_s15 + $0x2f4] sm:$0xf0] }
 0x36b   : > { %v7464_v9 = vadd.f32 %v3755_v26, %v3667_v24  ;;  %v3581_v59 = vadd.f32 %v3580_v60, %v3492_v4  ;;  %3806 = vmatmul.bf16.gmra.mxu0 %v4667_v58  ;;  %v4739_v26 = vor.u32 %v5994_v13, %v4738_v41 }
 0x36c   : > { %3895 = vmatmul.bf16.gmra.mxu1 %v4671_v49 }
 0x36d   : > { %3984 = vmatmul.bf16.gmra.mxu2 %v4675_v1 }
 0x36e   : > { %4073 = vmatmul.bf16.gmra.mxu3 %v4679_v15 }
 0x370   : > { %v3669_v39 = vpop.f32.mrf.mxu2  ;;  %v3493_v28 = vpop.f32.mrf.mxu0 }
 0x371   : > { %v3758_v54 = vpop.f32.mrf.mxu3  ;;  %v3670_v11 = vadd.f32 %v3669_v39, %v3581_v59  ;;  %v3582_v10 = vpop.f32.mrf.mxu1  ;;  %v3494_v34 = vadd.f32 %v3493_v28, %v7206_v12  ;;  %v4743_v12 = vor.u32 %v5986_v21, %v4740_v40  ;;  %v6001_v28 = vld [vmem:[%s6501_s15 + $0x334] sm:$0xf] }
 0x373   : > { %v7467_v20 = vadd.f32 %v3758_v54, %v3670_v11  ;;  %v3583_v63 = vadd.f32 %v3582_v10, %v3494_v34  ;;  %v4794_v54 = vld [vmem:[%s6501_s15 + $0x330] sm:$0xf]  ;;  %v4796_v10 = vld [vmem:[%s6501_s15 + $0x370] sm:$0xf0]  ;;  %v4802_v34 = vld [vmem:[%s6501_s15 + $0x338] sm:$0xf] }
 0x374   : > { %v6009_v11 = vld [vmem:[%s6501_s15 + $0x36c] sm:$0xf0]  ;;  %v4799_v13 = vor.u32 %v6001_v28, %v4796_v10 }
 0x375   : > { %v4795_v41 = vor.u32 %v6009_v11, %v4794_v54  ;;  %v6018_v54 = vld [vmem:[%s6501_s15 + $0x3bc] sm:$0xf] }
 0x376   : > { %v4868_v11 = vld [vmem:[%s6501_s15 + $0x3f8] sm:$0xf0] }
 0x378   : > { %v3671_v43 = vpop.f32.mrf.mxu2  ;;  %v3496_v37 = vpop.f32.mrf.mxu0 }
 0x379   : > { %v3760_v27 = vpop.f32.mrf.mxu3  ;;  %v3672_v62 = vadd.f32 %v3671_v43, %v3583_v63  ;;  %v3585_v56 = vpop.f32.mrf.mxu1  ;;  %v3497_v58 = vadd.f32 %v3496_v37, %v7209_v23  ;;  %v6010_v63 = vld [vmem:[%s6501_s15 + $0x374] sm:$0xf0] }
 0x37b   : > { %v7478_v49 = vadd.f32 %v3760_v27, %v3672_v62  ;;  %v3586_v24 = vadd.f32 %v3585_v56, %v3497_v58  ;;  %3811 = vmatmul.bf16.gmra.mxu0 %v4731_v50  ;;  %v4803_v27 = vor.u32 %v6010_v63, %v4802_v34 }
 0x37c   : > { %3900 = vmatmul.bf16.gmra.mxu1 %v4735_v0 }
 0x37d   : > { %3989 = vmatmul.bf16.gmra.mxu2 %v4739_v26 }
 0x37e   : > { %4078 = vmatmul.bf16.gmra.mxu3 %v4743_v12 }
 0x380   : > { %v3674_v51 = vpop.f32.mrf.mxu2  ;;  %v3498_v15 = vpop.f32.mrf.mxu0 }
 0x381   : > { %v3763_v60 = vpop.f32.mrf.mxu3  ;;  %v3675_v1 = vadd.f32 %v3674_v51, %v3586_v24  ;;  %v3587_v4 = vpop.f32.mrf.mxu1  ;;  %v3499_v23 = vadd.f32 %v3498_v15, %v7220_v38  ;;  %v4807_v38 = vor.u32 %v6002_v31, %v4804_v17  ;;  %v6017_v15 = vld [vmem:[%s6501_s15 + $0x3b4] sm:$0xf] }
 0x383   : > { %v7481_v59 = vadd.f32 %v3763_v60, %v3675_v1  ;;  %v3588_v39 = vadd.f32 %v3587_v4, %v3499_v23  ;;  %v4858_v60 = vld [vmem:[%s6501_s15 + $0x3b0] sm:$0xf]  ;;  %v4860_v4 = vld [vmem:[%s6501_s15 + $0x3f0] sm:$0xf0]  ;;  %v4866_v23 = vld [vmem:[%s6501_s15 + $0x3b8] sm:$0xf] }
 0x384   : > { %v6025_v1 = vld [vmem:[%s6501_s15 + $0x3ec] sm:$0xf0]  ;;  %v4863_v63 = vor.u32 %v6017_v15, %v4860_v4 }
 0x385   : > { %v4859_v34 = vor.u32 %v6025_v1, %v4858_v60  ;;  %v6034_v60 = vld [vmem:[%s6501_s15 + $0x43c] sm:$0xf] }
 0x386   : > { %v4932_v1 = vld [vmem:[%s6501_s15 + $0x478] sm:$0xf0] }
 0x388   : > { %v3676_v2 = vpop.f32.mrf.mxu2  ;;  %v3501_v40 = vpop.f32.mrf.mxu0 }
 0x389   : > { %v3765_v22 = vpop.f32.mrf.mxu3  ;;  %v3677_v21 = vadd.f32 %v3676_v2, %v3588_v39  ;;  %v3590_v43 = vpop.f32.mrf.mxu1  ;;  %v3502_v50 = vadd.f32 %v3501_v40, %v7232_v18  ;;  %v6026_v39 = vld [vmem:[%s6501_s15 + $0x3f4] sm:$0xf0] }
 0x38b   : > { %v7492_v0 = vadd.f32 %v3765_v22, %v3677_v21  ;;  %v3591_v62 = vadd.f32 %v3590_v43, %v3502_v50  ;;  %3816 = vmatmul.bf16.gmra.mxu0 %v4795_v41  ;;  %v4867_v22 = vor.u32 %v6026_v39, %v4866_v23 }
 0x38c   : > { %3905 = vmatmul.bf16.gmra.mxu1 %v4799_v13 }
 0x38d   : > { %3994 = vmatmul.bf16.gmra.mxu2 %v4803_v27 }
 0x38e   : > { %4083 = vmatmul.bf16.gmra.mxu3 %v4807_v38 }
 0x390   : > { %v3679_v37 = vpop.f32.mrf.mxu2  ;;  %v3503_v12 = vpop.f32.mrf.mxu0 }
 0x391   : > { %v3768_v56 = vpop.f32.mrf.mxu3  ;;  %v3680_v26 = vadd.f32 %v3679_v37, %v3591_v62  ;;  %v3592_v58 = vpop.f32.mrf.mxu1  ;;  %v3504_v18 = vadd.f32 %v3503_v12, %v7246_v44  ;;  %v4871_v44 = vor.u32 %v6018_v54, %v4868_v11  ;;  %v6033_v12 = vld [vmem:[%s6501_s15 + $0x434] sm:$0xf] }
 0x393   : > { %v7495_v24 = vadd.f32 %v3768_v56, %v3680_v26  ;;  %v3593_v51 = vadd.f32 %v3592_v58, %v3504_v18  ;;  %v4922_v56 = vld [vmem:[%s6501_s15 + $0x430] sm:$0xf]  ;;  %v4924_v58 = vld [vmem:[%s6501_s15 + $0x470] sm:$0xf0]  ;;  %v4930_v18 = vld [vmem:[%s6501_s15 + $0x438] sm:$0xf] }
 0x394   : > { %v6041_v26 = vld [vmem:[%s6501_s15 + $0x46c] sm:$0xf0]  ;;  %v4927_v39 = vor.u32 %v6033_v12, %v4924_v58 }
 0x395   : > { %v4923_v23 = vor.u32 %v6041_v26, %v4922_v56 }
 0x398   : > { %v3681_v28 = vpop.f32.mrf.mxu2  ;;  %v3506_v17 = vpop.f32.mrf.mxu0 }
 0x399   : > { %v3770_v10 = vpop.f32.mrf.mxu3  ;;  %v3682_v31 = vadd.f32 %v3681_v28, %v3593_v51  ;;  %v3595_v2 = vpop.f32.mrf.mxu1  ;;  %v3507_v41 = vadd.f32 %v3506_v17, %v7249_v8  ;;  %v6042_v51 = vld [vmem:[%s6501_s15 + $0x474] sm:$0xf0] }
 0x39b   : > { %v7506_v13 = vadd.f32 %v3770_v10, %v3682_v31  ;;  %v3596_v21 = vadd.f32 %v3595_v2, %v3507_v41  ;;  %3821 = vmatmul.bf16.gmra.mxu0 %v4859_v34  ;;  %v4935_v10 = vor.u32 %v6034_v60, %v4932_v1 }
 0x39c   : > { %3910 = vmatmul.bf16.gmra.mxu1 %v4863_v63 }
 0x39d   : > { %3999 = vmatmul.bf16.gmra.mxu2 %v4867_v22 }
 0x39e   : > { %4088 = vmatmul.bf16.gmra.mxu3 %v4871_v44 }
 0x3a0   : > { %v3684_v40 = vpop.f32.mrf.mxu2  ;;  %v3508_v38 = vpop.f32.mrf.mxu0 }
 0x3a1   : > { %v3773_v43 = vpop.f32.mrf.mxu3  ;;  %v3685_v27 = vadd.f32 %v3684_v40, %v3596_v21  ;;  %v3597_v50 = vpop.f32.mrf.mxu1  ;;  %v3509_v8 = vadd.f32 %v3508_v38, %v7260_v5  ;;  %v4931_v5 = vor.u32 %v6042_v51, %v4930_v18  ;;  %v4986_v40 = vld [vmem:[%s6501_s15 + $0x4b0] sm:$0xf]  ;;  %v4988_v38 = vld [vmem:[%s6501_s15 + $0x4f0] sm:$0xf0] }
 0x3a3   : > { %v7509_v62 = vadd.f32 %v3773_v43, %v3685_v27  ;;  %v3598_v37 = vadd.f32 %v3597_v50, %v3509_v8  ;;  %v6057_v43 = vld [vmem:[%s6501_s15 + $0x4ec] sm:$0xf0]  ;;  %v6049_v27 = vld [vmem:[%s6501_s15 + $0x4b4] sm:$0xf]  ;;  %v4994_v50 = vld [vmem:[%s6501_s15 + $0x4b8] sm:$0xf] }
 0x3a4   : > { %v6058_v8 = vld [vmem:[%s6501_s15 + $0x4f4] sm:$0xf0]  ;;  %v4987_v18 = vor.u32 %v6057_v43, %v4986_v40  ;;  %v4991_v51 = vor.u32 %v6049_v27, %v4988_v38  ;;  %v6065_v40 = vld [vmem:[%s6501_s15 + $0x534] sm:$0xf] }
 0x3a5   : > { %v5052_v43 = vld [vmem:[%s6501_s15 + $0x570] sm:$0xf0]  ;;  %v5058_v27 = vld [vmem:[%s6501_s15 + $0x538] sm:$0xf] }
 0x3a6   : > { %v6074_v38 = vld [vmem:[%s6501_s15 + $0x574] sm:$0xf0] }
 0x3a8   : > { %v3686_v15 = vpop.f32.mrf.mxu2  ;;  %v3787_v11 = vpop.f32.mrf.mxu0 }
 0x3a9   : > { %v3775_v4 = vpop.f32.mrf.mxu3  ;;  %v3687_v54 = vadd.f32 %v3686_v15, %v3598_v37  ;;  %v3876_v28 = vpop.f32.mrf.mxu1  ;;  %v3788_v63 = vadd.f32 %v3787_v11, %v7272_v61  ;;  %v6050_v37 = vld [vmem:[%s6501_s15 + $0x4bc] sm:$0xf] }
 0x3aa   : > { %v4996_v61 = vld [vmem:[%s6501_s15 + $0x4f8] sm:$0xf0] }
 0x3ab   : > { %v7519_v34 = vadd.f32 %v3775_v4, %v3687_v54  ;;  %3826 = vmatmul.bf16.gmra.mxu0 %v4923_v23  ;;  %v3877_v2 = vadd.f32 %v3876_v28, %v3788_v63  ;;  %v4995_v4 = vor.u32 %v6058_v8, %v4994_v50  ;;  %v6066_v50 = vld [vmem:[%s6501_s15 + $0x53c] sm:$0xf] }
 0x3ac   : > { %3915 = vmatmul.bf16.gmra.mxu1 %v4927_v39  ;;  %v5060_v8 = vld [vmem:[%s6501_s15 + $0x578] sm:$0xf0] }
 0x3ad   : > { %4004 = vmatmul.bf16.gmra.mxu2 %v4931_v5 }
 0x3ae   : > { %4093 = vmatmul.bf16.gmra.mxu3 %v4935_v10 }
 0x3b0   : > { %v3965_v31 = vpop.f32.mrf.mxu2  ;;  %v3789_v22 = vpop.f32.mrf.mxu0 }
 0x3b1   : > { %v4054_v17 = vpop.f32.mrf.mxu3  ;;  %v3878_v44 = vpop.f32.mrf.mxu1  ;;  %v3966_v41 = vadd.f32 %v3965_v31, %v3877_v2  ;;  %v3790_v21 = vadd.f32 %v3789_v22, %v7286_v36  ;;  %v4999_v36 = vor.u32 %v6050_v37, %v4996_v61 }
 0x3b3   : > { %v4055_v56 = vadd.f32 %v4054_v17, %v3966_v41  ;;  %v3879_v26 = vadd.f32 %v3878_v44, %v3790_v21  ;;  %v5050_v41 = vld [vmem:[%s6501_s15 + $0x530] sm:$0xf] }
 0x3b4   : > { %v6073_v21 = vld [vmem:[%s6501_s15 + $0x56c] sm:$0xf0] }
 0x3b5   : > { %v4166_v23 = vmul.f32 0.2, %v4055_v56  ;;  %vm4134_vm0 = vcmp.gt.f32.partialorder %v4055_v56, 0.0 }
 0x3b7   : > { %v4198_v28 = vsel %vm4134_vm0, %v4055_v56, %v4166_v23 }
 0x3b8   : > { %v3967_v12 = vpop.f32.mrf.mxu2  ;;  %v3792_v1 = vpop.f32.mrf.mxu0 }
 0x3b9   : > { %v4056_v58 = vpop.f32.mrf.mxu3  ;;  %v3968_v60 = vadd.f32 %v3967_v12, %v3879_v26  ;;  %v3881_v15 = vpop.f32.mrf.mxu1  ;;  %v3793_v11 = vadd.f32 %v3792_v1, %v7289_v53  ;;  %v5051_v12 = vor.u32 %v6073_v21, %v5050_v41  ;;  %v5059_v1 = vor.u32 %v6074_v38, %v5058_v27  ;;  %v5122_v41 = vld [vmem:[%s6501_s15 + $0x5b8] sm:$0xf] }
 0x3ba   : > { %v6090_v21 = vld [vmem:[%s6501_s15 + $0x5f4] sm:$0xf0] }
 0x3bb   : > { %v4057_v39 = vadd.f32 %v4056_v58, %v3968_v60  ;;  %3831 = vmatmul.bf16.gmra.mxu0 %v4987_v18  ;;  %v3882_v31 = vadd.f32 %v3881_v15, %v3793_v11  ;;  %v5055_v58 = vor.u32 %v6065_v40, %v5052_v43  ;;  %v5063_v15 = vor.u32 %v6066_v50, %v5060_v8  ;;  %v6082_v40 = vld [vmem:[%s6501_s15 + $0x5bc] sm:$0xf] }
 0x3bc   : > { %3920 = vmatmul.bf16.gmra.mxu1 %v4991_v51  ;;  %v5124_v43 = vld [vmem:[%s6501_s15 + $0x5f8] sm:$0xf0] }
 0x3bd   : > { %vm4135_vm1 = vcmp.gt.f32.partialorder %v4057_v39, 0.0  ;;  %v4167_v54 = vmul.f32 0.2, %v4057_v39  ;;  %4009 = vmatmul.bf16.gmra.mxu2 %v4995_v4 }
 0x3be   : > { %4098 = vmatmul.bf16.gmra.mxu3 %v4999_v36 }
 0x3bf   : > { %v4199_v5 = vsel %vm4135_vm1, %v4057_v39, %v4167_v54 }
 0x3c0   : > { %v6286_v10 = vpack.c.bf16 %v4199_v5, %v4198_v28  ;;  %v3970_v63 = vpop.f32.mrf.mxu2  ;;  %v3794_v17 = vpop.f32.mrf.mxu0 }
 0x3c1   : > { %v4059_v53 = vpop.f32.mrf.mxu3  ;;  %v3883_v2 = vpop.f32.mrf.mxu1  ;;  %v3971_v22 = vadd.f32 %v3970_v63, %v3882_v31  ;;  %v3795_v44 = vadd.f32 %v3794_v17, %v7300_v46  ;;  %v5114_v17 = vld [vmem:[%s6501_s15 + $0x5b0] sm:$0xf] }
 0x3c2   : > { %6287 = vst [vmem:[%s7536_s22] sm:$0xff] %v6286_v10  }
 0x3c3   : > { %v4060_v37 = vadd.f32 %v4059_v53, %v3971_v22  ;;  %v3884_v61 = vadd.f32 %v3883_v2, %v3795_v44  ;;  %v6089_v2 = vld [vmem:[%s6501_s15 + $0x5ec] sm:$0xf0]  ;;  %v6081_v22 = vld [vmem:[%s6501_s15 + $0x5b4] sm:$0xf] }
 0x3c4   : > { %v5116_v44 = vld [vmem:[%s6501_s15 + $0x5f0] sm:$0xf0] }
 0x3c5   : > { %v4168_v46 = vmul.f32 0.2, %v4060_v37  ;;  %vm4136_vm2 = vcmp.gt.f32.partialorder %v4060_v37, 0.0 }
 0x3c7   : > { %v4200_v39 = vsel %vm4136_vm2, %v4060_v37, %v4168_v46  ;;  %v5115_v37 = vor.u32 %v6089_v2, %v5114_v17  ;;  %v6098_v17 = vld [vmem:[%s6501_s15 + $0x63c] sm:$0xf] }
 0x3c8   : > { %v3972_v56 = vpop.f32.mrf.mxu2  ;;  %v3797_v51 = vpop.f32.mrf.mxu0  ;;  %v5188_v2 = vld [vmem:[%s6501_s15 + $0x678] sm:$0xf0] }
 0x3c9   : > { %v4061_v26 = vpop.f32.mrf.mxu3  ;;  %v3973_v18 = vadd.f32 %v3972_v56, %v3884_v61  ;;  %v3886_v60 = vpop.f32.mrf.mxu1  ;;  %v3798_v23 = vadd.f32 %v3797_v51, %v7312_v45  ;;  %v5119_v61 = vor.u32 %v6081_v22, %v5116_v44 }
 0x3cb   : > { %v4062_v4 = vadd.f32 %v4061_v26, %v3973_v18  ;;  %3836 = vmatmul.bf16.gmra.mxu0 %v5051_v12  ;;  %v3887_v10 = vadd.f32 %v3886_v60, %v3798_v23  ;;  %v5127_v18 = vor.u32 %v6082_v40, %v5124_v43 }
 0x3cc   : > { %3925 = vmatmul.bf16.gmra.mxu1 %v5055_v58  ;;  %v5123_v58 = vor.u32 %v6090_v21, %v5122_v41 }
 0x3cd   : > { %vm4137_vm3 = vcmp.gt.f32.partialorder %v4062_v4, 0.0  ;;  %v4169_v36 = vmul.f32 0.2, %v4062_v4  ;;  %4014 = vmatmul.bf16.gmra.mxu2 %v5059_v1 }
 0x3ce   : > { %4103 = vmatmul.bf16.gmra.mxu3 %v5063_v15 }
 0x3cf   : > { %v4201_v54 = vsel %vm4137_vm3, %v4062_v4, %v4169_v36 }
 0x3d0   : > { %v6291_v11 = vpack.c.bf16 %v4201_v54, %v4200_v39  ;;  %v3975_v28 = vpop.f32.mrf.mxu2  ;;  %v3799_v63 = vpop.f32.mrf.mxu0 }
 0x3d1   : > { %v4064_v5 = vpop.f32.mrf.mxu3  ;;  %v3888_v53 = vpop.f32.mrf.mxu1  ;;  %v3976_v31 = vadd.f32 %v3975_v28, %v3887_v10  ;;  %v3800_v45 = vadd.f32 %v3799_v63, %v7326_v32  ;;  %v6105_v10 = vld [vmem:[%s6501_s15 + $0x66c] sm:$0xf0]  ;;  %v6097_v63 = vld [vmem:[%s6501_s15 + $0x634] sm:$0xf] }
 0x3d2   : > { %6363 = vst [vmem:[%s7536_s22 + $0x8] sm:$0xff] %v6291_v11  }
 0x3d3   : > { %v4065_v27 = vadd.f32 %v4064_v5, %v3976_v31  ;;  %v3889_v38 = vadd.f32 %v3888_v53, %v3800_v45  ;;  %v5178_v5 = vld [vmem:[%s6501_s15 + $0x630] sm:$0xf]  ;;  %v5180_v53 = vld [vmem:[%s6501_s15 + $0x670] sm:$0xf0]  ;;  %v5186_v31 = vld [vmem:[%s6501_s15 + $0x638] sm:$0xf] }
 0x3d4   : > { %v6106_v45 = vld [vmem:[%s6501_s15 + $0x674] sm:$0xf0]  ;;  %v5179_v40 = vor.u32 %v6105_v10, %v5178_v5  ;;  %v5183_v43 = vor.u32 %v6097_v63, %v5180_v53 }
 0x3d5   : > { %v4170_v32 = vmul.f32 0.2, %v4065_v27  ;;  %vm4138_vm4 = vcmp.gt.f32.partialorder %v4065_v27, 0.0 }
 0x3d7   : > { %v4202_v15 = vsel %vm4138_vm4, %v4065_v27, %v4170_v32 }
 0x3d8   : > { %v3977_v50 = vpop.f32.mrf.mxu2  ;;  %v3802_v26 = vpop.f32.mrf.mxu0 }
 0x3d9   : > { %v4066_v8 = vpop.f32.mrf.mxu3  ;;  %v3978_v56 = vadd.f32 %v3977_v50, %v3889_v38  ;;  %v3891_v12 = vpop.f32.mrf.mxu1  ;;  %v3803_v1 = vadd.f32 %v3802_v26, %v7329_v35 }
 0x3db   : > { %v4067_v51 = vadd.f32 %v4066_v8, %v3978_v56  ;;  %3841 = vmatmul.bf16.gmra.mxu0 %v5115_v37  ;;  %v3892_v39 = vadd.f32 %v3891_v12, %v3803_v1  ;;  %v5187_v8 = vor.u32 %v6106_v45, %v5186_v31  ;;  %v5191_v37 = vor.u32 %v6098_v17, %v5188_v2 }
 0x3dc   : > { %3930 = vmatmul.bf16.gmra.mxu1 %v5119_v61 }
 0x3dd   : > { %vm4139_vm5 = vcmp.gt.f32.partialorder %v4067_v51, 0.0  ;;  %v4171_v60 = vmul.f32 0.2, %v4067_v51  ;;  %4019 = vmatmul.bf16.gmra.mxu2 %v5123_v58 }
 0x3de   : > { %4108 = vmatmul.bf16.gmra.mxu3 %v5127_v18 }
 0x3df   : > { %v4203_v46 = vsel %vm4139_vm5, %v4067_v51, %v4171_v60 }
 0x3e0   : > { %v6296_v4 = vpack.c.bf16 %v4203_v46, %v4202_v15  ;;  %v3980_v36 = vpop.f32.mrf.mxu2  ;;  %v3804_v54 = vpop.f32.mrf.mxu0 }
 0x3e1   : > { %v4069_v23 = vpop.f32.mrf.mxu3  ;;  %v3893_v11 = vpop.f32.mrf.mxu1  ;;  %v3981_v28 = vadd.f32 %v3980_v36, %v3892_v39  ;;  %v3805_v35 = vadd.f32 %v3804_v54, %v7340_v30  ;;  %v6121_v36 = vld [vmem:[%s6501_s15 + $0x6ec] sm:$0xf0]  ;;  %v5244_v39 = vld [vmem:[%s6501_s15 + $0x6f0] sm:$0xf0]  ;;  %v5250_v54 = vld [vmem:[%s6501_s15 + $0x6b8] sm:$0xf] }
 0x3e2   : > { %6364 = vst [vmem:[%s7536_s22 + $0x10] sm:$0xff] %v6296_v4   ;;  %v5242_v4 = vld [vmem:[%s6501_s15 + $0x6b0] sm:$0xf] }
 0x3e3   : > { %v4070_v22 = vadd.f32 %v4069_v23, %v3981_v28  ;;  %v3894_v44 = vadd.f32 %v3893_v11, %v3805_v35  ;;  %v6113_v23 = vld [vmem:[%s6501_s15 + $0x6b4] sm:$0xf]  ;;  %v6122_v11 = vld [vmem:[%s6501_s15 + $0x6f4] sm:$0xf0]  ;;  %v6114_v28 = vld [vmem:[%s6501_s15 + $0x6bc] sm:$0xf]  ;;  %v5243_v31 = vor.u32 %v6121_v36, %v5242_v4 }
 0x3e4   : > { %v5252_v35 = vld [vmem:[%s6501_s15 + $0x6f8] sm:$0xf0]  ;;  %v5247_v45 = vor.u32 %v6113_v23, %v5244_v39 }
 0x3e5   : > { %v4172_v30 = vmul.f32 0.2, %v4070_v22  ;;  %vm4140_vm6 = vcmp.gt.f32.partialorder %v4070_v22, 0.0 }
 0x3e7   : > { %v4204_v12 = vsel %vm4140_vm6, %v4070_v22, %v4172_v30 }
 0x3e8   : > { %v3982_v41 = vpop.f32.mrf.mxu2  ;;  %v3807_v38 = vpop.f32.mrf.mxu0 }
 0x3e9   : > { %v4071_v21 = vpop.f32.mrf.mxu3  ;;  %v3983_v27 = vadd.f32 %v3982_v41, %v3894_v44  ;;  %v3896_v50 = vpop.f32.mrf.mxu1  ;;  %v3808_v26 = vadd.f32 %v3807_v38, %v7352_v29  ;;  %v5251_v44 = vor.u32 %v6122_v11, %v5250_v54  ;;  %v5255_v41 = vor.u32 %v6114_v28, %v5252_v35 }
 0x3eb   : > { %v4072_v61 = vadd.f32 %v4071_v21, %v3983_v27  ;;  %3846 = vmatmul.bf16.gmra.mxu0 %v5179_v40  ;;  %v3897_v60 = vadd.f32 %v3896_v50, %v3808_v26 }
 0x3ec   : > { %3935 = vmatmul.bf16.gmra.mxu1 %v5183_v43 }
 0x3ed   : > { %vm4141_vm7 = vcmp.gt.f32.partialorder %v4072_v61, 0.0  ;;  %v4173_v56 = vmul.f32 0.2, %v4072_v61  ;;  %4024 = vmatmul.bf16.gmra.mxu2 %v5187_v8 }
 0x3ee   : > { %4113 = vmatmul.bf16.gmra.mxu3 %v5191_v37 }
 0x3ef   : > { %v4205_v58 = vsel %vm4141_vm7, %v4072_v61, %v4173_v56 }
 0x3f0   : > { %v6301_v18 = vpack.c.bf16 %v4205_v58, %v4204_v12  ;;  %v3985_v32 = vpop.f32.mrf.mxu2  ;;  %v3809_v1 = vpop.f32.mrf.mxu0  ;;  %v5306_v12 = vld [vmem:[%s6501_s15 + $0x730] sm:$0xf] }
 0x3f1   : > { %v4074_v51 = vpop.f32.mrf.mxu3  ;;  %v3898_v15 = vpop.f32.mrf.mxu1  ;;  %v3986_v46 = vadd.f32 %v3985_v32, %v3897_v60  ;;  %v3810_v29 = vadd.f32 %v3809_v1, %v7366_v33  ;;  %v6137_v58 = vld [vmem:[%s6501_s15 + $0x76c] sm:$0xf0]  ;;  %v5308_v32 = vld [vmem:[%s6501_s15 + $0x770] sm:$0xf0]  ;;  %v6138_v60 = vld [vmem:[%s6501_s15 + $0x774] sm:$0xf0] }
 0x3f2   : > { %6365 = vst [vmem:[%s7536_s22 + $0x18] sm:$0xff] %v6301_v18   ;;  %v6129_v18 = vld [vmem:[%s6501_s15 + $0x734] sm:$0xf]  ;;  %v6130_v1 = vld [vmem:[%s6501_s15 + $0x73c] sm:$0xf]  ;;  %v5307_v23 = vor.u32 %v6137_v58, %v5306_v12 }
 0x3f3   : > { %v4075_v5 = vadd.f32 %v4074_v51, %v3986_v46  ;;  %v3899_v10 = vadd.f32 %v3898_v15, %v3810_v29  ;;  %v5314_v51 = vld [vmem:[%s6501_s15 + $0x738] sm:$0xf]  ;;  %v5316_v15 = vld [vmem:[%s6501_s15 + $0x778] sm:$0xf0]  ;;  %v5311_v39 = vor.u32 %v6129_v18, %v5308_v32 }
 0x3f4   : > { %v5315_v35 = vor.u32 %v6138_v60, %v5314_v51 }
 0x3f5   : > { %v4174_v33 = vmul.f32 0.2, %v4075_v5  ;;  %vm4142_vm8 = vcmp.gt.f32.partialorder %v4075_v5, 0.0 }
 0x3f7   : > { %v4206_v27 = vsel %vm4142_vm8, %v4075_v5, %v4174_v33  ;;  %v5319_v5 = vor.u32 %v6130_v1, %v5316_v15 }
 0x3f8   : > { %v3987_v63 = vpop.f32.mrf.mxu2  ;;  %v3812_v2 = vpop.f32.mrf.mxu0 }
 0x3f9   : > { %v4076_v53 = vpop.f32.mrf.mxu3  ;;  %v3988_v17 = vadd.f32 %v3987_v63, %v3899_v10  ;;  %v3901_v22 = vpop.f32.mrf.mxu1  ;;  %v3813_v43 = vadd.f32 %v3812_v2, %v7369_v19 }
 0x3fb   : > { %v4077_v21 = vadd.f32 %v4076_v53, %v3988_v17  ;;  %3851 = vmatmul.bf16.gmra.mxu0 %v5243_v31  ;;  %v3902_v30 = vadd.f32 %v3901_v22, %v3813_v43  ;;  %v6153_v43 = vld [vmem:[%s6501_s15 + $0x7ec] sm:$0xf0] }
 0x3fc   : > { %3940 = vmatmul.bf16.gmra.mxu1 %v5247_v45 }
 0x3fd   : > { %vm4143_vm9 = vcmp.gt.f32.partialorder %v4077_v21, 0.0  ;;  %v4175_v40 = vmul.f32 0.2, %v4077_v21  ;;  %4029 = vmatmul.bf16.gmra.mxu2 %v5251_v44 }
 0x3fe   : > { %4118 = vmatmul.bf16.gmra.mxu3 %v5255_v41 }
 0x3ff   : > { %v4207_v38 = vsel %vm4143_vm9, %v4077_v21, %v4175_v40  ;;  %v5370_v40 = vld [vmem:[%s6501_s15 + $0x7b0] sm:$0xf] }
 0x400   : > { %v6306_v50 = vpack.c.bf16 %v4207_v38, %v4206_v27  ;;  %v3990_v8 = vpop.f32.mrf.mxu2  ;;  %v3814_v61 = vpop.f32.mrf.mxu0  ;;  %v6145_v27 = vld [vmem:[%s6501_s15 + $0x7b4] sm:$0xf]  ;;  %v5371_v12 = vor.u32 %v6153_v43, %v5370_v40 }
 0x401   : > { %v4079_v37 = vpop.f32.mrf.mxu3  ;;  %v3903_v56 = vpop.f32.mrf.mxu1  ;;  %v3991_v26 = vadd.f32 %v3990_v8, %v3902_v30  ;;  %v3815_v19 = vadd.f32 %v3814_v61, %v7380_v14  ;;  %v5372_v38 = vld [vmem:[%s6501_s15 + $0x7f0] sm:$0xf0]  ;;  %v6154_v8 = vld [vmem:[%s6501_s15 + $0x7f4] sm:$0xf0]  ;;  %v5380_v30 = vld [vmem:[%s6501_s15 + $0x7f8] sm:$0xf0] }
 0x402   : > { %6366 = vst [vmem:[%s7536_s22 + $0x20] sm:$0xff] %v6306_v50   ;;  %v5378_v50 = vld [vmem:[%s6501_s15 + $0x7b8] sm:$0xf]  ;;  %v5375_v58 = vor.u32 %v6145_v27, %v5372_v38 }
 0x403   : > { %v4080_v46 = vadd.f32 %v4079_v37, %v3991_v26  ;;  %v3904_v29 = vadd.f32 %v3903_v56, %v3815_v19  ;;  %v6146_v37 = vld [vmem:[%s6501_s15 + $0x7bc] sm:$0xf]  ;;  %v5379_v60 = vor.u32 %v6154_v8, %v5378_v50 }
 0x404   : > { %v5383_v1 = vor.u32 %v6146_v37, %v5380_v30 }
 0x405   : > { %v4176_v14 = vmul.f32 0.2, %v4080_v46  ;;  %vm4144_vm10 = vcmp.gt.f32.partialorder %v4080_v46, 0.0 }
 0x407   : > { %v4208_v31 = vsel %vm4144_vm10, %v4080_v46, %v4176_v14 }
 0x408   : > { %v3992_v4 = vpop.f32.mrf.mxu2  ;;  %v3817_v11 = vpop.f32.mrf.mxu0 }
 0x409   : > { %v4081_v36 = vpop.f32.mrf.mxu3  ;;  %v3993_v54 = vadd.f32 %v3992_v4, %v3904_v29  ;;  %v3906_v28 = vpop.f32.mrf.mxu1  ;;  %v3818_v53 = vadd.f32 %v3817_v11, %v7383_v57 }
 0x40b   : > { %v4082_v10 = vadd.f32 %v4081_v36, %v3993_v54  ;;  %3856 = vmatmul.bf16.gmra.mxu0 %v5307_v23  ;;  %v3907_v44 = vadd.f32 %v3906_v28, %v3818_v53 }
 0x40c   : > { %3945 = vmatmul.bf16.gmra.mxu1 %v5311_v39 }
 0x40d   : > { %vm4145_vm11 = vcmp.gt.f32.partialorder %v4082_v10, 0.0  ;;  %v4177_v63 = vmul.f32 0.2, %v4082_v10  ;;  %4034 = vmatmul.bf16.gmra.mxu2 %v5315_v35 }
 0x40e   : > { %4123 = vmatmul.bf16.gmra.mxu3 %v5319_v5 }
 0x40f   : > { %v4209_v45 = vsel %vm4145_vm11, %v4082_v10, %v4177_v63 }
 0x410   : > { %v6311_v17 = vpack.c.bf16 %v4209_v45, %v4208_v31  ;;  %v3995_v2 = vpop.f32.mrf.mxu2  ;;  %v3819_v41 = vpop.f32.mrf.mxu0 }
 0x411   : > { %v4084_v22 = vpop.f32.mrf.mxu3  ;;  %v3908_v33 = vpop.f32.mrf.mxu1  ;;  %v3996_v21 = vadd.f32 %v3995_v2, %v3907_v44  ;;  %v3820_v57 = vadd.f32 %v3819_v41, %v7394_v25 }
 0x412   : > { %6367 = vst [vmem:[%s7536_s22 + $0x28] sm:$0xff] %v6311_v17  }
 0x413   : > { %v4085_v61 = vadd.f32 %v4084_v22, %v3996_v21  ;;  %v3909_v56 = vadd.f32 %v3908_v33, %v3820_v57 }
 0x415   : > { %v4178_v25 = vmul.f32 0.2, %v4085_v61  ;;  %vm4146_vm12 = vcmp.gt.f32.partialorder %v4085_v61, 0.0 }
 0x417   : > { %v4210_v4 = vsel %vm4146_vm12, %v4085_v61, %v4178_v25 }
 0x418   : > { %v3997_v26 = vpop.f32.mrf.mxu2  ;;  %v3822_v32 = vpop.f32.mrf.mxu0 }
 0x419   : > { %v4086_v19 = vpop.f32.mrf.mxu3  ;;  %v3998_v18 = vadd.f32 %v3997_v26, %v3909_v56  ;;  %v3911_v51 = vpop.f32.mrf.mxu1  ;;  %v3823_v29 = vadd.f32 %v3822_v32, %v7397_v16 }
 0x41b   : > { %v4087_v15 = vadd.f32 %v4086_v19, %v3998_v18  ;;  %3861 = vmatmul.bf16.gmra.mxu0 %v5371_v12  ;;  %v3912_v11 = vadd.f32 %v3911_v51, %v3823_v29 }
 0x41c   : > { %3950 = vmatmul.bf16.gmra.mxu1 %v5375_v58 }
 0x41d   : > { %vm4147_vm13 = vcmp.gt.f32.partialorder %v4087_v15, 0.0  ;;  %v4179_v46 = vmul.f32 0.2, %v4087_v15  ;;  %4039 = vmatmul.bf16.gmra.mxu2 %v5379_v60 }
 0x41e   : > { %4128 = vmatmul.bf16.gmra.mxu3 %v5383_v1 }
 0x41f   : > { %v4211_v36 = vsel %vm4147_vm13, %v4087_v15, %v4179_v46 }
 0x420   : > { %v6316_v23 = vpack.c.bf16 %v4211_v36, %v4210_v4  ;;  %v4000_v39 = vpop.f32.mrf.mxu2  ;;  %v3824_v28 = vpop.f32.mrf.mxu0 }
 0x421   : > { %v4089_v54 = vpop.f32.mrf.mxu3  ;;  %v3913_v35 = vpop.f32.mrf.mxu1  ;;  %v4001_v5 = vadd.f32 %v4000_v39, %v3912_v11  ;;  %v3825_v14 = vadd.f32 %v3824_v28, %v7408_v55 }
 0x422   : > { %6368 = vst [vmem:[%s7536_s22 + $0x30] sm:$0xff] %v6316_v23  }
 0x423   : > { %v4090_v10 = vadd.f32 %v4089_v54, %v4001_v5  ;;  %v3914_v63 = vadd.f32 %v3913_v35, %v3825_v14 }
 0x425   : > { %v4180_v2 = vmul.f32 0.2, %v4090_v10  ;;  %vm4148_vm14 = vcmp.gt.f32.partialorder %v4090_v10, 0.0 }
 0x427   : > { %v4212_v33 = vsel %vm4148_vm14, %v4090_v10, %v4180_v2 }
 0x428   : > { %v4002_v53 = vpop.f32.mrf.mxu2  ;;  %v3827_v16 = vpop.f32.mrf.mxu0 }
 0x429   : > { %v4091_v31 = vpop.f32.mrf.mxu3  ;;  %v4003_v45 = vadd.f32 %v4002_v53, %v3914_v63  ;;  %v3916_v17 = vpop.f32.mrf.mxu1  ;;  %v3828_v41 = vadd.f32 %v3827_v16, %v7411_v48 }
 0x42b   : > { %v4092_v22 = vadd.f32 %v4091_v31, %v4003_v45  ;;  %v3917_v43 = vadd.f32 %v3916_v17, %v3828_v41 }
 0x42d   : > { %vm4149_vm15 = vcmp.gt.f32.partialorder %v4092_v22, 0.0  ;;  %v4181_v44 = vmul.f32 0.2, %v4092_v22 }
 0x42f   : > { %v4213_v21 = vsel %vm4149_vm15, %v4092_v22, %v4181_v44 }
 0x430   : > { %v6321_v57 = vpack.c.bf16 %v4213_v21, %v4212_v33  ;;  %v4005_v40 = vpop.f32.mrf.mxu2  ;;  %v3829_v27 = vpop.f32.mrf.mxu0 }
 0x431   : > { %v4094_v55 = vpop.f32.mrf.mxu3  ;;  %v3918_v38 = vpop.f32.mrf.mxu1  ;;  %v4006_v50 = vadd.f32 %v4005_v40, %v3917_v43  ;;  %v3830_v8 = vadd.f32 %v3829_v27, %v7422_v6 }
 0x432   : > { %6369 = vst [vmem:[%s7536_s22 + $0x38] sm:$0xff] %v6321_v57  }
 0x433   : > { %v4095_v37 = vadd.f32 %v4094_v55, %v4006_v50  ;;  %v3919_v30 = vadd.f32 %v3918_v38, %v3830_v8 }
 0x435   : > { %v4182_v12 = vmul.f32 0.2, %v4095_v37  ;;  %vm4150_vm0 = vcmp.gt.f32.partialorder %v4095_v37, 0.0 }
 0x437   : > { %v4214_v51 = vsel %vm4150_vm0, %v4095_v37, %v4182_v12 }
 0x438   : > { %v4007_v61 = vpop.f32.mrf.mxu2  ;;  %v3832_v19 = vpop.f32.mrf.mxu0 }
 0x439   : > { %v4096_v56 = vpop.f32.mrf.mxu3  ;;  %v4008_v26 = vadd.f32 %v4007_v61, %v3919_v30  ;;  %v3921_v48 = vpop.f32.mrf.mxu1  ;;  %v3833_v32 = vadd.f32 %v3832_v19, %v7425_v42 }
 0x43b   : > { %v4097_v58 = vadd.f32 %v4096_v56, %v4008_v26  ;;  %v3922_v15 = vadd.f32 %v3921_v48, %v3833_v32 }
 0x43d   : > { %vm4151_vm1 = vcmp.gt.f32.partialorder %v4097_v58, 0.0  ;;  %v4183_v18 = vmul.f32 0.2, %v4097_v58 }
 0x43f   : > { %v4215_v60 = vsel %vm4151_vm1, %v4097_v58, %v4183_v18 }
 0x440   : > { %v6326_v1 = vpack.c.bf16 %v4215_v60, %v4214_v51  ;;  %v4010_v25 = vpop.f32.mrf.mxu2  ;;  %v3834_v46 = vpop.f32.mrf.mxu0 }
 0x441   : > { %v4099_v6 = vpop.f32.mrf.mxu3  ;;  %v3923_v29 = vpop.f32.mrf.mxu1  ;;  %v4011_v4 = vadd.f32 %v4010_v25, %v3922_v15  ;;  %v3835_v36 = vadd.f32 %v3834_v46, %v7436_v3 }
 0x442   : > { %6370 = vst [vmem:[%s7536_s22 + $0x40] sm:$0xff] %v6326_v1  }
 0x443   : > { %v4100_v23 = vadd.f32 %v4099_v6, %v4011_v4  ;;  %v3924_v39 = vadd.f32 %v3923_v29, %v3835_v36 }
 0x445   : > { %v4184_v5 = vmul.f32 0.2, %v4100_v23  ;;  %vm4152_vm2 = vcmp.gt.f32.partialorder %v4100_v23, 0.0 }
 0x447   : > { %v4216_v53 = vsel %vm4152_vm2, %v4100_v23, %v4184_v5 }
 0x448   : > { %v4012_v54 = vpop.f32.mrf.mxu2  ;;  %v3837_v35 = vpop.f32.mrf.mxu0 }
 0x449   : > { %v4101_v11 = vpop.f32.mrf.mxu3  ;;  %v4013_v28 = vadd.f32 %v4012_v54, %v3924_v39  ;;  %v3926_v42 = vpop.f32.mrf.mxu1  ;;  %v3838_v63 = vadd.f32 %v3837_v35, %v7439_v47 }
 0x44b   : > { %v4102_v14 = vadd.f32 %v4101_v11, %v4013_v28  ;;  %v3927_v17 = vadd.f32 %v3926_v42, %v3838_v63 }
 0x44d   : > { %vm4153_vm3 = vcmp.gt.f32.partialorder %v4102_v14, 0.0  ;;  %v4185_v10 = vmul.f32 0.2, %v4102_v14 }
 0x44f   : > { %v4217_v31 = vsel %vm4153_vm3, %v4102_v14, %v4185_v10 }
 0x450   : > { %v6331_v45 = vpack.c.bf16 %v4217_v31, %v4216_v53  ;;  %v4015_v16 = vpop.f32.mrf.mxu2  ;;  %v3839_v2 = vpop.f32.mrf.mxu0 }
 0x451   : > { %v4104_v3 = vpop.f32.mrf.mxu3  ;;  %v3928_v22 = vpop.f32.mrf.mxu1  ;;  %v4016_v44 = vadd.f32 %v4015_v16, %v3927_v17  ;;  %v3840_v41 = vadd.f32 %v3839_v2, %v7450_v7 }
 0x452   : > { %6371 = vst [vmem:[%s7536_s22 + $0x48] sm:$0xff] %v6331_v45  }
 0x453   : > { %v4105_v33 = vadd.f32 %v4104_v3, %v4016_v44  ;;  %v3929_v21 = vadd.f32 %v3928_v22, %v3840_v41 }
 0x455   : > { %v4186_v27 = vmul.f32 0.2, %v4105_v33  ;;  %vm4154_vm4 = vcmp.gt.f32.partialorder %v4105_v33, 0.0 }
 0x457   : > { %v4218_v37 = vsel %vm4154_vm4, %v4105_v33, %v4186_v27 }
 0x458   : > { %v4017_v57 = vpop.f32.mrf.mxu2  ;;  %v3842_v43 = vpop.f32.mrf.mxu0 }
 0x459   : > { %v4106_v40 = vpop.f32.mrf.mxu3  ;;  %v4018_v55 = vadd.f32 %v4017_v57, %v3929_v21  ;;  %v3931_v47 = vpop.f32.mrf.mxu1  ;;  %v3843_v8 = vadd.f32 %v3842_v43, %v7453_v52 }
 0x45b   : > { %v4107_v38 = vadd.f32 %v4106_v40, %v4018_v55  ;;  %v3932_v26 = vadd.f32 %v3931_v47, %v3843_v8 }
 0x45d   : > { %vm4155_vm5 = vcmp.gt.f32.partialorder %v4107_v38, 0.0  ;;  %v4187_v50 = vmul.f32 0.2, %v4107_v38 }
 0x45f   : > { %v4219_v30 = vsel %vm4155_vm5, %v4107_v38, %v4187_v50 }
 0x460   : > { %v6336_v61 = vpack.c.bf16 %v4219_v30, %v4218_v37  ;;  %v4020_v56 = vpop.f32.mrf.mxu2  ;;  %v3844_v19 = vpop.f32.mrf.mxu0 }
 0x461   : > { %v4109_v7 = vpop.f32.mrf.mxu3  ;;  %v3933_v48 = vpop.f32.mrf.mxu1  ;;  %v4021_v12 = vadd.f32 %v4020_v56, %v3932_v26  ;;  %v3845_v58 = vadd.f32 %v3844_v19, %v7464_v9 }
 0x462   : > { %6372 = vst [vmem:[%s7536_s22 + $0x50] sm:$0xff] %v6336_v61  }
 0x463   : > { %v4110_v18 = vadd.f32 %v4109_v7, %v4021_v12  ;;  %v3934_v32 = vadd.f32 %v3933_v48, %v3845_v58 }
 0x465   : > { %v4188_v6 = vmul.f32 0.2, %v4110_v18  ;;  %vm4156_vm6 = vcmp.gt.f32.partialorder %v4110_v18, 0.0 }
 0x467   : > { %v4220_v4 = vsel %vm4156_vm6, %v4110_v18, %v4188_v6 }
 0x468   : > { %v4022_v51 = vpop.f32.mrf.mxu2  ;;  %v3847_v25 = vpop.f32.mrf.mxu0 }
 0x469   : > { %v4111_v60 = vpop.f32.mrf.mxu3  ;;  %v4023_v1 = vadd.f32 %v4022_v51, %v3934_v32  ;;  %v3936_v52 = vpop.f32.mrf.mxu1  ;;  %v3848_v29 = vadd.f32 %v3847_v25, %v7467_v20 }
 0x46b   : > { %v4112_v15 = vadd.f32 %v4111_v60, %v4023_v1  ;;  %v3937_v54 = vadd.f32 %v3936_v52, %v3848_v29 }
 0x46d   : > { %vm4157_vm7 = vcmp.gt.f32.partialorder %v4112_v15, 0.0  ;;  %v4189_v46 = vmul.f32 0.2, %v4112_v15 }
 0x46f   : > { %v4221_v36 = vsel %vm4157_vm7, %v4112_v15, %v4189_v46 }
 0x470   : > { %v6341_v23 = vpack.c.bf16 %v4221_v36, %v4220_v4  ;;  %v4025_v39 = vpop.f32.mrf.mxu2  ;;  %v3849_v11 = vpop.f32.mrf.mxu0 }
 0x471   : > { %v4114_v9 = vpop.f32.mrf.mxu3  ;;  %v3938_v28 = vpop.f32.mrf.mxu1  ;;  %v4026_v35 = vadd.f32 %v4025_v39, %v3937_v54  ;;  %v3850_v42 = vadd.f32 %v3849_v11, %v7478_v49 }
 0x472   : > { %6373 = vst [vmem:[%s7536_s22 + $0x58] sm:$0xff] %v6341_v23  }
 0x473   : > { %v4115_v5 = vadd.f32 %v4114_v9, %v4026_v35  ;;  %v3939_v14 = vadd.f32 %v3938_v28, %v3850_v42 }
 0x475   : > { %v4190_v45 = vmul.f32 0.2, %v4115_v5  ;;  %vm4158_vm8 = vcmp.gt.f32.partialorder %v4115_v5, 0.0 }
 0x477   : > { %v4222_v2 = vsel %vm4158_vm8, %v4115_v5, %v4190_v45 }
 0x478   : > { %v4027_v10 = vpop.f32.mrf.mxu2  ;;  %v3852_v31 = vpop.f32.mrf.mxu0 }
 0x479   : > { %v4116_v63 = vpop.f32.mrf.mxu3  ;;  %v4028_v53 = vadd.f32 %v4027_v10, %v3939_v14  ;;  %v3941_v20 = vpop.f32.mrf.mxu1  ;;  %v3853_v17 = vadd.f32 %v3852_v31, %v7481_v59 }
 0x47b   : > { %v4117_v16 = vadd.f32 %v4116_v63, %v4028_v53  ;;  %v3942_v33 = vadd.f32 %v3941_v20, %v3853_v17 }
 0x47d   : > { %vm4159_vm9 = vcmp.gt.f32.partialorder %v4117_v16, 0.0  ;;  %v4191_v3 = vmul.f32 0.2, %v4117_v16 }
 0x47f   : > { %v4223_v22 = vsel %vm4159_vm9, %v4117_v16, %v4191_v3 }
 0x480   : > { %v6346_v44 = vpack.c.bf16 %v4223_v22, %v4222_v2  ;;  %v4030_v41 = vpop.f32.mrf.mxu2  ;;  %v3854_v21 = vpop.f32.mrf.mxu0 }
 0x481   : > { %v4119_v49 = vpop.f32.mrf.mxu3  ;;  %v3943_v57 = vpop.f32.mrf.mxu1  ;;  %v4031_v40 = vadd.f32 %v4030_v41, %v3942_v33  ;;  %v3855_v55 = vadd.f32 %v3854_v21, %v7492_v0 }
 0x482   : > { %6374 = vst [vmem:[%s7536_s22 + $0x60] sm:$0xff] %v6346_v44  }
 0x483   : > { %v4120_v43 = vadd.f32 %v4119_v49, %v4031_v40  ;;  %v3944_v47 = vadd.f32 %v3943_v57, %v3855_v55 }
 0x485   : > { %v4192_v37 = vmul.f32 0.2, %v4120_v43  ;;  %vm4160_vm10 = vcmp.gt.f32.partialorder %v4120_v43, 0.0 }
 0x487   : > { %v4224_v7 = vsel %vm4160_vm10, %v4120_v43, %v4192_v37 }
 0x488   : > { %v4032_v27 = vpop.f32.mrf.mxu2  ;;  %v3857_v8 = vpop.f32.mrf.mxu0 }
 0x489   : > { %v4121_v38 = vpop.f32.mrf.mxu3  ;;  %v4033_v50 = vadd.f32 %v4032_v27, %v3944_v47  ;;  %v3946_v59 = vpop.f32.mrf.mxu1  ;;  %v3858_v56 = vadd.f32 %v3857_v8, %v7495_v24 }
 0x48b   : > { %v4122_v30 = vadd.f32 %v4121_v38, %v4033_v50  ;;  %v3947_v12 = vadd.f32 %v3946_v59, %v3858_v56 }
 0x48d   : > { %vm4161_vm11 = vcmp.gt.f32.partialorder %v4122_v30, 0.0  ;;  %v4193_v61 = vmul.f32 0.2, %v4122_v30 }
 0x48f   : > { %v4225_v26 = vsel %vm4161_vm11, %v4122_v30, %v4193_v61 }
 0x490   : > { %v6351_v19 = vpack.c.bf16 %v4225_v26, %v4224_v7  ;;  %v4035_v48 = vpop.f32.mrf.mxu2  ;;  %v3859_v58 = vpop.f32.mrf.mxu0 }
 0x491   : > { %v4124_v0 = vpop.f32.mrf.mxu3  ;;  %v3948_v18 = vpop.f32.mrf.mxu1  ;;  %v4036_v32 = vadd.f32 %v4035_v48, %v3947_v12  ;;  %v3860_v51 = vadd.f32 %v3859_v58, %v7506_v13 }
 0x492   : > { %6375 = vst [vmem:[%s7536_s22 + $0x68] sm:$0xff] %v6351_v19  }
 0x493   : > { %v4125_v60 = vadd.f32 %v4124_v0, %v4036_v32  ;;  %v3949_v1 = vadd.f32 %v3948_v18, %v3860_v51 }
 0x495   : > { %v4194_v24 = vmul.f32 0.2, %v4125_v60  ;;  %vm4162_vm12 = vcmp.gt.f32.partialorder %v4125_v60, 0.0 }
 0x497   : > { %v4226_v23 = vsel %vm4162_vm12, %v4125_v60, %v4194_v24 }
 0x498   : > { %v4037_v25 = vpop.f32.mrf.mxu2  ;;  %v3862_v15 = vpop.f32.mrf.mxu0 }
 0x499   : > { %v4126_v52 = vpop.f32.mrf.mxu3  ;;  %v4038_v6 = vadd.f32 %v4037_v25, %v3949_v1  ;;  %v3951_v29 = vpop.f32.mrf.mxu1  ;;  %v3863_v36 = vadd.f32 %v3862_v15, %v7509_v62 }
 0x49b   : > { %v4127_v46 = vadd.f32 %v4126_v52, %v4038_v6  ;;  %v3952_v11 = vadd.f32 %v3951_v29, %v3863_v36 }
 0x49d   : > { %vm4163_vm13 = vcmp.gt.f32.partialorder %v4127_v46, 0.0  ;;  %v4195_v4 = vmul.f32 0.2, %v4127_v46 }
 0x49f   : > { %v4227_v39 = vsel %vm4163_vm13, %v4127_v46, %v4195_v4 }
 0x4a0   : > { %v6356_v9 = vpack.c.bf16 %v4227_v39, %v4226_v23  ;;  %v4040_v54 = vpop.f32.mrf.mxu2  ;;  %v3864_v28 = vpop.f32.mrf.mxu0 }
 0x4a1   : > { %v4129_v13 = vpop.f32.mrf.mxu3  ;;  %v4041_v35 = vadd.f32 %v4040_v54, %v3952_v11  ;;  %v3865_v42 = vadd.f32 %v3864_v28, %v7519_v34  ;;  %v3953_v5 = vpop.f32.mrf.mxu1 }
 0x4a2   : > { %6376 = vst [vmem:[%s7536_s22 + $0x70] sm:$0xff] %v6356_v9  }
 0x4a3   : > { %v4130_v14 = vadd.f32 %v4129_v13, %v4041_v35  ;;  %v3954_v10 = vadd.f32 %v3953_v5, %v3865_v42 }
 0x4a5   : > { %v4196_v20 = vmul.f32 0.2, %v4130_v14  ;;  %vm4164_vm14 = vcmp.gt.f32.partialorder %v4130_v14, 0.0 }
 0x4a7   : > { %v4228_v16 = vsel %vm4164_vm14, %v4130_v14, %v4196_v20 }
 0x4a8   : > { %v4042_v63 = vpop.f32.mrf.mxu2 }
 0x4a9   : > { %v4043_v53 = vadd.f32 %v4042_v63, %v3954_v10  ;;  %v4131_v31 = vpop.f32.mrf.mxu3 }
 0x4ab   : > { %v4132_v62 = vadd.f32 %v4131_v31, %v4043_v53 }
 0x4ad   : > { %vm4165_vm15 = vcmp.gt.f32.partialorder %v4132_v62, 0.0  ;;  %v4197_v45 = vmul.f32 0.2, %v4132_v62 }
 0x4af   : > { %v4229_v3 = vsel %vm4165_vm15, %v4132_v62, %v4197_v45 }
 0x4b0   : > { %v6361_v17 = vpack.c.bf16 %v4229_v3, %v4228_v16 }
 0x4b2   : > { %6377 = vst [vmem:[%s7536_s22 + $0x78] sm:$0xff] %v6361_v17  }
 0x4b3 PF: > { %s12_s9 = sadd.s32 1, %s6392_s9  }
 0x4b4   : > { %p9_p4 = scmp.ge.s32.totalorder %s12_s9, 4  }
 0x4b6   :  { %11 = sbr.rel (!%p9_p4) target bundleno = 1 (0x1), region = 58 }

// kernel: discriminator_forward.7
= control target key start
LH: loop header
LB: loop body
LE: loop exit
PB: predicated region body
PF: predicated region fallthrough
CT: control target
= control target key end

     0   :  { %s5333_s1 = inlined_call_operand.vmem [shape: bf16[2048,128], index: 1, kind: input, shape index: {}]   ;;  %s5334_s0 = inlined_call_operand.vmem [shape: bf16[128,2048], index: 0, kind: input, shape index: {}]   ;;  %s5335_s2 = inlined_call_operand.vmem [shape: bf16[128,128], index: 2, kind: output, shape index: {}]  }
   0x1   :  { %v3830_v0 = vld [vmem:[%s5333_s1 + $0x38] sm:$0xff]  ;;  %v3829_v4 = vld [vmem:[%s5333_s1 + $0x30] sm:$0xff]  ;;  %v3828_v8 = vld [vmem:[%s5333_s1 + $0x28] sm:$0xff] }
   0x2   :  { %v3838_v1 = vld [vmem:[%s5333_s1 + $0x78] sm:$0xff]  ;;  %1803 = vmatpush.bf16.msra.mxu0 %v3830_v0  ;;  %v3837_v5 = vld [vmem:[%s5333_s1 + $0x70] sm:$0xff]  ;;  %v3836_v9 = vld [vmem:[%s5333_s1 + $0x68] sm:$0xff] }
   0x3   :  { %v3846_v2 = vld [vmem:[%s5333_s1 + $0xb8] sm:$0xff]  ;;  %1852 = vmatpush.bf16.msra.mxu1 %v3838_v1  ;;  %v3845_v6 = vld [vmem:[%s5333_s1 + $0xb0] sm:$0xff]  ;;  %v3844_v10 = vld [vmem:[%s5333_s1 + $0xa8] sm:$0xff] }
   0x4   :  { %v3854_v3 = vld [vmem:[%s5333_s1 + $0xf8] sm:$0xff]  ;;  %1901 = vmatpush.bf16.msra.mxu2 %v3846_v2  ;;  %v3853_v7 = vld [vmem:[%s5333_s1 + $0xf0] sm:$0xff]  ;;  %v3852_v11 = vld [vmem:[%s5333_s1 + $0xe8] sm:$0xff] }
   0x5   :  { %1950 = vmatpush.bf16.msra.mxu3 %v3854_v3  ;;  %v3827_v12 = vld [vmem:[%s5333_s1 + $0x20] sm:$0xff]  ;;  %v3826_v16 = vld [vmem:[%s5333_s1 + $0x18] sm:$0xff]  ;;  %v3825_v20 = vld [vmem:[%s5333_s1 + $0x10] sm:$0xff] }
   0x6   :  { %1804 = vmatpush.bf16.msra.mxu0 %v3829_v4  ;;  %v3835_v13 = vld [vmem:[%s5333_s1 + $0x60] sm:$0xff]  ;;  %v3834_v17 = vld [vmem:[%s5333_s1 + $0x58] sm:$0xff]  ;;  %v3833_v21 = vld [vmem:[%s5333_s1 + $0x50] sm:$0xff] }
   0x7   :  { %1853 = vmatpush.bf16.msra.mxu1 %v3837_v5  ;;  %v3843_v14 = vld [vmem:[%s5333_s1 + $0xa0] sm:$0xff]  ;;  %v3842_v18 = vld [vmem:[%s5333_s1 + $0x98] sm:$0xff]  ;;  %v3841_v22 = vld [vmem:[%s5333_s1 + $0x90] sm:$0xff] }
   0x8   :  { %1902 = vmatpush.bf16.msra.mxu2 %v3845_v6  ;;  %v3851_v15 = vld [vmem:[%s5333_s1 + $0xe0] sm:$0xff]  ;;  %v3850_v19 = vld [vmem:[%s5333_s1 + $0xd8] sm:$0xff]  ;;  %v3849_v23 = vld [vmem:[%s5333_s1 + $0xd0] sm:$0xff] }
   0x9   :  { %1951 = vmatpush.bf16.msra.mxu3 %v3853_v7  ;;  %v3824_v24 = vld [vmem:[%s5333_s1 + $0x8] sm:$0xff]  ;;  %v3823_v28 = vld [vmem:[%s5333_s1] sm:$0xff]  ;;  %v3878_v40 = vld [vmem:[%s5333_s1 + $0x1b8] sm:$0xff] }
   0xa   :  { %1805 = vmatpush.bf16.msra.mxu0 %v3828_v8  ;;  %v3832_v25 = vld [vmem:[%s5333_s1 + $0x48] sm:$0xff]  ;;  %v3831_v29 = vld [vmem:[%s5333_s1 + $0x40] sm:$0xff]  ;;  %v3862_v41 = vld [vmem:[%s5333_s1 + $0x138] sm:$0xff] }
   0xb   :  { %1854 = vmatpush.bf16.msra.mxu1 %v3836_v9  ;;  %v3840_v26 = vld [vmem:[%s5333_s1 + $0x88] sm:$0xff]  ;;  %v3839_v30 = vld [vmem:[%s5333_s1 + $0x80] sm:$0xff]  ;;  %v3886_v46 = vld [vmem:[%s5333_s1 + $0x1f8] sm:$0xff] }
   0xc   :  { %1903 = vmatpush.bf16.msra.mxu2 %v3844_v10  ;;  %v3848_v27 = vld [vmem:[%s5333_s1 + $0xc8] sm:$0xff]  ;;  %v3847_v31 = vld [vmem:[%s5333_s1 + $0xc0] sm:$0xff]  ;;  %v3870_v47 = vld [vmem:[%s5333_s1 + $0x178] sm:$0xff] }
   0xd   :  { %1952 = vmatpush.bf16.msra.mxu3 %v3852_v11  ;;  %v2673_v32 = vld [vmem:[%s5334_s0] sm:$0xf]  ;;  %v3695_v34 = vld [vmem:[%s5334_s0 + $0x4] sm:$0xf]  ;;  %v2681_v36 = vld [vmem:[%s5334_s0 + $0x8] sm:$0xf] }
   0xe   :  { %1806 = vmatpush.bf16.msra.mxu0 %v3827_v12  ;;  %v3703_v33 = vld [vmem:[%s5334_s0 + $0x3c] sm:$0xf0]  ;;  %v2675_v35 = vld [vmem:[%s5334_s0 + $0x40] sm:$0xf0]  ;;  %v3704_v37 = vld [vmem:[%s5334_s0 + $0x44] sm:$0xf0] }
   0xf   :  { %1855 = vmatpush.bf16.msra.mxu1 %v3835_v13  ;;  %v3696_v38 = vld [vmem:[%s5334_s0 + $0xc] sm:$0xf]  ;;  %v2674_v42 = vor.u32 %v3703_v33, %v2673_v32  ;;  %v2678_v43 = vor.u32 %v3695_v34, %v2675_v35  ;;  %v2682_v44 = vor.u32 %v3704_v37, %v2681_v36  ;;  %v3877_v48 = vld [vmem:[%s5333_s1 + $0x1b0] sm:$0xff]  ;;  %v2737_v56 = vld [vmem:[%s5334_s0 + $0x80] sm:$0xf] }
  0x10   :  { %1904 = vmatpush.bf16.msra.mxu2 %v3843_v14  ;;  %v2683_v39 = vld [vmem:[%s5334_s0 + $0x48] sm:$0xf0]  ;;  %v3861_v49 = vld [vmem:[%s5333_s1 + $0x130] sm:$0xff]  ;;  %v3719_v57 = vld [vmem:[%s5334_s0 + $0xbc] sm:$0xf0] }
  0x11   :  { %1953 = vmatpush.bf16.msra.mxu3 %v3851_v15  ;;  %v2686_v45 = vor.u32 %v3696_v38, %v2683_v39  ;;  %v3885_v50 = vld [vmem:[%s5333_s1 + $0x1f0] sm:$0xff]  ;;  %v3876_v52 = vld [vmem:[%s5333_s1 + $0x1a8] sm:$0xff]  ;;  %v3711_v58 = vld [vmem:[%s5334_s0 + $0x84] sm:$0xf]  ;;  %v2738_v0 = vor.u32 %v3719_v57, %v2737_v56 }
  0x12   :  { %1807 = vmatpush.bf16.msra.mxu0 %v3826_v16  ;;  %v3869_v51 = vld [vmem:[%s5333_s1 + $0x170] sm:$0xff]  ;;  %v3860_v53 = vld [vmem:[%s5333_s1 + $0x128] sm:$0xff]  ;;  %v2739_v59 = vld [vmem:[%s5334_s0 + $0xc0] sm:$0xf0] }
  0x13   :  { %1856 = vmatpush.bf16.msra.mxu1 %v3834_v17  ;;  %v3884_v54 = vld [vmem:[%s5333_s1 + $0x1e8] sm:$0xff]  ;;  %v2742_v1 = vor.u32 %v3711_v58, %v2739_v59  ;;  %v3875_v4 = vld [vmem:[%s5333_s1 + $0x1a0] sm:$0xff]  ;;  %v3873_v36 = vld [vmem:[%s5333_s1 + $0x190] sm:$0xff] }
  0x14   :  { %1905 = vmatpush.bf16.msra.mxu2 %v3842_v18  ;;  %v3868_v55 = vld [vmem:[%s5333_s1 + $0x168] sm:$0xff]  ;;  %v3859_v5 = vld [vmem:[%s5333_s1 + $0x120] sm:$0xff]  ;;  %v3857_v37 = vld [vmem:[%s5333_s1 + $0x110] sm:$0xff] }
  0x15   :  { %1954 = vmatpush.bf16.msra.mxu3 %v3850_v19  ;;  %v2745_v60 = vld [vmem:[%s5334_s0 + $0x88] sm:$0xf]  ;;  %v3712_v62 = vld [vmem:[%s5334_s0 + $0x8c] sm:$0xf]  ;;  %v3883_v6 = vld [vmem:[%s5333_s1 + $0x1e0] sm:$0xff] }
  0x16   :  { %1808 = vmatpush.bf16.msra.mxu0 %v3825_v20  ;;  %v3720_v61 = vld [vmem:[%s5334_s0 + $0xc4] sm:$0xf0]  ;;  %v2747_v63 = vld [vmem:[%s5334_s0 + $0xc8] sm:$0xf0]  ;;  %v3867_v7 = vld [vmem:[%s5333_s1 + $0x160] sm:$0xff] }
  0x17   :  { %1857 = vmatpush.bf16.msra.mxu1 %v3833_v21  ;;  %v2746_v2 = vor.u32 %v3720_v61, %v2745_v60  ;;  %v2750_v3 = vor.u32 %v3712_v62, %v2747_v63  ;;  %v2801_v8 = vld [vmem:[%s5334_s0 + $0x100] sm:$0xf]  ;;  %v3727_v10 = vld [vmem:[%s5334_s0 + $0x104] sm:$0xf]  ;;  %v2809_v12 = vld [vmem:[%s5334_s0 + $0x108] sm:$0xf] }
  0x18   :  { %1906 = vmatpush.bf16.msra.mxu2 %v3841_v22  ;;  %v3735_v9 = vld [vmem:[%s5334_s0 + $0x13c] sm:$0xf0]  ;;  %v2803_v11 = vld [vmem:[%s5334_s0 + $0x140] sm:$0xf0]  ;;  %v3736_v13 = vld [vmem:[%s5334_s0 + $0x144] sm:$0xf0] }
  0x19   :  { %1955 = vmatpush.bf16.msra.mxu3 %v3849_v23  ;;  %v3728_v14 = vld [vmem:[%s5334_s0 + $0x10c] sm:$0xf]  ;;  %v2802_v16 = vor.u32 %v3735_v9, %v2801_v8  ;;  %v2806_v17 = vor.u32 %v3727_v10, %v2803_v11  ;;  %v2810_v18 = vor.u32 %v3736_v13, %v2809_v12  ;;  %v3874_v20 = vld [vmem:[%s5333_s1 + $0x198] sm:$0xff]  ;;  %v3881_v38 = vld [vmem:[%s5333_s1 + $0x1d0] sm:$0xff] }
  0x1a   :  { %1809 = vmatpush.bf16.msra.mxu0 %v3824_v24  ;;  %v2811_v15 = vld [vmem:[%s5334_s0 + $0x148] sm:$0xf0]  ;;  %v3858_v21 = vld [vmem:[%s5333_s1 + $0x118] sm:$0xff]  ;;  %v2865_v24 = vld [vmem:[%s5334_s0 + $0x180] sm:$0xf] }
  0x1b   :  { %1858 = vmatpush.bf16.msra.mxu1 %v3832_v25  ;;  %v2814_v19 = vor.u32 %v3728_v14, %v2811_v15  ;;  %v3882_v22 = vld [vmem:[%s5333_s1 + $0x1d8] sm:$0xff]  ;;  %v3751_v25 = vld [vmem:[%s5334_s0 + $0x1bc] sm:$0xf0]  ;;  %v3865_v39 = vld [vmem:[%s5333_s1 + $0x150] sm:$0xff] }
  0x1c   :  { %1907 = vmatpush.bf16.msra.mxu2 %v3840_v26  ;;  %v3866_v23 = vld [vmem:[%s5333_s1 + $0x158] sm:$0xff]  ;;  %v3743_v26 = vld [vmem:[%s5334_s0 + $0x184] sm:$0xf]  ;;  %v2866_v32 = vor.u32 %v3751_v25, %v2865_v24  ;;  %v2993_v56 = vld [vmem:[%s5334_s0 + $0x280] sm:$0xf] }
  0x1d   :  { %1956 = vmatpush.bf16.msra.mxu3 %v3848_v27  ;;  %v2867_v27 = vld [vmem:[%s5334_s0 + $0x1c0] sm:$0xf0]  ;;  %v3783_v57 = vld [vmem:[%s5334_s0 + $0x2bc] sm:$0xf0]  ;;  %v3001_v60 = vld [vmem:[%s5334_s0 + $0x288] sm:$0xf] }
  0x1e   :  { %1810 = vmatpush.bf16.msra.mxu0 %v3823_v28  ;;  %v2873_v28 = vld [vmem:[%s5334_s0 + $0x188] sm:$0xf]  ;;  %v2870_v33 = vor.u32 %v3743_v26, %v2867_v27  ;;  %v3775_v58 = vld [vmem:[%s5334_s0 + $0x284] sm:$0xf]  ;;  %v3776_v62 = vld [vmem:[%s5334_s0 + $0x28c] sm:$0xf] }
  0x1f   :  { %1859 = vmatpush.bf16.msra.mxu1 %v3831_v29  ;;  %v3752_v29 = vld [vmem:[%s5334_s0 + $0x1c4] sm:$0xf0]  ;;  %v2995_v59 = vld [vmem:[%s5334_s0 + $0x2c0] sm:$0xf0]  ;;  %v3003_v63 = vld [vmem:[%s5334_s0 + $0x2c8] sm:$0xf0] }
  0x20   :  { %1908 = vmatpush.bf16.msra.mxu2 %v3839_v30  ;;  %v3744_v30 = vld [vmem:[%s5334_s0 + $0x18c] sm:$0xf]  ;;  %v2874_v34 = vor.u32 %v3752_v29, %v2873_v28  ;;  %v3784_v61 = vld [vmem:[%s5334_s0 + $0x2c4] sm:$0xf0]  ;;  %v3057_v8 = vld [vmem:[%s5334_s0 + $0x300] sm:$0xf] }
  0x21   :  { %1957 = vmatpush.bf16.msra.mxu3 %v3847_v31  ;;  %1811 = vmatmul.bf16.vlgmr.msra.gmra.mxu0 %v2674_v42  ;;  %v2875_v31 = vld [vmem:[%s5334_s0 + $0x1c8] sm:$0xf0]  ;;  %v3759_v42 = vld [vmem:[%s5334_s0 + $0x204] sm:$0xf]  ;;  %v3799_v9 = vld [vmem:[%s5334_s0 + $0x33c] sm:$0xf0] }
  0x22   :  { %1999 = vmatpush.bf16.msrb.mxu0 %v3862_v41  ;;  %1860 = vmatmul.bf16.vlgmr.msra.gmra.mxu1 %v2678_v43  ;;  %v2878_v35 = vor.u32 %v3744_v30, %v2875_v31  ;;  %v3767_v41 = vld [vmem:[%s5334_s0 + $0x23c] sm:$0xf0]  ;;  %v2931_v43 = vld [vmem:[%s5334_s0 + $0x240] sm:$0xf0]  ;;  %v3065_v12 = vld [vmem:[%s5334_s0 + $0x308] sm:$0xf] }
  0x23   :  { %1909 = vmatmul.bf16.vlgmr.msra.gmra.mxu2 %v2682_v44  ;;  %2048 = vmatpush.bf16.msrb.mxu1 %v3870_v47  ;;  %v2937_v44 = vld [vmem:[%s5334_s0 + $0x208] sm:$0xf]  ;;  %v2939_v47 = vld [vmem:[%s5334_s0 + $0x248] sm:$0xf0]  ;;  %v3791_v10 = vld [vmem:[%s5334_s0 + $0x304] sm:$0xf] }
  0x24   :  { %2097 = vmatpush.bf16.msrb.mxu2 %v3878_v40  ;;  %1958 = vmatmul.bf16.vlgmr.msra.gmra.mxu3 %v2686_v45  ;;  %v2929_v40 = vld [vmem:[%s5334_s0 + $0x200] sm:$0xf]  ;;  %v3768_v45 = vld [vmem:[%s5334_s0 + $0x244] sm:$0xf0]  ;;  %v3059_v11 = vld [vmem:[%s5334_s0 + $0x340] sm:$0xf0] }
  0x25   :  { %2146 = vmatpush.bf16.msrb.mxu3 %v3886_v46  ;;  %v3760_v46 = vld [vmem:[%s5334_s0 + $0x20c] sm:$0xf]  ;;  %v3800_v13 = vld [vmem:[%s5334_s0 + $0x344] sm:$0xf0]  ;;  %v3121_v24 = vld [vmem:[%s5334_s0 + $0x380] sm:$0xf] }
  0x26   :  { %2000 = vmatpush.bf16.msrb.mxu0 %v3861_v49  ;;  %v2934_v49 = vor.u32 %v3759_v42, %v2931_v43  ;;  %v3792_v14 = vld [vmem:[%s5334_s0 + $0x30c] sm:$0xf]  ;;  %v3815_v25 = vld [vmem:[%s5334_s0 + $0x3bc] sm:$0xf0]  ;;  %v3807_v26 = vld [vmem:[%s5334_s0 + $0x384] sm:$0xf] }
  0x27   :  { %2049 = vmatpush.bf16.msrb.mxu1 %v3869_v51  ;;  %v2942_v51 = vor.u32 %v3760_v46, %v2939_v47  ;;  %v3067_v15 = vld [vmem:[%s5334_s0 + $0x348] sm:$0xf0]  ;;  %v3123_v27 = vld [vmem:[%s5334_s0 + $0x3c0] sm:$0xf0]  ;;  %v3129_v28 = vld [vmem:[%s5334_s0 + $0x388] sm:$0xf] }
  0x28   :  { %2098 = vmatpush.bf16.msrb.mxu2 %v3877_v48  ;;  %v2930_v48 = vor.u32 %v3767_v41, %v2929_v40  ;;  %v3816_v29 = vld [vmem:[%s5334_s0 + $0x3c4] sm:$0xf0]  ;;  %v3808_v30 = vld [vmem:[%s5334_s0 + $0x38c] sm:$0xf]  ;;  %v2689_v40 = vld [vmem:[%s5334_s0 + $0x10] sm:$0xf] }
  0x29   :  { %2147 = vmatpush.bf16.msrb.mxu3 %v3885_v50  ;;  %v2938_v50 = vor.u32 %v3768_v45, %v2937_v44  ;;  %v3131_v31 = vld [vmem:[%s5334_s0 + $0x3c8] sm:$0xf0]  ;;  %v3705_v41 = vld [vmem:[%s5334_s0 + $0x4c] sm:$0xf0]  ;;  %v3697_v42 = vld [vmem:[%s5334_s0 + $0x14] sm:$0xf] }
  0x2a   :  { %2001 = vmatpush.bf16.msrb.mxu0 %v3860_v53  ;;  %v3856_v53 = vld [vmem:[%s5333_s1 + $0x108] sm:$0xff]  ;;  %v2691_v43 = vld [vmem:[%s5334_s0 + $0x50] sm:$0xf0]  ;;  %v2697_v44 = vld [vmem:[%s5334_s0 + $0x18] sm:$0xf] }
  0x2b   :  { %2050 = vmatpush.bf16.msrb.mxu1 %v3868_v55  ;;  %v3864_v55 = vld [vmem:[%s5333_s1 + $0x148] sm:$0xff]  ;;  %v3706_v45 = vld [vmem:[%s5334_s0 + $0x54] sm:$0xf0]  ;;  %v3698_v46 = vld [vmem:[%s5334_s0 + $0x1c] sm:$0xf] }
  0x2c   :  { %2099 = vmatpush.bf16.msrb.mxu2 %v3876_v52  ;;  %v3872_v52 = vld [vmem:[%s5333_s1 + $0x188] sm:$0xff]  ;;  %v2699_v47 = vld [vmem:[%s5334_s0 + $0x58] sm:$0xf0] }
  0x2d   :  { %2148 = vmatpush.bf16.msrb.mxu3 %v3884_v54  ;;  %v3880_v54 = vld [vmem:[%s5333_s1 + $0x1c8] sm:$0xff] }
  0x2e   :  { %2002 = vmatpush.bf16.msrb.mxu0 %v3859_v5  ;;  %v3855_v5 = vld [vmem:[%s5333_s1 + $0x100] sm:$0xff] }
  0x2f   :  { %2051 = vmatpush.bf16.msrb.mxu1 %v3867_v7  ;;  %v3863_v7 = vld [vmem:[%s5333_s1 + $0x140] sm:$0xff] }
  0x30   :  { %2100 = vmatpush.bf16.msrb.mxu2 %v3875_v4  ;;  %v3871_v4 = vld [vmem:[%s5333_s1 + $0x180] sm:$0xff] }
  0x31   :  { %1816 = vmatmul.bf16.gmra.mxu0 %v2738_v0  ;;  %2149 = vmatpush.bf16.msrb.mxu3 %v3883_v6  ;;  %v2994_v0 = vor.u32 %v3783_v57, %v2993_v56  ;;  %v3879_v6 = vld [vmem:[%s5333_s1 + $0x1c0] sm:$0xff]  ;;  %v3892_v56 = vld [vmem:[%s5333_s1 + $0x228] sm:$0xff] }
  0x32   :  { %1865 = vmatmul.bf16.gmra.mxu1 %v2742_v1  ;;  %2003 = vmatpush.bf16.msrb.mxu0 %v3858_v21  ;;  %v2998_v1 = vor.u32 %v3775_v58, %v2995_v59  ;;  %v3894_v21 = vld [vmem:[%s5333_s1 + $0x238] sm:$0xff]  ;;  %v3916_v57 = vld [vmem:[%s5333_s1 + $0x2e8] sm:$0xff] }
  0x33   :  { %1914 = vmatmul.bf16.gmra.mxu2 %v2746_v2  ;;  %2052 = vmatpush.bf16.msrb.mxu1 %v3866_v23  ;;  %v3002_v2 = vor.u32 %v3784_v61, %v3001_v60  ;;  %v3902_v23 = vld [vmem:[%s5333_s1 + $0x278] sm:$0xff] }
  0x34   :  { %1963 = vmatmul.bf16.gmra.mxu3 %v2750_v3  ;;  %2101 = vmatpush.bf16.msrb.mxu2 %v3874_v20  ;;  %v3006_v3 = vor.u32 %v3776_v62, %v3003_v63  ;;  %v3910_v20 = vld [vmem:[%s5333_s1 + $0x2b8] sm:$0xff] }
  0x35   :  { %2150 = vmatpush.bf16.msrb.mxu3 %v3882_v22  ;;  %v3918_v22 = vld [vmem:[%s5333_s1 + $0x2f8] sm:$0xff] }
  0x36   :  { %2004 = vmatpush.bf16.msrb.mxu0 %v3857_v37  ;;  %v3893_v37 = vld [vmem:[%s5333_s1 + $0x230] sm:$0xff] }
  0x37   :  { %2053 = vmatpush.bf16.msrb.mxu1 %v3865_v39  ;;  %v3901_v39 = vld [vmem:[%s5333_s1 + $0x270] sm:$0xff] }
  0x38   :  { %2102 = vmatpush.bf16.msrb.mxu2 %v3873_v36  ;;  %v3909_v36 = vld [vmem:[%s5333_s1 + $0x2b0] sm:$0xff] }
  0x39   :  { %2151 = vmatpush.bf16.msrb.mxu3 %v3881_v38  ;;  %v3917_v38 = vld [vmem:[%s5333_s1 + $0x2f0] sm:$0xff] }
  0x3a   :  { %2005 = vmatpush.bf16.msrb.mxu0 %v3856_v53  ;;  %v2702_v53 = vor.u32 %v3698_v46, %v2699_v47 }
  0x3b   :  { %2054 = vmatpush.bf16.msrb.mxu1 %v3864_v55  ;;  %v3908_v55 = vld [vmem:[%s5333_s1 + $0x2a8] sm:$0xff] }
  0x3c   :  { %2103 = vmatpush.bf16.msrb.mxu2 %v3872_v52  ;;  %v2698_v52 = vor.u32 %v3706_v45, %v2697_v44 }
  0x3d   :  { %2152 = vmatpush.bf16.msrb.mxu3 %v3880_v54 }
  0x3e   :  { %2006 = vmatpush.bf16.msrb.mxu0 %v3855_v5  ;;  %v2755_v5 = vld [vmem:[%s5334_s0 + $0xd0] sm:$0xf0] }
  0x3f   :  { %2055 = vmatpush.bf16.msrb.mxu1 %v3863_v7  ;;  %v3722_v7 = vld [vmem:[%s5334_s0 + $0xd4] sm:$0xf0] }
  0x40   :  { %2104 = vmatpush.bf16.msrb.mxu2 %v3871_v4  ;;  %v3713_v4 = vld [vmem:[%s5334_s0 + $0x94] sm:$0xf] }
  0x41   :  { %1821 = vmatmul.bf16.gmra.mxu0 %v2802_v16  ;;  %2153 = vmatpush.bf16.msrb.mxu3 %v3879_v6  ;;  %v3058_v16 = vor.u32 %v3799_v9, %v3057_v8  ;;  %v2761_v6 = vld [vmem:[%s5334_s0 + $0x98] sm:$0xf]  ;;  %v3714_v8 = vld [vmem:[%s5334_s0 + $0x9c] sm:$0xf] }
  0x42   :  { %1870 = vmatmul.bf16.gmra.mxu1 %v2806_v17  ;;  %v3062_v17 = vor.u32 %v3791_v10, %v3059_v11  ;;  %2195 = vmatpush.bf16.msra.mxu0 %v3894_v21  ;;  %v2763_v9 = vld [vmem:[%s5334_s0 + $0xd8] sm:$0xf0]  ;;  %v3907_v21 = vld [vmem:[%s5333_s1 + $0x2a0] sm:$0xff] }
  0x43   :  { %1919 = vmatmul.bf16.gmra.mxu2 %v2810_v18  ;;  %v3066_v18 = vor.u32 %v3800_v13, %v3065_v12  ;;  %2244 = vmatpush.bf16.msra.mxu1 %v3902_v23  ;;  %v2758_v13 = vor.u32 %v3713_v4, %v2755_v5  ;;  %v3915_v23 = vld [vmem:[%s5333_s1 + $0x2e0] sm:$0xff]  ;;  %v3754_v4 = vld [vmem:[%s5334_s0 + $0x1d4] sm:$0xf0]  ;;  %v3746_v5 = vld [vmem:[%s5334_s0 + $0x19c] sm:$0xf] }
  0x44   :  { %1968 = vmatmul.bf16.gmra.mxu3 %v2814_v19  ;;  %v3070_v19 = vor.u32 %v3792_v14, %v3067_v15  ;;  %2293 = vmatpush.bf16.msra.mxu2 %v3910_v20 }
  0x45   :  { %2342 = vmatpush.bf16.msra.mxu3 %v3918_v22  ;;  %v3891_v22 = vld [vmem:[%s5333_s1 + $0x220] sm:$0xff] }
  0x46   :  { %2196 = vmatpush.bf16.msra.mxu0 %v3893_v37  ;;  %v3738_v37 = vld [vmem:[%s5334_s0 + $0x154] sm:$0xf0] }
  0x47   :  { %2245 = vmatpush.bf16.msra.mxu1 %v3901_v39  ;;  %v2827_v39 = vld [vmem:[%s5334_s0 + $0x158] sm:$0xf0] }
  0x48   :  { %2294 = vmatpush.bf16.msra.mxu2 %v3909_v36  ;;  %v2825_v36 = vld [vmem:[%s5334_s0 + $0x118] sm:$0xf] }
  0x49   :  { %2343 = vmatpush.bf16.msra.mxu3 %v3917_v38  ;;  %v3730_v38 = vld [vmem:[%s5334_s0 + $0x11c] sm:$0xf]  ;;  %v2826_v47 = vor.u32 %v3738_v37, %v2825_v36  ;;  %v3770_v36 = vld [vmem:[%s5334_s0 + $0x254] sm:$0xf0] }
  0x4a   :  { %2197 = vmatpush.bf16.msra.mxu0 %v3892_v56  ;;  %v3762_v37 = vld [vmem:[%s5334_s0 + $0x21c] sm:$0xf] }
  0x4c   :  { %2295 = vmatpush.bf16.msra.mxu2 %v3908_v55 }
  0x4d   :  { %2344 = vmatpush.bf16.msra.mxu3 %v3916_v57 }
  0x4e   :  { %2198 = vmatpush.bf16.msra.mxu0 %v3891_v22 }
  0x50   :  { %2296 = vmatpush.bf16.msra.mxu2 %v3907_v21  ;;  %v3913_v21 = vld [vmem:[%s5333_s1 + $0x2d0] sm:$0xff] }
  0x51   :  { %1826 = vmatmul.bf16.gmra.mxu0 %v2866_v32  ;;  %v3122_v32 = vor.u32 %v3815_v25, %v3121_v24  ;;  %2345 = vmatpush.bf16.msra.mxu3 %v3915_v23 }
  0x52   :  { %1875 = vmatmul.bf16.gmra.mxu1 %v2870_v33  ;;  %v3126_v33 = vor.u32 %v3807_v26, %v3123_v27 }
  0x53   :  { %1924 = vmatmul.bf16.gmra.mxu2 %v2874_v34  ;;  %v3130_v34 = vor.u32 %v3816_v29, %v3129_v28 }
  0x54   :  { %1973 = vmatmul.bf16.gmra.mxu3 %v2878_v35  ;;  %v3134_v35 = vor.u32 %v3808_v30, %v3131_v31  ;;  %v3899_v31 = vld [vmem:[%s5333_s1 + $0x260] sm:$0xff] }
  0x61   :  { %1831 = vmatmul.bf16.gmra.mxu0 %v2930_v48  ;;  %v2690_v48 = vor.u32 %v3705_v41, %v2689_v40 }
  0x62   :  { %1880 = vmatmul.bf16.gmra.mxu1 %v2934_v49  ;;  %v2694_v49 = vor.u32 %v3697_v42, %v2691_v43 }
  0x63   :  { %1929 = vmatmul.bf16.gmra.mxu2 %v2938_v50 }
  0x64   :  { %1978 = vmatmul.bf16.gmra.mxu3 %v2942_v51 }
  0x71   :  { %1836 = vmatmul.bf16.gmra.mxu0 %v2994_v0 }
  0x72   :  { %1885 = vmatmul.bf16.gmra.mxu1 %v2998_v1  ;;  %v3900_v1 = vld [vmem:[%s5333_s1 + $0x268] sm:$0xff] }
  0x73   :  { %1934 = vmatmul.bf16.gmra.mxu2 %v3002_v2  ;;  %v2753_v2 = vld [vmem:[%s5334_s0 + $0x90] sm:$0xf]  ;;  %2246 = vmatpush.bf16.msra.mxu1 %v3900_v1  ;;  %v3745_v1 = vld [vmem:[%s5334_s0 + $0x194] sm:$0xf] }
  0x74   :  { %1983 = vmatmul.bf16.gmra.mxu3 %v3006_v3  ;;  %v3721_v3 = vld [vmem:[%s5334_s0 + $0xcc] sm:$0xf0] }
  0x75   :  { %v2754_v12 = vor.u32 %v3721_v3, %v2753_v2  ;;  %v2883_v2 = vld [vmem:[%s5334_s0 + $0x1d0] sm:$0xf0]  ;;  %v2889_v3 = vld [vmem:[%s5334_s0 + $0x198] sm:$0xf] }
  0x77   :  { %2247 = vmatpush.bf16.msra.mxu1 %v3899_v31  ;;  %v2945_v31 = vld [vmem:[%s5334_s0 + $0x210] sm:$0xf] }
  0x81   :  { %1841 = vmatmul.bf16.gmra.mxu0 %v3058_v16 }
  0x82   :  { %1890 = vmatmul.bf16.gmra.mxu1 %v3062_v17  ;;  %v2762_v17 = vor.u32 %v3722_v7, %v2761_v6  ;;  %v2891_v6 = vld [vmem:[%s5334_s0 + $0x1d8] sm:$0xf0] }
  0x83   :  { %1939 = vmatmul.bf16.gmra.mxu2 %v3066_v18  ;;  %v2766_v18 = vor.u32 %v3714_v8, %v2763_v9 }
  0x84   :  { %1988 = vmatmul.bf16.gmra.mxu3 %v3070_v19 }
  0x91   :  { %1846 = vmatmul.bf16.gmra.mxu0 %v3122_v32  ;;  %v2817_v32 = vld [vmem:[%s5334_s0 + $0x110] sm:$0xf] }
  0x92   :  { %1895 = vmatmul.bf16.gmra.mxu1 %v3126_v33  ;;  %v3737_v33 = vld [vmem:[%s5334_s0 + $0x14c] sm:$0xf0] }
  0x93   :  { %1944 = vmatmul.bf16.gmra.mxu2 %v3130_v34  ;;  %v3729_v34 = vld [vmem:[%s5334_s0 + $0x114] sm:$0xf]  ;;  %v2818_v42 = vor.u32 %v3737_v33, %v2817_v32  ;;  %v3769_v32 = vld [vmem:[%s5334_s0 + $0x24c] sm:$0xf0] }
  0x94   :  { %1993 = vmatmul.bf16.gmra.mxu3 %v3134_v35  ;;  %v2819_v35 = vld [vmem:[%s5334_s0 + $0x150] sm:$0xf0] }
  0x95   :  { %v2822_v43 = vor.u32 %v3729_v34, %v2819_v35  ;;  %v3761_v33 = vld [vmem:[%s5334_s0 + $0x214] sm:$0xf]  ;;  %v2953_v35 = vld [vmem:[%s5334_s0 + $0x218] sm:$0xf] }
  0x96   :  { %v2947_v34 = vld [vmem:[%s5334_s0 + $0x250] sm:$0xf0] }
  0x9e   :  { %v1812_v50 = vpop.f32.mrf.mxu0 }
  0x9f   :  { %v1861_v51 = vpop.f32.mrf.mxu1 }
  0xa0   :  { %v1862_v54 = vadd.f32 %v1861_v51, %v1812_v50  ;;  %v3906_v51 = vld [vmem:[%s5333_s1 + $0x298] sm:$0xff] }
  0xa1   :  { %2007 = vmatmul.bf16.vlgmr.msrb.gmra.mxu0 %v2690_v48  ;;  %v2830_v48 = vor.u32 %v3730_v38, %v2827_v39  ;;  %2297 = vmatpush.bf16.msra.mxu2 %v3906_v51  ;;  %v2955_v38 = vld [vmem:[%s5334_s0 + $0x258] sm:$0xf0]  ;;  %v3904_v51 = vld [vmem:[%s5333_s1 + $0x288] sm:$0xff] }
  0xa2   :  { %2056 = vmatmul.bf16.vlgmr.msrb.gmra.mxu1 %v2694_v49 }
  0xa3   :  { %2105 = vmatmul.bf16.vlgmr.msrb.gmra.mxu2 %v2698_v52  ;;  %v3890_v52 = vld [vmem:[%s5333_s1 + $0x218] sm:$0xff] }
  0xa4   :  { %2154 = vmatmul.bf16.vlgmr.msrb.gmra.mxu3 %v2702_v53  ;;  %v3914_v53 = vld [vmem:[%s5333_s1 + $0x2d8] sm:$0xff]  ;;  %2199 = vmatpush.bf16.msra.mxu0 %v3890_v52  ;;  %v3888_v52 = vld [vmem:[%s5333_s1 + $0x208] sm:$0xff] }
  0xa5   :  { %2346 = vmatpush.bf16.msra.mxu3 %v3914_v53  ;;  %v3912_v53 = vld [vmem:[%s5333_s1 + $0x2c8] sm:$0xff] }
  0xa6   :  { %v1910_v58 = vpop.f32.mrf.mxu2  ;;  %v1814_v61 = vpop.f32.mrf.mxu0 }
  0xa7   :  { %v1959_v59 = vpop.f32.mrf.mxu3  ;;  %v1911_v60 = vadd.f32 %v1910_v58, %v1862_v54  ;;  %v1863_v62 = vpop.f32.mrf.mxu1 }
  0xa8   :  { %v1864_v63 = vadd.f32 %v1863_v62, %v1814_v61  ;;  %v3898_v61 = vld [vmem:[%s5333_s1 + $0x258] sm:$0xff]  ;;  %v2881_v62 = vld [vmem:[%s5334_s0 + $0x190] sm:$0xf] }
  0xa9   :  { %v4454_v0 = vadd.f32 %v1959_v59, %v1911_v60  ;;  %2248 = vmatpush.bf16.msra.mxu1 %v3898_v61  ;;  %2347 = vmatpush.bf16.msra.mxu3 %v3913_v21  ;;  %v3903_v21 = vld [vmem:[%s5333_s1 + $0x280] sm:$0xff] }
  0xad   :  { %2348 = vmatpush.bf16.msra.mxu3 %v3912_v53 }
  0xae   :  { %v1912_v10 = vpop.f32.mrf.mxu2  ;;  %v1817_v15 = vpop.f32.mrf.mxu0 }
  0xaf   :  { %v1961_v11 = vpop.f32.mrf.mxu3  ;;  %v1913_v14 = vadd.f32 %v1912_v10, %v1864_v63  ;;  %v1866_v16 = vpop.f32.mrf.mxu1  ;;  %v3753_v63 = vld [vmem:[%s5334_s0 + $0x1cc] sm:$0xf0]  ;;  %v2886_v10 = vor.u32 %v3745_v1, %v2883_v2  ;;  %v3777_v2 = vld [vmem:[%s5334_s0 + $0x294] sm:$0xf] }
  0xb0   :  { %v1867_v19 = vadd.f32 %v1866_v16, %v1817_v15  ;;  %v2882_v9 = vor.u32 %v3753_v63, %v2881_v62  ;;  %v2894_v15 = vor.u32 %v3746_v5, %v2891_v6  ;;  %v3896_v62 = vld [vmem:[%s5333_s1 + $0x248] sm:$0xff]  ;;  %v3009_v63 = vld [vmem:[%s5334_s0 + $0x290] sm:$0xf]  ;;  %v3786_v5 = vld [vmem:[%s5334_s0 + $0x2d4] sm:$0xf0] }
  0xb1   :  { %v4483_v20 = vadd.f32 %v1961_v11, %v1913_v14  ;;  %2012 = vmatmul.bf16.gmra.mxu0 %v2754_v12  ;;  %v2890_v14 = vor.u32 %v3754_v4, %v2889_v3  ;;  %v3785_v1 = vld [vmem:[%s5334_s0 + $0x2cc] sm:$0xf0]  ;;  %v3011_v3 = vld [vmem:[%s5334_s0 + $0x2d0] sm:$0xf0]  ;;  %v3017_v4 = vld [vmem:[%s5334_s0 + $0x298] sm:$0xf] }
  0xb2   :  { %2061 = vmatmul.bf16.gmra.mxu1 %v2758_v13  ;;  %v3778_v6 = vld [vmem:[%s5334_s0 + $0x29c] sm:$0xf] }
  0xb3   :  { %2110 = vmatmul.bf16.gmra.mxu2 %v2762_v17 }
  0xb4   :  { %2159 = vmatmul.bf16.gmra.mxu3 %v2766_v18  ;;  %v3905_v18 = vld [vmem:[%s5333_s1 + $0x290] sm:$0xff] }
  0xb5   :  { %2298 = vmatpush.bf16.msra.mxu2 %v3905_v18 }
  0xb6   :  { %v1915_v24 = vpop.f32.mrf.mxu2  ;;  %v1819_v27 = vpop.f32.mrf.mxu0 }
  0xb7   :  { %v1964_v25 = vpop.f32.mrf.mxu3  ;;  %v1916_v26 = vadd.f32 %v1915_v24, %v1867_v19  ;;  %v1868_v28 = vpop.f32.mrf.mxu1  ;;  %v3889_v19 = vld [vmem:[%s5333_s1 + $0x210] sm:$0xff] }
  0xb8   :  { %v1869_v29 = vadd.f32 %v1868_v28, %v1819_v27  ;;  %2200 = vmatpush.bf16.msra.mxu0 %v3889_v19 }
  0xb9   :  { %v4494_v30 = vadd.f32 %v1964_v25, %v1916_v26  ;;  %2299 = vmatpush.bf16.msra.mxu2 %v3904_v51 }
  0xbc   :  { %2201 = vmatpush.bf16.msra.mxu0 %v3888_v52 }
  0xbd   :  { %2300 = vmatpush.bf16.msra.mxu2 %v3903_v21 }
  0xbe   :  { %v1917_v40 = vpop.f32.mrf.mxu2  ;;  %v1822_v45 = vpop.f32.mrf.mxu0 }
  0xbf   :  { %v1966_v41 = vpop.f32.mrf.mxu3  ;;  %v1918_v44 = vadd.f32 %v1917_v40, %v1869_v29  ;;  %v1871_v46 = vpop.f32.mrf.mxu1  ;;  %v3897_v29 = vld [vmem:[%s5333_s1 + $0x250] sm:$0xff] }
  0xc0   :  { %v1872_v49 = vadd.f32 %v1871_v46, %v1822_v45  ;;  %2249 = vmatpush.bf16.msra.mxu1 %v3897_v29  ;;  %v2954_v46 = vor.u32 %v3770_v36, %v2953_v35  ;;  %v3801_v35 = vld [vmem:[%s5334_s0 + $0x34c] sm:$0xf0]  ;;  %v3793_v36 = vld [vmem:[%s5334_s0 + $0x314] sm:$0xf] }
  0xc1   :  { %v4523_v50 = vadd.f32 %v1966_v41, %v1918_v44  ;;  %2017 = vmatmul.bf16.gmra.mxu0 %v2818_v42  ;;  %v2946_v41 = vor.u32 %v3769_v32, %v2945_v31  ;;  %v2950_v42 = vor.u32 %v3761_v33, %v2947_v34  ;;  %v3895_v33 = vld [vmem:[%s5333_s1 + $0x240] sm:$0xff]  ;;  %v3073_v34 = vld [vmem:[%s5334_s0 + $0x310] sm:$0xf] }
  0xc2   :  { %2066 = vmatmul.bf16.gmra.mxu1 %v2822_v43 }
  0xc3   :  { %2115 = vmatmul.bf16.gmra.mxu2 %v2826_v47  ;;  %v2958_v47 = vor.u32 %v3762_v37, %v2955_v38  ;;  %v3075_v37 = vld [vmem:[%s5334_s0 + $0x350] sm:$0xf0]  ;;  %v3081_v38 = vld [vmem:[%s5334_s0 + $0x318] sm:$0xf] }
  0xc4   :  { %2164 = vmatmul.bf16.gmra.mxu3 %v2830_v48  ;;  %2250 = vmatpush.bf16.msra.mxu1 %v3896_v62 }
  0xc6   :  { %v1920_v54 = vpop.f32.mrf.mxu2  ;;  %v1824_v57 = vpop.f32.mrf.mxu0 }
  0xc7   :  { %v1969_v55 = vpop.f32.mrf.mxu3  ;;  %v1921_v56 = vadd.f32 %v1920_v54, %v1872_v49  ;;  %v1873_v58 = vpop.f32.mrf.mxu1 }
  0xc8   :  { %v1874_v59 = vadd.f32 %v1873_v58, %v1824_v57  ;;  %2251 = vmatpush.bf16.msra.mxu1 %v3895_v33 }
  0xc9   :  { %v4534_v60 = vadd.f32 %v1969_v55, %v1921_v56 }
  0xce   :  { %v1922_v7 = vpop.f32.mrf.mxu2  ;;  %v1827_v12 = vpop.f32.mrf.mxu0 }
  0xcf   :  { %v1971_v8 = vpop.f32.mrf.mxu3  ;;  %v1923_v11 = vadd.f32 %v1922_v7, %v1874_v59  ;;  %v1876_v13 = vpop.f32.mrf.mxu1  ;;  %v3019_v7 = vld [vmem:[%s5334_s0 + $0x2d8] sm:$0xf0] }
  0xd0   :  { %v1877_v16 = vadd.f32 %v1876_v13, %v1827_v12 }
  0xd1   :  { %v4563_v17 = vadd.f32 %v1971_v8, %v1923_v11  ;;  %2022 = vmatmul.bf16.gmra.mxu0 %v2882_v9  ;;  %v3014_v11 = vor.u32 %v3777_v2, %v3011_v3 }
  0xd2   :  { %2071 = vmatmul.bf16.gmra.mxu1 %v2886_v10  ;;  %v3010_v10 = vor.u32 %v3785_v1, %v3009_v63 }
  0xd3   :  { %2120 = vmatmul.bf16.gmra.mxu2 %v2890_v14 }
  0xd4   :  { %2169 = vmatmul.bf16.gmra.mxu3 %v2894_v15  ;;  %v3018_v15 = vor.u32 %v3786_v5, %v3017_v4  ;;  %v3934_v4 = vld [vmem:[%s5333_s1 + $0x378] sm:$0xff]  ;;  %v3137_v5 = vld [vmem:[%s5334_s0 + $0x390] sm:$0xf] }
  0xd5   :  { %2440 = vmatpush.bf16.msrb.mxu1 %v3934_v4  ;;  %v3940_v4 = vld [vmem:[%s5333_s1 + $0x3a8] sm:$0xff] }
  0xd6   :  { %v1925_v22 = vpop.f32.mrf.mxu2  ;;  %v1829_v25 = vpop.f32.mrf.mxu0 }
  0xd7   :  { %v1974_v23 = vpop.f32.mrf.mxu3  ;;  %v1926_v24 = vadd.f32 %v1925_v22, %v1877_v16  ;;  %v1878_v26 = vpop.f32.mrf.mxu1  ;;  %v3022_v16 = vor.u32 %v3778_v6, %v3019_v7  ;;  %v3887_v22 = vld [vmem:[%s5333_s1 + $0x200] sm:$0xff]  ;;  %v3817_v6 = vld [vmem:[%s5334_s0 + $0x3cc] sm:$0xf0]  ;;  %v3809_v7 = vld [vmem:[%s5334_s0 + $0x394] sm:$0xf] }
  0xd8   :  { %v1879_v27 = vadd.f32 %v1878_v26, %v1829_v25  ;;  %2202 = vmatpush.bf16.msra.mxu0 %v3887_v22 }
  0xd9   :  { %v4574_v28 = vadd.f32 %v1974_v23, %v1926_v24  ;;  %v3911_v23 = vld [vmem:[%s5333_s1 + $0x2c0] sm:$0xff] }
  0xda   :  { %2349 = vmatpush.bf16.msra.mxu3 %v3911_v23 }
  0xde   :  { %v1927_v39 = vpop.f32.mrf.mxu2  ;;  %v1832_v44 = vpop.f32.mrf.mxu0 }
  0xdf   :  { %v1976_v40 = vpop.f32.mrf.mxu3  ;;  %v1928_v43 = vadd.f32 %v1927_v39, %v1879_v27  ;;  %v1881_v45 = vpop.f32.mrf.mxu1  ;;  %v3802_v39 = vld [vmem:[%s5334_s0 + $0x354] sm:$0xf0] }
  0xe0   :  { %v1882_v48 = vadd.f32 %v1881_v45, %v1832_v44  ;;  %v3074_v44 = vor.u32 %v3801_v35, %v3073_v34  ;;  %v3078_v45 = vor.u32 %v3793_v36, %v3075_v37  ;;  %v3082_v51 = vor.u32 %v3802_v39, %v3081_v38 }
  0xe1   :  { %v4603_v49 = vadd.f32 %v1976_v40, %v1928_v43  ;;  %2027 = vmatmul.bf16.gmra.mxu0 %v2946_v41  ;;  %v3794_v40 = vld [vmem:[%s5334_s0 + $0x31c] sm:$0xf] }
  0xe2   :  { %2076 = vmatmul.bf16.gmra.mxu1 %v2950_v42  ;;  %v3083_v41 = vld [vmem:[%s5334_s0 + $0x358] sm:$0xf0] }
  0xe3   :  { %2125 = vmatmul.bf16.gmra.mxu2 %v2954_v46  ;;  %v3086_v52 = vor.u32 %v3794_v40, %v3083_v41  ;;  %v3933_v40 = vld [vmem:[%s5333_s1 + $0x370] sm:$0xff]  ;;  %v2705_v41 = vld [vmem:[%s5334_s0 + $0x20] sm:$0xf] }
  0xe4   :  { %2174 = vmatmul.bf16.gmra.mxu3 %v2958_v47  ;;  %2441 = vmatpush.bf16.msrb.mxu1 %v3933_v40 }
  0xe6   :  { %v1930_v54 = vpop.f32.mrf.mxu2  ;;  %v1834_v57 = vpop.f32.mrf.mxu0 }
  0xe7   :  { %v1979_v55 = vpop.f32.mrf.mxu3  ;;  %v1931_v56 = vadd.f32 %v1930_v54, %v1882_v48  ;;  %v1883_v58 = vpop.f32.mrf.mxu1 }
  0xe8   :  { %v1884_v59 = vadd.f32 %v1883_v58, %v1834_v57  ;;  %v3950_v57 = vld [vmem:[%s5333_s1 + $0x3f8] sm:$0xff] }
  0xe9   :  { %v4614_v61 = vadd.f32 %v1979_v55, %v1931_v56  ;;  %v3942_v55 = vld [vmem:[%s5333_s1 + $0x3b8] sm:$0xff]  ;;  %2538 = vmatpush.bf16.msrb.mxu3 %v3950_v57 }
  0xea   :  { %v3926_v56 = vld [vmem:[%s5333_s1 + $0x338] sm:$0xff]  ;;  %2489 = vmatpush.bf16.msrb.mxu2 %v3942_v55 }
  0xeb   :  { %2391 = vmatpush.bf16.msrb.mxu0 %v3926_v56 }
  0xee   :  { %v1932_v8 = vpop.f32.mrf.mxu2  ;;  %v1837_v13 = vpop.f32.mrf.mxu0 }
  0xef   :  { %v1981_v9 = vpop.f32.mrf.mxu3  ;;  %v1933_v12 = vadd.f32 %v1932_v8, %v1884_v59  ;;  %v1886_v14 = vpop.f32.mrf.mxu1  ;;  %v3139_v8 = vld [vmem:[%s5334_s0 + $0x3d0] sm:$0xf0] }
  0xf0   :  { %v1887_v18 = vadd.f32 %v1886_v14, %v1837_v13 }
  0xf1   :  { %v4643_v19 = vadd.f32 %v1981_v9, %v1933_v12  ;;  %2032 = vmatmul.bf16.gmra.mxu0 %v3010_v10  ;;  %v3145_v9 = vld [vmem:[%s5334_s0 + $0x398] sm:$0xf]  ;;  %v3147_v12 = vld [vmem:[%s5334_s0 + $0x3d8] sm:$0xf0] }
  0xf2   :  { %2081 = vmatmul.bf16.gmra.mxu1 %v3014_v11  ;;  %v3818_v10 = vld [vmem:[%s5334_s0 + $0x3d4] sm:$0xf0]  ;;  %v3810_v11 = vld [vmem:[%s5334_s0 + $0x39c] sm:$0xf] }
  0xf3   :  { %2130 = vmatmul.bf16.gmra.mxu2 %v3018_v15  ;;  %v3138_v15 = vor.u32 %v3817_v6, %v3137_v5  ;;  %v3146_v23 = vor.u32 %v3818_v10, %v3145_v9  ;;  %v3924_v5 = vld [vmem:[%s5333_s1 + $0x328] sm:$0xff] }
  0xf4   :  { %2179 = vmatmul.bf16.gmra.mxu3 %v3022_v16  ;;  %v3142_v16 = vor.u32 %v3809_v7, %v3139_v8  ;;  %v3948_v6 = vld [vmem:[%s5333_s1 + $0x3e8] sm:$0xff] }
  0xf6   :  { %v1935_v24 = vpop.f32.mrf.mxu2  ;;  %v1839_v27 = vpop.f32.mrf.mxu0 }
  0xf7   :  { %v1984_v25 = vpop.f32.mrf.mxu3  ;;  %v1936_v26 = vadd.f32 %v1935_v24, %v1887_v18  ;;  %v1888_v29 = vpop.f32.mrf.mxu1  ;;  %v3150_v24 = vor.u32 %v3810_v11, %v3147_v12 }
  0xf8   :  { %v1889_v31 = vadd.f32 %v1888_v29, %v1839_v27  ;;  %v3941_v27 = vld [vmem:[%s5333_s1 + $0x3b0] sm:$0xff] }
  0xf9   :  { %v4654_v32 = vadd.f32 %v1984_v25, %v1936_v26  ;;  %v3925_v29 = vld [vmem:[%s5333_s1 + $0x330] sm:$0xff]  ;;  %2490 = vmatpush.bf16.msrb.mxu2 %v3941_v27 }
  0xfa   :  { %2392 = vmatpush.bf16.msrb.mxu0 %v3925_v29 }
  0xfd   :  { %2491 = vmatpush.bf16.msrb.mxu2 %v3940_v4 }
  0xfe   :  { %v1937_v42 = vpop.f32.mrf.mxu2  ;;  %v1842_v47 = vpop.f32.mrf.mxu0  ;;  %2393 = vmatpush.bf16.msrb.mxu0 %v3924_v5 }
  0xff   :  { %v1986_v43 = vpop.f32.mrf.mxu3  ;;  %v1938_v46 = vadd.f32 %v1937_v42, %v1889_v31  ;;  %v1891_v48 = vpop.f32.mrf.mxu1  ;;  %v3949_v31 = vld [vmem:[%s5333_s1 + $0x3f0] sm:$0xff]  ;;  %v3707_v42 = vld [vmem:[%s5334_s0 + $0x5c] sm:$0xf0] }
 0x100   :  { %v1892_v53 = vadd.f32 %v1891_v48, %v1842_v47  ;;  %2539 = vmatpush.bf16.msrb.mxu3 %v3949_v31  ;;  %v3700_v47 = vld [vmem:[%s5334_s0 + $0x2c] sm:$0xf] }
 0x101   :  { %v4683_v54 = vadd.f32 %v1986_v43, %v1938_v46  ;;  %2037 = vmatmul.bf16.gmra.mxu0 %v3074_v44  ;;  %v3699_v43 = vld [vmem:[%s5334_s0 + $0x24] sm:$0xf]  ;;  %v3708_v46 = vld [vmem:[%s5334_s0 + $0x64] sm:$0xf0]  ;;  %v2715_v48 = vld [vmem:[%s5334_s0 + $0x68] sm:$0xf0] }
 0x102   :  { %2086 = vmatmul.bf16.gmra.mxu1 %v3078_v45  ;;  %v2707_v44 = vld [vmem:[%s5334_s0 + $0x60] sm:$0xf0]  ;;  %v2713_v45 = vld [vmem:[%s5334_s0 + $0x28] sm:$0xf] }
 0x103   :  { %2135 = vmatmul.bf16.gmra.mxu2 %v3082_v51  ;;  %v2710_v55 = vor.u32 %v3699_v43, %v2707_v44  ;;  %v3923_v43 = vld [vmem:[%s5333_s1 + $0x320] sm:$0xff] }
 0x104   :  { %2184 = vmatmul.bf16.gmra.mxu3 %v3086_v52  ;;  %v3947_v44 = vld [vmem:[%s5333_s1 + $0x3e0] sm:$0xff]  ;;  %2394 = vmatpush.bf16.msrb.mxu0 %v3923_v43 }
 0x105   :  { %2540 = vmatpush.bf16.msrb.mxu3 %v3948_v6 }
 0x106   :  { %v1940_v58 = vpop.f32.mrf.mxu2  ;;  %v1844_v63 = vpop.f32.mrf.mxu0 }
 0x107   :  { %v1989_v59 = vpop.f32.mrf.mxu3  ;;  %v1941_v62 = vadd.f32 %v1940_v58, %v1892_v53  ;;  %v1893_v1 = vpop.f32.mrf.mxu1  ;;  %v2706_v53 = vor.u32 %v3707_v42, %v2705_v41  ;;  %v3939_v42 = vld [vmem:[%s5333_s1 + $0x3a0] sm:$0xff] }
 0x108   :  { %v1894_v2 = vadd.f32 %v1893_v1, %v1844_v63  ;;  %2492 = vmatpush.bf16.msrb.mxu2 %v3939_v42 }
 0x109   :  { %v4694_v3 = vadd.f32 %v1989_v59, %v1941_v62  ;;  %v2714_v59 = vor.u32 %v3708_v46, %v2713_v45  ;;  %v2718_v62 = vor.u32 %v3700_v47, %v2715_v48  ;;  %2541 = vmatpush.bf16.msrb.mxu3 %v3947_v44 }
 0x10e   :  { %v1942_v13 = vpop.f32.mrf.mxu2  ;;  %v1847_v21 = vpop.f32.mrf.mxu0 }
 0x10f   :  { %v1991_v14 = vpop.f32.mrf.mxu3  ;;  %v1943_v18 = vadd.f32 %v1942_v13, %v1894_v2  ;;  %v1896_v22 = vpop.f32.mrf.mxu1  ;;  %v3932_v13 = vld [vmem:[%s5333_s1 + $0x368] sm:$0xff] }
 0x110   :  { %v1897_v25 = vadd.f32 %v1896_v22, %v1847_v21  ;;  %v2777_v21 = vld [vmem:[%s5334_s0 + $0xa8] sm:$0xf]  ;;  %2442 = vmatpush.bf16.msrb.mxu1 %v3932_v13 }
 0x111   :  { %v4723_v26 = vadd.f32 %v1991_v14, %v1943_v18  ;;  %2042 = vmatmul.bf16.gmra.mxu0 %v3138_v15  ;;  %v2769_v15 = vld [vmem:[%s5334_s0 + $0xa0] sm:$0xf]  ;;  %v3715_v18 = vld [vmem:[%s5334_s0 + $0xa4] sm:$0xf]  ;;  %v3724_v22 = vld [vmem:[%s5334_s0 + $0xe4] sm:$0xf0] }
 0x112   :  { %2091 = vmatmul.bf16.gmra.mxu1 %v3142_v16  ;;  %v3723_v16 = vld [vmem:[%s5334_s0 + $0xdc] sm:$0xf0] }
 0x113   :  { %2140 = vmatmul.bf16.gmra.mxu2 %v3146_v23  ;;  %v3716_v23 = vld [vmem:[%s5334_s0 + $0xac] sm:$0xf]  ;;  %v2770_v29 = vor.u32 %v3723_v16, %v2769_v15  ;;  %v3938_v16 = vld [vmem:[%s5333_s1 + $0x398] sm:$0xff] }
 0x114   :  { %2189 = vmatmul.bf16.gmra.mxu3 %v3150_v24  ;;  %v2779_v24 = vld [vmem:[%s5334_s0 + $0xe8] sm:$0xf0]  ;;  %2493 = vmatpush.bf16.msrb.mxu2 %v3938_v16 }
 0x116   :  { %v1945_v33 = vpop.f32.mrf.mxu2  ;;  %v1849_v36 = vpop.f32.mrf.mxu0 }
 0x117   :  { %v1994_v34 = vpop.f32.mrf.mxu3  ;;  %v1946_v35 = vadd.f32 %v1945_v33, %v1897_v25  ;;  %v1898_v37 = vpop.f32.mrf.mxu1 }
 0x118   :  { %v1899_v38 = vadd.f32 %v1898_v37, %v1849_v36  ;;  %v2778_v36 = vor.u32 %v3724_v22, %v2777_v21  ;;  %v2782_v37 = vor.u32 %v3716_v23, %v2779_v24 }
 0x119   :  { %v4734_v39 = vadd.f32 %v1994_v34, %v1946_v35 }
 0x11e   :  { %v1947_v51 = vpop.f32.mrf.mxu2  ;;  %v2008_v57 = vpop.f32.mrf.mxu0 }
 0x11f   :  { %v1996_v52 = vpop.f32.mrf.mxu3  ;;  %v1948_v56 = vadd.f32 %v1947_v51, %v1899_v38  ;;  %v2057_v58 = vpop.f32.mrf.mxu1  ;;  %v2009_v63 = vadd.f32 %v2008_v57, %v4454_v0  ;;  %v3739_v57 = vld [vmem:[%s5334_s0 + $0x15c] sm:$0xf0] }
 0x121   :  { %v4764_v1 = vadd.f32 %v1996_v52, %v1948_v56  ;;  %v2058_v2 = vadd.f32 %v2057_v58, %v2009_v63  ;;  %2203 = vmatmul.bf16.vlgmr.msra.gmra.mxu0 %v2706_v53  ;;  %v3931_v53 = vld [vmem:[%s5333_s1 + $0x360] sm:$0xff]  ;;  %v3732_v63 = vld [vmem:[%s5334_s0 + $0x12c] sm:$0xf] }
 0x122   :  { %2252 = vmatmul.bf16.vlgmr.msra.gmra.mxu1 %v2710_v55  ;;  %v2833_v56 = vld [vmem:[%s5334_s0 + $0x120] sm:$0xf]  ;;  %v3731_v58 = vld [vmem:[%s5334_s0 + $0x124] sm:$0xf] }
 0x123   :  { %2301 = vmatmul.bf16.vlgmr.msra.gmra.mxu2 %v2714_v59  ;;  %v2841_v59 = vld [vmem:[%s5334_s0 + $0x128] sm:$0xf]  ;;  %2443 = vmatpush.bf16.msrb.mxu1 %v3931_v53  ;;  %v2834_v6 = vor.u32 %v3739_v57, %v2833_v56  ;;  %v3937_v57 = vld [vmem:[%s5333_s1 + $0x390] sm:$0xff] }
 0x124   :  { %2350 = vmatmul.bf16.vlgmr.msra.gmra.mxu3 %v2718_v62  ;;  %v3740_v62 = vld [vmem:[%s5334_s0 + $0x164] sm:$0xf0]  ;;  %2494 = vmatpush.bf16.msrb.mxu2 %v3937_v57 }
 0x126   :  { %v2106_v0 = vpop.f32.mrf.mxu2  ;;  %v2010_v9 = vpop.f32.mrf.mxu0 }
 0x127   :  { %v2155_v7 = vpop.f32.mrf.mxu3  ;;  %v2107_v8 = vadd.f32 %v2106_v0, %v2058_v2  ;;  %v2059_v10 = vpop.f32.mrf.mxu1  ;;  %v2011_v11 = vadd.f32 %v2010_v9, %v4483_v20  ;;  %v2771_v20 = vld [vmem:[%s5334_s0 + $0xe0] sm:$0xf0]  ;;  %v2843_v2 = vld [vmem:[%s5334_s0 + $0x168] sm:$0xf0] }
 0x128   :  { %v2774_v31 = vor.u32 %v3715_v18, %v2771_v20  ;;  %v3922_v18 = vld [vmem:[%s5333_s1 + $0x318] sm:$0xff] }
 0x129   :  { %v4776_v12 = vadd.f32 %v2155_v7, %v2107_v8  ;;  %v2060_v14 = vadd.f32 %v2059_v10, %v2011_v11  ;;  %v2842_v10 = vor.u32 %v3740_v62, %v2841_v59  ;;  %v2846_v11 = vor.u32 %v3732_v63, %v2843_v2  ;;  %v3946_v20 = vld [vmem:[%s5333_s1 + $0x3d8] sm:$0xff]  ;;  %2395 = vmatpush.bf16.msrb.mxu0 %v3922_v18 }
 0x12a   :  { %2542 = vmatpush.bf16.msrb.mxu3 %v3946_v20 }
 0x12e   :  { %v2108_v25 = vpop.f32.mrf.mxu2  ;;  %v2013_v34 = vpop.f32.mrf.mxu0 }
 0x12f   :  { %v2157_v27 = vpop.f32.mrf.mxu3  ;;  %v2109_v33 = vadd.f32 %v2108_v25, %v2060_v14  ;;  %v2062_v35 = vpop.f32.mrf.mxu1  ;;  %v2014_v38 = vadd.f32 %v2013_v34, %v4494_v30  ;;  %v3755_v34 = vld [vmem:[%s5334_s0 + $0x1dc] sm:$0xf0] }
 0x131   :  { %v4806_v40 = vadd.f32 %v2157_v27, %v2109_v33  ;;  %v2063_v41 = vadd.f32 %v2062_v35, %v2014_v38  ;;  %2208 = vmatmul.bf16.gmra.mxu0 %v2770_v29  ;;  %v3930_v29 = vld [vmem:[%s5333_s1 + $0x358] sm:$0xff]  ;;  %v2897_v33 = vld [vmem:[%s5334_s0 + $0x1a0] sm:$0xf]  ;;  %v3747_v35 = vld [vmem:[%s5334_s0 + $0x1a4] sm:$0xf] }
 0x132   :  { %2257 = vmatmul.bf16.gmra.mxu1 %v2774_v31  ;;  %v3748_v38 = vld [vmem:[%s5334_s0 + $0x1ac] sm:$0xf]  ;;  %v2898_v44 = vor.u32 %v3755_v34, %v2897_v33 }
 0x133   :  { %2306 = vmatmul.bf16.gmra.mxu2 %v2778_v36  ;;  %v2905_v36 = vld [vmem:[%s5334_s0 + $0x1a8] sm:$0xf]  ;;  %2444 = vmatpush.bf16.msrb.mxu1 %v3930_v29 }
 0x134   :  { %2355 = vmatmul.bf16.gmra.mxu3 %v2782_v37  ;;  %v3756_v37 = vld [vmem:[%s5334_s0 + $0x1e4] sm:$0xf0] }
 0x135   :  { %v3936_v34 = vld [vmem:[%s5333_s1 + $0x388] sm:$0xff] }
 0x136   :  { %v2111_v30 = vpop.f32.mrf.mxu2  ;;  %v2015_v47 = vpop.f32.mrf.mxu0  ;;  %2495 = vmatpush.bf16.msrb.mxu2 %v3936_v34 }
 0x137   :  { %v2160_v45 = vpop.f32.mrf.mxu3  ;;  %v2112_v46 = vadd.f32 %v2111_v30, %v2063_v41  ;;  %v2064_v48 = vpop.f32.mrf.mxu1  ;;  %v2016_v51 = vadd.f32 %v2015_v47, %v4523_v50  ;;  %v2835_v50 = vld [vmem:[%s5334_s0 + $0x160] sm:$0xf0]  ;;  %v2907_v41 = vld [vmem:[%s5334_s0 + $0x1e8] sm:$0xf0] }
 0x138   :  { %v2838_v0 = vor.u32 %v3731_v58, %v2835_v50  ;;  %v3921_v58 = vld [vmem:[%s5333_s1 + $0x310] sm:$0xff] }
 0x139   :  { %v4818_v52 = vadd.f32 %v2160_v45, %v2112_v46  ;;  %v2065_v55 = vadd.f32 %v2064_v48, %v2016_v51  ;;  %v2906_v48 = vor.u32 %v3756_v37, %v2905_v36  ;;  %v2910_v51 = vor.u32 %v3748_v38, %v2907_v41  ;;  %v3945_v50 = vld [vmem:[%s5333_s1 + $0x3d0] sm:$0xff]  ;;  %2396 = vmatpush.bf16.msrb.mxu0 %v3921_v58 }
 0x13a   :  { %2543 = vmatpush.bf16.msrb.mxu3 %v3945_v50 }
 0x13e   :  { %v2113_v4 = vpop.f32.mrf.mxu2  ;;  %v2018_v8 = vpop.f32.mrf.mxu0 }
 0x13f   :  { %v2162_v5 = vpop.f32.mrf.mxu3  ;;  %v2114_v7 = vadd.f32 %v2113_v4, %v2065_v55  ;;  %v2067_v9 = vpop.f32.mrf.mxu1  ;;  %v2019_v13 = vadd.f32 %v2018_v8, %v4534_v60  ;;  %v3771_v8 = vld [vmem:[%s5334_s0 + $0x25c] sm:$0xf0] }
 0x141   :  { %v4848_v14 = vadd.f32 %v2162_v5, %v2114_v7  ;;  %v2068_v15 = vadd.f32 %v2067_v9, %v2019_v13  ;;  %2213 = vmatmul.bf16.gmra.mxu0 %v2834_v6  ;;  %v3929_v6 = vld [vmem:[%s5333_s1 + $0x350] sm:$0xff]  ;;  %v2961_v7 = vld [vmem:[%s5334_s0 + $0x220] sm:$0xf]  ;;  %v3763_v9 = vld [vmem:[%s5334_s0 + $0x224] sm:$0xf] }
 0x142   :  { %2262 = vmatmul.bf16.gmra.mxu1 %v2838_v0  ;;  %v3764_v13 = vld [vmem:[%s5334_s0 + $0x22c] sm:$0xf]  ;;  %v2962_v20 = vor.u32 %v3771_v8, %v2961_v7  ;;  %v3935_v8 = vld [vmem:[%s5333_s1 + $0x380] sm:$0xff] }
 0x143   :  { %2311 = vmatmul.bf16.gmra.mxu2 %v2842_v10  ;;  %v2969_v10 = vld [vmem:[%s5334_s0 + $0x228] sm:$0xf]  ;;  %2445 = vmatpush.bf16.msrb.mxu1 %v3929_v6 }
 0x144   :  { %2360 = vmatmul.bf16.gmra.mxu3 %v2846_v11  ;;  %v3772_v11 = vld [vmem:[%s5334_s0 + $0x264] sm:$0xf0]  ;;  %2496 = vmatpush.bf16.msrb.mxu2 %v3935_v8 }
 0x146   :  { %v2116_v60 = vpop.f32.mrf.mxu2  ;;  %v2020_v23 = vpop.f32.mrf.mxu0 }
 0x147   :  { %v2165_v21 = vpop.f32.mrf.mxu3  ;;  %v2117_v22 = vadd.f32 %v2116_v60, %v2068_v15  ;;  %v2069_v24 = vpop.f32.mrf.mxu1  ;;  %v2021_v25 = vadd.f32 %v2020_v23, %v4563_v17  ;;  %v2899_v17 = vld [vmem:[%s5334_s0 + $0x1e0] sm:$0xf0]  ;;  %v2971_v15 = vld [vmem:[%s5334_s0 + $0x268] sm:$0xf0] }
 0x148   :  { %v2902_v30 = vor.u32 %v3747_v35, %v2899_v17  ;;  %v3920_v35 = vld [vmem:[%s5333_s1 + $0x308] sm:$0xff] }
 0x149   :  { %v4860_v27 = vadd.f32 %v2165_v21, %v2117_v22  ;;  %v2070_v31 = vadd.f32 %v2069_v24, %v2021_v25  ;;  %v2970_v24 = vor.u32 %v3772_v11, %v2969_v10  ;;  %v2974_v25 = vor.u32 %v3764_v13, %v2971_v15  ;;  %v3944_v17 = vld [vmem:[%s5333_s1 + $0x3c8] sm:$0xff]  ;;  %2397 = vmatpush.bf16.msrb.mxu0 %v3920_v35 }
 0x14a   :  { %2544 = vmatpush.bf16.msrb.mxu3 %v3944_v17 }
 0x14e   :  { %v2118_v42 = vpop.f32.mrf.mxu2  ;;  %v2023_v46 = vpop.f32.mrf.mxu0 }
 0x14f   :  { %v2167_v43 = vpop.f32.mrf.mxu3  ;;  %v2119_v45 = vadd.f32 %v2118_v42, %v2070_v31  ;;  %v2072_v47 = vpop.f32.mrf.mxu1  ;;  %v2024_v53 = vadd.f32 %v2023_v46, %v4574_v28  ;;  %v3787_v46 = vld [vmem:[%s5334_s0 + $0x2dc] sm:$0xf0] }
 0x151   :  { %v4890_v55 = vadd.f32 %v2167_v43, %v2119_v45  ;;  %v2073_v56 = vadd.f32 %v2072_v47, %v2024_v53  ;;  %2218 = vmatmul.bf16.gmra.mxu0 %v2898_v44  ;;  %v3928_v44 = vld [vmem:[%s5333_s1 + $0x348] sm:$0xff]  ;;  %v3025_v45 = vld [vmem:[%s5334_s0 + $0x2a0] sm:$0xf]  ;;  %v3779_v47 = vld [vmem:[%s5334_s0 + $0x2a4] sm:$0xf] }
 0x152   :  { %2267 = vmatmul.bf16.gmra.mxu1 %v2902_v30  ;;  %v3780_v53 = vld [vmem:[%s5334_s0 + $0x2ac] sm:$0xf]  ;;  %v3026_v50 = vor.u32 %v3787_v46, %v3025_v45 }
 0x153   :  { %2316 = vmatmul.bf16.gmra.mxu2 %v2906_v48  ;;  %v3033_v48 = vld [vmem:[%s5334_s0 + $0x2a8] sm:$0xf]  ;;  %2446 = vmatpush.bf16.msrb.mxu1 %v3928_v44 }
 0x154   :  { %2365 = vmatmul.bf16.gmra.mxu3 %v2910_v51  ;;  %v3788_v51 = vld [vmem:[%s5334_s0 + $0x2e4] sm:$0xf0] }
 0x156   :  { %v2121_v28 = vpop.f32.mrf.mxu2  ;;  %v2025_v63 = vpop.f32.mrf.mxu0 }
 0x157   :  { %v2170_v59 = vpop.f32.mrf.mxu3  ;;  %v2122_v62 = vadd.f32 %v2121_v28, %v2073_v56  ;;  %v2074_v2 = vpop.f32.mrf.mxu1  ;;  %v2026_v4 = vadd.f32 %v2025_v63, %v4603_v49  ;;  %v2963_v49 = vld [vmem:[%s5334_s0 + $0x260] sm:$0xf0]  ;;  %v3035_v56 = vld [vmem:[%s5334_s0 + $0x2e8] sm:$0xf0] }
 0x158   :  { %v2966_v60 = vor.u32 %v3763_v9, %v2963_v49  ;;  %v3919_v9 = vld [vmem:[%s5333_s1 + $0x300] sm:$0xff] }
 0x159   :  { %v4902_v5 = vadd.f32 %v2170_v59, %v2122_v62  ;;  %v2075_v0 = vadd.f32 %v2074_v2, %v2026_v4  ;;  %v3034_v2 = vor.u32 %v3788_v51, %v3033_v48  ;;  %v3038_v4 = vor.u32 %v3780_v53, %v3035_v56  ;;  %v3943_v49 = vld [vmem:[%s5333_s1 + $0x3c0] sm:$0xff]  ;;  %2398 = vmatpush.bf16.msrb.mxu0 %v3919_v9 }
 0x15a   :  { %2545 = vmatpush.bf16.msrb.mxu3 %v3943_v49 }
 0x15e   :  { %v2123_v16 = vpop.f32.mrf.mxu2  ;;  %v2028_v22 = vpop.f32.mrf.mxu0 }
 0x15f   :  { %v2172_v18 = vpop.f32.mrf.mxu3  ;;  %v2124_v21 = vadd.f32 %v2123_v16, %v2075_v0  ;;  %v2077_v23 = vpop.f32.mrf.mxu1  ;;  %v2029_v29 = vadd.f32 %v2028_v22, %v4614_v61  ;;  %v3803_v22 = vld [vmem:[%s5334_s0 + $0x35c] sm:$0xf0] }
 0x161   :  { %v4932_v31 = vadd.f32 %v2172_v18, %v2124_v21  ;;  %v2078_v33 = vadd.f32 %v2077_v23, %v2029_v29  ;;  %2223 = vmatmul.bf16.gmra.mxu0 %v2962_v20  ;;  %v3927_v20 = vld [vmem:[%s5333_s1 + $0x340] sm:$0xff]  ;;  %v3796_v29 = vld [vmem:[%s5334_s0 + $0x32c] sm:$0xf] }
 0x162   :  { %2272 = vmatmul.bf16.gmra.mxu1 %v2966_v60  ;;  %v3089_v21 = vld [vmem:[%s5334_s0 + $0x320] sm:$0xf]  ;;  %v3795_v23 = vld [vmem:[%s5334_s0 + $0x324] sm:$0xf] }
 0x163   :  { %2321 = vmatmul.bf16.gmra.mxu2 %v2970_v24  ;;  %v3097_v24 = vld [vmem:[%s5334_s0 + $0x328] sm:$0xf]  ;;  %2447 = vmatpush.bf16.msrb.mxu1 %v3927_v20  ;;  %v3090_v17 = vor.u32 %v3803_v22, %v3089_v21 }
 0x164   :  { %2370 = vmatmul.bf16.gmra.mxu3 %v2974_v25  ;;  %v3804_v25 = vld [vmem:[%s5334_s0 + $0x364] sm:$0xf0] }
 0x166   :  { %v2126_v61 = vpop.f32.mrf.mxu2  ;;  %v2030_v38 = vpop.f32.mrf.mxu0 }
 0x167   :  { %v2175_v36 = vpop.f32.mrf.mxu3  ;;  %v2127_v37 = vadd.f32 %v2126_v61, %v2078_v33  ;;  %v2079_v41 = vpop.f32.mrf.mxu1  ;;  %v2031_v42 = vadd.f32 %v2030_v38, %v4643_v19  ;;  %v3027_v19 = vld [vmem:[%s5334_s0 + $0x2e0] sm:$0xf0]  ;;  %v3099_v33 = vld [vmem:[%s5334_s0 + $0x368] sm:$0xf0] }
 0x168   :  { %v3030_v28 = vor.u32 %v3779_v47, %v3027_v19 }
 0x169   :  { %v4944_v43 = vadd.f32 %v2175_v36, %v2127_v37  ;;  %v2080_v30 = vadd.f32 %v2079_v41, %v2031_v42  ;;  %v3098_v41 = vor.u32 %v3804_v25, %v3097_v24  ;;  %v3102_v42 = vor.u32 %v3796_v29, %v3099_v33  ;;  %v3709_v25 = vld [vmem:[%s5334_s0 + $0x6c] sm:$0xf0]  ;;  %v3701_v29 = vld [vmem:[%s5334_s0 + $0x34] sm:$0xf] }
 0x16a   :  { %v2723_v33 = vld [vmem:[%s5334_s0 + $0x70] sm:$0xf0] }
 0x16e   :  { %v2128_v57 = vpop.f32.mrf.mxu2  ;;  %v2033_v62 = vpop.f32.mrf.mxu0 }
 0x16f   :  { %v2177_v58 = vpop.f32.mrf.mxu3  ;;  %v2129_v59 = vadd.f32 %v2128_v57, %v2080_v30  ;;  %v2082_v63 = vpop.f32.mrf.mxu1  ;;  %v2034_v6 = vadd.f32 %v2033_v62, %v4654_v32  ;;  %v3812_v62 = vld [vmem:[%s5334_s0 + $0x3ac] sm:$0xf] }
 0x171   :  { %v4974_v0 = vadd.f32 %v2177_v58, %v2129_v59  ;;  %v2083_v7 = vadd.f32 %v2082_v63, %v2034_v6  ;;  %2228 = vmatmul.bf16.gmra.mxu0 %v3026_v50  ;;  %v3819_v58 = vld [vmem:[%s5334_s0 + $0x3dc] sm:$0xf0]  ;;  %v3811_v50 = vld [vmem:[%s5334_s0 + $0x3a4] sm:$0xf]  ;;  %v3820_v59 = vld [vmem:[%s5334_s0 + $0x3e4] sm:$0xf0] }
 0x172   :  { %2277 = vmatmul.bf16.gmra.mxu1 %v3030_v28  ;;  %v3155_v28 = vld [vmem:[%s5334_s0 + $0x3e0] sm:$0xf0]  ;;  %v3163_v63 = vld [vmem:[%s5334_s0 + $0x3e8] sm:$0xf0] }
 0x173   :  { %2326 = vmatmul.bf16.gmra.mxu2 %v3034_v2 }
 0x174   :  { %2375 = vmatmul.bf16.gmra.mxu3 %v3038_v4 }
 0x176   :  { %v2131_v32 = vpop.f32.mrf.mxu2  ;;  %v2035_v13 = vpop.f32.mrf.mxu0 }
 0x177   :  { %v2180_v10 = vpop.f32.mrf.mxu3  ;;  %v2132_v11 = vadd.f32 %v2131_v32, %v2083_v7  ;;  %v2084_v15 = vpop.f32.mrf.mxu1  ;;  %v2036_v16 = vadd.f32 %v2035_v13, %v4683_v54  ;;  %v3091_v54 = vld [vmem:[%s5334_s0 + $0x360] sm:$0xf0]  ;;  %v3158_v7 = vor.u32 %v3811_v50, %v3155_v28 }
 0x178   :  { %v3094_v61 = vor.u32 %v3795_v23, %v3091_v54 }
 0x179   :  { %v4986_v18 = vadd.f32 %v2180_v10, %v2132_v11  ;;  %v2085_v60 = vadd.f32 %v2084_v15, %v2036_v16  ;;  %v3166_v10 = vor.u32 %v3812_v62, %v3163_v63  ;;  %v3717_v62 = vld [vmem:[%s5334_s0 + $0xb4] sm:$0xf] }
 0x17a   :  { %v2787_v63 = vld [vmem:[%s5334_s0 + $0xf0] sm:$0xf0] }
 0x17e   :  { %v2133_v34 = vpop.f32.mrf.mxu2  ;;  %v2038_v37 = vpop.f32.mrf.mxu0 }
 0x17f   :  { %v2182_v35 = vpop.f32.mrf.mxu3  ;;  %v2134_v36 = vadd.f32 %v2133_v34, %v2085_v60  ;;  %v2087_v38 = vpop.f32.mrf.mxu1  ;;  %v2039_v44 = vadd.f32 %v2038_v37, %v4694_v3  ;;  %v3153_v3 = vld [vmem:[%s5334_s0 + $0x3a0] sm:$0xf]  ;;  %v3710_v34 = vld [vmem:[%s5334_s0 + $0x74] sm:$0xf0] }
 0x180   :  { %v3154_v6 = vor.u32 %v3819_v58, %v3153_v3 }
 0x181   :  { %v5016_v30 = vadd.f32 %v2182_v35, %v2134_v36  ;;  %v2088_v45 = vadd.f32 %v2087_v38, %v2039_v44  ;;  %2233 = vmatmul.bf16.gmra.mxu0 %v3090_v17  ;;  %v3702_v35 = vld [vmem:[%s5334_s0 + $0x3c] sm:$0xf]  ;;  %v2726_v38 = vor.u32 %v3701_v29, %v2723_v33 }
 0x182   :  { %2282 = vmatmul.bf16.gmra.mxu1 %v3094_v61  ;;  %v2731_v17 = vld [vmem:[%s5334_s0 + $0x78] sm:$0xf0] }
 0x183   :  { %2331 = vmatmul.bf16.gmra.mxu2 %v3098_v41 }
 0x184   :  { %2380 = vmatmul.bf16.gmra.mxu3 %v3102_v42 }
 0x186   :  { %v2136_v46 = vpop.f32.mrf.mxu2  ;;  %v2040_v48 = vpop.f32.mrf.mxu0 }
 0x187   :  { %v2185_v47 = vpop.f32.mrf.mxu3  ;;  %v2137_v19 = vadd.f32 %v2136_v46, %v2088_v45  ;;  %v2089_v51 = vpop.f32.mrf.mxu1  ;;  %v2041_v53 = vadd.f32 %v2040_v48, %v4723_v26  ;;  %v3161_v26 = vld [vmem:[%s5334_s0 + $0x3a8] sm:$0xf]  ;;  %v2734_v46 = vor.u32 %v3702_v35, %v2731_v17  ;;  %v3733_v35 = vld [vmem:[%s5334_s0 + $0x134] sm:$0xf] }
 0x188   :  { %v3162_v32 = vor.u32 %v3820_v59, %v3161_v26  ;;  %v3725_v59 = vld [vmem:[%s5334_s0 + $0xec] sm:$0xf0]  ;;  %v2851_v17 = vld [vmem:[%s5334_s0 + $0x170] sm:$0xf0] }
 0x189   :  { %v5019_v56 = vadd.f32 %v2185_v47, %v2137_v19  ;;  %v2090_v57 = vadd.f32 %v2089_v51, %v2041_v53 }
 0x18e   :  { %v2138_v2 = vpop.f32.mrf.mxu2  ;;  %v2043_v9 = vpop.f32.mrf.mxu0 }
 0x18f   :  { %v2187_v4 = vpop.f32.mrf.mxu3  ;;  %v2139_v8 = vadd.f32 %v2138_v2, %v2090_v57  ;;  %v2092_v49 = vpop.f32.mrf.mxu1  ;;  %v2044_v11 = vadd.f32 %v2043_v9, %v4734_v39  ;;  %v2721_v39 = vld [vmem:[%s5334_s0 + $0x30] sm:$0xf]  ;;  %v3726_v2 = vld [vmem:[%s5334_s0 + $0xf4] sm:$0xf0] }
 0x190   :  { %v2722_v37 = vor.u32 %v3709_v25, %v2721_v39 }
 0x191   :  { %v5046_v13 = vadd.f32 %v2187_v4, %v2139_v8  ;;  %v2093_v15 = vadd.f32 %v2092_v49, %v2044_v11  ;;  %2238 = vmatmul.bf16.gmra.mxu0 %v3154_v6  ;;  %v3718_v4 = vld [vmem:[%s5334_s0 + $0xbc] sm:$0xf]  ;;  %v2790_v49 = vor.u32 %v3717_v62, %v2787_v63 }
 0x192   :  { %2287 = vmatmul.bf16.gmra.mxu1 %v3158_v7  ;;  %v2795_v6 = vld [vmem:[%s5334_s0 + $0xf8] sm:$0xf0] }
 0x193   :  { %2336 = vmatmul.bf16.gmra.mxu2 %v3162_v32 }
 0x194   :  { %2385 = vmatmul.bf16.gmra.mxu3 %v3166_v10 }
 0x196   :  { %v2141_v16 = vpop.f32.mrf.mxu2  ;;  %v2045_v21 = vpop.f32.mrf.mxu0 }
 0x197   :  { %v2190_v20 = vpop.f32.mrf.mxu3  ;;  %v2142_v60 = vadd.f32 %v2141_v16, %v2093_v15  ;;  %v2094_v22 = vpop.f32.mrf.mxu1  ;;  %v2046_v23 = vadd.f32 %v2045_v21, %v4764_v1  ;;  %v2729_v1 = vld [vmem:[%s5334_s0 + $0x38] sm:$0xf]  ;;  %v2798_v16 = vor.u32 %v3718_v4, %v2795_v6  ;;  %v3749_v4 = vld [vmem:[%s5334_s0 + $0x1b4] sm:$0xf] }
 0x198   :  { %v2730_v45 = vor.u32 %v3710_v34, %v2729_v1  ;;  %v3741_v34 = vld [vmem:[%s5334_s0 + $0x16c] sm:$0xf0]  ;;  %v2915_v6 = vld [vmem:[%s5334_s0 + $0x1f0] sm:$0xf0] }
 0x199   :  { %v5049_v54 = vadd.f32 %v2190_v20, %v2142_v60  ;;  %v2095_v24 = vadd.f32 %v2094_v22, %v2046_v23 }
 0x19e   :  { %v2143_v61 = vpop.f32.mrf.mxu2  ;;  %v2204_v42 = vpop.f32.mrf.mxu0 }
 0x19f   :  { %v2192_v36 = vpop.f32.mrf.mxu3  ;;  %v2144_v41 = vadd.f32 %v2143_v61, %v2095_v24  ;;  %v2253_v44 = vpop.f32.mrf.mxu1  ;;  %v2205_v47 = vadd.f32 %v2204_v42, %v4776_v12  ;;  %v2785_v12 = vld [vmem:[%s5334_s0 + $0xb0] sm:$0xf]  ;;  %v3742_v61 = vld [vmem:[%s5334_s0 + $0x174] sm:$0xf0] }
 0x1a0   :  { %v2786_v9 = vor.u32 %v3725_v59, %v2785_v12 }
 0x1a1   :  { %v5076_v19 = vadd.f32 %v2192_v36, %v2144_v41  ;;  %v2254_v48 = vadd.f32 %v2253_v44, %v2205_v47  ;;  %2399 = vmatmul.bf16.vlgmr.msrb.gmra.mxu0 %v2722_v37  ;;  %v3734_v36 = vld [vmem:[%s5334_s0 + $0x13c] sm:$0xf]  ;;  %v2854_v44 = vor.u32 %v3733_v35, %v2851_v17 }
 0x1a2   :  { %2448 = vmatmul.bf16.vlgmr.msrb.gmra.mxu1 %v2726_v38  ;;  %v2859_v37 = vld [vmem:[%s5334_s0 + $0x178] sm:$0xf0] }
 0x1a3   :  { %2497 = vmatmul.bf16.vlgmr.msrb.gmra.mxu2 %v2730_v45 }
 0x1a4   :  { %2546 = vmatmul.bf16.vlgmr.msrb.gmra.mxu3 %v2734_v46 }
 0x1a6   :  { %v2302_v51 = vpop.f32.mrf.mxu2  ;;  %v2206_v3 = vpop.f32.mrf.mxu0 }
 0x1a7   :  { %v2351_v53 = vpop.f32.mrf.mxu3  ;;  %v2303_v57 = vadd.f32 %v2302_v51, %v2254_v48  ;;  %v2255_v58 = vpop.f32.mrf.mxu1  ;;  %v2207_v50 = vadd.f32 %v2206_v3, %v4806_v40  ;;  %v2793_v40 = vld [vmem:[%s5334_s0 + $0xb8] sm:$0xf]  ;;  %v2862_v51 = vor.u32 %v3734_v36, %v2859_v37  ;;  %v3765_v36 = vld [vmem:[%s5334_s0 + $0x234] sm:$0xf] }
 0x1a8   :  { %v2794_v15 = vor.u32 %v3726_v2, %v2793_v40  ;;  %v3757_v2 = vld [vmem:[%s5334_s0 + $0x1ec] sm:$0xf0]  ;;  %v2979_v37 = vld [vmem:[%s5334_s0 + $0x270] sm:$0xf0] }
 0x1a9   :  { %v5079_v28 = vadd.f32 %v2351_v53, %v2303_v57  ;;  %v2256_v26 = vadd.f32 %v2255_v58, %v2207_v50 }
 0x1ae   :  { %v2304_v7 = vpop.f32.mrf.mxu2  ;;  %v2209_v10 = vpop.f32.mrf.mxu0 }
 0x1af   :  { %v2353_v8 = vpop.f32.mrf.mxu3  ;;  %v2305_v32 = vadd.f32 %v2304_v7, %v2256_v26  ;;  %v2258_v11 = vpop.f32.mrf.mxu1  ;;  %v2210_v20 = vadd.f32 %v2209_v10, %v4818_v52  ;;  %v2849_v52 = vld [vmem:[%s5334_s0 + $0x130] sm:$0xf]  ;;  %v3758_v7 = vld [vmem:[%s5334_s0 + $0x1f4] sm:$0xf0] }
 0x1b0   :  { %v2850_v42 = vor.u32 %v3741_v34, %v2849_v52 }
 0x1b1   :  { %v5106_v60 = vadd.f32 %v2353_v8, %v2305_v32  ;;  %v2259_v21 = vadd.f32 %v2258_v11, %v2210_v20  ;;  %2404 = vmatmul.bf16.gmra.mxu0 %v2786_v9  ;;  %v3750_v8 = vld [vmem:[%s5334_s0 + $0x1bc] sm:$0xf]  ;;  %v2918_v11 = vor.u32 %v3749_v4, %v2915_v6 }
 0x1b2   :  { %2453 = vmatmul.bf16.gmra.mxu1 %v2790_v49  ;;  %v2923_v9 = vld [vmem:[%s5334_s0 + $0x1f8] sm:$0xf0] }
 0x1b3   :  { %2502 = vmatmul.bf16.gmra.mxu2 %v2794_v15 }
 0x1b4   :  { %2551 = vmatmul.bf16.gmra.mxu3 %v2798_v16 }
 0x1b6   :  { %v2307_v22 = vpop.f32.mrf.mxu2  ;;  %v2211_v39 = vpop.f32.mrf.mxu0 }
 0x1b7   :  { %v2356_v23 = vpop.f32.mrf.mxu3  ;;  %v2308_v24 = vadd.f32 %v2307_v22, %v2259_v21  ;;  %v2260_v25 = vpop.f32.mrf.mxu1  ;;  %v2212_v29 = vadd.f32 %v2211_v39, %v4848_v14  ;;  %v2857_v14 = vld [vmem:[%s5334_s0 + $0x138] sm:$0xf]  ;;  %v2926_v22 = vor.u32 %v3750_v8, %v2923_v9  ;;  %v3781_v8 = vld [vmem:[%s5334_s0 + $0x2b4] sm:$0xf] }
 0x1b8   :  { %v2858_v48 = vor.u32 %v3742_v61, %v2857_v14  ;;  %v3773_v61 = vld [vmem:[%s5334_s0 + $0x26c] sm:$0xf0]  ;;  %v3043_v9 = vld [vmem:[%s5334_s0 + $0x2f0] sm:$0xf0] }
 0x1b9   :  { %v5109_v33 = vadd.f32 %v2356_v23, %v2308_v24  ;;  %v2261_v1 = vadd.f32 %v2260_v25, %v2212_v29 }
 0x1be   :  { %v2309_v38 = vpop.f32.mrf.mxu2  ;;  %v2214_v46 = vpop.f32.mrf.mxu0 }
 0x1bf   :  { %v2358_v41 = vpop.f32.mrf.mxu3  ;;  %v2310_v45 = vadd.f32 %v2309_v38, %v2261_v1  ;;  %v2263_v47 = vpop.f32.mrf.mxu1  ;;  %v2215_v53 = vadd.f32 %v2214_v46, %v4860_v27  ;;  %v2913_v27 = vld [vmem:[%s5334_s0 + $0x1b0] sm:$0xf]  ;;  %v3774_v38 = vld [vmem:[%s5334_s0 + $0x274] sm:$0xf0] }
 0x1c0   :  { %v2914_v10 = vor.u32 %v3757_v2, %v2913_v27 }
 0x1c1   :  { %v5136_v57 = vadd.f32 %v2358_v41, %v2310_v45  ;;  %v2264_v3 = vadd.f32 %v2263_v47, %v2215_v53  ;;  %2409 = vmatmul.bf16.gmra.mxu0 %v2850_v42  ;;  %v3766_v41 = vld [vmem:[%s5334_s0 + $0x23c] sm:$0xf]  ;;  %v2982_v47 = vor.u32 %v3765_v36, %v2979_v37 }
 0x1c2   :  { %2458 = vmatmul.bf16.gmra.mxu1 %v2854_v44  ;;  %v2987_v42 = vld [vmem:[%s5334_s0 + $0x278] sm:$0xf0] }
 0x1c3   :  { %2507 = vmatmul.bf16.gmra.mxu2 %v2858_v48 }
 0x1c4   :  { %2556 = vmatmul.bf16.gmra.mxu3 %v2862_v51 }
 0x1c6   :  { %v2312_v58 = vpop.f32.mrf.mxu2  ;;  %v2216_v12 = vpop.f32.mrf.mxu0 }
 0x1c7   :  { %v2361_v50 = vpop.f32.mrf.mxu3  ;;  %v2313_v26 = vadd.f32 %v2312_v58, %v2264_v3  ;;  %v2265_v59 = vpop.f32.mrf.mxu1  ;;  %v2217_v62 = vadd.f32 %v2216_v12, %v4890_v55  ;;  %v2921_v55 = vld [vmem:[%s5334_s0 + $0x1b8] sm:$0xf]  ;;  %v2990_v58 = vor.u32 %v3766_v41, %v2987_v42  ;;  %v3797_v41 = vld [vmem:[%s5334_s0 + $0x334] sm:$0xf] }
 0x1c8   :  { %v2922_v21 = vor.u32 %v3758_v7, %v2921_v55  ;;  %v3789_v7 = vld [vmem:[%s5334_s0 + $0x2ec] sm:$0xf0]  ;;  %v3107_v42 = vld [vmem:[%s5334_s0 + $0x370] sm:$0xf0] }
 0x1c9   :  { %v5139_v63 = vadd.f32 %v2361_v50, %v2313_v26  ;;  %v2266_v40 = vadd.f32 %v2265_v59, %v2217_v62 }
 0x1ce   :  { %v2314_v49 = vpop.f32.mrf.mxu2  ;;  %v2219_v16 = vpop.f32.mrf.mxu0 }
 0x1cf   :  { %v2363_v32 = vpop.f32.mrf.mxu3  ;;  %v2315_v15 = vadd.f32 %v2314_v49, %v2266_v40  ;;  %v2268_v20 = vpop.f32.mrf.mxu1  ;;  %v2220_v23 = vadd.f32 %v2219_v16, %v4902_v5  ;;  %v2977_v5 = vld [vmem:[%s5334_s0 + $0x230] sm:$0xf]  ;;  %v3790_v49 = vld [vmem:[%s5334_s0 + $0x2f4] sm:$0xf0] }
 0x1d0   :  { %v2978_v46 = vor.u32 %v3773_v61, %v2977_v5 }
 0x1d1   :  { %v5166_v24 = vadd.f32 %v2363_v32, %v2315_v15  ;;  %v2269_v39 = vadd.f32 %v2268_v20, %v2220_v23  ;;  %2414 = vmatmul.bf16.gmra.mxu0 %v2914_v10  ;;  %v3782_v32 = vld [vmem:[%s5334_s0 + $0x2bc] sm:$0xf]  ;;  %v3046_v20 = vor.u32 %v3781_v8, %v3043_v9 }
 0x1d2   :  { %2463 = vmatmul.bf16.gmra.mxu1 %v2918_v11  ;;  %v3051_v10 = vld [vmem:[%s5334_s0 + $0x2f8] sm:$0xf0] }
 0x1d3   :  { %2512 = vmatmul.bf16.gmra.mxu2 %v2922_v21 }
 0x1d4   :  { %2561 = vmatmul.bf16.gmra.mxu3 %v2926_v22 }
 0x1d6   :  { %v2317_v25 = vpop.f32.mrf.mxu2  ;;  %v2221_v52 = vpop.f32.mrf.mxu0 }
 0x1d7   :  { %v2366_v29 = vpop.f32.mrf.mxu3  ;;  %v2318_v1 = vadd.f32 %v2317_v25, %v2269_v39  ;;  %v2270_v34 = vpop.f32.mrf.mxu1  ;;  %v2222_v35 = vadd.f32 %v2221_v52, %v4932_v31  ;;  %v2985_v31 = vld [vmem:[%s5334_s0 + $0x238] sm:$0xf]  ;;  %v3054_v25 = vor.u32 %v3782_v32, %v3051_v10  ;;  %v3813_v32 = vld [vmem:[%s5334_s0 + $0x3b4] sm:$0xf] }
 0x1d8   :  { %v2986_v3 = vor.u32 %v3774_v38, %v2985_v31  ;;  %v3805_v38 = vld [vmem:[%s5334_s0 + $0x36c] sm:$0xf0]  ;;  %v3171_v10 = vld [vmem:[%s5334_s0 + $0x3f0] sm:$0xf0] }
 0x1d9   :  { %v5169_v17 = vadd.f32 %v2366_v29, %v2318_v1  ;;  %v2271_v14 = vadd.f32 %v2270_v34, %v2222_v35 }
 0x1de   :  { %v2319_v44 = vpop.f32.mrf.mxu2  ;;  %v2224_v51 = vpop.f32.mrf.mxu0 }
 0x1df   :  { %v2368_v45 = vpop.f32.mrf.mxu3  ;;  %v2320_v48 = vadd.f32 %v2319_v44, %v2271_v14  ;;  %v2273_v53 = vpop.f32.mrf.mxu1  ;;  %v2225_v50 = vadd.f32 %v2224_v51, %v4944_v43  ;;  %v3041_v43 = vld [vmem:[%s5334_s0 + $0x2b0] sm:$0xf]  ;;  %v3806_v44 = vld [vmem:[%s5334_s0 + $0x374] sm:$0xf0] }
 0x1e0   :  { %v3042_v16 = vor.u32 %v3789_v7, %v3041_v43 }
 0x1e1   :  { %v5196_v26 = vadd.f32 %v2368_v45, %v2320_v48  ;;  %v2274_v12 = vadd.f32 %v2273_v53, %v2225_v50  ;;  %2419 = vmatmul.bf16.gmra.mxu0 %v2978_v46  ;;  %v3798_v45 = vld [vmem:[%s5334_s0 + $0x33c] sm:$0xf]  ;;  %v3110_v53 = vor.u32 %v3797_v41, %v3107_v42 }
 0x1e2   :  { %2468 = vmatmul.bf16.gmra.mxu1 %v2982_v47  ;;  %v3115_v46 = vld [vmem:[%s5334_s0 + $0x378] sm:$0xf0] }
 0x1e3   :  { %2517 = vmatmul.bf16.gmra.mxu2 %v2986_v3 }
 0x1e4   :  { %2566 = vmatmul.bf16.gmra.mxu3 %v2990_v58 }
 0x1e6   :  { %v2322_v59 = vpop.f32.mrf.mxu2  ;;  %v2226_v27 = vpop.f32.mrf.mxu0 }
 0x1e7   :  { %v2371_v62 = vpop.f32.mrf.mxu3  ;;  %v2323_v40 = vadd.f32 %v2322_v59, %v2274_v12  ;;  %v2275_v2 = vpop.f32.mrf.mxu1  ;;  %v2227_v4 = vadd.f32 %v2226_v27, %v4974_v0  ;;  %v3049_v0 = vld [vmem:[%s5334_s0 + $0x2b8] sm:$0xf]  ;;  %v3118_v59 = vor.u32 %v3798_v45, %v3115_v46 }
 0x1e8   :  { %v3050_v39 = vor.u32 %v3790_v49, %v3049_v0  ;;  %v3821_v49 = vld [vmem:[%s5334_s0 + $0x3ec] sm:$0xf0] }
 0x1e9   :  { %v5199_v6 = vadd.f32 %v2371_v62, %v2323_v40  ;;  %v2276_v55 = vadd.f32 %v2275_v2, %v2227_v4 }
 0x1ee   :  { %v2324_v11 = vpop.f32.mrf.mxu2  ;;  %v2229_v22 = vpop.f32.mrf.mxu0 }
 0x1ef   :  { %v2373_v15 = vpop.f32.mrf.mxu3  ;;  %v2325_v21 = vadd.f32 %v2324_v11, %v2276_v55  ;;  %v2278_v23 = vpop.f32.mrf.mxu1  ;;  %v2230_v29 = vadd.f32 %v2229_v22, %v4986_v18  ;;  %v3105_v18 = vld [vmem:[%s5334_s0 + $0x330] sm:$0xf]  ;;  %v3822_v11 = vld [vmem:[%s5334_s0 + $0x3f4] sm:$0xf0] }
 0x1f0   :  { %v3106_v51 = vor.u32 %v3805_v38, %v3105_v18 }
 0x1f1   :  { %v5226_v1 = vadd.f32 %v2373_v15, %v2325_v21  ;;  %v2279_v52 = vadd.f32 %v2278_v23, %v2230_v29  ;;  %2424 = vmatmul.bf16.gmra.mxu0 %v3042_v16  ;;  %v3814_v15 = vld [vmem:[%s5334_s0 + $0x3bc] sm:$0xf]  ;;  %v3174_v23 = vor.u32 %v3813_v32, %v3171_v10 }
 0x1f2   :  { %2473 = vmatmul.bf16.gmra.mxu1 %v3046_v20  ;;  %v3179_v16 = vld [vmem:[%s5334_s0 + $0x3f8] sm:$0xf0] }
 0x1f3   :  { %2522 = vmatmul.bf16.gmra.mxu2 %v3050_v39 }
 0x1f4   :  { %2571 = vmatmul.bf16.gmra.mxu3 %v3054_v25 }
 0x1f6   :  { %v2327_v34 = vpop.f32.mrf.mxu2  ;;  %v2231_v5 = vpop.f32.mrf.mxu0 }
 0x1f7   :  { %v2376_v35 = vpop.f32.mrf.mxu3  ;;  %v2328_v14 = vadd.f32 %v2327_v34, %v2279_v52  ;;  %v2280_v61 = vpop.f32.mrf.mxu1  ;;  %v2232_v36 = vadd.f32 %v2231_v5, %v5016_v30  ;;  %v3113_v30 = vld [vmem:[%s5334_s0 + $0x338] sm:$0xf]  ;;  %v3182_v34 = vor.u32 %v3814_v15, %v3179_v16 }
 0x1f8   :  { %v3114_v12 = vor.u32 %v3806_v44, %v3113_v30 }
 0x1f9   :  { %v5229_v37 = vadd.f32 %v2376_v35, %v2328_v14  ;;  %v2281_v31 = vadd.f32 %v2280_v61, %v2232_v36 }
 0x1fe   :  { %v2329_v47 = vpop.f32.mrf.mxu2  ;;  %v2234_v58 = vpop.f32.mrf.mxu0 }
 0x1ff   :  { %v2378_v48 = vpop.f32.mrf.mxu3  ;;  %v2330_v3 = vadd.f32 %v2329_v47, %v2281_v31  ;;  %v2283_v50 = vpop.f32.mrf.mxu1  ;;  %v2235_v62 = vadd.f32 %v2234_v58, %v5019_v56  ;;  %v3169_v56 = vld [vmem:[%s5334_s0 + $0x3b0] sm:$0xf] }
 0x200   :  { %v3170_v22 = vor.u32 %v3821_v49, %v3169_v56 }
 0x201   :  { %v5256_v40 = vadd.f32 %v2378_v48, %v2330_v3  ;;  %v2284_v27 = vadd.f32 %v2283_v50, %v2235_v62  ;;  %2429 = vmatmul.bf16.gmra.mxu0 %v3106_v51 }
 0x202   :  { %2478 = vmatmul.bf16.gmra.mxu1 %v3110_v53 }
 0x203   :  { %2527 = vmatmul.bf16.gmra.mxu2 %v3114_v12 }
 0x204   :  { %2576 = vmatmul.bf16.gmra.mxu3 %v3118_v59 }
 0x206   :  { %v2332_v2 = vpop.f32.mrf.mxu2  ;;  %v2236_v43 = vpop.f32.mrf.mxu0 }
 0x207   :  { %v2381_v4 = vpop.f32.mrf.mxu3  ;;  %v2333_v55 = vadd.f32 %v2332_v2, %v2284_v27  ;;  %v2285_v7 = vpop.f32.mrf.mxu1  ;;  %v2237_v8 = vadd.f32 %v2236_v43, %v5046_v13  ;;  %v3177_v13 = vld [vmem:[%s5334_s0 + $0x3b8] sm:$0xf] }
 0x208   :  { %v3178_v52 = vor.u32 %v3822_v11, %v3177_v13 }
 0x209   :  { %v5259_v9 = vadd.f32 %v2381_v4, %v2333_v55  ;;  %v2286_v0 = vadd.f32 %v2285_v7, %v2237_v8 }
 0x20e   :  { %v2334_v20 = vpop.f32.mrf.mxu2  ;;  %v2239_v25 = vpop.f32.mrf.mxu0 }
 0x20f   :  { %v2383_v21 = vpop.f32.mrf.mxu3  ;;  %v2335_v39 = vadd.f32 %v2334_v20, %v2286_v0  ;;  %v2288_v29 = vpop.f32.mrf.mxu1  ;;  %v2240_v35 = vadd.f32 %v2239_v25, %v5049_v54 }
 0x211   :  { %v5286_v14 = vadd.f32 %v2383_v21, %v2335_v39  ;;  %v2289_v5 = vadd.f32 %v2288_v29, %v2240_v35  ;;  %2434 = vmatmul.bf16.gmra.mxu0 %v3170_v22 }
 0x212   :  { %2483 = vmatmul.bf16.gmra.mxu1 %v3174_v23 }
 0x213   :  { %2532 = vmatmul.bf16.gmra.mxu2 %v3178_v52 }
 0x214   :  { %2581 = vmatmul.bf16.gmra.mxu3 %v3182_v34 }
 0x216   :  { %v2337_v61 = vpop.f32.mrf.mxu2  ;;  %v2241_v18 = vpop.f32.mrf.mxu0 }
 0x217   :  { %v2386_v36 = vpop.f32.mrf.mxu3  ;;  %v2338_v31 = vadd.f32 %v2337_v61, %v2289_v5  ;;  %v2290_v38 = vpop.f32.mrf.mxu1  ;;  %v2242_v41 = vadd.f32 %v2241_v18, %v5076_v19 }
 0x219   :  { %v5289_v42 = vadd.f32 %v2386_v36, %v2338_v31  ;;  %v2291_v30 = vadd.f32 %v2290_v38, %v2242_v41 }
 0x21e   :  { %v2339_v44 = vpop.f32.mrf.mxu2  ;;  %v2400_v46 = vpop.f32.mrf.mxu0 }
 0x21f   :  { %v2388_v45 = vpop.f32.mrf.mxu3  ;;  %v2340_v54 = vadd.f32 %v2339_v44, %v2291_v30  ;;  %v2449_v47 = vpop.f32.mrf.mxu1  ;;  %v2401_v51 = vadd.f32 %v2400_v46, %v5079_v28 }
 0x221   :  { %v5291_v48 = vadd.f32 %v2388_v45, %v2340_v54  ;;  %v2450_v58 = vadd.f32 %v2449_v47, %v2401_v51 }
 0x226   :  { %v2498_v53 = vpop.f32.mrf.mxu2  ;;  %v2402_v50 = vpop.f32.mrf.mxu0 }
 0x227   :  { %v2547_v3 = vpop.f32.mrf.mxu3  ;;  %v2451_v12 = vpop.f32.mrf.mxu1  ;;  %v2499_v59 = vadd.f32 %v2498_v53, %v2450_v58  ;;  %v2403_v19 = vadd.f32 %v2402_v50, %v5106_v60 }
 0x229   :  { %v2548_v62 = vadd.f32 %v2547_v3, %v2499_v59  ;;  %v2452_v27 = vadd.f32 %v2451_v12, %v2403_v19 }
 0x22b   :  { %v2603_v8 = vmul.f32 0.2, %v2548_v62  ;;  %vm2587_vm0 = vcmp.gt.f32.partialorder %v2548_v62, 0.0 }
 0x22d   :  { %v2619_v49 = vsel %vm2587_vm0, %v2548_v62, %v2603_v8 }
 0x22e   :  { %v2500_v2 = vpop.f32.mrf.mxu2  ;;  %v2405_v43 = vpop.f32.mrf.mxu0 }
 0x22f   :  { %v2549_v4 = vpop.f32.mrf.mxu3  ;;  %v2501_v55 = vadd.f32 %v2500_v2, %v2452_v27  ;;  %v2454_v7 = vpop.f32.mrf.mxu1  ;;  %v2406_v56 = vadd.f32 %v2405_v43, %v5109_v33 }
 0x231   :  { %v2550_v0 = vadd.f32 %v2549_v4, %v2501_v55  ;;  %v2455_v60 = vadd.f32 %v2454_v7, %v2406_v56 }
 0x233   :  { %vm2588_vm1 = vcmp.gt.f32.partialorder %v2550_v0, 0.0  ;;  %v2604_v28 = vmul.f32 0.2, %v2550_v0 }
 0x235   :  { %v2620_v32 = vsel %vm2588_vm1, %v2550_v0, %v2604_v28 }
 0x236   :  { %v3954_v10 = vpack.c.bf16 %v2620_v32, %v2619_v49  ;;  %v2503_v13 = vpop.f32.mrf.mxu2  ;;  %v2407_v15 = vpop.f32.mrf.mxu0 }
 0x237   :  { %v2552_v11 = vpop.f32.mrf.mxu3  ;;  %v2456_v16 = vpop.f32.mrf.mxu1  ;;  %v2504_v20 = vadd.f32 %v2503_v13, %v2455_v60  ;;  %v2408_v21 = vadd.f32 %v2407_v15, %v5136_v57 }
 0x238   :  { %3955 = vst [vmem:[%s5335_s2] sm:$0xff] %v3954_v10  }
 0x239   :  { %v2553_v22 = vadd.f32 %v2552_v11, %v2504_v20  ;;  %v2457_v23 = vadd.f32 %v2456_v16, %v2408_v21 }
 0x23b   :  { %v2605_v34 = vmul.f32 0.2, %v2553_v22  ;;  %vm2589_vm2 = vcmp.gt.f32.partialorder %v2553_v22, 0.0 }
 0x23d   :  { %v2621_v36 = vsel %vm2589_vm2, %v2553_v22, %v2605_v34 }
 0x23e   :  { %v2505_v39 = vpop.f32.mrf.mxu2  ;;  %v2410_v29 = vpop.f32.mrf.mxu0 }
 0x23f   :  { %v2554_v25 = vpop.f32.mrf.mxu3  ;;  %v2506_v33 = vadd.f32 %v2505_v39, %v2457_v23  ;;  %v2459_v52 = vpop.f32.mrf.mxu1  ;;  %v2411_v61 = vadd.f32 %v2410_v29, %v5139_v63 }
 0x241   :  { %v2555_v35 = vadd.f32 %v2554_v25, %v2506_v33  ;;  %v2460_v57 = vadd.f32 %v2459_v52, %v2411_v61 }
 0x243   :  { %vm2590_vm3 = vcmp.gt.f32.partialorder %v2555_v35, 0.0  ;;  %v2606_v5 = vmul.f32 0.2, %v2555_v35 }
 0x245   :  { %v2622_v31 = vsel %vm2590_vm3, %v2555_v35, %v2606_v5 }
 0x246   :  { %v3959_v18 = vpack.c.bf16 %v2622_v31, %v2621_v36  ;;  %v2508_v38 = vpop.f32.mrf.mxu2  ;;  %v2412_v30 = vpop.f32.mrf.mxu0 }
 0x247   :  { %v2557_v41 = vpop.f32.mrf.mxu3  ;;  %v2461_v44 = vpop.f32.mrf.mxu1  ;;  %v2509_v45 = vadd.f32 %v2508_v38, %v2460_v57  ;;  %v2413_v54 = vadd.f32 %v2412_v30, %v5166_v24 }
 0x248   :  { %3991 = vst [vmem:[%s5335_s2 + $0x8] sm:$0xff] %v3959_v18  }
 0x249   :  { %v2558_v46 = vadd.f32 %v2557_v41, %v2509_v45  ;;  %v2462_v47 = vadd.f32 %v2461_v44, %v2413_v54 }
 0x24b   :  { %v2607_v50 = vmul.f32 0.2, %v2558_v46  ;;  %vm2591_vm4 = vcmp.gt.f32.partialorder %v2558_v46, 0.0 }
 0x24d   :  { %v2623_v62 = vsel %vm2591_vm4, %v2558_v46, %v2607_v50 }
 0x24e   :  { %v2510_v51 = vpop.f32.mrf.mxu2  ;;  %v2415_v3 = vpop.f32.mrf.mxu0 }
 0x24f   :  { %v2559_v53 = vpop.f32.mrf.mxu3  ;;  %v2511_v63 = vadd.f32 %v2510_v51, %v2462_v47  ;;  %v2464_v58 = vpop.f32.mrf.mxu1  ;;  %v2416_v19 = vadd.f32 %v2415_v3, %v5169_v17 }
 0x251   :  { %v2560_v12 = vadd.f32 %v2559_v53, %v2511_v63  ;;  %v2465_v24 = vadd.f32 %v2464_v58, %v2416_v19 }
 0x253   :  { %vm2592_vm5 = vcmp.gt.f32.partialorder %v2560_v12, 0.0  ;;  %v2608_v59 = vmul.f32 0.2, %v2560_v12 }
 0x255   :  { %v2624_v27 = vsel %vm2592_vm5, %v2560_v12, %v2608_v59 }
 0x256   :  { %v3964_v2 = vpack.c.bf16 %v2624_v27, %v2623_v62  ;;  %v2513_v4 = vpop.f32.mrf.mxu2  ;;  %v2417_v43 = vpop.f32.mrf.mxu0 }
 0x257   :  { %v2562_v55 = vpop.f32.mrf.mxu3  ;;  %v2466_v7 = vpop.f32.mrf.mxu1  ;;  %v2514_v8 = vadd.f32 %v2513_v4, %v2465_v24  ;;  %v2418_v0 = vadd.f32 %v2417_v43, %v5196_v26 }
 0x258   :  { %3992 = vst [vmem:[%s5335_s2 + $0x10] sm:$0xff] %v3964_v2  }
 0x259   :  { %v2563_v28 = vadd.f32 %v2562_v55, %v2514_v8  ;;  %v2467_v56 = vadd.f32 %v2466_v7, %v2418_v0 }
 0x25b   :  { %v2609_v11 = vmul.f32 0.2, %v2563_v28  ;;  %vm2593_vm6 = vcmp.gt.f32.partialorder %v2563_v28, 0.0 }
 0x25d   :  { %v2625_v20 = vsel %vm2593_vm6, %v2563_v28, %v2609_v11 }
 0x25e   :  { %v2515_v49 = vpop.f32.mrf.mxu2  ;;  %v2420_v10 = vpop.f32.mrf.mxu0 }
 0x25f   :  { %v2564_v32 = vpop.f32.mrf.mxu3  ;;  %v2516_v17 = vadd.f32 %v2515_v49, %v2467_v56  ;;  %v2469_v13 = vpop.f32.mrf.mxu1  ;;  %v2421_v16 = vadd.f32 %v2420_v10, %v5199_v6 }
 0x261   :  { %v2565_v60 = vadd.f32 %v2564_v32, %v2516_v17  ;;  %v2470_v26 = vadd.f32 %v2469_v13, %v2421_v16 }
 0x263   :  { %vm2594_vm7 = vcmp.gt.f32.partialorder %v2565_v60, 0.0  ;;  %v2610_v15 = vmul.f32 0.2, %v2565_v60 }
 0x265   :  { %v2626_v21 = vsel %vm2594_vm7, %v2565_v60, %v2610_v15 }
 0x266   :  { %v3969_v22 = vpack.c.bf16 %v2626_v21, %v2625_v20  ;;  %v2518_v23 = vpop.f32.mrf.mxu2  ;;  %v2422_v25 = vpop.f32.mrf.mxu0 }
 0x267   :  { %v2567_v39 = vpop.f32.mrf.mxu3  ;;  %v2471_v33 = vpop.f32.mrf.mxu1  ;;  %v2519_v29 = vadd.f32 %v2518_v23, %v2470_v26  ;;  %v2423_v52 = vadd.f32 %v2422_v25, %v5226_v1 }
 0x268   :  { %3993 = vst [vmem:[%s5335_s2 + $0x18] sm:$0xff] %v3969_v22  }
 0x269   :  { %v2568_v34 = vadd.f32 %v2567_v39, %v2519_v29  ;;  %v2472_v35 = vadd.f32 %v2471_v33, %v2423_v52 }
 0x26b   :  { %v2611_v18 = vmul.f32 0.2, %v2568_v34  ;;  %vm2595_vm8 = vcmp.gt.f32.partialorder %v2568_v34, 0.0 }
 0x26d   :  { %v2627_v30 = vsel %vm2595_vm8, %v2568_v34, %v2611_v18 }
 0x26e   :  { %v2520_v5 = vpop.f32.mrf.mxu2  ;;  %v2425_v36 = vpop.f32.mrf.mxu0 }
 0x26f   :  { %v2569_v61 = vpop.f32.mrf.mxu3  ;;  %v2521_v6 = vadd.f32 %v2520_v5, %v2472_v35  ;;  %v2474_v31 = vpop.f32.mrf.mxu1  ;;  %v2426_v57 = vadd.f32 %v2425_v36, %v5229_v37 }
 0x271   :  { %v2570_v38 = vadd.f32 %v2569_v61, %v2521_v6  ;;  %v2475_v1 = vadd.f32 %v2474_v31, %v2426_v57 }
 0x273   :  { %vm2596_vm9 = vcmp.gt.f32.partialorder %v2570_v38, 0.0  ;;  %v2612_v41 = vmul.f32 0.2, %v2570_v38 }
 0x275   :  { %v2628_v44 = vsel %vm2596_vm9, %v2570_v38, %v2612_v41 }
 0x276   :  { %v3974_v45 = vpack.c.bf16 %v2628_v44, %v2627_v30  ;;  %v2523_v54 = vpop.f32.mrf.mxu2  ;;  %v2427_v47 = vpop.f32.mrf.mxu0 }
 0x277   :  { %v2572_v46 = vpop.f32.mrf.mxu3  ;;  %v2476_v51 = vpop.f32.mrf.mxu1  ;;  %v2524_v53 = vadd.f32 %v2523_v54, %v2475_v1  ;;  %v2428_v63 = vadd.f32 %v2427_v47, %v5256_v40 }
 0x278   :  { %3994 = vst [vmem:[%s5335_s2 + $0x20] sm:$0xff] %v3974_v45  }
 0x279   :  { %v2573_v3 = vadd.f32 %v2572_v46, %v2524_v53  ;;  %v2477_v58 = vadd.f32 %v2476_v51, %v2428_v63 }
 0x27b   :  { %v2613_v62 = vmul.f32 0.2, %v2573_v3  ;;  %vm2597_vm10 = vcmp.gt.f32.partialorder %v2573_v3, 0.0 }
 0x27d   :  { %v2629_v55 = vsel %vm2597_vm10, %v2573_v3, %v2613_v62 }
 0x27e   :  { %v2525_v50 = vpop.f32.mrf.mxu2  ;;  %v2430_v59 = vpop.f32.mrf.mxu0 }
 0x27f   :  { %v2574_v12 = vpop.f32.mrf.mxu3  ;;  %v2526_v37 = vadd.f32 %v2525_v50, %v2477_v58  ;;  %v2479_v19 = vpop.f32.mrf.mxu1  ;;  %v2431_v4 = vadd.f32 %v2430_v59, %v5259_v9 }
 0x281   :  { %v2575_v27 = vadd.f32 %v2574_v12, %v2526_v37  ;;  %v2480_v40 = vadd.f32 %v2479_v19, %v2431_v4 }
 0x283   :  { %vm2598_vm11 = vcmp.gt.f32.partialorder %v2575_v27, 0.0  ;;  %v2614_v2 = vmul.f32 0.2, %v2575_v27 }
 0x285   :  { %v2630_v24 = vsel %vm2598_vm11, %v2575_v27, %v2614_v2 }
 0x286   :  { %v3979_v43 = vpack.c.bf16 %v2630_v24, %v2629_v55  ;;  %v2528_v7 = vpop.f32.mrf.mxu2  ;;  %v2432_v0 = vpop.f32.mrf.mxu0 }
 0x287   :  { %v2577_v8 = vpop.f32.mrf.mxu3  ;;  %v2481_v28 = vpop.f32.mrf.mxu1  ;;  %v2529_v56 = vadd.f32 %v2528_v7, %v2480_v40  ;;  %v2433_v49 = vadd.f32 %v2432_v0, %v5286_v14 }
 0x288   :  { %3995 = vst [vmem:[%s5335_s2 + $0x28] sm:$0xff] %v3979_v43  }
 0x289   :  { %v2578_v32 = vadd.f32 %v2577_v8, %v2529_v56  ;;  %v2482_v17 = vadd.f32 %v2481_v28, %v2433_v49 }
 0x28b   :  { %v2615_v60 = vmul.f32 0.2, %v2578_v32  ;;  %vm2599_vm12 = vcmp.gt.f32.partialorder %v2578_v32, 0.0 }
 0x28d   :  { %v2631_v22 = vsel %vm2599_vm12, %v2578_v32, %v2615_v60 }
 0x28e   :  { %v2530_v10 = vpop.f32.mrf.mxu2  ;;  %v2435_v11 = vpop.f32.mrf.mxu0 }
 0x28f   :  { %v2579_v13 = vpop.f32.mrf.mxu3  ;;  %v2531_v9 = vadd.f32 %v2530_v10, %v2482_v17  ;;  %v2484_v16 = vpop.f32.mrf.mxu1  ;;  %v2436_v21 = vadd.f32 %v2435_v11, %v5289_v42 }
 0x291   :  { %v2580_v15 = vadd.f32 %v2579_v13, %v2531_v9  ;;  %v2485_v14 = vadd.f32 %v2484_v16, %v2436_v21 }
 0x293   :  { %vm2600_vm13 = vcmp.gt.f32.partialorder %v2580_v15, 0.0  ;;  %v2616_v20 = vmul.f32 0.2, %v2580_v15 }
 0x295   :  { %v2632_v23 = vsel %vm2600_vm13, %v2580_v15, %v2616_v20 }
 0x296   :  { %v3984_v39 = vpack.c.bf16 %v2632_v23, %v2631_v22  ;;  %v2533_v26 = vpop.f32.mrf.mxu2  ;;  %v2437_v33 = vpop.f32.mrf.mxu0 }
 0x297   :  { %v2582_v25 = vpop.f32.mrf.mxu3  ;;  %v2534_v29 = vadd.f32 %v2533_v26, %v2485_v14  ;;  %v2438_v52 = vadd.f32 %v2437_v33, %v5291_v48  ;;  %v2486_v34 = vpop.f32.mrf.mxu1 }
 0x298   :  { %3996 = vst [vmem:[%s5335_s2 + $0x30] sm:$0xff] %v3984_v39  }
 0x299   :  { %v2583_v35 = vadd.f32 %v2582_v25, %v2534_v29  ;;  %v2487_v5 = vadd.f32 %v2486_v34, %v2438_v52 }
 0x29b   :  { %v2617_v36 = vmul.f32 0.2, %v2583_v35  ;;  %vm2601_vm14 = vcmp.gt.f32.partialorder %v2583_v35, 0.0 }
 0x29d   :  { %v2633_v38 = vsel %vm2601_vm14, %v2583_v35, %v2617_v36 }
 0x29e   :  { %v2535_v61 = vpop.f32.mrf.mxu2 }
 0x29f   :  { %v2536_v6 = vadd.f32 %v2535_v61, %v2487_v5  ;;  %v2584_v42 = vpop.f32.mrf.mxu3 }
 0x2a1   :  { %v2585_v31 = vadd.f32 %v2584_v42, %v2536_v6 }
 0x2a3   :  { %vm2602_vm15 = vcmp.gt.f32.partialorder %v2585_v31, 0.0  ;;  %v2618_v18 = vmul.f32 0.2, %v2585_v31 }
 0x2a5   :  { %v2634_v41 = vsel %vm2602_vm15, %v2585_v31, %v2618_v18 }
 0x2a6   :  { %v3989_v57 = vpack.c.bf16 %v2634_v41, %v2633_v38 }
 0x2a8   :  { %3997 = vst [vmem:[%s5335_s2 + $0x38] sm:$0xff] %v3989_v57  }

// kernel: discriminator_forward.8
= control target key start
LH: loop header
LB: loop body
LE: loop exit
PB: predicated region body
PF: predicated region fallthrough
CT: control target
= control target key end

     0   :  { %s2963_s1 = inlined_call_operand.vmem [shape: bf16[2048,128], index: 1, kind: input, shape index: {}]   ;;  %s2964_s0 = inlined_call_operand.vmem [shape: bf16[32,2048], index: 0, kind: input, shape index: {}]   ;;  %s2965_s2 = inlined_call_operand.vmem [shape: bf16[32,128], index: 2, kind: output, shape index: {}]  }
   0x1   :  { %v2234_v0 = vld [vmem:[%s2963_s1 + $0x38] sm:$0xff]  ;;  %v2233_v4 = vld [vmem:[%s2963_s1 + $0x30] sm:$0xff]  ;;  %v2232_v8 = vld [vmem:[%s2963_s1 + $0x28] sm:$0xff] }
   0x2   :  { %v2242_v1 = vld [vmem:[%s2963_s1 + $0x78] sm:$0xff]  ;;  %1227 = vmatpush.bf16.msra.mxu0 %v2234_v0  ;;  %v2241_v5 = vld [vmem:[%s2963_s1 + $0x70] sm:$0xff]  ;;  %v2240_v9 = vld [vmem:[%s2963_s1 + $0x68] sm:$0xff] }
   0x3   :  { %v2250_v2 = vld [vmem:[%s2963_s1 + $0xb8] sm:$0xff]  ;;  %1246 = vmatpush.bf16.msra.mxu1 %v2242_v1  ;;  %v2249_v6 = vld [vmem:[%s2963_s1 + $0xb0] sm:$0xff]  ;;  %v2248_v10 = vld [vmem:[%s2963_s1 + $0xa8] sm:$0xff] }
   0x4   :  { %v2258_v3 = vld [vmem:[%s2963_s1 + $0xf8] sm:$0xff]  ;;  %1265 = vmatpush.bf16.msra.mxu2 %v2250_v2  ;;  %v2257_v7 = vld [vmem:[%s2963_s1 + $0xf0] sm:$0xff]  ;;  %v2256_v11 = vld [vmem:[%s2963_s1 + $0xe8] sm:$0xff] }
   0x5   :  { %1284 = vmatpush.bf16.msra.mxu3 %v2258_v3  ;;  %v2231_v12 = vld [vmem:[%s2963_s1 + $0x20] sm:$0xff]  ;;  %v2230_v16 = vld [vmem:[%s2963_s1 + $0x18] sm:$0xff]  ;;  %v2229_v20 = vld [vmem:[%s2963_s1 + $0x10] sm:$0xff] }
   0x6   :  { %1228 = vmatpush.bf16.msra.mxu0 %v2233_v4  ;;  %v2239_v13 = vld [vmem:[%s2963_s1 + $0x60] sm:$0xff]  ;;  %v2238_v17 = vld [vmem:[%s2963_s1 + $0x58] sm:$0xff]  ;;  %v2237_v21 = vld [vmem:[%s2963_s1 + $0x50] sm:$0xff] }
   0x7   :  { %1247 = vmatpush.bf16.msra.mxu1 %v2241_v5  ;;  %v2247_v14 = vld [vmem:[%s2963_s1 + $0xa0] sm:$0xff]  ;;  %v2246_v18 = vld [vmem:[%s2963_s1 + $0x98] sm:$0xff]  ;;  %v2245_v22 = vld [vmem:[%s2963_s1 + $0x90] sm:$0xff] }
   0x8   :  { %1266 = vmatpush.bf16.msra.mxu2 %v2249_v6  ;;  %v2255_v15 = vld [vmem:[%s2963_s1 + $0xe0] sm:$0xff]  ;;  %v2254_v19 = vld [vmem:[%s2963_s1 + $0xd8] sm:$0xff]  ;;  %v2253_v23 = vld [vmem:[%s2963_s1 + $0xd0] sm:$0xff] }
   0x9   :  { %1285 = vmatpush.bf16.msra.mxu3 %v2257_v7  ;;  %v2228_v24 = vld [vmem:[%s2963_s1 + $0x8] sm:$0xff]  ;;  %v2227_v28 = vld [vmem:[%s2963_s1] sm:$0xff]  ;;  %v2282_v40 = vld [vmem:[%s2963_s1 + $0x1b8] sm:$0xff] }
   0xa   :  { %1229 = vmatpush.bf16.msra.mxu0 %v2232_v8  ;;  %v2236_v25 = vld [vmem:[%s2963_s1 + $0x48] sm:$0xff]  ;;  %v2235_v29 = vld [vmem:[%s2963_s1 + $0x40] sm:$0xff]  ;;  %v2266_v41 = vld [vmem:[%s2963_s1 + $0x138] sm:$0xff] }
   0xb   :  { %1248 = vmatpush.bf16.msra.mxu1 %v2240_v9  ;;  %v2244_v26 = vld [vmem:[%s2963_s1 + $0x88] sm:$0xff]  ;;  %v2243_v30 = vld [vmem:[%s2963_s1 + $0x80] sm:$0xff]  ;;  %v2274_v46 = vld [vmem:[%s2963_s1 + $0x178] sm:$0xff] }
   0xc   :  { %1267 = vmatpush.bf16.msra.mxu2 %v2248_v10  ;;  %v2252_v27 = vld [vmem:[%s2963_s1 + $0xc8] sm:$0xff]  ;;  %v2251_v31 = vld [vmem:[%s2963_s1 + $0xc0] sm:$0xff]  ;;  %v2290_v47 = vld [vmem:[%s2963_s1 + $0x1f8] sm:$0xff] }
   0xd   :  { %1286 = vmatpush.bf16.msra.mxu3 %v2256_v11  ;;  %v1557_v32 = vld [vmem:[%s2964_s0] sm:$0xf]  ;;  %v2195_v34 = vld [vmem:[%s2964_s0 + $0x4] sm:$0xf]  ;;  %v1565_v36 = vld [vmem:[%s2964_s0 + $0x8] sm:$0xf] }
   0xe   :  { %1230 = vmatpush.bf16.msra.mxu0 %v2231_v12  ;;  %v2203_v33 = vld [vmem:[%s2964_s0 + $0x3c] sm:$0xf0]  ;;  %v1559_v35 = vld [vmem:[%s2964_s0 + $0x40] sm:$0xf0]  ;;  %v2204_v37 = vld [vmem:[%s2964_s0 + $0x44] sm:$0xf0] }
   0xf   :  { %1249 = vmatpush.bf16.msra.mxu1 %v2239_v13  ;;  %v2196_v38 = vld [vmem:[%s2964_s0 + $0xc] sm:$0xf]  ;;  %v1558_v42 = vor.u32 %v2203_v33, %v1557_v32  ;;  %v1562_v43 = vor.u32 %v2195_v34, %v1559_v35  ;;  %v1566_v44 = vor.u32 %v2204_v37, %v1565_v36  ;;  %v2281_v48 = vld [vmem:[%s2963_s1 + $0x1b0] sm:$0xff]  ;;  %v2279_v56 = vld [vmem:[%s2963_s1 + $0x1a0] sm:$0xff] }
  0x10   :  { %1268 = vmatpush.bf16.msra.mxu2 %v2247_v14  ;;  %v1567_v39 = vld [vmem:[%s2964_s0 + $0x48] sm:$0xf0]  ;;  %v2265_v49 = vld [vmem:[%s2963_s1 + $0x130] sm:$0xff]  ;;  %v2263_v57 = vld [vmem:[%s2963_s1 + $0x120] sm:$0xff] }
  0x11   :  { %1287 = vmatpush.bf16.msra.mxu3 %v2255_v15  ;;  %v1570_v45 = vor.u32 %v2196_v38, %v1567_v39  ;;  %v2273_v50 = vld [vmem:[%s2963_s1 + $0x170] sm:$0xff]  ;;  %v2280_v52 = vld [vmem:[%s2963_s1 + $0x1a8] sm:$0xff]  ;;  %v2271_v58 = vld [vmem:[%s2963_s1 + $0x160] sm:$0xff] }
  0x12   :  { %1231 = vmatpush.bf16.msra.mxu0 %v2230_v16  ;;  %v2289_v51 = vld [vmem:[%s2963_s1 + $0x1f0] sm:$0xff]  ;;  %v2264_v53 = vld [vmem:[%s2963_s1 + $0x128] sm:$0xff]  ;;  %v2287_v59 = vld [vmem:[%s2963_s1 + $0x1e0] sm:$0xff] }
  0x13   :  { %1250 = vmatpush.bf16.msra.mxu1 %v2238_v17  ;;  %v2272_v54 = vld [vmem:[%s2963_s1 + $0x168] sm:$0xff]  ;;  %v1621_v60 = vld [vmem:[%s2964_s0 + $0x80] sm:$0xf]  ;;  %v2211_v62 = vld [vmem:[%s2964_s0 + $0x84] sm:$0xf] }
  0x14   :  { %1269 = vmatpush.bf16.msra.mxu2 %v2246_v18  ;;  %v2288_v55 = vld [vmem:[%s2963_s1 + $0x1e8] sm:$0xff]  ;;  %v2219_v61 = vld [vmem:[%s2964_s0 + $0xbc] sm:$0xf0]  ;;  %v1623_v63 = vld [vmem:[%s2964_s0 + $0xc0] sm:$0xf0] }
  0x15   :  { %1288 = vmatpush.bf16.msra.mxu3 %v2254_v19  ;;  %v1629_v0 = vld [vmem:[%s2964_s0 + $0x88] sm:$0xf]  ;;  %v2212_v2 = vld [vmem:[%s2964_s0 + $0x8c] sm:$0xf]  ;;  %v2278_v4 = vld [vmem:[%s2963_s1 + $0x198] sm:$0xff]  ;;  %v1622_v6 = vor.u32 %v2219_v61, %v1621_v60  ;;  %v1626_v7 = vor.u32 %v2211_v62, %v1623_v63 }
  0x16   :  { %1232 = vmatpush.bf16.msra.mxu0 %v2229_v20  ;;  %v2220_v1 = vld [vmem:[%s2964_s0 + $0xc4] sm:$0xf0]  ;;  %v1631_v3 = vld [vmem:[%s2964_s0 + $0xc8] sm:$0xf0]  ;;  %v2262_v5 = vld [vmem:[%s2963_s1 + $0x118] sm:$0xff] }
  0x17   :  { %1251 = vmatpush.bf16.msra.mxu1 %v2237_v21  ;;  %v1630_v8 = vor.u32 %v2220_v1, %v1629_v0  ;;  %v1634_v9 = vor.u32 %v2212_v2, %v1631_v3  ;;  %v2270_v10 = vld [vmem:[%s2963_s1 + $0x158] sm:$0xff]  ;;  %v2277_v12 = vld [vmem:[%s2963_s1 + $0x190] sm:$0xff]  ;;  %v2276_v16 = vld [vmem:[%s2963_s1 + $0x188] sm:$0xff] }
  0x18   :  { %1270 = vmatpush.bf16.msra.mxu2 %v2245_v22  ;;  %v2286_v11 = vld [vmem:[%s2963_s1 + $0x1d8] sm:$0xff]  ;;  %v2261_v13 = vld [vmem:[%s2963_s1 + $0x110] sm:$0xff]  ;;  %v2260_v17 = vld [vmem:[%s2963_s1 + $0x108] sm:$0xff] }
  0x19   :  { %1289 = vmatpush.bf16.msra.mxu3 %v2253_v23  ;;  %v2269_v14 = vld [vmem:[%s2963_s1 + $0x150] sm:$0xff]  ;;  %v2268_v18 = vld [vmem:[%s2963_s1 + $0x148] sm:$0xff]  ;;  %v2275_v20 = vld [vmem:[%s2963_s1 + $0x180] sm:$0xff] }
  0x1a   :  { %1233 = vmatpush.bf16.msra.mxu0 %v2228_v24  ;;  %v2285_v15 = vld [vmem:[%s2963_s1 + $0x1d0] sm:$0xff]  ;;  %v2284_v19 = vld [vmem:[%s2963_s1 + $0x1c8] sm:$0xff]  ;;  %v2259_v21 = vld [vmem:[%s2963_s1 + $0x100] sm:$0xff] }
  0x1b   :  { %1252 = vmatpush.bf16.msra.mxu1 %v2236_v25  ;;  %v2267_v22 = vld [vmem:[%s2963_s1 + $0x140] sm:$0xff]  ;;  %v1573_v24 = vld [vmem:[%s2964_s0 + $0x10] sm:$0xf]  ;;  %v2314_v25 = vld [vmem:[%s2963_s1 + $0x2b8] sm:$0xff] }
  0x1c   :  { %1271 = vmatpush.bf16.msra.mxu2 %v2244_v26  ;;  %v2283_v23 = vld [vmem:[%s2963_s1 + $0x1c0] sm:$0xff]  ;;  %v2298_v26 = vld [vmem:[%s2963_s1 + $0x238] sm:$0xff]  ;;  %v2313_v37 = vld [vmem:[%s2963_s1 + $0x2b0] sm:$0xff] }
  0x1d   :  { %1290 = vmatpush.bf16.msra.mxu3 %v2252_v27  ;;  %v2205_v27 = vld [vmem:[%s2964_s0 + $0x4c] sm:$0xf0]  ;;  %v2198_v32 = vld [vmem:[%s2964_s0 + $0x1c] sm:$0xf] }
  0x1e   :  { %1234 = vmatpush.bf16.msra.mxu0 %v2227_v28  ;;  %v2197_v28 = vld [vmem:[%s2964_s0 + $0x14] sm:$0xf]  ;;  %v1583_v33 = vld [vmem:[%s2964_s0 + $0x58] sm:$0xf0]  ;;  %v1574_v36 = vor.u32 %v2205_v27, %v1573_v24  ;;  %v1591_v24 = vld [vmem:[%s2964_s0 + $0x60] sm:$0xf0] }
  0x1f   :  { %1253 = vmatpush.bf16.msra.mxu1 %v2235_v29  ;;  %v1575_v29 = vld [vmem:[%s2964_s0 + $0x50] sm:$0xf0]  ;;  %v2306_v34 = vld [vmem:[%s2963_s1 + $0x278] sm:$0xff]  ;;  %v2200_v27 = vld [vmem:[%s2964_s0 + $0x2c] sm:$0xf] }
  0x20   :  { %1272 = vmatpush.bf16.msra.mxu2 %v2243_v30  ;;  %v1581_v30 = vld [vmem:[%s2964_s0 + $0x18] sm:$0xf]  ;;  %v1578_v38 = vor.u32 %v2197_v28, %v1575_v29  ;;  %v1647_v61 = vld [vmem:[%s2964_s0 + $0xd8] sm:$0xf0]  ;;  %v2309_v1 = vld [vmem:[%s2963_s1 + $0x290] sm:$0xff] }
  0x21   :  { %1291 = vmatpush.bf16.msra.mxu3 %v2251_v31  ;;  %1235 = vmatmul.bf16.vlgmr.msra.gmra.mxu0 %v1558_v42  ;;  %v2206_v31 = vld [vmem:[%s2964_s0 + $0x54] sm:$0xf0]  ;;  %v2305_v42 = vld [vmem:[%s2963_s1 + $0x270] sm:$0xff]  ;;  %v1599_v28 = vld [vmem:[%s2964_s0 + $0x68] sm:$0xf0] }
  0x22   :  { %1303 = vmatpush.bf16.msrb.mxu0 %v2266_v41  ;;  %1254 = vmatmul.bf16.vlgmr.msra.gmra.mxu1 %v1562_v43  ;;  %v2322_v35 = vld [vmem:[%s2963_s1 + $0x2f8] sm:$0xff]  ;;  %v1582_v39 = vor.u32 %v2206_v31, %v1581_v30  ;;  %v2297_v41 = vld [vmem:[%s2963_s1 + $0x230] sm:$0xff] }
  0x23   :  { %1273 = vmatmul.bf16.vlgmr.msra.gmra.mxu2 %v1566_v44  ;;  %1322 = vmatpush.bf16.msrb.mxu1 %v2274_v46  ;;  %v2321_v43 = vld [vmem:[%s2963_s1 + $0x2f0] sm:$0xff]  ;;  %v2312_v44 = vld [vmem:[%s2963_s1 + $0x2a8] sm:$0xff]  ;;  %v2294_v60 = vld [vmem:[%s2963_s1 + $0x218] sm:$0xff] }
  0x24   :  { %1341 = vmatpush.bf16.msrb.mxu2 %v2282_v40  ;;  %1292 = vmatmul.bf16.vlgmr.msra.gmra.mxu3 %v1570_v45  ;;  %v1586_v40 = vor.u32 %v2198_v32, %v1583_v33  ;;  %v2296_v45 = vld [vmem:[%s2963_s1 + $0x228] sm:$0xff]  ;;  %v2302_v62 = vld [vmem:[%s2963_s1 + $0x258] sm:$0xff]  ;;  %v2337_v30 = vld [vmem:[%s2963_s1 + $0x370] sm:$0xff]  ;;  %v1602_v33 = vor.u32 %v2200_v27, %v1599_v28 }
  0x25   :  { %1360 = vmatpush.bf16.msrb.mxu3 %v2290_v47  ;;  %v2304_v46 = vld [vmem:[%s2963_s1 + $0x268] sm:$0xff]  ;;  %v2318_v63 = vld [vmem:[%s2963_s1 + $0x2d8] sm:$0xff] }
  0x26   :  { %1304 = vmatpush.bf16.msrb.mxu0 %v2265_v49  ;;  %v2320_v47 = vld [vmem:[%s2963_s1 + $0x2e8] sm:$0xff]  ;;  %v2295_v49 = vld [vmem:[%s2963_s1 + $0x220] sm:$0xff]  ;;  %v1679_v27 = vld [vmem:[%s2964_s0 + $0xf8] sm:$0xf0] }
  0x27   :  { %1323 = vmatpush.bf16.msrb.mxu1 %v2273_v50  ;;  %v2303_v50 = vld [vmem:[%s2963_s1 + $0x260] sm:$0xff] }
  0x28   :  { %1342 = vmatpush.bf16.msrb.mxu2 %v2281_v48  ;;  %v2311_v48 = vld [vmem:[%s2963_s1 + $0x2a0] sm:$0xff] }
  0x29   :  { %1361 = vmatpush.bf16.msrb.mxu3 %v2289_v51  ;;  %v2319_v51 = vld [vmem:[%s2963_s1 + $0x2e0] sm:$0xff] }
  0x2a   :  { %1305 = vmatpush.bf16.msrb.mxu0 %v2264_v53  ;;  %v2221_v53 = vld [vmem:[%s2964_s0 + $0xcc] sm:$0xf0] }
  0x2b   :  { %1324 = vmatpush.bf16.msrb.mxu1 %v2272_v54  ;;  %v2310_v54 = vld [vmem:[%s2963_s1 + $0x298] sm:$0xff] }
  0x2c   :  { %1343 = vmatpush.bf16.msrb.mxu2 %v2280_v52  ;;  %v1637_v52 = vld [vmem:[%s2964_s0 + $0x90] sm:$0xf] }
  0x2d   :  { %1362 = vmatpush.bf16.msrb.mxu3 %v2288_v55  ;;  %v2213_v55 = vld [vmem:[%s2964_s0 + $0x94] sm:$0xf]  ;;  %v1638_v0 = vor.u32 %v2221_v53, %v1637_v52  ;;  %v2216_v52 = vld [vmem:[%s2964_s0 + $0xac] sm:$0xf]  ;;  %v2326_v53 = vld [vmem:[%s2963_s1 + $0x318] sm:$0xff] }
  0x2e   :  { %1306 = vmatpush.bf16.msrb.mxu0 %v2263_v57  ;;  %v1645_v57 = vld [vmem:[%s2964_s0 + $0x98] sm:$0xf] }
  0x2f   :  { %1325 = vmatpush.bf16.msrb.mxu1 %v2271_v58  ;;  %v2222_v58 = vld [vmem:[%s2964_s0 + $0xd4] sm:$0xf0] }
  0x30   :  { %1344 = vmatpush.bf16.msrb.mxu2 %v2279_v56  ;;  %v1639_v56 = vld [vmem:[%s2964_s0 + $0xd0] sm:$0xf0]  ;;  %v1646_v3 = vor.u32 %v2222_v58, %v1645_v57 }
  0x31   :  { %1363 = vmatpush.bf16.msrb.mxu3 %v2287_v59  ;;  %1240 = vmatmul.bf16.gmra.mxu0 %v1622_v6  ;;  %v2214_v59 = vld [vmem:[%s2964_s0 + $0x9c] sm:$0xf]  ;;  %v1642_v2 = vor.u32 %v2213_v55, %v1639_v56  ;;  %v2301_v6 = vld [vmem:[%s2963_s1 + $0x250] sm:$0xff] }
  0x32   :  { %1307 = vmatpush.bf16.msrb.mxu0 %v2262_v5  ;;  %1259 = vmatmul.bf16.gmra.mxu1 %v1626_v7  ;;  %v2293_v5 = vld [vmem:[%s2963_s1 + $0x210] sm:$0xff]  ;;  %v2350_v55 = vld [vmem:[%s2963_s1 + $0x3d8] sm:$0xff] }
  0x33   :  { %1278 = vmatmul.bf16.gmra.mxu2 %v1630_v8  ;;  %1326 = vmatpush.bf16.msrb.mxu1 %v2270_v10  ;;  %v2317_v7 = vld [vmem:[%s2963_s1 + $0x2d0] sm:$0xff]  ;;  %v2308_v8 = vld [vmem:[%s2963_s1 + $0x288] sm:$0xff] }
  0x34   :  { %1345 = vmatpush.bf16.msrb.mxu2 %v2278_v4  ;;  %1297 = vmatmul.bf16.gmra.mxu3 %v1634_v9  ;;  %v1650_v4 = vor.u32 %v2214_v59, %v1647_v61  ;;  %v2292_v9 = vld [vmem:[%s2963_s1 + $0x208] sm:$0xff]  ;;  %v2341_v56 = vld [vmem:[%s2963_s1 + $0x390] sm:$0xff] }
  0x35   :  { %1364 = vmatpush.bf16.msrb.mxu3 %v2286_v11  ;;  %v2300_v10 = vld [vmem:[%s2963_s1 + $0x248] sm:$0xff]  ;;  %v2333_v58 = vld [vmem:[%s2963_s1 + $0x350] sm:$0xff] }
  0x36   :  { %1308 = vmatpush.bf16.msrb.mxu0 %v2261_v13  ;;  %v2316_v11 = vld [vmem:[%s2963_s1 + $0x2c8] sm:$0xff]  ;;  %v2346_v13 = vld [vmem:[%s2963_s1 + $0x3b8] sm:$0xff] }
  0x37   :  { %1327 = vmatpush.bf16.msrb.mxu1 %v2269_v14  ;;  %v2291_v14 = vld [vmem:[%s2963_s1 + $0x200] sm:$0xff] }
  0x38   :  { %1346 = vmatpush.bf16.msrb.mxu2 %v2277_v12  ;;  %v2307_v12 = vld [vmem:[%s2963_s1 + $0x280] sm:$0xff] }
  0x39   :  { %1365 = vmatpush.bf16.msrb.mxu3 %v2285_v15  ;;  %v2299_v15 = vld [vmem:[%s2963_s1 + $0x240] sm:$0xff] }
  0x3a   :  { %1309 = vmatpush.bf16.msrb.mxu0 %v2260_v17  ;;  %v1589_v17 = vld [vmem:[%s2964_s0 + $0x20] sm:$0xf] }
  0x3b   :  { %1328 = vmatpush.bf16.msrb.mxu1 %v2268_v18  ;;  %v2207_v18 = vld [vmem:[%s2964_s0 + $0x5c] sm:$0xf0] }
  0x3c   :  { %1347 = vmatpush.bf16.msrb.mxu2 %v2276_v16  ;;  %v2315_v16 = vld [vmem:[%s2963_s1 + $0x2c0] sm:$0xff]  ;;  %v1590_v29 = vor.u32 %v2207_v18, %v1589_v17 }
  0x3d   :  { %1366 = vmatpush.bf16.msrb.mxu3 %v2284_v19  ;;  %v2330_v19 = vld [vmem:[%s2963_s1 + $0x338] sm:$0xff] }
  0x3e   :  { %1310 = vmatpush.bf16.msrb.mxu0 %v2259_v21  ;;  %v2199_v21 = vld [vmem:[%s2964_s0 + $0x24] sm:$0xf] }
  0x3f   :  { %1329 = vmatpush.bf16.msrb.mxu1 %v2267_v22  ;;  %v2354_v22 = vld [vmem:[%s2963_s1 + $0x3f8] sm:$0xff]  ;;  %v1594_v31 = vor.u32 %v2199_v21, %v1591_v24  ;;  %v2225_v21 = vld [vmem:[%s2964_s0 + $0xec] sm:$0xf0] }
  0x40   :  { %1348 = vmatpush.bf16.msrb.mxu2 %v2275_v20  ;;  %v2338_v20 = vld [vmem:[%s2963_s1 + $0x378] sm:$0xff] }
  0x41   :  { %1367 = vmatpush.bf16.msrb.mxu3 %v2283_v23  ;;  %1311 = vmatmul.bf16.vlgmr.msrb.gmra.mxu0 %v1574_v36  ;;  %v2345_v23 = vld [vmem:[%s2963_s1 + $0x3b0] sm:$0xff]  ;;  %v2344_v36 = vld [vmem:[%s2963_s1 + $0x3a8] sm:$0xff]  ;;  %v1677_v24 = vld [vmem:[%s2964_s0 + $0xb8] sm:$0xf] }
  0x42   :  { %1379 = vmatpush.bf16.msra.mxu0 %v2298_v26  ;;  %1330 = vmatmul.bf16.vlgmr.msrb.gmra.mxu1 %v1578_v38  ;;  %v2208_v26 = vld [vmem:[%s2964_s0 + $0x64] sm:$0xf0] }
  0x43   :  { %1398 = vmatpush.bf16.msra.mxu1 %v2306_v34  ;;  %1349 = vmatmul.bf16.vlgmr.msrb.gmra.mxu2 %v1582_v39  ;;  %v2329_v34 = vld [vmem:[%s2963_s1 + $0x330] sm:$0xff]  ;;  %v2328_v38 = vld [vmem:[%s2963_s1 + $0x328] sm:$0xff] }
  0x44   :  { %1417 = vmatpush.bf16.msra.mxu2 %v2314_v25  ;;  %1368 = vmatmul.bf16.vlgmr.msrb.gmra.mxu3 %v1586_v40  ;;  %v1597_v25 = vld [vmem:[%s2964_s0 + $0x28] sm:$0xf]  ;;  %v2343_v40 = vld [vmem:[%s2963_s1 + $0x3a0] sm:$0xff] }
  0x45   :  { %1436 = vmatpush.bf16.msra.mxu3 %v2322_v35  ;;  %v1598_v32 = vor.u32 %v2208_v26, %v1597_v25  ;;  %v2353_v35 = vld [vmem:[%s2963_s1 + $0x3f0] sm:$0xff]  ;;  %v2352_v39 = vld [vmem:[%s2963_s1 + $0x3e8] sm:$0xff]  ;;  %v2226_v25 = vld [vmem:[%s2964_s0 + $0xf4] sm:$0xf0] }
  0x46   :  { %1380 = vmatpush.bf16.msra.mxu0 %v2297_v41  ;;  %v2335_v41 = vld [vmem:[%s2963_s1 + $0x360] sm:$0xff]  ;;  %v2218_v26 = vld [vmem:[%s2964_s0 + $0xbc] sm:$0xf] }
  0x47   :  { %1399 = vmatpush.bf16.msra.mxu1 %v2305_v42  ;;  %v2327_v42 = vld [vmem:[%s2963_s1 + $0x320] sm:$0xff] }
  0x48   :  { %1418 = vmatpush.bf16.msra.mxu2 %v2313_v37  ;;  %v2336_v37 = vld [vmem:[%s2963_s1 + $0x368] sm:$0xff] }
  0x49   :  { %1437 = vmatpush.bf16.msra.mxu3 %v2321_v43  ;;  %v2351_v43 = vld [vmem:[%s2963_s1 + $0x3e0] sm:$0xff] }
  0x4a   :  { %1381 = vmatpush.bf16.msra.mxu0 %v2296_v45  ;;  %v1653_v45 = vld [vmem:[%s2964_s0 + $0xa0] sm:$0xf] }
  0x4b   :  { %1400 = vmatpush.bf16.msra.mxu1 %v2304_v46  ;;  %v2223_v46 = vld [vmem:[%s2964_s0 + $0xdc] sm:$0xf0] }
  0x4c   :  { %1419 = vmatpush.bf16.msra.mxu2 %v2312_v44  ;;  %v2342_v44 = vld [vmem:[%s2963_s1 + $0x398] sm:$0xff]  ;;  %v1654_v57 = vor.u32 %v2223_v46, %v1653_v45 }
  0x4d   :  { %1438 = vmatpush.bf16.msra.mxu3 %v2320_v47  ;;  %v2334_v47 = vld [vmem:[%s2963_s1 + $0x358] sm:$0xff] }
  0x4e   :  { %1382 = vmatpush.bf16.msra.mxu0 %v2295_v49  ;;  %v1655_v49 = vld [vmem:[%s2964_s0 + $0xe0] sm:$0xf0] }
  0x4f   :  { %1401 = vmatpush.bf16.msra.mxu1 %v2303_v50  ;;  %v1661_v50 = vld [vmem:[%s2964_s0 + $0xa8] sm:$0xf] }
  0x50   :  { %1420 = vmatpush.bf16.msra.mxu2 %v2311_v48  ;;  %v2215_v48 = vld [vmem:[%s2964_s0 + $0xa4] sm:$0xf] }
  0x51   :  { %1439 = vmatpush.bf16.msra.mxu3 %v2319_v51  ;;  %1316 = vmatmul.bf16.gmra.mxu0 %v1638_v0  ;;  %v2224_v51 = vld [vmem:[%s2964_s0 + $0xe4] sm:$0xf0]  ;;  %v1658_v59 = vor.u32 %v2215_v48, %v1655_v49 }
  0x52   :  { %1383 = vmatpush.bf16.msra.mxu0 %v2294_v60  ;;  %1335 = vmatmul.bf16.gmra.mxu1 %v1642_v2  ;;  %v1662_v60 = vor.u32 %v2224_v51, %v1661_v50  ;;  %v2340_v0 = vld [vmem:[%s2963_s1 + $0x388] sm:$0xff] }
  0x53   :  { %1402 = vmatpush.bf16.msra.mxu1 %v2302_v62  ;;  %1354 = vmatmul.bf16.gmra.mxu2 %v1646_v3  ;;  %v2325_v62 = vld [vmem:[%s2963_s1 + $0x310] sm:$0xff]  ;;  %v2324_v2 = vld [vmem:[%s2963_s1 + $0x308] sm:$0xff] }
  0x54   :  { %1421 = vmatpush.bf16.msra.mxu2 %v2310_v54  ;;  %1373 = vmatmul.bf16.gmra.mxu3 %v1650_v4  ;;  %v1663_v54 = vld [vmem:[%s2964_s0 + $0xe8] sm:$0xf0]  ;;  %v2339_v4 = vld [vmem:[%s2963_s1 + $0x380] sm:$0xff] }
  0x55   :  { %1440 = vmatpush.bf16.msra.mxu3 %v2318_v63  ;;  %v1666_v61 = vor.u32 %v2216_v52, %v1663_v54  ;;  %v2349_v63 = vld [vmem:[%s2963_s1 + $0x3d0] sm:$0xff]  ;;  %v2348_v3 = vld [vmem:[%s2963_s1 + $0x3c8] sm:$0xff] }
  0x56   :  { %1384 = vmatpush.bf16.msra.mxu0 %v2293_v5  ;;  %v2331_v5 = vld [vmem:[%s2963_s1 + $0x340] sm:$0xff] }
  0x57   :  { %1403 = vmatpush.bf16.msra.mxu1 %v2301_v6  ;;  %v2323_v6 = vld [vmem:[%s2963_s1 + $0x300] sm:$0xff] }
  0x58   :  { %1422 = vmatpush.bf16.msra.mxu2 %v2309_v1  ;;  %v2332_v1 = vld [vmem:[%s2963_s1 + $0x348] sm:$0xff] }
  0x59   :  { %1441 = vmatpush.bf16.msra.mxu3 %v2317_v7  ;;  %v2347_v7 = vld [vmem:[%s2963_s1 + $0x3c0] sm:$0xff] }
  0x5a   :  { %1385 = vmatpush.bf16.msra.mxu0 %v2292_v9  ;;  %v2209_v9 = vld [vmem:[%s2964_s0 + $0x6c] sm:$0xf0] }
  0x5b   :  { %1404 = vmatpush.bf16.msra.mxu1 %v2300_v10  ;;  %v2201_v10 = vld [vmem:[%s2964_s0 + $0x34] sm:$0xf] }
  0x5c   :  { %1423 = vmatpush.bf16.msra.mxu2 %v2308_v8  ;;  %v1605_v8 = vld [vmem:[%s2964_s0 + $0x30] sm:$0xf] }
  0x5d   :  { %1442 = vmatpush.bf16.msra.mxu3 %v2316_v11  ;;  %v1607_v11 = vld [vmem:[%s2964_s0 + $0x70] sm:$0xf0] }
  0x5e   :  { %1386 = vmatpush.bf16.msra.mxu0 %v2291_v14  ;;  %v2202_v14 = vld [vmem:[%s2964_s0 + $0x3c] sm:$0xf]  ;;  %v1610_v17 = vor.u32 %v2201_v10, %v1607_v11 }
  0x5f   :  { %1405 = vmatpush.bf16.msra.mxu1 %v2299_v15  ;;  %v1615_v15 = vld [vmem:[%s2964_s0 + $0x78] sm:$0xf0] }
  0x60   :  { %1424 = vmatpush.bf16.msra.mxu2 %v2307_v12  ;;  %v1613_v12 = vld [vmem:[%s2964_s0 + $0x38] sm:$0xf] }
  0x61   :  { %1443 = vmatpush.bf16.msra.mxu3 %v2315_v16  ;;  %1387 = vmatmul.bf16.vlgmr.msra.gmra.mxu0 %v1590_v29  ;;  %v1606_v16 = vor.u32 %v2209_v9, %v1605_v8 }
  0x62   :  { %1455 = vmatpush.bf16.msrb.mxu0 %v2330_v19  ;;  %1406 = vmatmul.bf16.vlgmr.msra.gmra.mxu1 %v1594_v31  ;;  %v1618_v19 = vor.u32 %v2202_v14, %v1615_v15  ;;  %v1682_v31 = vor.u32 %v2218_v26, %v1679_v27 }
  0x63   :  { %1474 = vmatpush.bf16.msrb.mxu1 %v2338_v20  ;;  %1425 = vmatmul.bf16.vlgmr.msra.gmra.mxu2 %v1598_v32  ;;  %v1669_v20 = vld [vmem:[%s2964_s0 + $0xb0] sm:$0xf] }
  0x64   :  { %1493 = vmatpush.bf16.msrb.mxu2 %v2346_v13  ;;  %1444 = vmatmul.bf16.vlgmr.msra.gmra.mxu3 %v1602_v33  ;;  %v2210_v13 = vld [vmem:[%s2964_s0 + $0x74] sm:$0xf0]  ;;  %v1670_v28 = vor.u32 %v2225_v21, %v1669_v20 }
  0x65   :  { %1512 = vmatpush.bf16.msrb.mxu3 %v2354_v22  ;;  %v1614_v18 = vor.u32 %v2210_v13, %v1613_v12  ;;  %v2217_v22 = vld [vmem:[%s2964_s0 + $0xb4] sm:$0xf] }
  0x66   :  { %1456 = vmatpush.bf16.msrb.mxu0 %v2329_v34 }
  0x67   :  { %1475 = vmatpush.bf16.msrb.mxu1 %v2337_v30  ;;  %v1678_v30 = vor.u32 %v2226_v25, %v1677_v24 }
  0x68   :  { %1494 = vmatpush.bf16.msrb.mxu2 %v2345_v23  ;;  %v1671_v23 = vld [vmem:[%s2964_s0 + $0xf0] sm:$0xf0] }
  0x69   :  { %1513 = vmatpush.bf16.msrb.mxu3 %v2353_v35  ;;  %v1674_v29 = vor.u32 %v2217_v22, %v1671_v23 }
  0x6a   :  { %1457 = vmatpush.bf16.msrb.mxu0 %v2328_v38 }
  0x6b   :  { %1476 = vmatpush.bf16.msrb.mxu1 %v2336_v37 }
  0x6c   :  { %1495 = vmatpush.bf16.msrb.mxu2 %v2344_v36 }
  0x6d   :  { %1514 = vmatpush.bf16.msrb.mxu3 %v2352_v39 }
  0x6e   :  { %1458 = vmatpush.bf16.msrb.mxu0 %v2327_v42 }
  0x6f   :  { %1477 = vmatpush.bf16.msrb.mxu1 %v2335_v41 }
  0x70   :  { %1496 = vmatpush.bf16.msrb.mxu2 %v2343_v40 }
  0x71   :  { %1515 = vmatpush.bf16.msrb.mxu3 %v2351_v43  ;;  %1392 = vmatmul.bf16.gmra.mxu0 %v1654_v57 }
  0x72   :  { %1459 = vmatpush.bf16.msrb.mxu0 %v2326_v53  ;;  %1411 = vmatmul.bf16.gmra.mxu1 %v1658_v59 }
  0x73   :  { %1478 = vmatpush.bf16.msrb.mxu1 %v2334_v47  ;;  %1430 = vmatmul.bf16.gmra.mxu2 %v1662_v60 }
  0x74   :  { %1497 = vmatpush.bf16.msrb.mxu2 %v2342_v44  ;;  %1449 = vmatmul.bf16.gmra.mxu3 %v1666_v61 }
  0x75   :  { %1516 = vmatpush.bf16.msrb.mxu3 %v2350_v55 }
  0x76   :  { %1460 = vmatpush.bf16.msrb.mxu0 %v2325_v62 }
  0x77   :  { %1479 = vmatpush.bf16.msrb.mxu1 %v2333_v58 }
  0x78   :  { %1498 = vmatpush.bf16.msrb.mxu2 %v2341_v56 }
  0x79   :  { %1517 = vmatpush.bf16.msrb.mxu3 %v2349_v63 }
  0x7a   :  { %1461 = vmatpush.bf16.msrb.mxu0 %v2324_v2 }
  0x7b   :  { %1480 = vmatpush.bf16.msrb.mxu1 %v2332_v1 }
  0x7c   :  { %1499 = vmatpush.bf16.msrb.mxu2 %v2340_v0 }
  0x7d   :  { %1518 = vmatpush.bf16.msrb.mxu3 %v2348_v3 }
  0x7e   :  { %1462 = vmatpush.bf16.msrb.mxu0 %v2323_v6 }
  0x7f   :  { %1481 = vmatpush.bf16.msrb.mxu1 %v2331_v5 }
  0x80   :  { %1500 = vmatpush.bf16.msrb.mxu2 %v2339_v4 }
  0x81   :  { %1519 = vmatpush.bf16.msrb.mxu3 %v2347_v7  ;;  %1463 = vmatmul.bf16.vlgmr.msrb.gmra.mxu0 %v1606_v16 }
  0x82   :  { %1482 = vmatmul.bf16.vlgmr.msrb.gmra.mxu1 %v1610_v17 }
  0x83   :  { %1501 = vmatmul.bf16.vlgmr.msrb.gmra.mxu2 %v1614_v18 }
  0x84   :  { %1520 = vmatmul.bf16.vlgmr.msrb.gmra.mxu3 %v1618_v19 }
  0x91   :  { %1468 = vmatmul.bf16.gmra.mxu0 %v1670_v28 }
  0x92   :  { %1487 = vmatmul.bf16.gmra.mxu1 %v1674_v29 }
  0x93   :  { %1506 = vmatmul.bf16.gmra.mxu2 %v1678_v30 }
  0x94   :  { %1525 = vmatmul.bf16.gmra.mxu3 %v1682_v31 }
  0x9e   :  { %v1236_v32 = vpop.f32.mrf.mxu0 }
  0x9f   :  { %v1255_v33 = vpop.f32.mrf.mxu1 }
  0xa0   :  { %v1256_v34 = vadd.f32 %v1255_v33, %v1236_v32 }
  0xa6   :  { %v1274_v35 = vpop.f32.mrf.mxu2  ;;  %v1238_v38 = vpop.f32.mrf.mxu0 }
  0xa7   :  { %v1293_v36 = vpop.f32.mrf.mxu3  ;;  %v1275_v37 = vadd.f32 %v1274_v35, %v1256_v34  ;;  %v1257_v39 = vpop.f32.mrf.mxu1 }
  0xa8   :  { %v1258_v40 = vadd.f32 %v1257_v39, %v1238_v38 }
  0xa9   :  { %v1294_v41 = vadd.f32 %v1293_v36, %v1275_v37 }
  0xae   :  { %v1276_v42 = vpop.f32.mrf.mxu2  ;;  %v1241_v45 = vpop.f32.mrf.mxu0 }
  0xaf   :  { %v1295_v43 = vpop.f32.mrf.mxu3  ;;  %v1277_v44 = vadd.f32 %v1276_v42, %v1258_v40  ;;  %v1260_v46 = vpop.f32.mrf.mxu1 }
  0xb0   :  { %v1261_v47 = vadd.f32 %v1260_v46, %v1241_v45 }
  0xb1   :  { %v1296_v48 = vadd.f32 %v1295_v43, %v1277_v44 }
  0xb6   :  { %v1279_v49 = vpop.f32.mrf.mxu2  ;;  %v1243_v52 = vpop.f32.mrf.mxu0 }
  0xb7   :  { %v1298_v50 = vpop.f32.mrf.mxu3  ;;  %v1280_v51 = vadd.f32 %v1279_v49, %v1261_v47  ;;  %v1262_v53 = vpop.f32.mrf.mxu1 }
  0xb8   :  { %v1263_v54 = vadd.f32 %v1262_v53, %v1243_v52 }
  0xb9   :  { %v1299_v55 = vadd.f32 %v1298_v50, %v1280_v51 }
  0xbe   :  { %v1281_v56 = vpop.f32.mrf.mxu2  ;;  %v1312_v59 = vpop.f32.mrf.mxu0 }
  0xbf   :  { %v1300_v57 = vpop.f32.mrf.mxu3  ;;  %v1282_v58 = vadd.f32 %v1281_v56, %v1263_v54  ;;  %v1331_v60 = vpop.f32.mrf.mxu1  ;;  %v1313_v18 = vadd.f32 %v1312_v59, %v1294_v41 }
  0xc1   :  { %v1301_v61 = vadd.f32 %v1300_v57, %v1282_v58  ;;  %v1332_v20 = vadd.f32 %v1331_v60, %v1313_v18 }
  0xc6   :  { %v1350_v62 = vpop.f32.mrf.mxu2  ;;  %v1314_v0 = vpop.f32.mrf.mxu0 }
  0xc7   :  { %v1369_v63 = vpop.f32.mrf.mxu3  ;;  %v1333_v1 = vpop.f32.mrf.mxu1  ;;  %v1351_v24 = vadd.f32 %v1350_v62, %v1332_v20  ;;  %v1315_v25 = vadd.f32 %v1314_v0, %v1296_v48 }
  0xc9   :  { %v1370_v26 = vadd.f32 %v1369_v63, %v1351_v24  ;;  %v1334_v27 = vadd.f32 %v1333_v1, %v1315_v25 }
  0xce   :  { %v1352_v2 = vpop.f32.mrf.mxu2  ;;  %v1317_v4 = vpop.f32.mrf.mxu0 }
  0xcf   :  { %v1371_v3 = vpop.f32.mrf.mxu3  ;;  %v1336_v5 = vpop.f32.mrf.mxu1  ;;  %v1353_v29 = vadd.f32 %v1352_v2, %v1334_v27  ;;  %v1318_v35 = vadd.f32 %v1317_v4, %v1299_v55 }
  0xd1   :  { %v1372_v34 = vadd.f32 %v1371_v3, %v1353_v29  ;;  %v1337_v40 = vadd.f32 %v1336_v5, %v1318_v35 }
  0xd6   :  { %v1355_v6 = vpop.f32.mrf.mxu2  ;;  %v1319_v8 = vpop.f32.mrf.mxu0 }
  0xd7   :  { %v1374_v7 = vpop.f32.mrf.mxu3  ;;  %v1338_v9 = vpop.f32.mrf.mxu1  ;;  %v1356_v44 = vadd.f32 %v1355_v6, %v1337_v40  ;;  %v1320_v45 = vadd.f32 %v1319_v8, %v1301_v61 }
  0xd9   :  { %v1375_v50 = vadd.f32 %v1374_v7, %v1356_v44  ;;  %v1339_v51 = vadd.f32 %v1338_v9, %v1320_v45 }
  0xde   :  { %v1357_v10 = vpop.f32.mrf.mxu2  ;;  %v1388_v12 = vpop.f32.mrf.mxu0 }
  0xdf   :  { %v1376_v11 = vpop.f32.mrf.mxu3  ;;  %v1407_v13 = vpop.f32.mrf.mxu1  ;;  %v1389_v30 = vadd.f32 %v1388_v12, %v1370_v26  ;;  %v1358_v53 = vadd.f32 %v1357_v10, %v1339_v51 }
  0xe1   :  { %v1408_v36 = vadd.f32 %v1407_v13, %v1389_v30  ;;  %v1377_v63 = vadd.f32 %v1376_v11, %v1358_v53 }
  0xe6   :  { %v1426_v14 = vpop.f32.mrf.mxu2  ;;  %v1390_v16 = vpop.f32.mrf.mxu0 }
  0xe7   :  { %v1445_v15 = vpop.f32.mrf.mxu3  ;;  %v1409_v17 = vpop.f32.mrf.mxu1  ;;  %v1427_v37 = vadd.f32 %v1426_v14, %v1408_v36  ;;  %v1391_v38 = vadd.f32 %v1390_v16, %v1372_v34 }
  0xe9   :  { %v1446_v46 = vadd.f32 %v1445_v15, %v1427_v37  ;;  %v1410_v47 = vadd.f32 %v1409_v17, %v1391_v38 }
  0xee   :  { %v1428_v19 = vpop.f32.mrf.mxu2  ;;  %v1393_v22 = vpop.f32.mrf.mxu0 }
  0xef   :  { %v1447_v21 = vpop.f32.mrf.mxu3  ;;  %v1412_v23 = vpop.f32.mrf.mxu1  ;;  %v1429_v48 = vadd.f32 %v1428_v19, %v1410_v47  ;;  %v1394_v55 = vadd.f32 %v1393_v22, %v1375_v50 }
  0xf1   :  { %v1448_v54 = vadd.f32 %v1447_v21, %v1429_v48  ;;  %v1413_v0 = vadd.f32 %v1412_v23, %v1394_v55 }
  0xf6   :  { %v1431_v28 = vpop.f32.mrf.mxu2  ;;  %v1395_v32 = vpop.f32.mrf.mxu0 }
  0xf7   :  { %v1450_v31 = vpop.f32.mrf.mxu3  ;;  %v1414_v33 = vpop.f32.mrf.mxu1  ;;  %v1432_v1 = vadd.f32 %v1431_v28, %v1413_v0  ;;  %v1396_v61 = vadd.f32 %v1395_v32, %v1377_v63 }
  0xf9   :  { %v1451_v8 = vadd.f32 %v1450_v31, %v1432_v1  ;;  %v1415_v9 = vadd.f32 %v1414_v33, %v1396_v61 }
  0xfe   :  { %v1433_v39 = vpop.f32.mrf.mxu2  ;;  %v1464_v42 = vpop.f32.mrf.mxu0 }
  0xff   :  { %v1452_v41 = vpop.f32.mrf.mxu3  ;;  %v1483_v43 = vpop.f32.mrf.mxu1  ;;  %v1465_v49 = vadd.f32 %v1464_v42, %v1446_v46  ;;  %v1434_v14 = vadd.f32 %v1433_v39, %v1415_v9 }
 0x101   :  { %v1484_v56 = vadd.f32 %v1483_v43, %v1465_v49  ;;  %v1453_v20 = vadd.f32 %v1452_v41, %v1434_v14 }
 0x106   :  { %v1502_v52 = vpop.f32.mrf.mxu2  ;;  %v1466_v58 = vpop.f32.mrf.mxu0 }
 0x107   :  { %v1521_v57 = vpop.f32.mrf.mxu3  ;;  %v1485_v59 = vpop.f32.mrf.mxu1  ;;  %v1503_v60 = vadd.f32 %v1502_v52, %v1484_v56  ;;  %v1467_v62 = vadd.f32 %v1466_v58, %v1448_v54 }
 0x109   :  { %v1522_v2 = vadd.f32 %v1521_v57, %v1503_v60  ;;  %v1486_v3 = vadd.f32 %v1485_v59, %v1467_v62 }
 0x10b   :  { %v1535_v10 = vmul.f32 0.2, %v1522_v2  ;;  %vm1531_vm0 = vcmp.gt.f32.partialorder %v1522_v2, 0.0 }
 0x10d   :  { %v1539_v11 = vsel %vm1531_vm0, %v1522_v2, %v1535_v10 }
 0x10e   :  { %v1504_v4 = vpop.f32.mrf.mxu2  ;;  %v1469_v7 = vpop.f32.mrf.mxu0 }
 0x10f   :  { %v1505_v5 = vadd.f32 %v1504_v4, %v1486_v3  ;;  %v1523_v6 = vpop.f32.mrf.mxu3  ;;  %v1488_v13 = vpop.f32.mrf.mxu1  ;;  %v1470_v16 = vadd.f32 %v1469_v7, %v1451_v8 }
 0x111   :  { %v1524_v12 = vadd.f32 %v1523_v6, %v1505_v5  ;;  %v1489_v21 = vadd.f32 %v1488_v13, %v1470_v16 }
 0x113   :  { %vm1532_vm1 = vcmp.gt.f32.partialorder %v1524_v12, 0.0  ;;  %v1536_v15 = vmul.f32 0.2, %v1524_v12 }
 0x115   :  { %v1540_v17 = vsel %vm1532_vm1, %v1524_v12, %v1536_v15 }
 0x116   :  { %v2358_v18 = vpack.c.bf16 %v1540_v17, %v1539_v11  ;;  %v1507_v19 = vpop.f32.mrf.mxu2  ;;  %v1471_v23 = vpop.f32.mrf.mxu0 }
 0x117   :  { %v1526_v22 = vpop.f32.mrf.mxu3  ;;  %v1508_v24 = vadd.f32 %v1507_v19, %v1489_v21  ;;  %v1472_v25 = vadd.f32 %v1471_v23, %v1453_v20  ;;  %v1490_v26 = vpop.f32.mrf.mxu1 }
 0x118   :  { %2359 = vst [vmem:[%s2965_s2] sm:$0xff] %v2358_v18  }
 0x119   :  { %v1527_v27 = vadd.f32 %v1526_v22, %v1508_v24  ;;  %v1491_v28 = vadd.f32 %v1490_v26, %v1472_v25 }
 0x11b   :  { %v1537_v32 = vmul.f32 0.2, %v1527_v27  ;;  %vm1533_vm2 = vcmp.gt.f32.partialorder %v1527_v27, 0.0 }
 0x11d   :  { %v1541_v35 = vsel %vm1533_vm2, %v1527_v27, %v1537_v32 }
 0x11e   :  { %v1509_v29 = vpop.f32.mrf.mxu2 }
 0x11f   :  { %v1510_v30 = vadd.f32 %v1509_v29, %v1491_v28  ;;  %v1528_v31 = vpop.f32.mrf.mxu3 }
 0x121   :  { %v1529_v33 = vadd.f32 %v1528_v31, %v1510_v30 }
 0x123   :  { %vm1534_vm3 = vcmp.gt.f32.partialorder %v1529_v33, 0.0  ;;  %v1538_v34 = vmul.f32 0.2, %v1529_v33 }
 0x125   :  { %v1542_v36 = vsel %vm1534_vm3, %v1529_v33, %v1538_v34 }
 0x126   :  { %v2363_v37 = vpack.c.bf16 %v1542_v36, %v1541_v35 }
 0x128   :  { %2365 = vst [vmem:[%s2965_s2 + $0x8] sm:$0xff] %v2363_v37  }

// kernel: discriminator_forward.9
= control target key start
LH: loop header
LB: loop body
LE: loop exit
PB: predicated region body
PF: predicated region fallthrough
CT: control target
= control target key end

     0   :  { %s2616_s1 = inlined_call_operand.vmem [shape: bf16[2048,128], index: 1, kind: input, shape index: {}]   ;;  %s2617_s2 = inlined_call_operand.vmem [shape: f32[1,128], index: 2, kind: input, shape index: {}]   ;;  %s2618_s0 = inlined_call_operand.vmem [shape: bf16[16,2048], index: 0, kind: input, shape index: {}]   ;;  %s2619_s3 = inlined_call_operand.vmem [shape: f32[16,128], index: 3, kind: output, shape index: {}]  }
   0x1   :  { %v1977_v0 = vld [vmem:[%s2616_s1 + $0x38] sm:$0xff]  ;;  %v1976_v4 = vld [vmem:[%s2616_s1 + $0x30] sm:$0xff]  ;;  %v1975_v8 = vld [vmem:[%s2616_s1 + $0x28] sm:$0xff] }
   0x2   :  { %v1985_v1 = vld [vmem:[%s2616_s1 + $0x78] sm:$0xff]  ;;  %1138 = vmatpush.bf16.msra.mxu0 %v1977_v0  ;;  %v1984_v5 = vld [vmem:[%s2616_s1 + $0x70] sm:$0xff]  ;;  %v1983_v9 = vld [vmem:[%s2616_s1 + $0x68] sm:$0xff] }
   0x3   :  { %v1993_v2 = vld [vmem:[%s2616_s1 + $0xb8] sm:$0xff]  ;;  %1152 = vmatpush.bf16.msra.mxu1 %v1985_v1  ;;  %v1992_v6 = vld [vmem:[%s2616_s1 + $0xb0] sm:$0xff]  ;;  %v1991_v10 = vld [vmem:[%s2616_s1 + $0xa8] sm:$0xff] }
   0x4   :  { %v2001_v3 = vld [vmem:[%s2616_s1 + $0xf8] sm:$0xff]  ;;  %1166 = vmatpush.bf16.msra.mxu2 %v1993_v2  ;;  %v2000_v7 = vld [vmem:[%s2616_s1 + $0xf0] sm:$0xff]  ;;  %v1999_v11 = vld [vmem:[%s2616_s1 + $0xe8] sm:$0xff] }
   0x5   :  { %1180 = vmatpush.bf16.msra.mxu3 %v2001_v3  ;;  %v1974_v12 = vld [vmem:[%s2616_s1 + $0x20] sm:$0xff]  ;;  %v1973_v16 = vld [vmem:[%s2616_s1 + $0x18] sm:$0xff]  ;;  %v1972_v20 = vld [vmem:[%s2616_s1 + $0x10] sm:$0xff] }
   0x6   :  { %1139 = vmatpush.bf16.msra.mxu0 %v1976_v4  ;;  %v1982_v13 = vld [vmem:[%s2616_s1 + $0x60] sm:$0xff]  ;;  %v1981_v17 = vld [vmem:[%s2616_s1 + $0x58] sm:$0xff]  ;;  %v1980_v21 = vld [vmem:[%s2616_s1 + $0x50] sm:$0xff] }
   0x7   :  { %1153 = vmatpush.bf16.msra.mxu1 %v1984_v5  ;;  %v1990_v14 = vld [vmem:[%s2616_s1 + $0xa0] sm:$0xff]  ;;  %v1989_v18 = vld [vmem:[%s2616_s1 + $0x98] sm:$0xff]  ;;  %v1988_v22 = vld [vmem:[%s2616_s1 + $0x90] sm:$0xff] }
   0x8   :  { %1167 = vmatpush.bf16.msra.mxu2 %v1992_v6  ;;  %v1998_v15 = vld [vmem:[%s2616_s1 + $0xe0] sm:$0xff]  ;;  %v1997_v19 = vld [vmem:[%s2616_s1 + $0xd8] sm:$0xff]  ;;  %v1996_v23 = vld [vmem:[%s2616_s1 + $0xd0] sm:$0xff] }
   0x9   :  { %1181 = vmatpush.bf16.msra.mxu3 %v2000_v7  ;;  %v1971_v24 = vld [vmem:[%s2616_s1 + $0x8] sm:$0xff]  ;;  %v1970_v28 = vld [vmem:[%s2616_s1] sm:$0xff]  ;;  %v2009_v32 = vld [vmem:[%s2616_s1 + $0x138] sm:$0xff] }
   0xa   :  { %1140 = vmatpush.bf16.msra.mxu0 %v1975_v8  ;;  %v1979_v25 = vld [vmem:[%s2616_s1 + $0x48] sm:$0xff]  ;;  %v1978_v29 = vld [vmem:[%s2616_s1 + $0x40] sm:$0xff]  ;;  %v2017_v33 = vld [vmem:[%s2616_s1 + $0x178] sm:$0xff] }
   0xb   :  { %1154 = vmatpush.bf16.msra.mxu1 %v1983_v9  ;;  %v1987_v26 = vld [vmem:[%s2616_s1 + $0x88] sm:$0xff]  ;;  %v1986_v30 = vld [vmem:[%s2616_s1 + $0x80] sm:$0xff]  ;;  %v2025_v42 = vld [vmem:[%s2616_s1 + $0x1b8] sm:$0xff] }
   0xc   :  { %1168 = vmatpush.bf16.msra.mxu2 %v1991_v10  ;;  %v1995_v27 = vld [vmem:[%s2616_s1 + $0xc8] sm:$0xff]  ;;  %v1994_v31 = vld [vmem:[%s2616_s1 + $0xc0] sm:$0xff]  ;;  %v2033_v43 = vld [vmem:[%s2616_s1 + $0x1f8] sm:$0xff] }
   0xd   :  { %1182 = vmatpush.bf16.msra.mxu3 %v1999_v11  ;;  %v1380_v34 = vld [vmem:[%s2618_s0] sm:$0xf]  ;;  %v1388_v36 = vld [vmem:[%s2618_s0 + $0x8] sm:$0xf]  ;;  %v1954_v38 = vld [vmem:[%s2618_s0 + $0x4] sm:$0xf] }
   0xe   :  { %1141 = vmatpush.bf16.msra.mxu0 %v1974_v12  ;;  %v1962_v35 = vld [vmem:[%s2618_s0 + $0x3c] sm:$0xf0]  ;;  %v1963_v37 = vld [vmem:[%s2618_s0 + $0x44] sm:$0xf0]  ;;  %v1382_v39 = vld [vmem:[%s2618_s0 + $0x40] sm:$0xf0] }
   0xf   :  { %1155 = vmatpush.bf16.msra.mxu1 %v1982_v13  ;;  %v1955_v40 = vld [vmem:[%s2618_s0 + $0xc] sm:$0xf]  ;;  %v1381_v44 = vor.u32 %v1962_v35, %v1380_v34  ;;  %v1389_v45 = vor.u32 %v1963_v37, %v1388_v36  ;;  %v1385_v46 = vor.u32 %v1954_v38, %v1382_v39  ;;  %v2008_v48 = vld [vmem:[%s2616_s1 + $0x130] sm:$0xff]  ;;  %v2006_v56 = vld [vmem:[%s2616_s1 + $0x120] sm:$0xff] }
  0x10   :  { %1169 = vmatpush.bf16.msra.mxu2 %v1990_v14  ;;  %v1390_v41 = vld [vmem:[%s2618_s0 + $0x48] sm:$0xf0]  ;;  %v2016_v49 = vld [vmem:[%s2616_s1 + $0x170] sm:$0xff]  ;;  %v2014_v57 = vld [vmem:[%s2616_s1 + $0x160] sm:$0xff] }
  0x11   :  { %1183 = vmatpush.bf16.msra.mxu3 %v1998_v15  ;;  %v1393_v47 = vor.u32 %v1955_v40, %v1390_v41  ;;  %v2024_v50 = vld [vmem:[%s2616_s1 + $0x1b0] sm:$0xff]  ;;  %v2007_v52 = vld [vmem:[%s2616_s1 + $0x128] sm:$0xff]  ;;  %v2022_v58 = vld [vmem:[%s2616_s1 + $0x1a0] sm:$0xff] }
  0x12   :  { %1142 = vmatpush.bf16.msra.mxu0 %v1973_v16  ;;  %v2032_v51 = vld [vmem:[%s2616_s1 + $0x1f0] sm:$0xff]  ;;  %v2015_v53 = vld [vmem:[%s2616_s1 + $0x168] sm:$0xff]  ;;  %v2030_v59 = vld [vmem:[%s2616_s1 + $0x1e0] sm:$0xff] }
  0x13   :  { %1156 = vmatpush.bf16.msra.mxu1 %v1981_v17  ;;  %v2023_v54 = vld [vmem:[%s2616_s1 + $0x1a8] sm:$0xff]  ;;  %v2005_v60 = vld [vmem:[%s2616_s1 + $0x118] sm:$0xff]  ;;  %v2004_v0 = vld [vmem:[%s2616_s1 + $0x110] sm:$0xff] }
  0x14   :  { %1170 = vmatpush.bf16.msra.mxu2 %v1989_v18  ;;  %v2031_v55 = vld [vmem:[%s2616_s1 + $0x1e8] sm:$0xff]  ;;  %v2013_v61 = vld [vmem:[%s2616_s1 + $0x158] sm:$0xff]  ;;  %v2012_v1 = vld [vmem:[%s2616_s1 + $0x150] sm:$0xff] }
  0x15   :  { %1184 = vmatpush.bf16.msra.mxu3 %v1997_v19  ;;  %v2021_v62 = vld [vmem:[%s2616_s1 + $0x198] sm:$0xff]  ;;  %v2020_v2 = vld [vmem:[%s2616_s1 + $0x190] sm:$0xff]  ;;  %v2003_v4 = vld [vmem:[%s2616_s1 + $0x108] sm:$0xff] }
  0x16   :  { %1143 = vmatpush.bf16.msra.mxu0 %v1972_v20  ;;  %v2029_v63 = vld [vmem:[%s2616_s1 + $0x1d8] sm:$0xff]  ;;  %v2028_v3 = vld [vmem:[%s2616_s1 + $0x1d0] sm:$0xff]  ;;  %v2011_v5 = vld [vmem:[%s2616_s1 + $0x148] sm:$0xff] }
  0x17   :  { %1157 = vmatpush.bf16.msra.mxu1 %v1980_v21  ;;  %v2019_v6 = vld [vmem:[%s2616_s1 + $0x188] sm:$0xff]  ;;  %v2002_v8 = vld [vmem:[%s2616_s1 + $0x100] sm:$0xff]  ;;  %v2041_v12 = vld [vmem:[%s2616_s1 + $0x238] sm:$0xff] }
  0x18   :  { %1171 = vmatpush.bf16.msra.mxu2 %v1988_v22  ;;  %v2027_v7 = vld [vmem:[%s2616_s1 + $0x1c8] sm:$0xff]  ;;  %v2010_v9 = vld [vmem:[%s2616_s1 + $0x140] sm:$0xff]  ;;  %v2049_v13 = vld [vmem:[%s2616_s1 + $0x278] sm:$0xff] }
  0x19   :  { %1185 = vmatpush.bf16.msra.mxu3 %v1996_v23  ;;  %v2018_v10 = vld [vmem:[%s2616_s1 + $0x180] sm:$0xff]  ;;  %v1396_v14 = vld [vmem:[%s2618_s0 + $0x10] sm:$0xf]  ;;  %v1404_v16 = vld [vmem:[%s2618_s0 + $0x18] sm:$0xf] }
  0x1a   :  { %1144 = vmatpush.bf16.msra.mxu0 %v1971_v24  ;;  %v2026_v11 = vld [vmem:[%s2616_s1 + $0x1c0] sm:$0xff]  ;;  %v1964_v15 = vld [vmem:[%s2618_s0 + $0x4c] sm:$0xf0]  ;;  %v1965_v17 = vld [vmem:[%s2618_s0 + $0x54] sm:$0xf0] }
  0x1b   :  { %1158 = vmatpush.bf16.msra.mxu1 %v1979_v25  ;;  %v1956_v18 = vld [vmem:[%s2618_s0 + $0x14] sm:$0xf]  ;;  %v1957_v20 = vld [vmem:[%s2618_s0 + $0x1c] sm:$0xf]  ;;  %v1397_v24 = vor.u32 %v1964_v15, %v1396_v14  ;;  %v1405_v25 = vor.u32 %v1965_v17, %v1404_v16  ;;  %v2055_v34 = vld [vmem:[%s2616_s1 + $0x2a8] sm:$0xff] }
  0x1c   :  { %1172 = vmatpush.bf16.msra.mxu2 %v1987_v26  ;;  %v1398_v19 = vld [vmem:[%s2618_s0 + $0x50] sm:$0xf0]  ;;  %v1406_v21 = vld [vmem:[%s2618_s0 + $0x58] sm:$0xf0]  ;;  %v2063_v35 = vld [vmem:[%s2616_s1 + $0x2e8] sm:$0xff] }
  0x1d   :  { %1186 = vmatpush.bf16.msra.mxu3 %v1995_v27  ;;  %v2057_v22 = vld [vmem:[%s2616_s1 + $0x2b8] sm:$0xff]  ;;  %v1401_v26 = vor.u32 %v1956_v18, %v1398_v19  ;;  %v1409_v27 = vor.u32 %v1957_v20, %v1406_v21  ;;  %v2038_v36 = vld [vmem:[%s2616_s1 + $0x220] sm:$0xff]  ;;  %v2087_v14 = vld [vmem:[%s2616_s1 + $0x3a8] sm:$0xff] }
  0x1e   :  { %1145 = vmatpush.bf16.msra.mxu0 %v1970_v28  ;;  %v2065_v23 = vld [vmem:[%s2616_s1 + $0x2f8] sm:$0xff]  ;;  %v2040_v28 = vld [vmem:[%s2616_s1 + $0x230] sm:$0xff]  ;;  %v2046_v37 = vld [vmem:[%s2616_s1 + $0x260] sm:$0xff] }
  0x1f   :  { %1159 = vmatpush.bf16.msra.mxu1 %v1978_v29  ;;  %v2048_v29 = vld [vmem:[%s2616_s1 + $0x270] sm:$0xff]  ;;  %v2054_v38 = vld [vmem:[%s2616_s1 + $0x2a0] sm:$0xff]  ;;  %v2037_v40 = vld [vmem:[%s2616_s1 + $0x218] sm:$0xff] }
  0x20   :  { %1173 = vmatpush.bf16.msra.mxu2 %v1986_v30  ;;  %v2056_v30 = vld [vmem:[%s2616_s1 + $0x2b0] sm:$0xff]  ;;  %v2062_v39 = vld [vmem:[%s2616_s1 + $0x2e0] sm:$0xff]  ;;  %v2045_v41 = vld [vmem:[%s2616_s1 + $0x258] sm:$0xff] }
  0x21   :  { %1187 = vmatpush.bf16.msra.mxu3 %v1994_v31  ;;  %1146 = vmatmul.bf16.vlgmr.msra.gmra.mxu0 %v1381_v44  ;;  %v2064_v31 = vld [vmem:[%s2616_s1 + $0x2f0] sm:$0xff]  ;;  %v2095_v15 = vld [vmem:[%s2616_s1 + $0x3e8] sm:$0xff]  ;;  %v2070_v16 = vld [vmem:[%s2616_s1 + $0x320] sm:$0xff] }
  0x22   :  { %1194 = vmatpush.bf16.msrb.mxu0 %v2009_v32  ;;  %1160 = vmatmul.bf16.vlgmr.msra.gmra.mxu1 %v1385_v46  ;;  %v2039_v32 = vld [vmem:[%s2616_s1 + $0x228] sm:$0xff]  ;;  %v2036_v44 = vld [vmem:[%s2616_s1 + $0x210] sm:$0xff]  ;;  %v2078_v17 = vld [vmem:[%s2616_s1 + $0x360] sm:$0xff] }
  0x23   :  { %1208 = vmatpush.bf16.msrb.mxu1 %v2017_v33  ;;  %1174 = vmatmul.bf16.vlgmr.msra.gmra.mxu2 %v1389_v45  ;;  %v2047_v33 = vld [vmem:[%s2616_s1 + $0x268] sm:$0xff]  ;;  %v2044_v45 = vld [vmem:[%s2616_s1 + $0x250] sm:$0xff]  ;;  %v2086_v18 = vld [vmem:[%s2616_s1 + $0x3a0] sm:$0xff] }
  0x24   :  { %1222 = vmatpush.bf16.msrb.mxu2 %v2025_v42  ;;  %1188 = vmatmul.bf16.vlgmr.msra.gmra.mxu3 %v1393_v47  ;;  %v2053_v42 = vld [vmem:[%s2616_s1 + $0x298] sm:$0xff]  ;;  %v2052_v46 = vld [vmem:[%s2616_s1 + $0x290] sm:$0xff]  ;;  %v2094_v19 = vld [vmem:[%s2616_s1 + $0x3e0] sm:$0xff] }
  0x25   :  { %1236 = vmatpush.bf16.msrb.mxu3 %v2033_v43  ;;  %v2061_v43 = vld [vmem:[%s2616_s1 + $0x2d8] sm:$0xff]  ;;  %v2060_v47 = vld [vmem:[%s2616_s1 + $0x2d0] sm:$0xff] }
  0x26   :  { %1195 = vmatpush.bf16.msrb.mxu0 %v2008_v48  ;;  %v2035_v48 = vld [vmem:[%s2616_s1 + $0x208] sm:$0xff]  ;;  %v2069_v20 = vld [vmem:[%s2616_s1 + $0x318] sm:$0xff] }
  0x27   :  { %1209 = vmatpush.bf16.msrb.mxu1 %v2016_v49  ;;  %v2043_v49 = vld [vmem:[%s2616_s1 + $0x248] sm:$0xff]  ;;  %v2077_v21 = vld [vmem:[%s2616_s1 + $0x358] sm:$0xff] }
  0x28   :  { %1223 = vmatpush.bf16.msrb.mxu2 %v2024_v50  ;;  %v2051_v50 = vld [vmem:[%s2616_s1 + $0x288] sm:$0xff] }
  0x29   :  { %1237 = vmatpush.bf16.msrb.mxu3 %v2032_v51  ;;  %v2059_v51 = vld [vmem:[%s2616_s1 + $0x2c8] sm:$0xff] }
  0x2a   :  { %1196 = vmatpush.bf16.msrb.mxu0 %v2007_v52  ;;  %v2034_v52 = vld [vmem:[%s2616_s1 + $0x200] sm:$0xff] }
  0x2b   :  { %1210 = vmatpush.bf16.msrb.mxu1 %v2015_v53  ;;  %v2042_v53 = vld [vmem:[%s2616_s1 + $0x240] sm:$0xff] }
  0x2c   :  { %1224 = vmatpush.bf16.msrb.mxu2 %v2023_v54  ;;  %v2050_v54 = vld [vmem:[%s2616_s1 + $0x280] sm:$0xff] }
  0x2d   :  { %1238 = vmatpush.bf16.msrb.mxu3 %v2031_v55  ;;  %v2058_v55 = vld [vmem:[%s2616_s1 + $0x2c0] sm:$0xff] }
  0x2e   :  { %1197 = vmatpush.bf16.msrb.mxu0 %v2006_v56  ;;  %v2073_v56 = vld [vmem:[%s2616_s1 + $0x338] sm:$0xff] }
  0x2f   :  { %1211 = vmatpush.bf16.msrb.mxu1 %v2014_v57  ;;  %v2081_v57 = vld [vmem:[%s2616_s1 + $0x378] sm:$0xff] }
  0x30   :  { %1225 = vmatpush.bf16.msrb.mxu2 %v2022_v58  ;;  %v1412_v58 = vld [vmem:[%s2618_s0 + $0x20] sm:$0xf] }
  0x31   :  { %1239 = vmatpush.bf16.msrb.mxu3 %v2030_v59  ;;  %v1966_v59 = vld [vmem:[%s2618_s0 + $0x5c] sm:$0xf0] }
  0x32   :  { %1198 = vmatpush.bf16.msrb.mxu0 %v2005_v60  ;;  %v1420_v60 = vld [vmem:[%s2618_s0 + $0x28] sm:$0xf] }
  0x33   :  { %1212 = vmatpush.bf16.msrb.mxu1 %v2013_v61  ;;  %v1967_v61 = vld [vmem:[%s2618_s0 + $0x64] sm:$0xf0] }
  0x34   :  { %1226 = vmatpush.bf16.msrb.mxu2 %v2021_v62  ;;  %v1958_v62 = vld [vmem:[%s2618_s0 + $0x24] sm:$0xf] }
  0x35   :  { %1240 = vmatpush.bf16.msrb.mxu3 %v2029_v63  ;;  %v1414_v63 = vld [vmem:[%s2618_s0 + $0x60] sm:$0xf0] }
  0x36   :  { %1199 = vmatpush.bf16.msrb.mxu0 %v2004_v0  ;;  %v1959_v0 = vld [vmem:[%s2618_s0 + $0x2c] sm:$0xf] }
  0x37   :  { %1213 = vmatpush.bf16.msrb.mxu1 %v2012_v1  ;;  %v1422_v1 = vld [vmem:[%s2618_s0 + $0x68] sm:$0xf0] }
  0x38   :  { %1227 = vmatpush.bf16.msrb.mxu2 %v2020_v2  ;;  %v2089_v2 = vld [vmem:[%s2616_s1 + $0x3b8] sm:$0xff] }
  0x39   :  { %1241 = vmatpush.bf16.msrb.mxu3 %v2028_v3  ;;  %v2097_v3 = vld [vmem:[%s2616_s1 + $0x3f8] sm:$0xff] }
  0x3a   :  { %1200 = vmatpush.bf16.msrb.mxu0 %v2003_v4  ;;  %v1413_v4 = vor.u32 %v1966_v59, %v1412_v58 }
  0x3b   :  { %1214 = vmatpush.bf16.msrb.mxu1 %v2011_v5  ;;  %v1421_v5 = vor.u32 %v1967_v61, %v1420_v60 }
  0x3c   :  { %1228 = vmatpush.bf16.msrb.mxu2 %v2019_v6  ;;  %v1417_v6 = vor.u32 %v1958_v62, %v1414_v63 }
  0x3d   :  { %1242 = vmatpush.bf16.msrb.mxu3 %v2027_v7  ;;  %v1425_v7 = vor.u32 %v1959_v0, %v1422_v1 }
  0x3e   :  { %1201 = vmatpush.bf16.msrb.mxu0 %v2002_v8  ;;  %v2072_v8 = vld [vmem:[%s2616_s1 + $0x330] sm:$0xff] }
  0x3f   :  { %1215 = vmatpush.bf16.msrb.mxu1 %v2010_v9  ;;  %v2080_v9 = vld [vmem:[%s2616_s1 + $0x370] sm:$0xff] }
  0x40   :  { %1229 = vmatpush.bf16.msrb.mxu2 %v2018_v10  ;;  %v2088_v10 = vld [vmem:[%s2616_s1 + $0x3b0] sm:$0xff] }
  0x41   :  { %1243 = vmatpush.bf16.msrb.mxu3 %v2026_v11  ;;  %1202 = vmatmul.bf16.vlgmr.msrb.gmra.mxu0 %v1397_v24  ;;  %v2096_v11 = vld [vmem:[%s2616_s1 + $0x3f0] sm:$0xff] }
  0x42   :  { %1250 = vmatpush.bf16.msra.mxu0 %v2041_v12  ;;  %1216 = vmatmul.bf16.vlgmr.msrb.gmra.mxu1 %v1401_v26  ;;  %v2071_v12 = vld [vmem:[%s2616_s1 + $0x328] sm:$0xff]  ;;  %v2068_v24 = vld [vmem:[%s2616_s1 + $0x310] sm:$0xff] }
  0x43   :  { %1264 = vmatpush.bf16.msra.mxu1 %v2049_v13  ;;  %1230 = vmatmul.bf16.vlgmr.msrb.gmra.mxu2 %v1405_v25  ;;  %v2079_v13 = vld [vmem:[%s2616_s1 + $0x368] sm:$0xff]  ;;  %v2076_v25 = vld [vmem:[%s2616_s1 + $0x350] sm:$0xff] }
  0x44   :  { %1278 = vmatpush.bf16.msra.mxu2 %v2057_v22  ;;  %1244 = vmatmul.bf16.vlgmr.msrb.gmra.mxu3 %v1409_v27  ;;  %v2085_v22 = vld [vmem:[%s2616_s1 + $0x398] sm:$0xff]  ;;  %v2084_v26 = vld [vmem:[%s2616_s1 + $0x390] sm:$0xff] }
  0x45   :  { %1292 = vmatpush.bf16.msra.mxu3 %v2065_v23  ;;  %v2093_v23 = vld [vmem:[%s2616_s1 + $0x3d8] sm:$0xff]  ;;  %v2092_v27 = vld [vmem:[%s2616_s1 + $0x3d0] sm:$0xff] }
  0x46   :  { %1251 = vmatpush.bf16.msra.mxu0 %v2040_v28  ;;  %v2067_v28 = vld [vmem:[%s2616_s1 + $0x308] sm:$0xff] }
  0x47   :  { %1265 = vmatpush.bf16.msra.mxu1 %v2048_v29  ;;  %v2075_v29 = vld [vmem:[%s2616_s1 + $0x348] sm:$0xff] }
  0x48   :  { %1279 = vmatpush.bf16.msra.mxu2 %v2056_v30  ;;  %v2083_v30 = vld [vmem:[%s2616_s1 + $0x388] sm:$0xff] }
  0x49   :  { %1293 = vmatpush.bf16.msra.mxu3 %v2064_v31  ;;  %v2091_v31 = vld [vmem:[%s2616_s1 + $0x3c8] sm:$0xff] }
  0x4a   :  { %1252 = vmatpush.bf16.msra.mxu0 %v2039_v32  ;;  %v2066_v32 = vld [vmem:[%s2616_s1 + $0x300] sm:$0xff] }
  0x4b   :  { %1266 = vmatpush.bf16.msra.mxu1 %v2047_v33  ;;  %v2074_v33 = vld [vmem:[%s2616_s1 + $0x340] sm:$0xff] }
  0x4c   :  { %1280 = vmatpush.bf16.msra.mxu2 %v2055_v34  ;;  %v2082_v34 = vld [vmem:[%s2616_s1 + $0x380] sm:$0xff] }
  0x4d   :  { %1294 = vmatpush.bf16.msra.mxu3 %v2063_v35  ;;  %v2090_v35 = vld [vmem:[%s2616_s1 + $0x3c0] sm:$0xff] }
  0x4e   :  { %1253 = vmatpush.bf16.msra.mxu0 %v2038_v36  ;;  %v1428_v36 = vld [vmem:[%s2618_s0 + $0x30] sm:$0xf] }
  0x4f   :  { %1267 = vmatpush.bf16.msra.mxu1 %v2046_v37  ;;  %v1968_v37 = vld [vmem:[%s2618_s0 + $0x6c] sm:$0xf0] }
  0x50   :  { %1281 = vmatpush.bf16.msra.mxu2 %v2054_v38  ;;  %v1960_v38 = vld [vmem:[%s2618_s0 + $0x34] sm:$0xf] }
  0x51   :  { %1295 = vmatpush.bf16.msra.mxu3 %v2062_v39  ;;  %v1430_v39 = vld [vmem:[%s2618_s0 + $0x70] sm:$0xf0] }
  0x52   :  { %1254 = vmatpush.bf16.msra.mxu0 %v2037_v40  ;;  %v1436_v40 = vld [vmem:[%s2618_s0 + $0x38] sm:$0xf] }
  0x53   :  { %1268 = vmatpush.bf16.msra.mxu1 %v2045_v41  ;;  %v1969_v41 = vld [vmem:[%s2618_s0 + $0x74] sm:$0xf0] }
  0x54   :  { %1282 = vmatpush.bf16.msra.mxu2 %v2053_v42  ;;  %v1961_v42 = vld [vmem:[%s2618_s0 + $0x3c] sm:$0xf] }
  0x55   :  { %1296 = vmatpush.bf16.msra.mxu3 %v2061_v43  ;;  %v1438_v43 = vld [vmem:[%s2618_s0 + $0x78] sm:$0xf0] }
  0x56   :  { %1255 = vmatpush.bf16.msra.mxu0 %v2036_v44  ;;  %v1429_v44 = vor.u32 %v1968_v37, %v1428_v36 }
  0x57   :  { %1269 = vmatpush.bf16.msra.mxu1 %v2044_v45  ;;  %v1433_v45 = vor.u32 %v1960_v38, %v1430_v39 }
  0x58   :  { %1283 = vmatpush.bf16.msra.mxu2 %v2052_v46  ;;  %v1437_v46 = vor.u32 %v1969_v41, %v1436_v40 }
  0x59   :  { %1297 = vmatpush.bf16.msra.mxu3 %v2060_v47  ;;  %v1441_v47 = vor.u32 %v1961_v42, %v1438_v43 }
  0x5a   :  { %1256 = vmatpush.bf16.msra.mxu0 %v2035_v48 }
  0x5b   :  { %1270 = vmatpush.bf16.msra.mxu1 %v2043_v49 }
  0x5c   :  { %1284 = vmatpush.bf16.msra.mxu2 %v2051_v50 }
  0x5d   :  { %1298 = vmatpush.bf16.msra.mxu3 %v2059_v51 }
  0x5e   :  { %1257 = vmatpush.bf16.msra.mxu0 %v2034_v52 }
  0x5f   :  { %1271 = vmatpush.bf16.msra.mxu1 %v2042_v53  ;;  %v2098_v53 = vld [vmem:[%s2617_s2] ss:$0 sm:$0xff] }
  0x60   :  { %1285 = vmatpush.bf16.msra.mxu2 %v2050_v54 }
  0x61   :  { %1299 = vmatpush.bf16.msra.mxu3 %v2058_v55  ;;  %1258 = vmatmul.bf16.vlgmr.msra.gmra.mxu0 %v1413_v4 }
  0x62   :  { %1306 = vmatpush.bf16.msrb.mxu0 %v2073_v56  ;;  %1272 = vmatmul.bf16.vlgmr.msra.gmra.mxu1 %v1417_v6 }
  0x63   :  { %1320 = vmatpush.bf16.msrb.mxu1 %v2081_v57  ;;  %1286 = vmatmul.bf16.vlgmr.msra.gmra.mxu2 %v1421_v5 }
  0x64   :  { %1334 = vmatpush.bf16.msrb.mxu2 %v2089_v2  ;;  %1300 = vmatmul.bf16.vlgmr.msra.gmra.mxu3 %v1425_v7 }
  0x65   :  { %1348 = vmatpush.bf16.msrb.mxu3 %v2097_v3 }
  0x66   :  { %1307 = vmatpush.bf16.msrb.mxu0 %v2072_v8 }
  0x67   :  { %1321 = vmatpush.bf16.msrb.mxu1 %v2080_v9 }
  0x68   :  { %1335 = vmatpush.bf16.msrb.mxu2 %v2088_v10 }
  0x69   :  { %1349 = vmatpush.bf16.msrb.mxu3 %v2096_v11 }
  0x6a   :  { %1308 = vmatpush.bf16.msrb.mxu0 %v2071_v12 }
  0x6b   :  { %1322 = vmatpush.bf16.msrb.mxu1 %v2079_v13 }
  0x6c   :  { %1336 = vmatpush.bf16.msrb.mxu2 %v2087_v14 }
  0x6d   :  { %1350 = vmatpush.bf16.msrb.mxu3 %v2095_v15 }
  0x6e   :  { %1309 = vmatpush.bf16.msrb.mxu0 %v2070_v16 }
  0x6f   :  { %1323 = vmatpush.bf16.msrb.mxu1 %v2078_v17 }
  0x70   :  { %1337 = vmatpush.bf16.msrb.mxu2 %v2086_v18 }
  0x71   :  { %1351 = vmatpush.bf16.msrb.mxu3 %v2094_v19 }
  0x72   :  { %1310 = vmatpush.bf16.msrb.mxu0 %v2069_v20 }
  0x73   :  { %1324 = vmatpush.bf16.msrb.mxu1 %v2077_v21 }
  0x74   :  { %1338 = vmatpush.bf16.msrb.mxu2 %v2085_v22 }
  0x75   :  { %1352 = vmatpush.bf16.msrb.mxu3 %v2093_v23 }
  0x76   :  { %1311 = vmatpush.bf16.msrb.mxu0 %v2068_v24 }
  0x77   :  { %1325 = vmatpush.bf16.msrb.mxu1 %v2076_v25 }
  0x78   :  { %1339 = vmatpush.bf16.msrb.mxu2 %v2084_v26 }
  0x79   :  { %1353 = vmatpush.bf16.msrb.mxu3 %v2092_v27 }
  0x7a   :  { %1312 = vmatpush.bf16.msrb.mxu0 %v2067_v28 }
  0x7b   :  { %1326 = vmatpush.bf16.msrb.mxu1 %v2075_v29 }
  0x7c   :  { %1340 = vmatpush.bf16.msrb.mxu2 %v2083_v30 }
  0x7d   :  { %1354 = vmatpush.bf16.msrb.mxu3 %v2091_v31 }
  0x7e   :  { %1313 = vmatpush.bf16.msrb.mxu0 %v2066_v32 }
  0x7f   :  { %1327 = vmatpush.bf16.msrb.mxu1 %v2074_v33 }
  0x80   :  { %1341 = vmatpush.bf16.msrb.mxu2 %v2082_v34 }
  0x81   :  { %1355 = vmatpush.bf16.msrb.mxu3 %v2090_v35  ;;  %1314 = vmatmul.bf16.vlgmr.msrb.gmra.mxu0 %v1429_v44 }
  0x82   :  { %1328 = vmatmul.bf16.vlgmr.msrb.gmra.mxu1 %v1433_v45 }
  0x83   :  { %1342 = vmatmul.bf16.vlgmr.msrb.gmra.mxu2 %v1437_v46 }
  0x84   :  { %1356 = vmatmul.bf16.vlgmr.msrb.gmra.mxu3 %v1441_v47 }
  0x9e   :  { %v1147_v48 = vpop.f32.mrf.mxu0 }
  0x9f   :  { %v1161_v49 = vpop.f32.mrf.mxu1  ;;  %v1148_v55 = vadd.f32 %v2098_v53, %v1147_v48 }
  0xa1   :  { %v1162_v58 = vadd.f32 %v1161_v49, %v1148_v55 }
  0xa6   :  { %v1175_v50 = vpop.f32.mrf.mxu2  ;;  %v1149_v52 = vpop.f32.mrf.mxu0 }
  0xa7   :  { %v1189_v51 = vpop.f32.mrf.mxu3  ;;  %v1163_v54 = vpop.f32.mrf.mxu1  ;;  %v1176_v61 = vadd.f32 %v1175_v50, %v1162_v58  ;;  %v1150_v62 = vadd.f32 %v2098_v53, %v1149_v52 }
  0xa9   :  { %v1190_v1 = vadd.f32 %v1189_v51, %v1176_v61  ;;  %v1164_v2 = vadd.f32 %v1163_v54, %v1150_v62 }
  0xae   :  { %v1177_v56 = vpop.f32.mrf.mxu2 }
  0xaf   :  { %v1191_v57 = vpop.f32.mrf.mxu3  ;;  %v1178_v6 = vadd.f32 %v1177_v56, %v1164_v2 }
  0xb1   :  { %v1192_v10 = vadd.f32 %v1191_v57, %v1178_v6 }
  0xbe   :  { %v1203_v59 = vpop.f32.mrf.mxu0 }
  0xbf   :  { %v1217_v60 = vpop.f32.mrf.mxu1  ;;  %v1204_v4 = vadd.f32 %v1203_v59, %v1190_v1 }
  0xc1   :  { %v1218_v7 = vadd.f32 %v1217_v60, %v1204_v4 }
  0xc6   :  { %v1231_v63 = vpop.f32.mrf.mxu2  ;;  %v1205_v3 = vpop.f32.mrf.mxu0 }
  0xc7   :  { %v1245_v0 = vpop.f32.mrf.mxu3  ;;  %v1219_v5 = vpop.f32.mrf.mxu1  ;;  %v1232_v12 = vadd.f32 %v1231_v63, %v1218_v7  ;;  %v1206_v14 = vadd.f32 %v1205_v3, %v1192_v10 }
  0xc9   :  { %v1246_v15 = vadd.f32 %v1245_v0, %v1232_v12  ;;  %v1220_v18 = vadd.f32 %v1219_v5, %v1206_v14 }
  0xce   :  { %v1233_v8 = vpop.f32.mrf.mxu2 }
  0xcf   :  { %v1247_v9 = vpop.f32.mrf.mxu3  ;;  %v1234_v20 = vadd.f32 %v1233_v8, %v1220_v18 }
  0xd1   :  { %v1248_v24 = vadd.f32 %v1247_v9, %v1234_v20 }
  0xde   :  { %v1259_v11 = vpop.f32.mrf.mxu0 }
  0xdf   :  { %v1273_v13 = vpop.f32.mrf.mxu1  ;;  %v1260_v19 = vadd.f32 %v1259_v11, %v1246_v15 }
  0xe1   :  { %v1274_v22 = vadd.f32 %v1273_v13, %v1260_v19 }
  0xe6   :  { %v1287_v16 = vpop.f32.mrf.mxu2  ;;  %v1261_v21 = vpop.f32.mrf.mxu0 }
  0xe7   :  { %v1301_v17 = vpop.f32.mrf.mxu3  ;;  %v1275_v23 = vpop.f32.mrf.mxu1  ;;  %v1288_v25 = vadd.f32 %v1287_v16, %v1274_v22  ;;  %v1262_v26 = vadd.f32 %v1261_v21, %v1248_v24 }
  0xe9   :  { %v1302_v29 = vadd.f32 %v1301_v17, %v1288_v25  ;;  %v1276_v31 = vadd.f32 %v1275_v23, %v1262_v26 }
  0xee   :  { %v1289_v27 = vpop.f32.mrf.mxu2 }
  0xef   :  { %v1303_v28 = vpop.f32.mrf.mxu3  ;;  %v1290_v34 = vadd.f32 %v1289_v27, %v1276_v31 }
  0xf1   :  { %v1304_v38 = vadd.f32 %v1303_v28, %v1290_v34 }
  0xfe   :  { %v1315_v30 = vpop.f32.mrf.mxu0 }
  0xff   :  { %v1316_v32 = vadd.f32 %v1315_v30, %v1302_v29  ;;  %v1329_v33 = vpop.f32.mrf.mxu1 }
 0x101   :  { %v1330_v35 = vadd.f32 %v1329_v33, %v1316_v32 }
 0x106   :  { %v1343_v36 = vpop.f32.mrf.mxu2  ;;  %v1317_v40 = vpop.f32.mrf.mxu0 }
 0x107   :  { %v1357_v37 = vpop.f32.mrf.mxu3  ;;  %v1344_v39 = vadd.f32 %v1343_v36, %v1330_v35  ;;  %v1318_v42 = vadd.f32 %v1317_v40, %v1304_v38  ;;  %v1331_v44 = vpop.f32.mrf.mxu1 }
 0x109   :  { %v1358_v41 = vadd.f32 %v1357_v37, %v1344_v39  ;;  %v1332_v46 = vadd.f32 %v1331_v44, %v1318_v42 }
 0x10b   :  { %v1362_v43 = vsub.f32 0.0, %v1358_v41 }
 0x10d   :  { %v1364_v45 = vmul.f32 1.442695, %v1362_v43 }
 0x10e   :  { %v1345_v47 = vpop.f32.mrf.mxu2 }
 0x10f   :  { %2099 = vpow2.f32 %v1364_v45  ;;  %v1346_v48 = vadd.f32 %v1345_v47, %v1332_v46  ;;  %v1359_v49 = vpop.f32.mrf.mxu3 }
 0x111   :  { %v1360_v50 = vadd.f32 %v1359_v49, %v1346_v48 }
 0x113   :  { %v1363_v51 = vsub.f32 0.0, %v1360_v50 }
 0x115   :  { %v2100_v52 = vpop.eup %2099  ;;  %v1366_v53 = vmul.f32 1.442695, %v1363_v51 }
 0x116   :  { %v1368_v54 = vadd.f32 1.0, %v2100_v52 }
 0x117   :  { %2101 = vpow2.f32 %v1366_v53 }
 0x118   :  { %2103 = vrcp.f32 %v1368_v54 }
 0x11d   :  { %v2102_v55 = vpop.eup %2101 }
 0x11e   :  { %v2104_v56 = vpop.eup %2103  ;;  %v1369_v57 = vadd.f32 1.0, %v2102_v55 }
 0x11f   :  { %1372 = vst [vmem:[%s2619_s3] sm:$0xff] %v2104_v56 }
 0x120   :  { %2105 = vrcp.f32 %v1369_v57 }
 0x126   :  { %v2106_v58 = vpop.eup %2105 }
 0x127   :  { %1373 = vst [vmem:[%s2619_s3 + $0x8] sm:$0xff] %v2106_v58 }

</bundles_post_ra>
